<compile_context>
chip_gen: v7x
topology: tpu7x:2x2x1
jax: 0.10.0
libtpu: 0.0.40
codegen_flags: <defaults>
</compile_context>

<pallas_src>
import jax
import jax.numpy as jnp
from jax.experimental import pallas as pl
from jax.experimental.pallas import tpu as pltpu

# ----------------------------------------------------------------------------
# Shapes / wide-strip geometry
# ----------------------------------------------------------------------------
KH = KW = 5
C_IN, C1, C1P, C2 = 3, 6, 8, 16          # conv1 Cout padded 6 -> 8 (sublane granule)
IMG = 32                                  # fc1 = 16*5*5 implies a 3x32x32 input
PITCH = IMG                               # flat index of pixel (h, w) is 32*h + w
N_FC1, N_FC2, N_FC3 = 120, 84, 10
P2S = 5                                   # pool2 spatial size

# Strip widths: number of flat columns each stage produces so that every shifted
# read of the *next* stage stays in bounds.  Valid outputs always live at flat
# index 32*h + w (then at even, then at multiples-of-4 positions); the in-between
# garbage columns are computed but never read back at a valid position.
W_P2 = 532        # >= 128*4 + 4*4 + 1          (fc taps 128a + 4b, a,b < 5)
W_A2 = 600        # >= W_P2 + 66                (pool2 taps {0, 2, 64, 66})
W_P1 = 864        # >= W_A2 + 264               (conv2 taps 64*ki + 2*kj)
W_A1 = 900        # >= W_P1 + 33                (pool1 taps {0, 1, 32, 33})
W_IN = 1040       # >= max(W_A1 + 132, 1024)    (conv1 taps 32*ki + kj)


def _sigmoid(z):
    # Exact sigmoid (review correctness note: approx=True reciprocal deviates at
    # the ~1e-3 level from the PyTorch reference, so keep the full-precision path).
    return pl.reciprocal(1.0 + jnp.exp(-z), approx=False)


# ----------------------------------------------------------------------------
# The single fused kernel (one grid step == one batch sample)
# ----------------------------------------------------------------------------
def _lenet_kernel(x_ref, w1_ref, b1_ref, w2_ref, b2_ref,
                  wf1_ref, bf1_ref, wf2_ref, bf2_ref, wf3_ref, bf3_ref,
                  out_ref,
                  a1_ref, p1_ref, a2_ref, p2_ref, fcin_ref):
    f32 = jnp.float32

    # --- conv1 + bias + sigmoid: in-kernel im2col as 25 shifted-view matmuls ---
    acc1 = jnp.zeros((C1P, W_A1), f32)
    for ki in range(KH):
        for kj in range(KW):
            tap = PITCH * ki + kj
            acc1 = acc1 + jnp.dot(w1_ref[ki * KW + kj],                 # (8, 3)
                                  x_ref[0, :, tap:tap + W_A1],          # (3, W_A1)
                                  preferred_element_type=f32)
    a1_ref[...] = _sigmoid(acc1 + b1_ref[...])

    # --- maxpool1 (2x2 / 2) fused: max over the 4 corners of each window ------
    p1_ref[...] = jnp.maximum(
        jnp.maximum(a1_ref[:, 0:W_P1], a1_ref[:, 1:1 + W_P1]),
        jnp.maximum(a1_ref[:, PITCH:PITCH + W_P1],
                    a1_ref[:, PITCH + 1:PITCH + 1 + W_P1]))

    # --- conv2 + bias + sigmoid (pool1 lives at even rows/cols -> taps doubled) -
    acc2 = jnp.zeros((C2, W_A2), f32)
    for ki in range(KH):
        for kj in range(KW):
            tap = 2 * PITCH * ki + 2 * kj
            acc2 = acc2 + jnp.dot(w2_ref[ki * KW + kj],                 # (16, 8)
                                  p1_ref[:, tap:tap + W_A2],            # (8, W_A2)
                                  preferred_element_type=f32)
    a2_ref[...] = _sigmoid(acc2 + b2_ref[...])

    # --- maxpool2 fused (conv2 lives at stride-2 positions -> taps {0,2,64,66}) -
    p2_ref[...] = jnp.maximum(
        jnp.maximum(a2_ref[:, 0:W_P2], a2_ref[:, 2:2 + W_P2]),
        jnp.maximum(a2_ref[:, 2 * PITCH:2 * PITCH + W_P2],
                    a2_ref[:, 2 * PITCH + 2:2 * PITCH + 2 + W_P2]))

    # --- flatten: gather the 25 valid pooled columns into a (400, 1) vector.
    # Row order is (h*5 + w)*16 + c, which matches the init-time permuted fc1
    # weight columns (== torch.flatten's c*25 + h*5 + w order).
    for a in range(P2S):
        for b in range(P2S):
            idx = a * P2S + b
            col = 4 * PITCH * a + 4 * b                                 # 128a + 4b
            fcin_ref[C2 * idx:C2 * idx + C2, :] = p2_ref[:, col:col + 1]

    # --- fc1 -> sigmoid -> fc2 -> sigmoid -> fc3 (column-vector orientation) ---
    h = _sigmoid(jnp.dot(wf1_ref[...], fcin_ref[...],
                         preferred_element_type=f32) + bf1_ref[...])
    h = _sigmoid(jnp.dot(wf2_ref[...], h,
                         preferred_element_type=f32) + bf2_ref[...])
    out_ref[0] = jnp.dot(wf3_ref[...], h,
                         preferred_element_type=f32) + bf3_ref[...]


# ----------------------------------------------------------------------------
# Forward pass == Network.forward
# ----------------------------------------------------------------------------
def network_forward(params, x):
    """x: (B, 3, 32, 32) NCHW float32 -> (B, 10) logits."""
    bsz = x.shape[0]
    # Flatten spatial to the 32-pitch strip and zero-pad so every shifted conv1
    # view stays in bounds (pure input-side glue; no intermediate HBM traffic).
    xf = x.reshape(bsz, C_IN, IMG * IMG)
    xf = jnp.pad(xf, ((0, 0), (0, 0), (0, W_IN - IMG * IMG)))

    flops_per_b = (2 * KH * KW * (C1P * C_IN * W_A1 + C2 * C1P * W_A2)
                   + 2 * (N_FC1 * 400 + N_FC2 * N_FC1 + N_FC3 * N_FC2))
    trans_per_b = C1P * W_A1 + C2 * W_A2 + N_FC1 + N_FC2
    param_bytes = sum(int(p.size) * 4 for p in jax.tree_util.tree_leaves(params))
    cost = pl.CostEstimate(
        flops=bsz * flops_per_b,
        transcendentals=bsz * trans_per_b,
        bytes_accessed=int(xf.size) * 4 + param_bytes + bsz * N_FC3 * 4)

    out = pl.pallas_call(
        _lenet_kernel,
        out_shape=jax.ShapeDtypeStruct((bsz, N_FC3, 1), jnp.float32),
        grid=(bsz,),
        in_specs=[
            pl.BlockSpec((1, C_IN, W_IN), lambda b: (b, 0, 0)),        # per-sample input
            pl.BlockSpec((KH * KW, C1P, C_IN), lambda b: (0, 0, 0)),   # conv1 taps (resident)
            pl.BlockSpec((C1P, 1), lambda b: (0, 0)),
            pl.BlockSpec((KH * KW, C2, C1P), lambda b: (0, 0, 0)),     # conv2 taps (resident)
            pl.BlockSpec((C2, 1), lambda b: (0, 0)),
            pl.BlockSpec((N_FC1, C2 * P2S * P2S), lambda b: (0, 0)),   # fc1 (permuted cols)
            pl.BlockSpec((N_FC1, 1), lambda b: (0, 0)),
            pl.BlockSpec((N_FC2, N_FC1), lambda b: (0, 0)),
            pl.BlockSpec((N_FC2, 1), lambda b: (0, 0)),
            pl.BlockSpec((N_FC3, N_FC2), lambda b: (0, 0)),
            pl.BlockSpec((N_FC3, 1), lambda b: (0, 0)),
        ],
        out_specs=pl.BlockSpec((1, N_FC3, 1), lambda b: (b, 0, 0)),
        scratch_shapes=[
            pltpu.VMEM((C1P, W_A1), jnp.float32),        # conv1 activations (wide strip)
            pltpu.VMEM((C1P, W_P1), jnp.float32),        # pool1
            pltpu.VMEM((C2, W_A2), jnp.float32),         # conv2 activations
            pltpu.VMEM((C2, W_P2), jnp.float32),         # pool2
            pltpu.VMEM((C2 * P2S * P2S, 1), jnp.float32),  # flattened fc input (400, 1)
        ],
        compiler_params=pltpu.CompilerParams(
            dimension_semantics=("parallel",),           # v7x: batch across both TCs
            vmem_limit_bytes=32 * 1024 * 1024),
        cost_estimate=cost,
    )(xf,
      params["conv1_w"], params["conv1_b"],
      params["conv2_w"], params["conv2_b"],
      params["fc1_w"], params["fc1_b"],
      params["fc2_w"], params["fc2_b"],
      params["fc3_w"], params["fc3_b"])
    return out.reshape(bsz, N_FC3)


# ----------------------------------------------------------------------------
# Parameter init (PyTorch-like uniform; kernel-ready layouts, hoisted once)
# ----------------------------------------------------------------------------
def init_params(key):
    def uniform(k, shape, fan_in):
        bound = 1.0 / jnp.sqrt(jnp.float32(fan_in))
        return jax.random.uniform(k, shape, jnp.float32, -bound, bound)

    ks = jax.random.split(key, 10)
    c1w = uniform(ks[0], (C1, C_IN, KH, KW), C_IN * KH * KW)
    c1b = uniform(ks[1], (C1,), C_IN * KH * KW)
    c2w = uniform(ks[2], (C2, C1, KH, KW), C1 * KH * KW)
    c2b = uniform(ks[3], (C2,), C1 * KH * KW)
    f1w = uniform(ks[4], (N_FC1, C2 * P2S * P2S), C2 * P2S * P2S)
    f1b = uniform(ks[5], (N_FC1,), C2 * P2S * P2S)
    f2w = uniform(ks[6], (N_FC2, N_FC1), N_FC1)
    f2b = uniform(ks[7], (N_FC2,), N_FC1)
    f3w = uniform(ks[8], (N_FC3, N_FC2), N_FC2)
    f3b = uniform(ks[9], (N_FC3,), N_FC2)

    # conv weights as per-tap (ki,kj) slices: (25, Cout, Cin); conv1 Cout and
    # conv2 Cin zero-padded to 8 so the padded channels contribute nothing.
    w1k = jnp.zeros((KH * KW, C1P, C_IN), jnp.float32).at[:, :C1, :].set(
        jnp.transpose(c1w, (2, 3, 0, 1)).reshape(KH * KW, C1, C_IN))
    b1k = jnp.zeros((C1P, 1), jnp.float32).at[:C1, 0].set(c1b)
    w2k = jnp.zeros((KH * KW, C2, C1P), jnp.float32).at[:, :, :C1].set(
        jnp.transpose(c2w, (2, 3, 0, 1)).reshape(KH * KW, C2, C1))
    b2k = c2b.reshape(C2, 1)
    # fc1 columns permuted from torch-flatten order (c*25 + h*5 + w) to the
    # kernel's gather order ((h*5 + w)*16 + c).
    f1k = jnp.transpose(f1w.reshape(N_FC1, C2, P2S, P2S),
                        (0, 2, 3, 1)).reshape(N_FC1, C2 * P2S * P2S)
    return {
        "conv1_w": w1k, "conv1_b": b1k,
        "conv2_w": w2k, "conv2_b": b2k,
        "fc1_w": f1k, "fc1_b": f1b.reshape(N_FC1, 1),
        "fc2_w": f2w, "fc2_b": f2b.reshape(N_FC2, 1),
        "fc3_w": f3w, "fc3_b": f3b.reshape(N_FC3, 1),
    }


if __name__ == "__main__":
    key = jax.random.PRNGKey(0)
    pkey, xkey = jax.random.split(key)
    params = init_params(pkey)
    # fc1 (16*5*5 inputs) implies a 3x32x32 spatial input.
    x = jax.random.normal(xkey, (2, C_IN, IMG, IMG), jnp.float32)

    out = jax.jit(network_forward)(params, x)
    out = jax.block_until_ready(out)
    assert out.shape == (2, N_FC3) and out.dtype == jnp.float32
    assert bool(jnp.all(jnp.isfinite(out)))
    print("KERNEL_OK")
</pallas_src>

<mosaic_0001>
module attributes {stable_mosaic.version = 11 : i64} {
  func.func @_lenet_kernel(%arg0: i32, %arg1: memref<1x3x1040xf32, #tpu.memory_space<vmem>>, %arg2: memref<25x8x3xf32, #tpu.memory_space<vmem>>, %arg3: memref<8x1xf32, #tpu.memory_space<vmem>>, %arg4: memref<25x16x8xf32, #tpu.memory_space<vmem>>, %arg5: memref<16x1xf32, #tpu.memory_space<vmem>>, %arg6: memref<120x400xf32, #tpu.memory_space<vmem>>, %arg7: memref<120x1xf32, #tpu.memory_space<vmem>>, %arg8: memref<84x120xf32, #tpu.memory_space<vmem>>, %arg9: memref<84x1xf32, #tpu.memory_space<vmem>>, %arg10: memref<10x84xf32, #tpu.memory_space<vmem>>, %arg11: memref<10x1xf32, #tpu.memory_space<vmem>>, %arg12: memref<1x10x1xf32, #tpu.memory_space<vmem>>, %arg13: memref<8x900xf32, #tpu.memory_space<vmem>>, %arg14: memref<8x864xf32, #tpu.memory_space<vmem>>, %arg15: memref<16x600xf32, #tpu.memory_space<vmem>>, %arg16: memref<16x532xf32, #tpu.memory_space<vmem>>, %arg17: memref<400x1xf32, #tpu.memory_space<vmem>>) attributes {dimension_semantics = [#tpu.dimension_semantics<parallel>], iteration_bounds = array<i64: 2>, scalar_prefetch = 0 : i64, scratch_operands = 5 : i64, tpu.core_type = #tpu.core_type<tc>, window_params = [{transform_indices = @transform_0, window_bounds = array<i64: 1, 3, 1040>}, {pipeline_mode = #tpu.pipeline_mode<synchronous>, transform_indices = @transform_1, window_bounds = array<i64: 25, 8, 3>}, {pipeline_mode = #tpu.pipeline_mode<synchronous>, transform_indices = @transform_2, window_bounds = array<i64: 8, 1>}, {pipeline_mode = #tpu.pipeline_mode<synchronous>, transform_indices = @transform_3, window_bounds = array<i64: 25, 16, 8>}, {pipeline_mode = #tpu.pipeline_mode<synchronous>, transform_indices = @transform_4, window_bounds = array<i64: 16, 1>}, {pipeline_mode = #tpu.pipeline_mode<synchronous>, transform_indices = @transform_5, window_bounds = array<i64: 120, 400>}, {pipeline_mode = #tpu.pipeline_mode<synchronous>, transform_indices = @transform_6, window_bounds = array<i64: 120, 1>}, {pipeline_mode = #tpu.pipeline_mode<synchronous>, transform_indices = @transform_7, window_bounds = array<i64: 84, 120>}, {pipeline_mode = #tpu.pipeline_mode<synchronous>, transform_indices = @transform_8, window_bounds = array<i64: 84, 1>}, {pipeline_mode = #tpu.pipeline_mode<synchronous>, transform_indices = @transform_9, window_bounds = array<i64: 10, 84>}, {pipeline_mode = #tpu.pipeline_mode<synchronous>, transform_indices = @transform_10, window_bounds = array<i64: 10, 1>}, {transform_indices = @transform_11, window_bounds = array<i64: 1, 10, 1>}]} {
    %cst = arith.constant 0.000000e+00 : f32
    %0 = vector.broadcast %cst : f32 to vector<8x900xf32>
    %c0 = arith.constant 0 : index
    %c0_0 = arith.constant 0 : index
    %c0_1 = arith.constant 0 : index
    %1 = vector.load %arg2[%c0, %c0_0, %c0_1] : memref<25x8x3xf32, #tpu.memory_space<vmem>>, vector<1x8x3xf32>
    %2 = vector.shape_cast %1 : vector<1x8x3xf32> to vector<8x3xf32>
    %c0_2 = arith.constant 0 : index
    %c0_3 = arith.constant 0 : index
    %c0_4 = arith.constant 0 : index
    %3 = vector.load %arg1[%c0_2, %c0_3, %c0_4] : memref<1x3x1040xf32, #tpu.memory_space<vmem>>, vector<1x3x900xf32>
    %4 = vector.shape_cast %3 : vector<1x3x900xf32> to vector<3x900xf32>
    %cst_5 = arith.constant dense<0.000000e+00> : vector<8x900xf32>
    %5 = tpu.matmul %2, %4, %cst_5 {dimension_numbers = #tpu.dot_dimension_numbers<[1], [0], [0], [1], [0, 0, 1, 1], [], []>} : vector<8x3xf32>, vector<3x900xf32>, vector<8x900xf32> -> vector<8x900xf32>
    %6 = arith.addf %0, %5 : vector<8x900xf32>
    %c1 = arith.constant 1 : index
    %c0_6 = arith.constant 0 : index
    %c0_7 = arith.constant 0 : index
    %7 = vector.load %arg2[%c1, %c0_6, %c0_7] : memref<25x8x3xf32, #tpu.memory_space<vmem>>, vector<1x8x3xf32>
    %8 = vector.shape_cast %7 : vector<1x8x3xf32> to vector<8x3xf32>
    %c0_8 = arith.constant 0 : index
    %c0_9 = arith.constant 0 : index
    %c1_10 = arith.constant 1 : index
    %9 = vector.load %arg1[%c0_8, %c0_9, %c1_10] : memref<1x3x1040xf32, #tpu.memory_space<vmem>>, vector<1x3x900xf32>
    %10 = vector.shape_cast %9 : vector<1x3x900xf32> to vector<3x900xf32>
    %cst_11 = arith.constant dense<0.000000e+00> : vector<8x900xf32>
    %11 = tpu.matmul %8, %10, %cst_11 {dimension_numbers = #tpu.dot_dimension_numbers<[1], [0], [0], [1], [0, 0, 1, 1], [], []>} : vector<8x3xf32>, vector<3x900xf32>, vector<8x900xf32> -> vector<8x900xf32>
    %12 = arith.addf %6, %11 : vector<8x900xf32>
    %c2 = arith.constant 2 : index
    %c0_12 = arith.constant 0 : index
    %c0_13 = arith.constant 0 : index
    %13 = vector.load %arg2[%c2, %c0_12, %c0_13] : memref<25x8x3xf32, #tpu.memory_space<vmem>>, vector<1x8x3xf32>
    %14 = vector.shape_cast %13 : vector<1x8x3xf32> to vector<8x3xf32>
    %c0_14 = arith.constant 0 : index
    %c0_15 = arith.constant 0 : index
    %c2_16 = arith.constant 2 : index
    %15 = vector.load %arg1[%c0_14, %c0_15, %c2_16] : memref<1x3x1040xf32, #tpu.memory_space<vmem>>, vector<1x3x900xf32>
    %16 = vector.shape_cast %15 : vector<1x3x900xf32> to vector<3x900xf32>
    %cst_17 = arith.constant dense<0.000000e+00> : vector<8x900xf32>
    %17 = tpu.matmul %14, %16, %cst_17 {dimension_numbers = #tpu.dot_dimension_numbers<[1], [0], [0], [1], [0, 0, 1, 1], [], []>} : vector<8x3xf32>, vector<3x900xf32>, vector<8x900xf32> -> vector<8x900xf32>
    %18 = arith.addf %12, %17 : vector<8x900xf32>
    %c3 = arith.constant 3 : index
    %c0_18 = arith.constant 0 : index
    %c0_19 = arith.constant 0 : index
    %19 = vector.load %arg2[%c3, %c0_18, %c0_19] : memref<25x8x3xf32, #tpu.memory_space<vmem>>, vector<1x8x3xf32>
    %20 = vector.shape_cast %19 : vector<1x8x3xf32> to vector<8x3xf32>
    %c0_20 = arith.constant 0 : index
    %c0_21 = arith.constant 0 : index
    %c3_22 = arith.constant 3 : index
    %21 = vector.load %arg1[%c0_20, %c0_21, %c3_22] : memref<1x3x1040xf32, #tpu.memory_space<vmem>>, vector<1x3x900xf32>
    %22 = vector.shape_cast %21 : vector<1x3x900xf32> to vector<3x900xf32>
    %cst_23 = arith.constant dense<0.000000e+00> : vector<8x900xf32>
    %23 = tpu.matmul %20, %22, %cst_23 {dimension_numbers = #tpu.dot_dimension_numbers<[1], [0], [0], [1], [0, 0, 1, 1], [], []>} : vector<8x3xf32>, vector<3x900xf32>, vector<8x900xf32> -> vector<8x900xf32>
    %24 = arith.addf %18, %23 : vector<8x900xf32>
    %c4 = arith.constant 4 : index
    %c0_24 = arith.constant 0 : index
    %c0_25 = arith.constant 0 : index
    %25 = vector.load %arg2[%c4, %c0_24, %c0_25] : memref<25x8x3xf32, #tpu.memory_space<vmem>>, vector<1x8x3xf32>
    %26 = vector.shape_cast %25 : vector<1x8x3xf32> to vector<8x3xf32>
    %c0_26 = arith.constant 0 : index
    %c0_27 = arith.constant 0 : index
    %c4_28 = arith.constant 4 : index
    %27 = vector.load %arg1[%c0_26, %c0_27, %c4_28] : memref<1x3x1040xf32, #tpu.memory_space<vmem>>, vector<1x3x900xf32>
    %28 = vector.shape_cast %27 : vector<1x3x900xf32> to vector<3x900xf32>
    %cst_29 = arith.constant dense<0.000000e+00> : vector<8x900xf32>
    %29 = tpu.matmul %26, %28, %cst_29 {dimension_numbers = #tpu.dot_dimension_numbers<[1], [0], [0], [1], [0, 0, 1, 1], [], []>} : vector<8x3xf32>, vector<3x900xf32>, vector<8x900xf32> -> vector<8x900xf32>
    %30 = arith.addf %24, %29 : vector<8x900xf32>
    %c5 = arith.constant 5 : index
    %c0_30 = arith.constant 0 : index
    %c0_31 = arith.constant 0 : index
    %31 = vector.load %arg2[%c5, %c0_30, %c0_31] : memref<25x8x3xf32, #tpu.memory_space<vmem>>, vector<1x8x3xf32>
    %32 = vector.shape_cast %31 : vector<1x8x3xf32> to vector<8x3xf32>
    %c0_32 = arith.constant 0 : index
    %c0_33 = arith.constant 0 : index
    %c32 = arith.constant 32 : index
    %33 = vector.load %arg1[%c0_32, %c0_33, %c32] : memref<1x3x1040xf32, #tpu.memory_space<vmem>>, vector<1x3x900xf32>
    %34 = vector.shape_cast %33 : vector<1x3x900xf32> to vector<3x900xf32>
    %cst_34 = arith.constant dense<0.000000e+00> : vector<8x900xf32>
    %35 = tpu.matmul %32, %34, %cst_34 {dimension_numbers = #tpu.dot_dimension_numbers<[1], [0], [0], [1], [0, 0, 1, 1], [], []>} : vector<8x3xf32>, vector<3x900xf32>, vector<8x900xf32> -> vector<8x900xf32>
    %36 = arith.addf %30, %35 : vector<8x900xf32>
    %c6 = arith.constant 6 : index
    %c0_35 = arith.constant 0 : index
    %c0_36 = arith.constant 0 : index
    %37 = vector.load %arg2[%c6, %c0_35, %c0_36] : memref<25x8x3xf32, #tpu.memory_space<vmem>>, vector<1x8x3xf32>
    %38 = vector.shape_cast %37 : vector<1x8x3xf32> to vector<8x3xf32>
    %c0_37 = arith.constant 0 : index
    %c0_38 = arith.constant 0 : index
    %c33 = arith.constant 33 : index
    %39 = vector.load %arg1[%c0_37, %c0_38, %c33] : memref<1x3x1040xf32, #tpu.memory_space<vmem>>, vector<1x3x900xf32>
    %40 = vector.shape_cast %39 : vector<1x3x900xf32> to vector<3x900xf32>
    %cst_39 = arith.constant dense<0.000000e+00> : vector<8x900xf32>
    %41 = tpu.matmul %38, %40, %cst_39 {dimension_numbers = #tpu.dot_dimension_numbers<[1], [0], [0], [1], [0, 0, 1, 1], [], []>} : vector<8x3xf32>, vector<3x900xf32>, vector<8x900xf32> -> vector<8x900xf32>
    %42 = arith.addf %36, %41 : vector<8x900xf32>
    %c7 = arith.constant 7 : index
    %c0_40 = arith.constant 0 : index
    %c0_41 = arith.constant 0 : index
    %43 = vector.load %arg2[%c7, %c0_40, %c0_41] : memref<25x8x3xf32, #tpu.memory_space<vmem>>, vector<1x8x3xf32>
    %44 = vector.shape_cast %43 : vector<1x8x3xf32> to vector<8x3xf32>
    %c0_42 = arith.constant 0 : index
    %c0_43 = arith.constant 0 : index
    %c34 = arith.constant 34 : index
    %45 = vector.load %arg1[%c0_42, %c0_43, %c34] : memref<1x3x1040xf32, #tpu.memory_space<vmem>>, vector<1x3x900xf32>
    %46 = vector.shape_cast %45 : vector<1x3x900xf32> to vector<3x900xf32>
    %cst_44 = arith.constant dense<0.000000e+00> : vector<8x900xf32>
    %47 = tpu.matmul %44, %46, %cst_44 {dimension_numbers = #tpu.dot_dimension_numbers<[1], [0], [0], [1], [0, 0, 1, 1], [], []>} : vector<8x3xf32>, vector<3x900xf32>, vector<8x900xf32> -> vector<8x900xf32>
    %48 = arith.addf %42, %47 : vector<8x900xf32>
    %c8 = arith.constant 8 : index
    %c0_45 = arith.constant 0 : index
    %c0_46 = arith.constant 0 : index
    %49 = vector.load %arg2[%c8, %c0_45, %c0_46] : memref<25x8x3xf32, #tpu.memory_space<vmem>>, vector<1x8x3xf32>
    %50 = vector.shape_cast %49 : vector<1x8x3xf32> to vector<8x3xf32>
    %c0_47 = arith.constant 0 : index
    %c0_48 = arith.constant 0 : index
    %c35 = arith.constant 35 : index
    %51 = vector.load %arg1[%c0_47, %c0_48, %c35] : memref<1x3x1040xf32, #tpu.memory_space<vmem>>, vector<1x3x900xf32>
    %52 = vector.shape_cast %51 : vector<1x3x900xf32> to vector<3x900xf32>
    %cst_49 = arith.constant dense<0.000000e+00> : vector<8x900xf32>
    %53 = tpu.matmul %50, %52, %cst_49 {dimension_numbers = #tpu.dot_dimension_numbers<[1], [0], [0], [1], [0, 0, 1, 1], [], []>} : vector<8x3xf32>, vector<3x900xf32>, vector<8x900xf32> -> vector<8x900xf32>
    %54 = arith.addf %48, %53 : vector<8x900xf32>
    %c9 = arith.constant 9 : index
    %c0_50 = arith.constant 0 : index
    %c0_51 = arith.constant 0 : index
    %55 = vector.load %arg2[%c9, %c0_50, %c0_51] : memref<25x8x3xf32, #tpu.memory_space<vmem>>, vector<1x8x3xf32>
    %56 = vector.shape_cast %55 : vector<1x8x3xf32> to vector<8x3xf32>
    %c0_52 = arith.constant 0 : index
    %c0_53 = arith.constant 0 : index
    %c36 = arith.constant 36 : index
    %57 = vector.load %arg1[%c0_52, %c0_53, %c36] : memref<1x3x1040xf32, #tpu.memory_space<vmem>>, vector<1x3x900xf32>
    %58 = vector.shape_cast %57 : vector<1x3x900xf32> to vector<3x900xf32>
    %cst_54 = arith.constant dense<0.000000e+00> : vector<8x900xf32>
    %59 = tpu.matmul %56, %58, %cst_54 {dimension_numbers = #tpu.dot_dimension_numbers<[1], [0], [0], [1], [0, 0, 1, 1], [], []>} : vector<8x3xf32>, vector<3x900xf32>, vector<8x900xf32> -> vector<8x900xf32>
    %60 = arith.addf %54, %59 : vector<8x900xf32>
    %c10 = arith.constant 10 : index
    %c0_55 = arith.constant 0 : index
    %c0_56 = arith.constant 0 : index
    %61 = vector.load %arg2[%c10, %c0_55, %c0_56] : memref<25x8x3xf32, #tpu.memory_space<vmem>>, vector<1x8x3xf32>
    %62 = vector.shape_cast %61 : vector<1x8x3xf32> to vector<8x3xf32>
    %c0_57 = arith.constant 0 : index
    %c0_58 = arith.constant 0 : index
    %c64 = arith.constant 64 : index
    %63 = vector.load %arg1[%c0_57, %c0_58, %c64] : memref<1x3x1040xf32, #tpu.memory_space<vmem>>, vector<1x3x900xf32>
    %64 = vector.shape_cast %63 : vector<1x3x900xf32> to vector<3x900xf32>
    %cst_59 = arith.constant dense<0.000000e+00> : vector<8x900xf32>
    %65 = tpu.matmul %62, %64, %cst_59 {dimension_numbers = #tpu.dot_dimension_numbers<[1], [0], [0], [1], [0, 0, 1, 1], [], []>} : vector<8x3xf32>, vector<3x900xf32>, vector<8x900xf32> -> vector<8x900xf32>
    %66 = arith.addf %60, %65 : vector<8x900xf32>
    %c11 = arith.constant 11 : index
    %c0_60 = arith.constant 0 : index
    %c0_61 = arith.constant 0 : index
    %67 = vector.load %arg2[%c11, %c0_60, %c0_61] : memref<25x8x3xf32, #tpu.memory_space<vmem>>, vector<1x8x3xf32>
    %68 = vector.shape_cast %67 : vector<1x8x3xf32> to vector<8x3xf32>
    %c0_62 = arith.constant 0 : index
    %c0_63 = arith.constant 0 : index
    %c65 = arith.constant 65 : index
    %69 = vector.load %arg1[%c0_62, %c0_63, %c65] : memref<1x3x1040xf32, #tpu.memory_space<vmem>>, vector<1x3x900xf32>
    %70 = vector.shape_cast %69 : vector<1x3x900xf32> to vector<3x900xf32>
    %cst_64 = arith.constant dense<0.000000e+00> : vector<8x900xf32>
    %71 = tpu.matmul %68, %70, %cst_64 {dimension_numbers = #tpu.dot_dimension_numbers<[1], [0], [0], [1], [0, 0, 1, 1], [], []>} : vector<8x3xf32>, vector<3x900xf32>, vector<8x900xf32> -> vector<8x900xf32>
    %72 = arith.addf %66, %71 : vector<8x900xf32>
    %c12 = arith.constant 12 : index
    %c0_65 = arith.constant 0 : index
    %c0_66 = arith.constant 0 : index
    %73 = vector.load %arg2[%c12, %c0_65, %c0_66] : memref<25x8x3xf32, #tpu.memory_space<vmem>>, vector<1x8x3xf32>
    %74 = vector.shape_cast %73 : vector<1x8x3xf32> to vector<8x3xf32>
    %c0_67 = arith.constant 0 : index
    %c0_68 = arith.constant 0 : index
    %c66 = arith.constant 66 : index
    %75 = vector.load %arg1[%c0_67, %c0_68, %c66] : memref<1x3x1040xf32, #tpu.memory_space<vmem>>, vector<1x3x900xf32>
    %76 = vector.shape_cast %75 : vector<1x3x900xf32> to vector<3x900xf32>
    %cst_69 = arith.constant dense<0.000000e+00> : vector<8x900xf32>
    %77 = tpu.matmul %74, %76, %cst_69 {dimension_numbers = #tpu.dot_dimension_numbers<[1], [0], [0], [1], [0, 0, 1, 1], [], []>} : vector<8x3xf32>, vector<3x900xf32>, vector<8x900xf32> -> vector<8x900xf32>
    %78 = arith.addf %72, %77 : vector<8x900xf32>
    %c13 = arith.constant 13 : index
    %c0_70 = arith.constant 0 : index
    %c0_71 = arith.constant 0 : index
    %79 = vector.load %arg2[%c13, %c0_70, %c0_71] : memref<25x8x3xf32, #tpu.memory_space<vmem>>, vector<1x8x3xf32>
    %80 = vector.shape_cast %79 : vector<1x8x3xf32> to vector<8x3xf32>
    %c0_72 = arith.constant 0 : index
    %c0_73 = arith.constant 0 : index
    %c67 = arith.constant 67 : index
    %81 = vector.load %arg1[%c0_72, %c0_73, %c67] : memref<1x3x1040xf32, #tpu.memory_space<vmem>>, vector<1x3x900xf32>
    %82 = vector.shape_cast %81 : vector<1x3x900xf32> to vector<3x900xf32>
    %cst_74 = arith.constant dense<0.000000e+00> : vector<8x900xf32>
    %83 = tpu.matmul %80, %82, %cst_74 {dimension_numbers = #tpu.dot_dimension_numbers<[1], [0], [0], [1], [0, 0, 1, 1], [], []>} : vector<8x3xf32>, vector<3x900xf32>, vector<8x900xf32> -> vector<8x900xf32>
    %84 = arith.addf %78, %83 : vector<8x900xf32>
    %c14 = arith.constant 14 : index
    %c0_75 = arith.constant 0 : index
    %c0_76 = arith.constant 0 : index
    %85 = vector.load %arg2[%c14, %c0_75, %c0_76] : memref<25x8x3xf32, #tpu.memory_space<vmem>>, vector<1x8x3xf32>
    %86 = vector.shape_cast %85 : vector<1x8x3xf32> to vector<8x3xf32>
    %c0_77 = arith.constant 0 : index
    %c0_78 = arith.constant 0 : index
    %c68 = arith.constant 68 : index
    %87 = vector.load %arg1[%c0_77, %c0_78, %c68] : memref<1x3x1040xf32, #tpu.memory_space<vmem>>, vector<1x3x900xf32>
    %88 = vector.shape_cast %87 : vector<1x3x900xf32> to vector<3x900xf32>
    %cst_79 = arith.constant dense<0.000000e+00> : vector<8x900xf32>
    %89 = tpu.matmul %86, %88, %cst_79 {dimension_numbers = #tpu.dot_dimension_numbers<[1], [0], [0], [1], [0, 0, 1, 1], [], []>} : vector<8x3xf32>, vector<3x900xf32>, vector<8x900xf32> -> vector<8x900xf32>
    %90 = arith.addf %84, %89 : vector<8x900xf32>
    %c15 = arith.constant 15 : index
    %c0_80 = arith.constant 0 : index
    %c0_81 = arith.constant 0 : index
    %91 = vector.load %arg2[%c15, %c0_80, %c0_81] : memref<25x8x3xf32, #tpu.memory_space<vmem>>, vector<1x8x3xf32>
    %92 = vector.shape_cast %91 : vector<1x8x3xf32> to vector<8x3xf32>
    %c0_82 = arith.constant 0 : index
    %c0_83 = arith.constant 0 : index
    %c96 = arith.constant 96 : index
    %93 = vector.load %arg1[%c0_82, %c0_83, %c96] : memref<1x3x1040xf32, #tpu.memory_space<vmem>>, vector<1x3x900xf32>
    %94 = vector.shape_cast %93 : vector<1x3x900xf32> to vector<3x900xf32>
    %cst_84 = arith.constant dense<0.000000e+00> : vector<8x900xf32>
    %95 = tpu.matmul %92, %94, %cst_84 {dimension_numbers = #tpu.dot_dimension_numbers<[1], [0], [0], [1], [0, 0, 1, 1], [], []>} : vector<8x3xf32>, vector<3x900xf32>, vector<8x900xf32> -> vector<8x900xf32>
    %96 = arith.addf %90, %95 : vector<8x900xf32>
    %c16 = arith.constant 16 : index
    %c0_85 = arith.constant 0 : index
    %c0_86 = arith.constant 0 : index
    %97 = vector.load %arg2[%c16, %c0_85, %c0_86] : memref<25x8x3xf32, #tpu.memory_space<vmem>>, vector<1x8x3xf32>
    %98 = vector.shape_cast %97 : vector<1x8x3xf32> to vector<8x3xf32>
    %c0_87 = arith.constant 0 : index
    %c0_88 = arith.constant 0 : index
    %c97 = arith.constant 97 : index
    %99 = vector.load %arg1[%c0_87, %c0_88, %c97] : memref<1x3x1040xf32, #tpu.memory_space<vmem>>, vector<1x3x900xf32>
    %100 = vector.shape_cast %99 : vector<1x3x900xf32> to vector<3x900xf32>
    %cst_89 = arith.constant dense<0.000000e+00> : vector<8x900xf32>
    %101 = tpu.matmul %98, %100, %cst_89 {dimension_numbers = #tpu.dot_dimension_numbers<[1], [0], [0], [1], [0, 0, 1, 1], [], []>} : vector<8x3xf32>, vector<3x900xf32>, vector<8x900xf32> -> vector<8x900xf32>
    %102 = arith.addf %96, %101 : vector<8x900xf32>
    %c17 = arith.constant 17 : index
    %c0_90 = arith.constant 0 : index
    %c0_91 = arith.constant 0 : index
    %103 = vector.load %arg2[%c17, %c0_90, %c0_91] : memref<25x8x3xf32, #tpu.memory_space<vmem>>, vector<1x8x3xf32>
    %104 = vector.shape_cast %103 : vector<1x8x3xf32> to vector<8x3xf32>
    %c0_92 = arith.constant 0 : index
    %c0_93 = arith.constant 0 : index
    %c98 = arith.constant 98 : index
    %105 = vector.load %arg1[%c0_92, %c0_93, %c98] : memref<1x3x1040xf32, #tpu.memory_space<vmem>>, vector<1x3x900xf32>
    %106 = vector.shape_cast %105 : vector<1x3x900xf32> to vector<3x900xf32>
    %cst_94 = arith.constant dense<0.000000e+00> : vector<8x900xf32>
    %107 = tpu.matmul %104, %106, %cst_94 {dimension_numbers = #tpu.dot_dimension_numbers<[1], [0], [0], [1], [0, 0, 1, 1], [], []>} : vector<8x3xf32>, vector<3x900xf32>, vector<8x900xf32> -> vector<8x900xf32>
    %108 = arith.addf %102, %107 : vector<8x900xf32>
    %c18 = arith.constant 18 : index
    %c0_95 = arith.constant 0 : index
    %c0_96 = arith.constant 0 : index
    %109 = vector.load %arg2[%c18, %c0_95, %c0_96] : memref<25x8x3xf32, #tpu.memory_space<vmem>>, vector<1x8x3xf32>
    %110 = vector.shape_cast %109 : vector<1x8x3xf32> to vector<8x3xf32>
    %c0_97 = arith.constant 0 : index
    %c0_98 = arith.constant 0 : index
    %c99 = arith.constant 99 : index
    %111 = vector.load %arg1[%c0_97, %c0_98, %c99] : memref<1x3x1040xf32, #tpu.memory_space<vmem>>, vector<1x3x900xf32>
    %112 = vector.shape_cast %111 : vector<1x3x900xf32> to vector<3x900xf32>
    %cst_99 = arith.constant dense<0.000000e+00> : vector<8x900xf32>
    %113 = tpu.matmul %110, %112, %cst_99 {dimension_numbers = #tpu.dot_dimension_numbers<[1], [0], [0], [1], [0, 0, 1, 1], [], []>} : vector<8x3xf32>, vector<3x900xf32>, vector<8x900xf32> -> vector<8x900xf32>
    %114 = arith.addf %108, %113 : vector<8x900xf32>
    %c19 = arith.constant 19 : index
    %c0_100 = arith.constant 0 : index
    %c0_101 = arith.constant 0 : index
    %115 = vector.load %arg2[%c19, %c0_100, %c0_101] : memref<25x8x3xf32, #tpu.memory_space<vmem>>, vector<1x8x3xf32>
    %116 = vector.shape_cast %115 : vector<1x8x3xf32> to vector<8x3xf32>
    %c0_102 = arith.constant 0 : index
    %c0_103 = arith.constant 0 : index
    %c100 = arith.constant 100 : index
    %117 = vector.load %arg1[%c0_102, %c0_103, %c100] : memref<1x3x1040xf32, #tpu.memory_space<vmem>>, vector<1x3x900xf32>
    %118 = vector.shape_cast %117 : vector<1x3x900xf32> to vector<3x900xf32>
    %cst_104 = arith.constant dense<0.000000e+00> : vector<8x900xf32>
    %119 = tpu.matmul %116, %118, %cst_104 {dimension_numbers = #tpu.dot_dimension_numbers<[1], [0], [0], [1], [0, 0, 1, 1], [], []>} : vector<8x3xf32>, vector<3x900xf32>, vector<8x900xf32> -> vector<8x900xf32>
    %120 = arith.addf %114, %119 : vector<8x900xf32>
    %c20 = arith.constant 20 : index
    %c0_105 = arith.constant 0 : index
    %c0_106 = arith.constant 0 : index
    %121 = vector.load %arg2[%c20, %c0_105, %c0_106] : memref<25x8x3xf32, #tpu.memory_space<vmem>>, vector<1x8x3xf32>
    %122 = vector.shape_cast %121 : vector<1x8x3xf32> to vector<8x3xf32>
    %c0_107 = arith.constant 0 : index
    %c0_108 = arith.constant 0 : index
    %c128 = arith.constant 128 : index
    %123 = vector.load %arg1[%c0_107, %c0_108, %c128] : memref<1x3x1040xf32, #tpu.memory_space<vmem>>, vector<1x3x900xf32>
    %124 = vector.shape_cast %123 : vector<1x3x900xf32> to vector<3x900xf32>
    %cst_109 = arith.constant dense<0.000000e+00> : vector<8x900xf32>
    %125 = tpu.matmul %122, %124, %cst_109 {dimension_numbers = #tpu.dot_dimension_numbers<[1], [0], [0], [1], [0, 0, 1, 1], [], []>} : vector<8x3xf32>, vector<3x900xf32>, vector<8x900xf32> -> vector<8x900xf32>
    %126 = arith.addf %120, %125 : vector<8x900xf32>
    %c21 = arith.constant 21 : index
    %c0_110 = arith.constant 0 : index
    %c0_111 = arith.constant 0 : index
    %127 = vector.load %arg2[%c21, %c0_110, %c0_111] : memref<25x8x3xf32, #tpu.memory_space<vmem>>, vector<1x8x3xf32>
    %128 = vector.shape_cast %127 : vector<1x8x3xf32> to vector<8x3xf32>
    %c0_112 = arith.constant 0 : index
    %c0_113 = arith.constant 0 : index
    %c129 = arith.constant 129 : index
    %129 = vector.load %arg1[%c0_112, %c0_113, %c129] : memref<1x3x1040xf32, #tpu.memory_space<vmem>>, vector<1x3x900xf32>
    %130 = vector.shape_cast %129 : vector<1x3x900xf32> to vector<3x900xf32>
    %cst_114 = arith.constant dense<0.000000e+00> : vector<8x900xf32>
    %131 = tpu.matmul %128, %130, %cst_114 {dimension_numbers = #tpu.dot_dimension_numbers<[1], [0], [0], [1], [0, 0, 1, 1], [], []>} : vector<8x3xf32>, vector<3x900xf32>, vector<8x900xf32> -> vector<8x900xf32>
    %132 = arith.addf %126, %131 : vector<8x900xf32>
    %c22 = arith.constant 22 : index
    %c0_115 = arith.constant 0 : index
    %c0_116 = arith.constant 0 : index
    %133 = vector.load %arg2[%c22, %c0_115, %c0_116] : memref<25x8x3xf32, #tpu.memory_space<vmem>>, vector<1x8x3xf32>
    %134 = vector.shape_cast %133 : vector<1x8x3xf32> to vector<8x3xf32>
    %c0_117 = arith.constant 0 : index
    %c0_118 = arith.constant 0 : index
    %c130 = arith.constant 130 : index
    %135 = vector.load %arg1[%c0_117, %c0_118, %c130] : memref<1x3x1040xf32, #tpu.memory_space<vmem>>, vector<1x3x900xf32>
    %136 = vector.shape_cast %135 : vector<1x3x900xf32> to vector<3x900xf32>
    %cst_119 = arith.constant dense<0.000000e+00> : vector<8x900xf32>
    %137 = tpu.matmul %134, %136, %cst_119 {dimension_numbers = #tpu.dot_dimension_numbers<[1], [0], [0], [1], [0, 0, 1, 1], [], []>} : vector<8x3xf32>, vector<3x900xf32>, vector<8x900xf32> -> vector<8x900xf32>
    %138 = arith.addf %132, %137 : vector<8x900xf32>
    %c23 = arith.constant 23 : index
    %c0_120 = arith.constant 0 : index
    %c0_121 = arith.constant 0 : index
    %139 = vector.load %arg2[%c23, %c0_120, %c0_121] : memref<25x8x3xf32, #tpu.memory_space<vmem>>, vector<1x8x3xf32>
    %140 = vector.shape_cast %139 : vector<1x8x3xf32> to vector<8x3xf32>
    %c0_122 = arith.constant 0 : index
    %c0_123 = arith.constant 0 : index
    %c131 = arith.constant 131 : index
    %141 = vector.load %arg1[%c0_122, %c0_123, %c131] : memref<1x3x1040xf32, #tpu.memory_space<vmem>>, vector<1x3x900xf32>
    %142 = vector.shape_cast %141 : vector<1x3x900xf32> to vector<3x900xf32>
    %cst_124 = arith.constant dense<0.000000e+00> : vector<8x900xf32>
    %143 = tpu.matmul %140, %142, %cst_124 {dimension_numbers = #tpu.dot_dimension_numbers<[1], [0], [0], [1], [0, 0, 1, 1], [], []>} : vector<8x3xf32>, vector<3x900xf32>, vector<8x900xf32> -> vector<8x900xf32>
    %144 = arith.addf %138, %143 : vector<8x900xf32>
    %c24 = arith.constant 24 : index
    %c0_125 = arith.constant 0 : index
    %c0_126 = arith.constant 0 : index
    %145 = vector.load %arg2[%c24, %c0_125, %c0_126] : memref<25x8x3xf32, #tpu.memory_space<vmem>>, vector<1x8x3xf32>
    %146 = vector.shape_cast %145 : vector<1x8x3xf32> to vector<8x3xf32>
    %c0_127 = arith.constant 0 : index
    %c0_128 = arith.constant 0 : index
    %c132 = arith.constant 132 : index
    %147 = vector.load %arg1[%c0_127, %c0_128, %c132] : memref<1x3x1040xf32, #tpu.memory_space<vmem>>, vector<1x3x900xf32>
    %148 = vector.shape_cast %147 : vector<1x3x900xf32> to vector<3x900xf32>
    %cst_129 = arith.constant dense<0.000000e+00> : vector<8x900xf32>
    %149 = tpu.matmul %146, %148, %cst_129 {dimension_numbers = #tpu.dot_dimension_numbers<[1], [0], [0], [1], [0, 0, 1, 1], [], []>} : vector<8x3xf32>, vector<3x900xf32>, vector<8x900xf32> -> vector<8x900xf32>
    %150 = arith.addf %144, %149 : vector<8x900xf32>
    %c0_130 = arith.constant 0 : index
    %c0_131 = arith.constant 0 : index
    %151 = vector.load %arg3[%c0_130, %c0_131] : memref<8x1xf32, #tpu.memory_space<vmem>>, vector<8x1xf32>
    %152 = vector.broadcast %151 : vector<8x1xf32> to vector<8x900xf32>
    %153 = arith.addf %150, %152 : vector<8x900xf32>
    %cst_132 = arith.constant 0.000000e+00 : f32
    %154 = vector.broadcast %cst_132 : f32 to vector<8x900xf32>
    %155 = arith.subf %154, %153 : vector<8x900xf32>
    %156 = math.exp %155 : vector<8x900xf32>
    %cst_133 = arith.constant 1.000000e+00 : f32
    %157 = vector.broadcast %cst_133 : f32 to vector<8x900xf32>
    %158 = arith.addf %157, %156 : vector<8x900xf32>
    %159 = tpu.reciprocal %158 : vector<8x900xf32> -> vector<8x900xf32>
    %c0_134 = arith.constant 0 : index
    %c0_135 = arith.constant 0 : index
    %160 = vector.load %arg13[%c0_134, %c0_135] : memref<8x900xf32, #tpu.memory_space<vmem>>, vector<8x900xf32>
    tpu.vector_store %arg13[%c0_134, %c0_135], %159 {strides = array<i32>} : memref<8x900xf32, #tpu.memory_space<vmem>>, vector<8x900xf32>,
    %c0_136 = arith.constant 0 : index
    %c0_137 = arith.constant 0 : index
    %161 = vector.load %arg13[%c0_136, %c0_137] : memref<8x900xf32, #tpu.memory_space<vmem>>, vector<8x864xf32>
    %c0_138 = arith.constant 0 : index
    %c1_139 = arith.constant 1 : index
    %162 = vector.load %arg13[%c0_138, %c1_139] : memref<8x900xf32, #tpu.memory_space<vmem>>, vector<8x864xf32>
    %163 = arith.maximumf %161, %162 : vector<8x864xf32>
    %c0_140 = arith.constant 0 : index
    %c32_141 = arith.constant 32 : index
    %164 = vector.load %arg13[%c0_140, %c32_141] : memref<8x900xf32, #tpu.memory_space<vmem>>, vector<8x864xf32>
    %c0_142 = arith.constant 0 : index
    %c33_143 = arith.constant 33 : index
    %165 = vector.load %arg13[%c0_142, %c33_143] : memref<8x900xf32, #tpu.memory_space<vmem>>, vector<8x864xf32>
    %166 = arith.maximumf %164, %165 : vector<8x864xf32>
    %167 = arith.maximumf %163, %166 : vector<8x864xf32>
    %c0_144 = arith.constant 0 : index
    %c0_145 = arith.constant 0 : index
    %168 = vector.load %arg14[%c0_144, %c0_145] : memref<8x864xf32, #tpu.memory_space<vmem>>, vector<8x864xf32>
    tpu.vector_store %arg14[%c0_144, %c0_145], %167 {strides = array<i32>} : memref<8x864xf32, #tpu.memory_space<vmem>>, vector<8x864xf32>,
    %cst_146 = arith.constant 0.000000e+00 : f32
    %169 = vector.broadcast %cst_146 : f32 to vector<16x600xf32>
    %c0_147 = arith.constant 0 : index
    %c0_148 = arith.constant 0 : index
    %c0_149 = arith.constant 0 : index
    %170 = vector.load %arg4[%c0_147, %c0_148, %c0_149] : memref<25x16x8xf32, #tpu.memory_space<vmem>>, vector<1x16x8xf32>
    %171 = vector.shape_cast %170 : vector<1x16x8xf32> to vector<16x8xf32>
    %c0_150 = arith.constant 0 : index
    %c0_151 = arith.constant 0 : index
    %172 = vector.load %arg14[%c0_150, %c0_151] : memref<8x864xf32, #tpu.memory_space<vmem>>, vector<8x600xf32>
    %cst_152 = arith.constant dense<0.000000e+00> : vector<16x600xf32>
    %173 = tpu.matmul %171, %172, %cst_152 {dimension_numbers = #tpu.dot_dimension_numbers<[1], [0], [0], [1], [0, 0, 1, 1], [], []>} : vector<16x8xf32>, vector<8x600xf32>, vector<16x600xf32> -> vector<16x600xf32>
    %174 = arith.addf %169, %173 : vector<16x600xf32>
    %c1_153 = arith.constant 1 : index
    %c0_154 = arith.constant 0 : index
    %c0_155 = arith.constant 0 : index
    %175 = vector.load %arg4[%c1_153, %c0_154, %c0_155] : memref<25x16x8xf32, #tpu.memory_space<vmem>>, vector<1x16x8xf32>
    %176 = vector.shape_cast %175 : vector<1x16x8xf32> to vector<16x8xf32>
    %c0_156 = arith.constant 0 : index
    %c2_157 = arith.constant 2 : index
    %177 = vector.load %arg14[%c0_156, %c2_157] : memref<8x864xf32, #tpu.memory_space<vmem>>, vector<8x600xf32>
    %cst_158 = arith.constant dense<0.000000e+00> : vector<16x600xf32>
    %178 = tpu.matmul %176, %177, %cst_158 {dimension_numbers = #tpu.dot_dimension_numbers<[1], [0], [0], [1], [0, 0, 1, 1], [], []>} : vector<16x8xf32>, vector<8x600xf32>, vector<16x600xf32> -> vector<16x600xf32>
    %179 = arith.addf %174, %178 : vector<16x600xf32>
    %c2_159 = arith.constant 2 : index
    %c0_160 = arith.constant 0 : index
    %c0_161 = arith.constant 0 : index
    %180 = vector.load %arg4[%c2_159, %c0_160, %c0_161] : memref<25x16x8xf32, #tpu.memory_space<vmem>>, vector<1x16x8xf32>
    %181 = vector.shape_cast %180 : vector<1x16x8xf32> to vector<16x8xf32>
    %c0_162 = arith.constant 0 : index
    %c4_163 = arith.constant 4 : index
    %182 = vector.load %arg14[%c0_162, %c4_163] : memref<8x864xf32, #tpu.memory_space<vmem>>, vector<8x600xf32>
    %cst_164 = arith.constant dense<0.000000e+00> : vector<16x600xf32>
    %183 = tpu.matmul %181, %182, %cst_164 {dimension_numbers = #tpu.dot_dimension_numbers<[1], [0], [0], [1], [0, 0, 1, 1], [], []>} : vector<16x8xf32>, vector<8x600xf32>, vector<16x600xf32> -> vector<16x600xf32>
    %184 = arith.addf %179, %183 : vector<16x600xf32>
    %c3_165 = arith.constant 3 : index
    %c0_166 = arith.constant 0 : index
    %c0_167 = arith.constant 0 : index
    %185 = vector.load %arg4[%c3_165, %c0_166, %c0_167] : memref<25x16x8xf32, #tpu.memory_space<vmem>>, vector<1x16x8xf32>
    %186 = vector.shape_cast %185 : vector<1x16x8xf32> to vector<16x8xf32>
    %c0_168 = arith.constant 0 : index
    %c6_169 = arith.constant 6 : index
    %187 = vector.load %arg14[%c0_168, %c6_169] : memref<8x864xf32, #tpu.memory_space<vmem>>, vector<8x600xf32>
    %cst_170 = arith.constant dense<0.000000e+00> : vector<16x600xf32>
    %188 = tpu.matmul %186, %187, %cst_170 {dimension_numbers = #tpu.dot_dimension_numbers<[1], [0], [0], [1], [0, 0, 1, 1], [], []>} : vector<16x8xf32>, vector<8x600xf32>, vector<16x600xf32> -> vector<16x600xf32>
    %189 = arith.addf %184, %188 : vector<16x600xf32>
    %c4_171 = arith.constant 4 : index
    %c0_172 = arith.constant 0 : index
    %c0_173 = arith.constant 0 : index
    %190 = vector.load %arg4[%c4_171, %c0_172, %c0_173] : memref<25x16x8xf32, #tpu.memory_space<vmem>>, vector<1x16x8xf32>
    %191 = vector.shape_cast %190 : vector<1x16x8xf32> to vector<16x8xf32>
    %c0_174 = arith.constant 0 : index
    %c8_175 = arith.constant 8 : index
    %192 = vector.load %arg14[%c0_174, %c8_175] : memref<8x864xf32, #tpu.memory_space<vmem>>, vector<8x600xf32>
    %cst_176 = arith.constant dense<0.000000e+00> : vector<16x600xf32>
    %193 = tpu.matmul %191, %192, %cst_176 {dimension_numbers = #tpu.dot_dimension_numbers<[1], [0], [0], [1], [0, 0, 1, 1], [], []>} : vector<16x8xf32>, vector<8x600xf32>, vector<16x600xf32> -> vector<16x600xf32>
    %194 = arith.addf %189, %193 : vector<16x600xf32>
    %c5_177 = arith.constant 5 : index
    %c0_178 = arith.constant 0 : index
    %c0_179 = arith.constant 0 : index
    %195 = vector.load %arg4[%c5_177, %c0_178, %c0_179] : memref<25x16x8xf32, #tpu.memory_space<vmem>>, vector<1x16x8xf32>
    %196 = vector.shape_cast %195 : vector<1x16x8xf32> to vector<16x8xf32>
    %c0_180 = arith.constant 0 : index
    %c64_181 = arith.constant 64 : index
    %197 = vector.load %arg14[%c0_180, %c64_181] : memref<8x864xf32, #tpu.memory_space<vmem>>, vector<8x600xf32>
    %cst_182 = arith.constant dense<0.000000e+00> : vector<16x600xf32>
    %198 = tpu.matmul %196, %197, %cst_182 {dimension_numbers = #tpu.dot_dimension_numbers<[1], [0], [0], [1], [0, 0, 1, 1], [], []>} : vector<16x8xf32>, vector<8x600xf32>, vector<16x600xf32> -> vector<16x600xf32>
    %199 = arith.addf %194, %198 : vector<16x600xf32>
    %c6_183 = arith.constant 6 : index
    %c0_184 = arith.constant 0 : index
    %c0_185 = arith.constant 0 : index
    %200 = vector.load %arg4[%c6_183, %c0_184, %c0_185] : memref<25x16x8xf32, #tpu.memory_space<vmem>>, vector<1x16x8xf32>
    %201 = vector.shape_cast %200 : vector<1x16x8xf32> to vector<16x8xf32>
    %c0_186 = arith.constant 0 : index
    %c66_187 = arith.constant 66 : index
    %202 = vector.load %arg14[%c0_186, %c66_187] : memref<8x864xf32, #tpu.memory_space<vmem>>, vector<8x600xf32>
    %cst_188 = arith.constant dense<0.000000e+00> : vector<16x600xf32>
    %203 = tpu.matmul %201, %202, %cst_188 {dimension_numbers = #tpu.dot_dimension_numbers<[1], [0], [0], [1], [0, 0, 1, 1], [], []>} : vector<16x8xf32>, vector<8x600xf32>, vector<16x600xf32> -> vector<16x600xf32>
    %204 = arith.addf %199, %203 : vector<16x600xf32>
    %c7_189 = arith.constant 7 : index
    %c0_190 = arith.constant 0 : index
    %c0_191 = arith.constant 0 : index
    %205 = vector.load %arg4[%c7_189, %c0_190, %c0_191] : memref<25x16x8xf32, #tpu.memory_space<vmem>>, vector<1x16x8xf32>
    %206 = vector.shape_cast %205 : vector<1x16x8xf32> to vector<16x8xf32>
    %c0_192 = arith.constant 0 : index
    %c68_193 = arith.constant 68 : index
    %207 = vector.load %arg14[%c0_192, %c68_193] : memref<8x864xf32, #tpu.memory_space<vmem>>, vector<8x600xf32>
    %cst_194 = arith.constant dense<0.000000e+00> : vector<16x600xf32>
    %208 = tpu.matmul %206, %207, %cst_194 {dimension_numbers = #tpu.dot_dimension_numbers<[1], [0], [0], [1], [0, 0, 1, 1], [], []>} : vector<16x8xf32>, vector<8x600xf32>, vector<16x600xf32> -> vector<16x600xf32>
    %209 = arith.addf %204, %208 : vector<16x600xf32>
    %c8_195 = arith.constant 8 : index
    %c0_196 = arith.constant 0 : index
    %c0_197 = arith.constant 0 : index
    %210 = vector.load %arg4[%c8_195, %c0_196, %c0_197] : memref<25x16x8xf32, #tpu.memory_space<vmem>>, vector<1x16x8xf32>
    %211 = vector.shape_cast %210 : vector<1x16x8xf32> to vector<16x8xf32>
    %c0_198 = arith.constant 0 : index
    %c70 = arith.constant 70 : index
    %212 = vector.load %arg14[%c0_198, %c70] : memref<8x864xf32, #tpu.memory_space<vmem>>, vector<8x600xf32>
    %cst_199 = arith.constant dense<0.000000e+00> : vector<16x600xf32>
    %213 = tpu.matmul %211, %212, %cst_199 {dimension_numbers = #tpu.dot_dimension_numbers<[1], [0], [0], [1], [0, 0, 1, 1], [], []>} : vector<16x8xf32>, vector<8x600xf32>, vector<16x600xf32> -> vector<16x600xf32>
    %214 = arith.addf %209, %213 : vector<16x600xf32>
    %c9_200 = arith.constant 9 : index
    %c0_201 = arith.constant 0 : index
    %c0_202 = arith.constant 0 : index
    %215 = vector.load %arg4[%c9_200, %c0_201, %c0_202] : memref<25x16x8xf32, #tpu.memory_space<vmem>>, vector<1x16x8xf32>
    %216 = vector.shape_cast %215 : vector<1x16x8xf32> to vector<16x8xf32>
    %c0_203 = arith.constant 0 : index
    %c72 = arith.constant 72 : index
    %217 = vector.load %arg14[%c0_203, %c72] : memref<8x864xf32, #tpu.memory_space<vmem>>, vector<8x600xf32>
    %cst_204 = arith.constant dense<0.000000e+00> : vector<16x600xf32>
    %218 = tpu.matmul %216, %217, %cst_204 {dimension_numbers = #tpu.dot_dimension_numbers<[1], [0], [0], [1], [0, 0, 1, 1], [], []>} : vector<16x8xf32>, vector<8x600xf32>, vector<16x600xf32> -> vector<16x600xf32>
    %219 = arith.addf %214, %218 : vector<16x600xf32>
    %c10_205 = arith.constant 10 : index
    %c0_206 = arith.constant 0 : index
    %c0_207 = arith.constant 0 : index
    %220 = vector.load %arg4[%c10_205, %c0_206, %c0_207] : memref<25x16x8xf32, #tpu.memory_space<vmem>>, vector<1x16x8xf32>
    %221 = vector.shape_cast %220 : vector<1x16x8xf32> to vector<16x8xf32>
    %c0_208 = arith.constant 0 : index
    %c128_209 = arith.constant 128 : index
    %222 = vector.load %arg14[%c0_208, %c128_209] : memref<8x864xf32, #tpu.memory_space<vmem>>, vector<8x600xf32>
    %cst_210 = arith.constant dense<0.000000e+00> : vector<16x600xf32>
    %223 = tpu.matmul %221, %222, %cst_210 {dimension_numbers = #tpu.dot_dimension_numbers<[1], [0], [0], [1], [0, 0, 1, 1], [], []>} : vector<16x8xf32>, vector<8x600xf32>, vector<16x600xf32> -> vector<16x600xf32>
    %224 = arith.addf %219, %223 : vector<16x600xf32>
    %c11_211 = arith.constant 11 : index
    %c0_212 = arith.constant 0 : index
    %c0_213 = arith.constant 0 : index
    %225 = vector.load %arg4[%c11_211, %c0_212, %c0_213] : memref<25x16x8xf32, #tpu.memory_space<vmem>>, vector<1x16x8xf32>
    %226 = vector.shape_cast %225 : vector<1x16x8xf32> to vector<16x8xf32>
    %c0_214 = arith.constant 0 : index
    %c130_215 = arith.constant 130 : index
    %227 = vector.load %arg14[%c0_214, %c130_215] : memref<8x864xf32, #tpu.memory_space<vmem>>, vector<8x600xf32>
    %cst_216 = arith.constant dense<0.000000e+00> : vector<16x600xf32>
    %228 = tpu.matmul %226, %227, %cst_216 {dimension_numbers = #tpu.dot_dimension_numbers<[1], [0], [0], [1], [0, 0, 1, 1], [], []>} : vector<16x8xf32>, vector<8x600xf32>, vector<16x600xf32> -> vector<16x600xf32>
    %229 = arith.addf %224, %228 : vector<16x600xf32>
    %c12_217 = arith.constant 12 : index
    %c0_218 = arith.constant 0 : index
    %c0_219 = arith.constant 0 : index
    %230 = vector.load %arg4[%c12_217, %c0_218, %c0_219] : memref<25x16x8xf32, #tpu.memory_space<vmem>>, vector<1x16x8xf32>
    %231 = vector.shape_cast %230 : vector<1x16x8xf32> to vector<16x8xf32>
    %c0_220 = arith.constant 0 : index
    %c132_221 = arith.constant 132 : index
    %232 = vector.load %arg14[%c0_220, %c132_221] : memref<8x864xf32, #tpu.memory_space<vmem>>, vector<8x600xf32>
    %cst_222 = arith.constant dense<0.000000e+00> : vector<16x600xf32>
    %233 = tpu.matmul %231, %232, %cst_222 {dimension_numbers = #tpu.dot_dimension_numbers<[1], [0], [0], [1], [0, 0, 1, 1], [], []>} : vector<16x8xf32>, vector<8x600xf32>, vector<16x600xf32> -> vector<16x600xf32>
    %234 = arith.addf %229, %233 : vector<16x600xf32>
    %c13_223 = arith.constant 13 : index
    %c0_224 = arith.constant 0 : index
    %c0_225 = arith.constant 0 : index
    %235 = vector.load %arg4[%c13_223, %c0_224, %c0_225] : memref<25x16x8xf32, #tpu.memory_space<vmem>>, vector<1x16x8xf32>
    %236 = vector.shape_cast %235 : vector<1x16x8xf32> to vector<16x8xf32>
    %c0_226 = arith.constant 0 : index
    %c134 = arith.constant 134 : index
    %237 = vector.load %arg14[%c0_226, %c134] : memref<8x864xf32, #tpu.memory_space<vmem>>, vector<8x600xf32>
    %cst_227 = arith.constant dense<0.000000e+00> : vector<16x600xf32>
    %238 = tpu.matmul %236, %237, %cst_227 {dimension_numbers = #tpu.dot_dimension_numbers<[1], [0], [0], [1], [0, 0, 1, 1], [], []>} : vector<16x8xf32>, vector<8x600xf32>, vector<16x600xf32> -> vector<16x600xf32>
    %239 = arith.addf %234, %238 : vector<16x600xf32>
    %c14_228 = arith.constant 14 : index
    %c0_229 = arith.constant 0 : index
    %c0_230 = arith.constant 0 : index
    %240 = vector.load %arg4[%c14_228, %c0_229, %c0_230] : memref<25x16x8xf32, #tpu.memory_space<vmem>>, vector<1x16x8xf32>
    %241 = vector.shape_cast %240 : vector<1x16x8xf32> to vector<16x8xf32>
    %c0_231 = arith.constant 0 : index
    %c136 = arith.constant 136 : index
    %242 = vector.load %arg14[%c0_231, %c136] : memref<8x864xf32, #tpu.memory_space<vmem>>, vector<8x600xf32>
    %cst_232 = arith.constant dense<0.000000e+00> : vector<16x600xf32>
    %243 = tpu.matmul %241, %242, %cst_232 {dimension_numbers = #tpu.dot_dimension_numbers<[1], [0], [0], [1], [0, 0, 1, 1], [], []>} : vector<16x8xf32>, vector<8x600xf32>, vector<16x600xf32> -> vector<16x600xf32>
    %244 = arith.addf %239, %243 : vector<16x600xf32>
    %c15_233 = arith.constant 15 : index
    %c0_234 = arith.constant 0 : index
    %c0_235 = arith.constant 0 : index
    %245 = vector.load %arg4[%c15_233, %c0_234, %c0_235] : memref<25x16x8xf32, #tpu.memory_space<vmem>>, vector<1x16x8xf32>
    %246 = vector.shape_cast %245 : vector<1x16x8xf32> to vector<16x8xf32>
    %c0_236 = arith.constant 0 : index
    %c192 = arith.constant 192 : index
    %247 = vector.load %arg14[%c0_236, %c192] : memref<8x864xf32, #tpu.memory_space<vmem>>, vector<8x600xf32>
    %cst_237 = arith.constant dense<0.000000e+00> : vector<16x600xf32>
    %248 = tpu.matmul %246, %247, %cst_237 {dimension_numbers = #tpu.dot_dimension_numbers<[1], [0], [0], [1], [0, 0, 1, 1], [], []>} : vector<16x8xf32>, vector<8x600xf32>, vector<16x600xf32> -> vector<16x600xf32>
    %249 = arith.addf %244, %248 : vector<16x600xf32>
    %c16_238 = arith.constant 16 : index
    %c0_239 = arith.constant 0 : index
    %c0_240 = arith.constant 0 : index
    %250 = vector.load %arg4[%c16_238, %c0_239, %c0_240] : memref<25x16x8xf32, #tpu.memory_space<vmem>>, vector<1x16x8xf32>
    %251 = vector.shape_cast %250 : vector<1x16x8xf32> to vector<16x8xf32>
    %c0_241 = arith.constant 0 : index
    %c194 = arith.constant 194 : index
    %252 = vector.load %arg14[%c0_241, %c194] : memref<8x864xf32, #tpu.memory_space<vmem>>, vector<8x600xf32>
    %cst_242 = arith.constant dense<0.000000e+00> : vector<16x600xf32>
    %253 = tpu.matmul %251, %252, %cst_242 {dimension_numbers = #tpu.dot_dimension_numbers<[1], [0], [0], [1], [0, 0, 1, 1], [], []>} : vector<16x8xf32>, vector<8x600xf32>, vector<16x600xf32> -> vector<16x600xf32>
    %254 = arith.addf %249, %253 : vector<16x600xf32>
    %c17_243 = arith.constant 17 : index
    %c0_244 = arith.constant 0 : index
    %c0_245 = arith.constant 0 : index
    %255 = vector.load %arg4[%c17_243, %c0_244, %c0_245] : memref<25x16x8xf32, #tpu.memory_space<vmem>>, vector<1x16x8xf32>
    %256 = vector.shape_cast %255 : vector<1x16x8xf32> to vector<16x8xf32>
    %c0_246 = arith.constant 0 : index
    %c196 = arith.constant 196 : index
    %257 = vector.load %arg14[%c0_246, %c196] : memref<8x864xf32, #tpu.memory_space<vmem>>, vector<8x600xf32>
    %cst_247 = arith.constant dense<0.000000e+00> : vector<16x600xf32>
    %258 = tpu.matmul %256, %257, %cst_247 {dimension_numbers = #tpu.dot_dimension_numbers<[1], [0], [0], [1], [0, 0, 1, 1], [], []>} : vector<16x8xf32>, vector<8x600xf32>, vector<16x600xf32> -> vector<16x600xf32>
    %259 = arith.addf %254, %258 : vector<16x600xf32>
    %c18_248 = arith.constant 18 : index
    %c0_249 = arith.constant 0 : index
    %c0_250 = arith.constant 0 : index
    %260 = vector.load %arg4[%c18_248, %c0_249, %c0_250] : memref<25x16x8xf32, #tpu.memory_space<vmem>>, vector<1x16x8xf32>
    %261 = vector.shape_cast %260 : vector<1x16x8xf32> to vector<16x8xf32>
    %c0_251 = arith.constant 0 : index
    %c198 = arith.constant 198 : index
    %262 = vector.load %arg14[%c0_251, %c198] : memref<8x864xf32, #tpu.memory_space<vmem>>, vector<8x600xf32>
    %cst_252 = arith.constant dense<0.000000e+00> : vector<16x600xf32>
    %263 = tpu.matmul %261, %262, %cst_252 {dimension_numbers = #tpu.dot_dimension_numbers<[1], [0], [0], [1], [0, 0, 1, 1], [], []>} : vector<16x8xf32>, vector<8x600xf32>, vector<16x600xf32> -> vector<16x600xf32>
    %264 = arith.addf %259, %263 : vector<16x600xf32>
    %c19_253 = arith.constant 19 : index
    %c0_254 = arith.constant 0 : index
    %c0_255 = arith.constant 0 : index
    %265 = vector.load %arg4[%c19_253, %c0_254, %c0_255] : memref<25x16x8xf32, #tpu.memory_space<vmem>>, vector<1x16x8xf32>
    %266 = vector.shape_cast %265 : vector<1x16x8xf32> to vector<16x8xf32>
    %c0_256 = arith.constant 0 : index
    %c200 = arith.constant 200 : index
    %267 = vector.load %arg14[%c0_256, %c200] : memref<8x864xf32, #tpu.memory_space<vmem>>, vector<8x600xf32>
    %cst_257 = arith.constant dense<0.000000e+00> : vector<16x600xf32>
    %268 = tpu.matmul %266, %267, %cst_257 {dimension_numbers = #tpu.dot_dimension_numbers<[1], [0], [0], [1], [0, 0, 1, 1], [], []>} : vector<16x8xf32>, vector<8x600xf32>, vector<16x600xf32> -> vector<16x600xf32>
    %269 = arith.addf %264, %268 : vector<16x600xf32>
    %c20_258 = arith.constant 20 : index
    %c0_259 = arith.constant 0 : index
    %c0_260 = arith.constant 0 : index
    %270 = vector.load %arg4[%c20_258, %c0_259, %c0_260] : memref<25x16x8xf32, #tpu.memory_space<vmem>>, vector<1x16x8xf32>
    %271 = vector.shape_cast %270 : vector<1x16x8xf32> to vector<16x8xf32>
    %c0_261 = arith.constant 0 : index
    %c256 = arith.constant 256 : index
    %272 = vector.load %arg14[%c0_261, %c256] : memref<8x864xf32, #tpu.memory_space<vmem>>, vector<8x600xf32>
    %cst_262 = arith.constant dense<0.000000e+00> : vector<16x600xf32>
    %273 = tpu.matmul %271, %272, %cst_262 {dimension_numbers = #tpu.dot_dimension_numbers<[1], [0], [0], [1], [0, 0, 1, 1], [], []>} : vector<16x8xf32>, vector<8x600xf32>, vector<16x600xf32> -> vector<16x600xf32>
    %274 = arith.addf %269, %273 : vector<16x600xf32>
    %c21_263 = arith.constant 21 : index
    %c0_264 = arith.constant 0 : index
    %c0_265 = arith.constant 0 : index
    %275 = vector.load %arg4[%c21_263, %c0_264, %c0_265] : memref<25x16x8xf32, #tpu.memory_space<vmem>>, vector<1x16x8xf32>
    %276 = vector.shape_cast %275 : vector<1x16x8xf32> to vector<16x8xf32>
    %c0_266 = arith.constant 0 : index
    %c258 = arith.constant 258 : index
    %277 = vector.load %arg14[%c0_266, %c258] : memref<8x864xf32, #tpu.memory_space<vmem>>, vector<8x600xf32>
    %cst_267 = arith.constant dense<0.000000e+00> : vector<16x600xf32>
    %278 = tpu.matmul %276, %277, %cst_267 {dimension_numbers = #tpu.dot_dimension_numbers<[1], [0], [0], [1], [0, 0, 1, 1], [], []>} : vector<16x8xf32>, vector<8x600xf32>, vector<16x600xf32> -> vector<16x600xf32>
    %279 = arith.addf %274, %278 : vector<16x600xf32>
    %c22_268 = arith.constant 22 : index
    %c0_269 = arith.constant 0 : index
    %c0_270 = arith.constant 0 : index
    %280 = vector.load %arg4[%c22_268, %c0_269, %c0_270] : memref<25x16x8xf32, #tpu.memory_space<vmem>>, vector<1x16x8xf32>
    %281 = vector.shape_cast %280 : vector<1x16x8xf32> to vector<16x8xf32>
    %c0_271 = arith.constant 0 : index
    %c260 = arith.constant 260 : index
    %282 = vector.load %arg14[%c0_271, %c260] : memref<8x864xf32, #tpu.memory_space<vmem>>, vector<8x600xf32>
    %cst_272 = arith.constant dense<0.000000e+00> : vector<16x600xf32>
    %283 = tpu.matmul %281, %282, %cst_272 {dimension_numbers = #tpu.dot_dimension_numbers<[1], [0], [0], [1], [0, 0, 1, 1], [], []>} : vector<16x8xf32>, vector<8x600xf32>, vector<16x600xf32> -> vector<16x600xf32>
    %284 = arith.addf %279, %283 : vector<16x600xf32>
    %c23_273 = arith.constant 23 : index
    %c0_274 = arith.constant 0 : index
    %c0_275 = arith.constant 0 : index
    %285 = vector.load %arg4[%c23_273, %c0_274, %c0_275] : memref<25x16x8xf32, #tpu.memory_space<vmem>>, vector<1x16x8xf32>
    %286 = vector.shape_cast %285 : vector<1x16x8xf32> to vector<16x8xf32>
    %c0_276 = arith.constant 0 : index
    %c262 = arith.constant 262 : index
    %287 = vector.load %arg14[%c0_276, %c262] : memref<8x864xf32, #tpu.memory_space<vmem>>, vector<8x600xf32>
    %cst_277 = arith.constant dense<0.000000e+00> : vector<16x600xf32>
    %288 = tpu.matmul %286, %287, %cst_277 {dimension_numbers = #tpu.dot_dimension_numbers<[1], [0], [0], [1], [0, 0, 1, 1], [], []>} : vector<16x8xf32>, vector<8x600xf32>, vector<16x600xf32> -> vector<16x600xf32>
    %289 = arith.addf %284, %288 : vector<16x600xf32>
    %c24_278 = arith.constant 24 : index
    %c0_279 = arith.constant 0 : index
    %c0_280 = arith.constant 0 : index
    %290 = vector.load %arg4[%c24_278, %c0_279, %c0_280] : memref<25x16x8xf32, #tpu.memory_space<vmem>>, vector<1x16x8xf32>
    %291 = vector.shape_cast %290 : vector<1x16x8xf32> to vector<16x8xf32>
    %c0_281 = arith.constant 0 : index
    %c264 = arith.constant 264 : index
    %292 = vector.load %arg14[%c0_281, %c264] : memref<8x864xf32, #tpu.memory_space<vmem>>, vector<8x600xf32>
    %cst_282 = arith.constant dense<0.000000e+00> : vector<16x600xf32>
    %293 = tpu.matmul %291, %292, %cst_282 {dimension_numbers = #tpu.dot_dimension_numbers<[1], [0], [0], [1], [0, 0, 1, 1], [], []>} : vector<16x8xf32>, vector<8x600xf32>, vector<16x600xf32> -> vector<16x600xf32>
    %294 = arith.addf %289, %293 : vector<16x600xf32>
    %c0_283 = arith.constant 0 : index
    %c0_284 = arith.constant 0 : index
    %295 = vector.load %arg5[%c0_283, %c0_284] : memref<16x1xf32, #tpu.memory_space<vmem>>, vector<16x1xf32>
    %296 = vector.broadcast %295 : vector<16x1xf32> to vector<16x600xf32>
    %297 = arith.addf %294, %296 : vector<16x600xf32>
    %cst_285 = arith.constant 0.000000e+00 : f32
    %298 = vector.broadcast %cst_285 : f32 to vector<16x600xf32>
    %299 = arith.subf %298, %297 : vector<16x600xf32>
    %300 = math.exp %299 : vector<16x600xf32>
    %cst_286 = arith.constant 1.000000e+00 : f32
    %301 = vector.broadcast %cst_286 : f32 to vector<16x600xf32>
    %302 = arith.addf %301, %300 : vector<16x600xf32>
    %303 = tpu.reciprocal %302 : vector<16x600xf32> -> vector<16x600xf32>
    %c0_287 = arith.constant 0 : index
    %c0_288 = arith.constant 0 : index
    %304 = vector.load %arg15[%c0_287, %c0_288] : memref<16x600xf32, #tpu.memory_space<vmem>>, vector<16x600xf32>
    tpu.vector_store %arg15[%c0_287, %c0_288], %303 {strides = array<i32>} : memref<16x600xf32, #tpu.memory_space<vmem>>, vector<16x600xf32>,
    %c0_289 = arith.constant 0 : index
    %c0_290 = arith.constant 0 : index
    %305 = vector.load %arg15[%c0_289, %c0_290] : memref<16x600xf32, #tpu.memory_space<vmem>>, vector<16x532xf32>
    %c0_291 = arith.constant 0 : index
    %c2_292 = arith.constant 2 : index
    %306 = vector.load %arg15[%c0_291, %c2_292] : memref<16x600xf32, #tpu.memory_space<vmem>>, vector<16x532xf32>
    %307 = arith.maximumf %305, %306 : vector<16x532xf32>
    %c0_293 = arith.constant 0 : index
    %c64_294 = arith.constant 64 : index
    %308 = vector.load %arg15[%c0_293, %c64_294] : memref<16x600xf32, #tpu.memory_space<vmem>>, vector<16x532xf32>
    %c0_295 = arith.constant 0 : index
    %c66_296 = arith.constant 66 : index
    %309 = vector.load %arg15[%c0_295, %c66_296] : memref<16x600xf32, #tpu.memory_space<vmem>>, vector<16x532xf32>
    %310 = arith.maximumf %308, %309 : vector<16x532xf32>
    %311 = arith.maximumf %307, %310 : vector<16x532xf32>
    %c0_297 = arith.constant 0 : index
    %c0_298 = arith.constant 0 : index
    %312 = vector.load %arg16[%c0_297, %c0_298] : memref<16x532xf32, #tpu.memory_space<vmem>>, vector<16x532xf32>
    tpu.vector_store %arg16[%c0_297, %c0_298], %311 {strides = array<i32>} : memref<16x532xf32, #tpu.memory_space<vmem>>, vector<16x532xf32>,
    %c0_299 = arith.constant 0 : index
    %c0_300 = arith.constant 0 : index
    %313 = vector.load %arg16[%c0_299, %c0_300] : memref<16x532xf32, #tpu.memory_space<vmem>>, vector<16x1xf32>
    %c0_301 = arith.constant 0 : index
    %c0_302 = arith.constant 0 : index
    %314 = vector.load %arg17[%c0_301, %c0_302] : memref<400x1xf32, #tpu.memory_space<vmem>>, vector<16x1xf32>
    tpu.vector_store %arg17[%c0_301, %c0_302], %313 {strides = array<i32>} : memref<400x1xf32, #tpu.memory_space<vmem>>, vector<16x1xf32>,
    %c0_303 = arith.constant 0 : index
    %c4_304 = arith.constant 4 : index
    %315 = vector.load %arg16[%c0_303, %c4_304] : memref<16x532xf32, #tpu.memory_space<vmem>>, vector<16x1xf32>
    %c16_305 = arith.constant 16 : index
    %c0_306 = arith.constant 0 : index
    %316 = vector.load %arg17[%c16_305, %c0_306] : memref<400x1xf32, #tpu.memory_space<vmem>>, vector<16x1xf32>
    tpu.vector_store %arg17[%c16_305, %c0_306], %315 {strides = array<i32>} : memref<400x1xf32, #tpu.memory_space<vmem>>, vector<16x1xf32>,
    %c0_307 = arith.constant 0 : index
    %c8_308 = arith.constant 8 : index
    %317 = vector.load %arg16[%c0_307, %c8_308] : memref<16x532xf32, #tpu.memory_space<vmem>>, vector<16x1xf32>
    %c32_309 = arith.constant 32 : index
    %c0_310 = arith.constant 0 : index
    %318 = vector.load %arg17[%c32_309, %c0_310] : memref<400x1xf32, #tpu.memory_space<vmem>>, vector<16x1xf32>
    tpu.vector_store %arg17[%c32_309, %c0_310], %317 {strides = array<i32>} : memref<400x1xf32, #tpu.memory_space<vmem>>, vector<16x1xf32>,
    %c0_311 = arith.constant 0 : index
    %c12_312 = arith.constant 12 : index
    %319 = vector.load %arg16[%c0_311, %c12_312] : memref<16x532xf32, #tpu.memory_space<vmem>>, vector<16x1xf32>
    %c48 = arith.constant 48 : index
    %c0_313 = arith.constant 0 : index
    %320 = vector.load %arg17[%c48, %c0_313] : memref<400x1xf32, #tpu.memory_space<vmem>>, vector<16x1xf32>
    tpu.vector_store %arg17[%c48, %c0_313], %319 {strides = array<i32>} : memref<400x1xf32, #tpu.memory_space<vmem>>, vector<16x1xf32>,
    %c0_314 = arith.constant 0 : index
    %c16_315 = arith.constant 16 : index
    %321 = vector.load %arg16[%c0_314, %c16_315] : memref<16x532xf32, #tpu.memory_space<vmem>>, vector<16x1xf32>
    %c64_316 = arith.constant 64 : index
    %c0_317 = arith.constant 0 : index
    %322 = vector.load %arg17[%c64_316, %c0_317] : memref<400x1xf32, #tpu.memory_space<vmem>>, vector<16x1xf32>
    tpu.vector_store %arg17[%c64_316, %c0_317], %321 {strides = array<i32>} : memref<400x1xf32, #tpu.memory_space<vmem>>, vector<16x1xf32>,
    %c0_318 = arith.constant 0 : index
    %c128_319 = arith.constant 128 : index
    %323 = vector.load %arg16[%c0_318, %c128_319] : memref<16x532xf32, #tpu.memory_space<vmem>>, vector<16x1xf32>
    %c80 = arith.constant 80 : index
    %c0_320 = arith.constant 0 : index
    %324 = vector.load %arg17[%c80, %c0_320] : memref<400x1xf32, #tpu.memory_space<vmem>>, vector<16x1xf32>
    tpu.vector_store %arg17[%c80, %c0_320], %323 {strides = array<i32>} : memref<400x1xf32, #tpu.memory_space<vmem>>, vector<16x1xf32>,
    %c0_321 = arith.constant 0 : index
    %c132_322 = arith.constant 132 : index
    %325 = vector.load %arg16[%c0_321, %c132_322] : memref<16x532xf32, #tpu.memory_space<vmem>>, vector<16x1xf32>
    %c96_323 = arith.constant 96 : index
    %c0_324 = arith.constant 0 : index
    %326 = vector.load %arg17[%c96_323, %c0_324] : memref<400x1xf32, #tpu.memory_space<vmem>>, vector<16x1xf32>
    tpu.vector_store %arg17[%c96_323, %c0_324], %325 {strides = array<i32>} : memref<400x1xf32, #tpu.memory_space<vmem>>, vector<16x1xf32>,
    %c0_325 = arith.constant 0 : index
    %c136_326 = arith.constant 136 : index
    %327 = vector.load %arg16[%c0_325, %c136_326] : memref<16x532xf32, #tpu.memory_space<vmem>>, vector<16x1xf32>
    %c112 = arith.constant 112 : index
    %c0_327 = arith.constant 0 : index
    %328 = vector.load %arg17[%c112, %c0_327] : memref<400x1xf32, #tpu.memory_space<vmem>>, vector<16x1xf32>
    tpu.vector_store %arg17[%c112, %c0_327], %327 {strides = array<i32>} : memref<400x1xf32, #tpu.memory_space<vmem>>, vector<16x1xf32>,
    %c0_328 = arith.constant 0 : index
    %c140 = arith.constant 140 : index
    %329 = vector.load %arg16[%c0_328, %c140] : memref<16x532xf32, #tpu.memory_space<vmem>>, vector<16x1xf32>
    %c128_329 = arith.constant 128 : index
    %c0_330 = arith.constant 0 : index
    %330 = vector.load %arg17[%c128_329, %c0_330] : memref<400x1xf32, #tpu.memory_space<vmem>>, vector<16x1xf32>
    tpu.vector_store %arg17[%c128_329, %c0_330], %329 {strides = array<i32>} : memref<400x1xf32, #tpu.memory_space<vmem>>, vector<16x1xf32>,
    %c0_331 = arith.constant 0 : index
    %c144 = arith.constant 144 : index
    %331 = vector.load %arg16[%c0_331, %c144] : memref<16x532xf32, #tpu.memory_space<vmem>>, vector<16x1xf32>
    %c144_332 = arith.constant 144 : index
    %c0_333 = arith.constant 0 : index
    %332 = vector.load %arg17[%c144_332, %c0_333] : memref<400x1xf32, #tpu.memory_space<vmem>>, vector<16x1xf32>
    tpu.vector_store %arg17[%c144_332, %c0_333], %331 {strides = array<i32>} : memref<400x1xf32, #tpu.memory_space<vmem>>, vector<16x1xf32>,
    %c0_334 = arith.constant 0 : index
    %c256_335 = arith.constant 256 : index
    %333 = vector.load %arg16[%c0_334, %c256_335] : memref<16x532xf32, #tpu.memory_space<vmem>>, vector<16x1xf32>
    %c160 = arith.constant 160 : index
    %c0_336 = arith.constant 0 : index
    %334 = vector.load %arg17[%c160, %c0_336] : memref<400x1xf32, #tpu.memory_space<vmem>>, vector<16x1xf32>
    tpu.vector_store %arg17[%c160, %c0_336], %333 {strides = array<i32>} : memref<400x1xf32, #tpu.memory_space<vmem>>, vector<16x1xf32>,
    %c0_337 = arith.constant 0 : index
    %c260_338 = arith.constant 260 : index
    %335 = vector.load %arg16[%c0_337, %c260_338] : memref<16x532xf32, #tpu.memory_space<vmem>>, vector<16x1xf32>
    %c176 = arith.constant 176 : index
    %c0_339 = arith.constant 0 : index
    %336 = vector.load %arg17[%c176, %c0_339] : memref<400x1xf32, #tpu.memory_space<vmem>>, vector<16x1xf32>
    tpu.vector_store %arg17[%c176, %c0_339], %335 {strides = array<i32>} : memref<400x1xf32, #tpu.memory_space<vmem>>, vector<16x1xf32>,
    %c0_340 = arith.constant 0 : index
    %c264_341 = arith.constant 264 : index
    %337 = vector.load %arg16[%c0_340, %c264_341] : memref<16x532xf32, #tpu.memory_space<vmem>>, vector<16x1xf32>
    %c192_342 = arith.constant 192 : index
    %c0_343 = arith.constant 0 : index
    %338 = vector.load %arg17[%c192_342, %c0_343] : memref<400x1xf32, #tpu.memory_space<vmem>>, vector<16x1xf32>
    tpu.vector_store %arg17[%c192_342, %c0_343], %337 {strides = array<i32>} : memref<400x1xf32, #tpu.memory_space<vmem>>, vector<16x1xf32>,
    %c0_344 = arith.constant 0 : index
    %c268 = arith.constant 268 : index
    %339 = vector.load %arg16[%c0_344, %c268] : memref<16x532xf32, #tpu.memory_space<vmem>>, vector<16x1xf32>
    %c208 = arith.constant 208 : index
    %c0_345 = arith.constant 0 : index
    %340 = vector.load %arg17[%c208, %c0_345] : memref<400x1xf32, #tpu.memory_space<vmem>>, vector<16x1xf32>
    tpu.vector_store %arg17[%c208, %c0_345], %339 {strides = array<i32>} : memref<400x1xf32, #tpu.memory_space<vmem>>, vector<16x1xf32>,
    %c0_346 = arith.constant 0 : index
    %c272 = arith.constant 272 : index
    %341 = vector.load %arg16[%c0_346, %c272] : memref<16x532xf32, #tpu.memory_space<vmem>>, vector<16x1xf32>
    %c224 = arith.constant 224 : index
    %c0_347 = arith.constant 0 : index
    %342 = vector.load %arg17[%c224, %c0_347] : memref<400x1xf32, #tpu.memory_space<vmem>>, vector<16x1xf32>
    tpu.vector_store %arg17[%c224, %c0_347], %341 {strides = array<i32>} : memref<400x1xf32, #tpu.memory_space<vmem>>, vector<16x1xf32>,
    %c0_348 = arith.constant 0 : index
    %c384 = arith.constant 384 : index
    %343 = vector.load %arg16[%c0_348, %c384] : memref<16x532xf32, #tpu.memory_space<vmem>>, vector<16x1xf32>
    %c240 = arith.constant 240 : index
    %c0_349 = arith.constant 0 : index
    %344 = vector.load %arg17[%c240, %c0_349] : memref<400x1xf32, #tpu.memory_space<vmem>>, vector<16x1xf32>
    tpu.vector_store %arg17[%c240, %c0_349], %343 {strides = array<i32>} : memref<400x1xf32, #tpu.memory_space<vmem>>, vector<16x1xf32>,
    %c0_350 = arith.constant 0 : index
    %c388 = arith.constant 388 : index
    %345 = vector.load %arg16[%c0_350, %c388] : memref<16x532xf32, #tpu.memory_space<vmem>>, vector<16x1xf32>
    %c256_351 = arith.constant 256 : index
    %c0_352 = arith.constant 0 : index
    %346 = vector.load %arg17[%c256_351, %c0_352] : memref<400x1xf32, #tpu.memory_space<vmem>>, vector<16x1xf32>
    tpu.vector_store %arg17[%c256_351, %c0_352], %345 {strides = array<i32>} : memref<400x1xf32, #tpu.memory_space<vmem>>, vector<16x1xf32>,
    %c0_353 = arith.constant 0 : index
    %c392 = arith.constant 392 : index
    %347 = vector.load %arg16[%c0_353, %c392] : memref<16x532xf32, #tpu.memory_space<vmem>>, vector<16x1xf32>
    %c272_354 = arith.constant 272 : index
    %c0_355 = arith.constant 0 : index
    %348 = vector.load %arg17[%c272_354, %c0_355] : memref<400x1xf32, #tpu.memory_space<vmem>>, vector<16x1xf32>
    tpu.vector_store %arg17[%c272_354, %c0_355], %347 {strides = array<i32>} : memref<400x1xf32, #tpu.memory_space<vmem>>, vector<16x1xf32>,
    %c0_356 = arith.constant 0 : index
    %c396 = arith.constant 396 : index
    %349 = vector.load %arg16[%c0_356, %c396] : memref<16x532xf32, #tpu.memory_space<vmem>>, vector<16x1xf32>
    %c288 = arith.constant 288 : index
    %c0_357 = arith.constant 0 : index
    %350 = vector.load %arg17[%c288, %c0_357] : memref<400x1xf32, #tpu.memory_space<vmem>>, vector<16x1xf32>
    tpu.vector_store %arg17[%c288, %c0_357], %349 {strides = array<i32>} : memref<400x1xf32, #tpu.memory_space<vmem>>, vector<16x1xf32>,
    %c0_358 = arith.constant 0 : index
    %c400 = arith.constant 400 : index
    %351 = vector.load %arg16[%c0_358, %c400] : memref<16x532xf32, #tpu.memory_space<vmem>>, vector<16x1xf32>
    %c304 = arith.constant 304 : index
    %c0_359 = arith.constant 0 : index
    %352 = vector.load %arg17[%c304, %c0_359] : memref<400x1xf32, #tpu.memory_space<vmem>>, vector<16x1xf32>
    tpu.vector_store %arg17[%c304, %c0_359], %351 {strides = array<i32>} : memref<400x1xf32, #tpu.memory_space<vmem>>, vector<16x1xf32>,
    %c0_360 = arith.constant 0 : index
    %c512 = arith.constant 512 : index
    %353 = vector.load %arg16[%c0_360, %c512] : memref<16x532xf32, #tpu.memory_space<vmem>>, vector<16x1xf32>
    %c320 = arith.constant 320 : index
    %c0_361 = arith.constant 0 : index
    %354 = vector.load %arg17[%c320, %c0_361] : memref<400x1xf32, #tpu.memory_space<vmem>>, vector<16x1xf32>
    tpu.vector_store %arg17[%c320, %c0_361], %353 {strides = array<i32>} : memref<400x1xf32, #tpu.memory_space<vmem>>, vector<16x1xf32>,
    %c0_362 = arith.constant 0 : index
    %c516 = arith.constant 516 : index
    %355 = vector.load %arg16[%c0_362, %c516] : memref<16x532xf32, #tpu.memory_space<vmem>>, vector<16x1xf32>
    %c336 = arith.constant 336 : index
    %c0_363 = arith.constant 0 : index
    %356 = vector.load %arg17[%c336, %c0_363] : memref<400x1xf32, #tpu.memory_space<vmem>>, vector<16x1xf32>
    tpu.vector_store %arg17[%c336, %c0_363], %355 {strides = array<i32>} : memref<400x1xf32, #tpu.memory_space<vmem>>, vector<16x1xf32>,
    %c0_364 = arith.constant 0 : index
    %c520 = arith.constant 520 : index
    %357 = vector.load %arg16[%c0_364, %c520] : memref<16x532xf32, #tpu.memory_space<vmem>>, vector<16x1xf32>
    %c352 = arith.constant 352 : index
    %c0_365 = arith.constant 0 : index
    %358 = vector.load %arg17[%c352, %c0_365] : memref<400x1xf32, #tpu.memory_space<vmem>>, vector<16x1xf32>
    tpu.vector_store %arg17[%c352, %c0_365], %357 {strides = array<i32>} : memref<400x1xf32, #tpu.memory_space<vmem>>, vector<16x1xf32>,
    %c0_366 = arith.constant 0 : index
    %c524 = arith.constant 524 : index
    %359 = vector.load %arg16[%c0_366, %c524] : memref<16x532xf32, #tpu.memory_space<vmem>>, vector<16x1xf32>
    %c368 = arith.constant 368 : index
    %c0_367 = arith.constant 0 : index
    %360 = vector.load %arg17[%c368, %c0_367] : memref<400x1xf32, #tpu.memory_space<vmem>>, vector<16x1xf32>
    tpu.vector_store %arg17[%c368, %c0_367], %359 {strides = array<i32>} : memref<400x1xf32, #tpu.memory_space<vmem>>, vector<16x1xf32>,
    %c0_368 = arith.constant 0 : index
    %c528 = arith.constant 528 : index
    %361 = vector.load %arg16[%c0_368, %c528] : memref<16x532xf32, #tpu.memory_space<vmem>>, vector<16x1xf32>
    %c384_369 = arith.constant 384 : index
    %c0_370 = arith.constant 0 : index
    %362 = vector.load %arg17[%c384_369, %c0_370] : memref<400x1xf32, #tpu.memory_space<vmem>>, vector<16x1xf32>
    tpu.vector_store %arg17[%c384_369, %c0_370], %361 {strides = array<i32>} : memref<400x1xf32, #tpu.memory_space<vmem>>, vector<16x1xf32>,
    %c0_371 = arith.constant 0 : index
    %c0_372 = arith.constant 0 : index
    %363 = vector.load %arg6[%c0_371, %c0_372] : memref<120x400xf32, #tpu.memory_space<vmem>>, vector<120x400xf32>
    %c0_373 = arith.constant 0 : index
    %c0_374 = arith.constant 0 : index
    %364 = vector.load %arg17[%c0_373, %c0_374] : memref<400x1xf32, #tpu.memory_space<vmem>>, vector<400x1xf32>
    %cst_375 = arith.constant dense<0.000000e+00> : vector<120x1xf32>
    %365 = tpu.matmul %363, %364, %cst_375 {dimension_numbers = #tpu.dot_dimension_numbers<[1], [0], [0], [1], [0, 0, 1, 1], [], []>} : vector<120x400xf32>, vector<400x1xf32>, vector<120x1xf32> -> vector<120x1xf32>
    %c0_376 = arith.constant 0 : index
    %c0_377 = arith.constant 0 : index
    %366 = vector.load %arg7[%c0_376, %c0_377] : memref<120x1xf32, #tpu.memory_space<vmem>>, vector<120x1xf32>
    %367 = arith.addf %365, %366 : vector<120x1xf32>
    %cst_378 = arith.constant 0.000000e+00 : f32
    %368 = vector.broadcast %cst_378 : f32 to vector<120x1xf32>
    %369 = arith.subf %368, %367 : vector<120x1xf32>
    %370 = math.exp %369 : vector<120x1xf32>
    %cst_379 = arith.constant 1.000000e+00 : f32
    %371 = vector.broadcast %cst_379 : f32 to vector<120x1xf32>
    %372 = arith.addf %371, %370 : vector<120x1xf32>
    %373 = tpu.reciprocal %372 : vector<120x1xf32> -> vector<120x1xf32>
    %c0_380 = arith.constant 0 : index
    %c0_381 = arith.constant 0 : index
    %374 = vector.load %arg8[%c0_380, %c0_381] : memref<84x120xf32, #tpu.memory_space<vmem>>, vector<84x120xf32>
    %cst_382 = arith.constant dense<0.000000e+00> : vector<84x1xf32>
    %375 = tpu.matmul %374, %373, %cst_382 {dimension_numbers = #tpu.dot_dimension_numbers<[1], [0], [0], [1], [0, 0, 1, 1], [], []>} : vector<84x120xf32>, vector<120x1xf32>, vector<84x1xf32> -> vector<84x1xf32>
    %c0_383 = arith.constant 0 : index
    %c0_384 = arith.constant 0 : index
    %376 = vector.load %arg9[%c0_383, %c0_384] : memref<84x1xf32, #tpu.memory_space<vmem>>, vector<84x1xf32>
    %377 = arith.addf %375, %376 : vector<84x1xf32>
    %cst_385 = arith.constant 0.000000e+00 : f32
    %378 = vector.broadcast %cst_385 : f32 to vector<84x1xf32>
    %379 = arith.subf %378, %377 : vector<84x1xf32>
    %380 = math.exp %379 : vector<84x1xf32>
    %cst_386 = arith.constant 1.000000e+00 : f32
    %381 = vector.broadcast %cst_386 : f32 to vector<84x1xf32>
    %382 = arith.addf %381, %380 : vector<84x1xf32>
    %383 = tpu.reciprocal %382 : vector<84x1xf32> -> vector<84x1xf32>
    %c0_387 = arith.constant 0 : index
    %c0_388 = arith.constant 0 : index
    %384 = vector.load %arg10[%c0_387, %c0_388] : memref<10x84xf32, #tpu.memory_space<vmem>>, vector<10x84xf32>
    %cst_389 = arith.constant dense<0.000000e+00> : vector<10x1xf32>
    %385 = tpu.matmul %384, %383, %cst_389 {dimension_numbers = #tpu.dot_dimension_numbers<[1], [0], [0], [1], [0, 0, 1, 1], [], []>} : vector<10x84xf32>, vector<84x1xf32>, vector<10x1xf32> -> vector<10x1xf32>
    %c0_390 = arith.constant 0 : index
    %c0_391 = arith.constant 0 : index
    %386 = vector.load %arg11[%c0_390, %c0_391] : memref<10x1xf32, #tpu.memory_space<vmem>>, vector<10x1xf32>
    %387 = arith.addf %385, %386 : vector<10x1xf32>
    %c0_392 = arith.constant 0 : index
    %c0_393 = arith.constant 0 : index
    %c0_394 = arith.constant 0 : index
    %388 = vector.load %arg12[%c0_392, %c0_393, %c0_394] : memref<1x10x1xf32, #tpu.memory_space<vmem>>, vector<1x10x1xf32>
    %389 = vector.shape_cast %388 : vector<1x10x1xf32> to vector<10x1xf32>
    %390 = vector.shape_cast %387 : vector<10x1xf32> to vector<1x10x1xf32>
    tpu.vector_store %arg12[%c0_392, %c0_393, %c0_394], %390 {strides = array<i32>} : memref<1x10x1xf32, #tpu.memory_space<vmem>>, vector<1x10x1xf32>,
    return
  }
  func.func @transform_0(%arg0: i32) -> (i32, i32, i32) {
    %c0_i32 = arith.constant 0 : i32
    %c0_i32_0 = arith.constant 0 : i32
    %c0_i32_1 = arith.constant 0 : i32
    return %arg0, %c0_i32, %c0_i32_0 : i32, i32, i32
  }
  func.func @transform_1(%arg0: i32) -> (i32, i32, i32) {
    %c0_i32 = arith.constant 0 : i32
    %c0_i32_0 = arith.constant 0 : i32
    %c0_i32_1 = arith.constant 0 : i32
    %c0_i32_2 = arith.constant 0 : i32
    return %c0_i32, %c0_i32_0, %c0_i32_1 : i32, i32, i32
  }
  func.func @transform_2(%arg0: i32) -> (i32, i32) {
    %c0_i32 = arith.constant 0 : i32
    %c0_i32_0 = arith.constant 0 : i32
    %c0_i32_1 = arith.constant 0 : i32
    return %c0_i32, %c0_i32_0 : i32, i32
  }
  func.func @transform_3(%arg0: i32) -> (i32, i32, i32) {
    %c0_i32 = arith.constant 0 : i32
    %c0_i32_0 = arith.constant 0 : i32
    %c0_i32_1 = arith.constant 0 : i32
    %c0_i32_2 = arith.constant 0 : i32
    return %c0_i32, %c0_i32_0, %c0_i32_1 : i32, i32, i32
  }
  func.func @transform_4(%arg0: i32) -> (i32, i32) {
    %c0_i32 = arith.constant 0 : i32
    %c0_i32_0 = arith.constant 0 : i32
    %c0_i32_1 = arith.constant 0 : i32
    return %c0_i32, %c0_i32_0 : i32, i32
  }
  func.func @transform_5(%arg0: i32) -> (i32, i32) {
    %c0_i32 = arith.constant 0 : i32
    %c0_i32_0 = arith.constant 0 : i32
    %c0_i32_1 = arith.constant 0 : i32
    return %c0_i32, %c0_i32_0 : i32, i32
  }
  func.func @transform_6(%arg0: i32) -> (i32, i32) {
    %c0_i32 = arith.constant 0 : i32
    %c0_i32_0 = arith.constant 0 : i32
    %c0_i32_1 = arith.constant 0 : i32
    return %c0_i32, %c0_i32_0 : i32, i32
  }
  func.func @transform_7(%arg0: i32) -> (i32, i32) {
    %c0_i32 = arith.constant 0 : i32
    %c0_i32_0 = arith.constant 0 : i32
    %c0_i32_1 = arith.constant 0 : i32
    return %c0_i32, %c0_i32_0 : i32, i32
  }
  func.func @transform_8(%arg0: i32) -> (i32, i32) {
    %c0_i32 = arith.constant 0 : i32
    %c0_i32_0 = arith.constant 0 : i32
    %c0_i32_1 = arith.constant 0 : i32
    return %c0_i32, %c0_i32_0 : i32, i32
  }
  func.func @transform_9(%arg0: i32) -> (i32, i32) {
    %c0_i32 = arith.constant 0 : i32
    %c0_i32_0 = arith.constant 0 : i32
    %c0_i32_1 = arith.constant 0 : i32
    return %c0_i32, %c0_i32_0 : i32, i32
  }
  func.func @transform_10(%arg0: i32) -> (i32, i32) {
    %c0_i32 = arith.constant 0 : i32
    %c0_i32_0 = arith.constant 0 : i32
    %c0_i32_1 = arith.constant 0 : i32
    return %c0_i32, %c0_i32_0 : i32, i32
  }
  func.func @transform_11(%arg0: i32) -> (i32, i32, i32) {
    %c0_i32 = arith.constant 0 : i32
    %c0_i32_0 = arith.constant 0 : i32
    %c0_i32_1 = arith.constant 0 : i32
    return %arg0, %c0_i32, %c0_i32_0 : i32, i32, i32
  }
}

</mosaic_0001>

<bundles_post_ra>
// kernel: network_forward.1
= control target key start
LH: loop header
LB: loop body
LE: loop exit
PB: predicated region body
PF: predicated region fallthrough
CT: control target
= control target key end

     0   :  { %s19162_s17 = smov 0   ;;  %s21904_s0 = inlined_call_operand.vmem [shape: f32[2,3,1040], index: 0, kind: input, shape index: {}]   ;;  %s21905_s1 = inlined_call_operand.vmem [shape: f32[25,8,3], index: 1, kind: input, shape index: {}]   ;;  %s21906_s2 = inlined_call_operand.vmem [shape: f32[8,1], index: 2, kind: input, shape index: {}]   ;;  %s21907_s3 = inlined_call_operand.vmem [shape: f32[25,16,8], index: 3, kind: input, shape index: {}]   ;;  %s21908_s4 = inlined_call_operand.vmem [shape: f32[16,1], index: 4, kind: input, shape index: {}]   ;;  %s21909_s5 = inlined_call_operand.vmem [shape: f32[120,400], index: 5, kind: input, shape index: {}]   ;;  %s21910_s6 = inlined_call_operand.vmem [shape: f32[120,1], index: 6, kind: input, shape index: {}]   ;;  %s21911_s7 = inlined_call_operand.vmem [shape: f32[84,120], index: 7, kind: input, shape index: {}]   ;;  %s21912_s8 = inlined_call_operand.vmem [shape: f32[84,1], index: 8, kind: input, shape index: {}]   ;;  %s21913_s9 = inlined_call_operand.vmem [shape: f32[10,84], index: 9, kind: input, shape index: {}]   ;;  %s21914_s10 = inlined_call_operand.vmem [shape: f32[10,1], index: 10, kind: input, shape index: {}]   ;;  %s21915_s11 = inlined_call_operand.vmem [shape: f32[2,10,1], index: 11, kind: output, shape index: {}]  }
   0x1 LB: > { %s17250_s18 = sadd.s32 4294967295, %s19071_s17   ;;  %p17254_p0 = scmp.ge.s32.totalorder %s19071_s17, 1  ;;  %s19071_s17 = sphi %s19162_s17, %s21_s17  }
   0x2   : > { %p337_p1 = scmp.lt.s32.totalorder %s19071_s17, 3 }
   0x4   : > { %p338_p2 = pnand %p17254_p0, %p337_p1 }
   0x5   : > { %p377_p3 = scmp.lt.s32.totalorder (!%p338_p2), %s17250_s18, 1  ;;  %v19073_v0 = vmov (!%p338_p2), 0.0   ;;  %s19074_s23 = smov (!%p338_p2), 127   ;;  %vm418_vm0 = vcmask (!%p338_p2), 1039360   ;;  %vm430_vm1 = vcmask (!%p338_p2), 1042432   ;;  %vm426_vm2 = vcmask (!%p338_p2), 23552  }
   0x6   : > { %341 = sbr.rel (%p338_p2) target bundleno = 2914 (0xb62), region = 64  ;;  %511 = vmatprep.mubr.f32.mxu1 (!%p338_p2), %v19073_v0  ;;  %653 = vmatprep.mubr.f32.mxu0 (!%p338_p2), %v19073_v0  ;;  %s19075_s24 = smov (!%p338_p2), 126   ;;  %vm1064_vm3 = vcmask (!%p338_p2), 1031168   ;;  %vm1413_vm4 = vcmask (!%p338_p2), 1022976   ;;  %vm1762_vm5 = vcmask (!%p338_p2), 1014784   ;;  %vm2111_vm6 = vcmask (!%p338_p2), 785408  }
   0x7   : > { %s19076_s25 = smov (!%p338_p2), 125   ;;  %s19077_s26 = smov (!%p338_p2), 124   ;;  %vm2460_vm7 = vcmask (!%p338_p2), 777216   ;;  %vm2809_vm8 = vcmask (!%p338_p2), 769024   ;;  %vm3158_vm9 = vcmask (!%p338_p2), 760832   ;;  %vm3507_vm10 = vcmask (!%p338_p2), 752640  }
   0x8   : > { %s19078_s27 = smov (!%p338_p2), 96   ;;  %s19079_s28 = smov (!%p338_p2), 95   ;;  %vm3856_vm11 = vcmask (!%p338_p2), 523264   ;;  %vm4205_vm12 = vcmask (!%p338_p2), 515072   ;;  %vm4554_vm13 = vcmask (!%p338_p2), 506880   ;;  %vm4903_vm14 = vcmask (!%p338_p2), 498688  }
   0x9   : > { %s19080_s29 = smov (!%p338_p2), 94   ;;  %s19081_s30 = smov (!%p338_p2), 93   ;;  %vm5252_vm15 = vcmask (!%p338_p2), 490496  }
   0xa   : > { %s19082_s14 = smov (!%p338_p2), 92   ;;  %s19083_s21 = smov (!%p338_p2), 64  }
   0xb   : > { %s19088_s13 = smov (!%p338_p2), 32   ;;  %s19091_s15 = smov (!%p338_p2), 29  }
   0xc   : > { %s19092_s20 = smov (!%p338_p2), 28   ;;  %s19097_s12 = smov (!%p338_p2), 56  }
   0xd   : > { %s21917_s18 = smov (!%p377_p3, %s17250_s18), 1 }
   0xe   : > { %s18748_s19 = smul.u32 36, %s21917_s18 }
  0x10   : > { %s19176_s22 = scalar_lea.vmem %s21904_s0, %s18748_s19  ;;  %s19086_s19 = smov 61  }
  0x11   : > { %v19181_v1 = vld [vmem:[%s19176_s22 + $0x8] sm:$0x77]  ;;  %v19184_v2 = vld [vmem:[%s19176_s22] sm:$0x77]  ;;  %v19195_v4 = vld [vmem:[%s19176_s22 + $0x10] sm:$0x77] }
  0x12   : > { %406 = vrot.lane.b32.xlu0 %v19181_v1, %s19074_s23  ;;  %402 = vrot.lane.b32.xlu1 %v19184_v2, %s19074_s23  ;;  %v19192_v3 = vcombine.high %v19181_v1, %v19181_v1  ;;  %v19203_v5 = vcombine.high %v19195_v4, %v19195_v4  ;;  %v19207_v6 = vcombine.high %v19184_v2, %v19184_v2  ;;  %v19210_v7 = vld [vmem:[%s19176_s22 + $0x18] sm:$0x77]  ;;  %v1036_v9 = vld [vmem:[%s19176_s22] sm:$0x77] }
  0x13   : > { %v19218_v8 = vcombine.high %v19210_v7, %v19210_v7  ;;  %v1044_v10 = vcombine.high %v1036_v9, %v1036_v9  ;;  %v1037_v11 = vld [vmem:[%s19176_s22 + $0x8] sm:$0x77]  ;;  %v1038_v13 = vld [vmem:[%s19176_s22 + $0x10] sm:$0x77]  ;;  %v1039_v15 = vld [vmem:[%s19176_s22 + $0x18] sm:$0x77] }
  0x14   : > { %v1045_v12 = vcombine.high %v1037_v11, %v1037_v11  ;;  %v1046_v14 = vcombine.high %v1038_v13, %v1038_v13  ;;  %v1047_v16 = vcombine.high %v1039_v15, %v1039_v15  ;;  %v1385_v17 = vld [vmem:[%s19176_s22] sm:$0x77]  ;;  %v1386_v19 = vld [vmem:[%s19176_s22 + $0x8] sm:$0x77]  ;;  %v1387_v21 = vld [vmem:[%s19176_s22 + $0x10] sm:$0x77] }
  0x15   : > { %v1393_v18 = vcombine.high %v1385_v17, %v1385_v17  ;;  %v1394_v20 = vcombine.high %v1386_v19, %v1386_v19  ;;  %v1395_v22 = vcombine.high %v1387_v21, %v1387_v21  ;;  %v1388_v23 = vld [vmem:[%s19176_s22 + $0x18] sm:$0x77]  ;;  %v1734_v25 = vld [vmem:[%s19176_s22] sm:$0x77]  ;;  %v1735_v27 = vld [vmem:[%s19176_s22 + $0x8] sm:$0x77] }
  0x16   : > { %410 = vrot.lane.b32.xlu0 %v19195_v4, %s19074_s23  ;;  %408 = vrot.lane.b32.xlu1 %v19192_v3, %s19074_s23  ;;  %v1396_v24 = vcombine.high %v1388_v23, %v1388_v23  ;;  %v1742_v26 = vcombine.high %v1734_v25, %v1734_v25  ;;  %v1743_v28 = vcombine.high %v1735_v27, %v1735_v27  ;;  %v1736_v29 = vld [vmem:[%s19176_s22 + $0x10] sm:$0x77]  ;;  %v1737_v31 = vld [vmem:[%s19176_s22 + $0x18] sm:$0x77] }
  0x17   : > { %v1744_v30 = vcombine.high %v1736_v29, %v1736_v29  ;;  %v1745_v32 = vcombine.high %v1737_v31, %v1737_v31  ;;  %v2083_v33 = vld [vmem:[%s19176_s22] sm:$0x77]  ;;  %v2084_v35 = vld [vmem:[%s19176_s22 + $0x8] sm:$0x77]  ;;  %v2085_v37 = vld [vmem:[%s19176_s22 + $0x10] sm:$0x77] }
  0x18   : > { %v2091_v34 = vcombine.high %v2083_v33, %v2083_v33  ;;  %v2092_v36 = vcombine.high %v2084_v35, %v2084_v35  ;;  %v2093_v38 = vcombine.high %v2085_v37, %v2085_v37  ;;  %v2086_v39 = vld [vmem:[%s19176_s22 + $0x18] sm:$0x77]  ;;  %v2432_v41 = vld [vmem:[%s19176_s22] sm:$0x77]  ;;  %v2433_v43 = vld [vmem:[%s19176_s22 + $0x8] sm:$0x77] }
  0x19   : > { %v2094_v40 = vcombine.high %v2086_v39, %v2086_v39  ;;  %v2440_v42 = vcombine.high %v2432_v41, %v2432_v41  ;;  %v2441_v44 = vcombine.high %v2433_v43, %v2433_v43  ;;  %v2434_v45 = vld [vmem:[%s19176_s22 + $0x10] sm:$0x77]  ;;  %v2435_v47 = vld [vmem:[%s19176_s22 + $0x18] sm:$0x77]  ;;  %v2781_v49 = vld [vmem:[%s19176_s22] sm:$0x77] }
  0x1a   : > { %412 = vrot.lane.b32.xlu1 %v19203_v5, %s19074_s23  ;;  %404 = vrot.lane.b32.xlu0 %v19207_v6, %s19074_s23  ;;  %v2442_v46 = vcombine.high %v2434_v45, %v2434_v45  ;;  %v2443_v48 = vcombine.high %v2435_v47, %v2435_v47  ;;  %v2789_v50 = vcombine.high %v2781_v49, %v2781_v49  ;;  %v2782_v51 = vld [vmem:[%s19176_s22 + $0x8] sm:$0x77]  ;;  %v2783_v53 = vld [vmem:[%s19176_s22 + $0x10] sm:$0x77] }
  0x1b   : > { %v2790_v52 = vcombine.high %v2782_v51, %v2782_v51  ;;  %v2791_v54 = vcombine.high %v2783_v53, %v2783_v53  ;;  %v2784_v55 = vld [vmem:[%s19176_s22 + $0x18] sm:$0x77]  ;;  %v3130_v57 = vld [vmem:[%s19176_s22] sm:$0x77]  ;;  %v3131_v59 = vld [vmem:[%s19176_s22 + $0x8] sm:$0x77] }
  0x1c   : > { %v2792_v56 = vcombine.high %v2784_v55, %v2784_v55  ;;  %v3138_v58 = vcombine.high %v3130_v57, %v3130_v57  ;;  %v3139_v60 = vcombine.high %v3131_v59, %v3131_v59  ;;  %v3132_v61 = vld [vmem:[%s19176_s22 + $0x10] sm:$0x77] }
  0x1e   : > { %416 = vrot.lane.b32.xlu1 %v19218_v8, %s19074_s23  ;;  %414 = vrot.lane.b32.xlu0 %v19210_v7, %s19074_s23 }
  0x22   : > { %1052 = vrot.lane.b32.xlu1 %v1037_v11, %s19075_s24  ;;  %1050 = vrot.lane.b32.xlu0 %v1044_v10, %s19075_s24  ;;  %v3133_v10 = vld [vmem:[%s19176_s22 + $0x18] sm:$0x77] }
  0x26   : > { %1054 = vrot.lane.b32.xlu1 %v1045_v12, %s19075_s24  ;;  %1048 = vrot.lane.b32.xlu0 %v1036_v9, %s19075_s24  ;;  %v3140_v9 = vcombine.high %v3132_v61, %v3132_v61 }
  0x2a   : > { %1058 = vrot.lane.b32.xlu1 %v1046_v14, %s19075_s24  ;;  %1056 = vrot.lane.b32.xlu0 %v1038_v13, %s19075_s24  ;;  %v3141_v13 = vcombine.high %v3133_v10, %v3133_v10 }
  0x2e   : > { %1062 = vrot.lane.b32.xlu1 %v1047_v16, %s19075_s24  ;;  %1060 = vrot.lane.b32.xlu0 %v1039_v15, %s19075_s24  ;;  %v3479_v16 = vld [vmem:[%s19176_s22] sm:$0x77] }
  0x32   : > { %1401 = vrot.lane.b32.xlu1 %v1386_v19, %s19076_s25  ;;  %1399 = vrot.lane.b32.xlu0 %v1393_v18, %s19076_s25  ;;  %v17258_v19 = vld [vmem:[%s21905_s1 + $0x8] sm:$0xff] }
  0x36   : > { %1403 = vrot.lane.b32.xlu1 %v1394_v20, %s19076_s25  ;;  %1397 = vrot.lane.b32.xlu0 %v1385_v17, %s19076_s25  ;;  %v3480_v20 = vld [vmem:[%s19176_s22 + $0x8] sm:$0x77] }
  0x3a   : > { %1407 = vrot.lane.b32.xlu1 %v1395_v22, %s19076_s25  ;;  %1405 = vrot.lane.b32.xlu0 %v1387_v21, %s19076_s25  ;;  %v3487_v21 = vcombine.high %v3479_v16, %v3479_v16 }
  0x3e   : > { %1411 = vrot.lane.b32.xlu1 %v1396_v24, %s19076_s25  ;;  %1409 = vrot.lane.b32.xlu0 %v1388_v23, %s19076_s25 }
  0x42   : > { %1750 = vrot.lane.b32.xlu1 %v1735_v27, %s19077_s26  ;;  %1748 = vrot.lane.b32.xlu0 %v1742_v26, %s19077_s26  ;;  %v3488_v27 = vcombine.high %v3480_v20, %v3480_v20 }
  0x46   : > { %1752 = vrot.lane.b32.xlu1 %v1743_v28, %s19077_s26  ;;  %1746 = vrot.lane.b32.xlu0 %v1734_v25, %s19077_s26 }
  0x4a   : > { %1756 = vrot.lane.b32.xlu1 %v1744_v30, %s19077_s26  ;;  %1754 = vrot.lane.b32.xlu0 %v1736_v29, %s19077_s26 }
  0x4e   : > { %1760 = vrot.lane.b32.xlu1 %v1745_v32, %s19077_s26  ;;  %1758 = vrot.lane.b32.xlu0 %v1737_v31, %s19077_s26  ;;  %v3481_v31 = vld [vmem:[%s19176_s22 + $0x10] sm:$0x77] }
  0x52   : > { %2099 = vrot.lane.b32.xlu1 %v2084_v35, %s19078_s27  ;;  %2097 = vrot.lane.b32.xlu0 %v2091_v34, %s19078_s27  ;;  %v387_v35 = vld [vmem:[%s21905_s1] sm:$0xff] }
  0x56   : > { %2101 = vrot.lane.b32.xlu1 %v2092_v36, %s19078_s27  ;;  %2095 = vrot.lane.b32.xlu0 %v2083_v33, %s19078_s27  ;;  %v3489_v33 = vcombine.high %v3481_v31, %v3481_v31 }
  0x5a   : > { %2105 = vrot.lane.b32.xlu1 %v2093_v38, %s19078_s27  ;;  %2103 = vrot.lane.b32.xlu0 %v2085_v37, %s19078_s27 }
  0x5e   : > { %2109 = vrot.lane.b32.xlu1 %v2094_v40, %s19078_s27  ;;  %2107 = vrot.lane.b32.xlu0 %v2086_v39, %s19078_s27 }
  0x62   : > { %2448 = vrot.lane.b32.xlu1 %v2433_v43, %s19079_s28  ;;  %2446 = vrot.lane.b32.xlu0 %v2440_v42, %s19079_s28 }
  0x66   : > { %2450 = vrot.lane.b32.xlu1 %v2441_v44, %s19079_s28  ;;  %2444 = vrot.lane.b32.xlu0 %v2432_v41, %s19079_s28 }
  0x6a   : > { %2454 = vrot.lane.b32.xlu1 %v2442_v46, %s19079_s28  ;;  %2452 = vrot.lane.b32.xlu0 %v2434_v45, %s19079_s28 }
  0x6e   : > { %2458 = vrot.lane.b32.xlu1 %v2443_v48, %s19079_s28  ;;  %2456 = vrot.lane.b32.xlu0 %v2435_v47, %s19079_s28  ;;  %s19095_s28 = smov 120  }
  0x72   : > { %2797 = vrot.lane.b32.xlu1 %v2782_v51, %s19080_s29  ;;  %2795 = vrot.lane.b32.xlu0 %v2789_v50, %s19080_s29 }
  0x76   : > { %2799 = vrot.lane.b32.xlu1 %v2790_v52, %s19080_s29  ;;  %2793 = vrot.lane.b32.xlu0 %v2781_v49, %s19080_s29  ;;  %v3830_v49 = vld [vmem:[%s19176_s22 + $0x10] sm:$0x77] }
  0x7a   : > { %2803 = vrot.lane.b32.xlu1 %v2791_v54, %s19080_s29  ;;  %2801 = vrot.lane.b32.xlu0 %v2783_v53, %s19080_s29  ;;  %v3838_v54 = vcombine.high %v3830_v49, %v3830_v49 }
  0x7e   : > { %2807 = vrot.lane.b32.xlu1 %v2792_v56, %s19080_s29  ;;  %2805 = vrot.lane.b32.xlu0 %v2784_v55, %s19080_s29  ;;  %v3831_v55 = vld [vmem:[%s19176_s22 + $0x18] sm:$0x77]  ;;  %s19087_s29 = smov 60  }
  0x82   : > { %3146 = vrot.lane.b32.xlu1 %v3131_v59, %s19081_s30  ;;  %3144 = vrot.lane.b32.xlu0 %v3138_v58, %s19081_s30 }
  0x84   : > { %v407_v62 = vpop.permute.xlu0 %406  ;;  %v403_v63 = vpop.permute.xlu1 %402 }
  0x86   : > { %3148 = vrot.lane.b32.xlu1 %v3139_v60, %s19081_s30  ;;  %3142 = vrot.lane.b32.xlu0 %v3130_v57, %s19081_s30  ;;  %v3839_v60 = vcombine.high %v3831_v55, %v3831_v55 }
  0x88   : > { %v411_v11 = vpop.permute.xlu0 %410  ;;  %v409_v12 = vpop.permute.xlu1 %408 }
  0x89   : > { %v422_v23 = vsel %vm418_vm0, %v409_v12, %v411_v11  ;;  %v421_v25 = vsel %vm418_vm0, %v407_v62, %v409_v12  ;;  %v4178_v12 = vld [vmem:[%s19176_s22 + $0x8] sm:$0x77] }
  0x8a   : > { %3152 = vrot.lane.b32.xlu1 %v3140_v9, %s19081_s30  ;;  %3150 = vrot.lane.b32.xlu0 %v3132_v61, %s19081_s30  ;;  %v17296_v61 = vld [vmem:[%s21905_s1 + $0x18] sm:$0xff]  ;;  %v4177_v9 = vld [vmem:[%s19176_s22] sm:$0x77] }
  0x8c   : > { %v413_v14 = vpop.permute.xlu1 %412  ;;  %v405_v15 = vpop.permute.xlu0 %404 }
  0x8d   : > { %v420_v17 = vsel %vm418_vm0, %v405_v15, %v407_v62  ;;  %v419_v18 = vsel %vm418_vm0, %v403_v63, %v405_v15  ;;  %v423_v28 = vsel %vm418_vm0, %v411_v11, %v413_v14 }
  0x8e   : > { %3156 = vrot.lane.b32.xlu1 %v3141_v13, %s19081_s30  ;;  %3154 = vrot.lane.b32.xlu0 %v3133_v10, %s19081_s30  ;;  %v4185_v13 = vcombine.high %v4177_v9, %v4177_v9  ;;  %s19084_s30 = smov 63  }
  0x8f   : > { %17259 = vmatprep.subr.msk.mxu1 %vm430_vm1, %v420_v17 }
  0x90   : > { %17260 = vmatpush1.msk.msra.mxu1 %vm430_vm1, %v419_v18  ;;  %v417_v22 = vpop.permute.xlu1 %416  ;;  %v415_v24 = vpop.permute.xlu0 %414  ;;  %v4186_v18 = vcombine.high %v4178_v12, %v4178_v12 }
  0x91   : > { %17261 = vmatmul.mubr.msk.f32.vlgmr.msra.gmra.mrb[0].mxu1 %vm426_vm2, %v17258_v19  ;;  %17262 = vmatprep.subr.msk.mxu1 %vm430_vm1, %v422_v23  ;;  %v424_v26 = vsel %vm418_vm0, %v413_v14, %v415_v24  ;;  %v425_v32 = vsel %vm418_vm0, %v415_v24, %v417_v22  ;;  %v17309_v23 = vld [vmem:[%s21905_s1 + $0x20] sm:$0xff] }
  0x92   : > { %17263 = vmatpush1.msk.msra.mxu1 %vm430_vm1, %v421_v25  ;;  %3495 = vrot.lane.b32.xlu1 %v3480_v20, %s19082_s14  ;;  %v4180_v25 = vld [vmem:[%s19176_s22 + $0x18] sm:$0x77] }
  0x93   : > { %3493 = vrot.lane.b32.xlu0 %v3487_v21, %s19082_s14  ;;  %17265 = vmatprep.subr.msk.mxu0 %vm430_vm1, %v424_v26 }
  0x94   : > { %582 = vmatprep.mubr.f32.mxu1 %v19073_v0  ;;  %17266 = vmatpush1.msk.msra.mxu0 %vm430_vm1, %v423_v28  ;;  %v1053_v29 = vpop.permute.xlu1 %1052  ;;  %v1051_v30 = vpop.permute.xlu0 %1050 }
  0x95   : > { %17268 = vmatprep.subr.msk.mxu1 %vm430_vm1, %v417_v22  ;;  %17264 = vmatmul.mubr.msk.f32.vlgmr.msra.gmra.mrb[2].mxu1 %vm426_vm2, %v17258_v19 }
  0x96   : > { %17267 = vmatmul.mubr.msk.f32.vlgmr.msra.gmra.mrb[0].mxu0 %vm426_vm2, %v17258_v19  ;;  %17269 = vmatpush1.msk.msra.mxu1 %vm430_vm1, %v425_v32 }
  0x97   : > { %17271 = vmatprep.subr.msk.mxu0 %vm430_vm1, %v19207_v6  ;;  %3497 = vrot.lane.b32.xlu1 %v3488_v27, %s19082_s14  ;;  %v1066_v6 = vsel %vm1064_vm3, %v1051_v30, %v1053_v29 }
  0x98   : > { %3491 = vrot.lane.b32.xlu0 %v3479_v16, %s19082_s14  ;;  %17272 = vmatpush1.msk.msra.mxu0 %vm430_vm1, %v19184_v2  ;;  %v1055_v34 = vpop.permute.xlu1 %1054  ;;  %v1049_v36 = vpop.permute.xlu0 %1048  ;;  %v3482_v2 = vld [vmem:[%s19176_s22 + $0x18] sm:$0x77] }
  0x99   : > { %724 = vmatprep.mubr.f32.mxu1 %v19073_v0  ;;  %814 = vmatprep.mubr.f32.mxu0 %v19073_v0  ;;  %v1065_v39 = vsel %vm1064_vm3, %v1049_v36, %v1051_v30  ;;  %v1067_v43 = vsel %vm1064_vm3, %v1053_v29, %v1055_v34  ;;  %v4188_v30 = vcombine.high %v4180_v25, %v4180_v25 }
  0x9a   : > { %17277 = vmatprep.subr.msk.mxu0 %vm430_vm1, %v19203_v5  ;;  %17270 = vmatmul.mubr.msk.f32.vlgmr.msra.gmra.mrb[4].mxu1 %vm426_vm2, %v17258_v19  ;;  %v3490_v5 = vcombine.high %v3482_v2, %v3482_v2  ;;  %v4179_v19 = vld [vmem:[%s19176_s22 + $0x10] sm:$0x77] }
  0x9b   : > { %17273 = vmatmul.mubr.msk.f32.vlgmr.msra.gmra.mrb[2].mxu0 %vm426_vm2, %v387_v35  ;;  %3501 = vrot.lane.b32.xlu1 %v3489_v33, %s19082_s14  ;;  %v4187_v24 = vcombine.high %v4179_v19, %v4179_v19  ;;  %v4526_v33 = vld [vmem:[%s19176_s22] sm:$0x77] }
  0x9c   : > { %17278 = vmatpush1.msk.msra.mxu0 %vm430_vm1, %v19195_v4  ;;  %3499 = vrot.lane.b32.xlu0 %v3481_v31, %s19082_s14  ;;  %v1059_v37 = vpop.permute.xlu1 %1058  ;;  %v1057_v38 = vpop.permute.xlu0 %1056  ;;  %v3828_v4 = vld [vmem:[%s19176_s22] sm:$0x77] }
  0x9d   : > { %17284 = vmatprep.subr.msk.mxu0 %vm430_vm1, %v1066_v6  ;;  %17274 = vmatprep.subr.msk.mxu1 %vm430_vm1, %v19192_v3  ;;  %v1068_v3 = vsel %vm1064_vm3, %v1055_v34, %v1057_v38  ;;  %v3836_v41 = vcombine.high %v3828_v4, %v3828_v4  ;;  %v1069_v48 = vsel %vm1064_vm3, %v1057_v38, %v1059_v37 }
  0x9e   : > { %17275 = vmatpush1.msk.msra.mxu1 %vm430_vm1, %v19181_v1  ;;  %885 = vmatprep.mubr.f32.mxu1 %v19073_v0  ;;  %v4534_v6 = vcombine.high %v4526_v33, %v4526_v33 }
  0x9f   : > { %956 = vmatprep.mubr.f32.mxu0 %v19073_v0  ;;  %17276 = vmatmul.mubr.msk.f32.vlgmr.msra.gmra.mrb[2].mxu1 %vm426_vm2, %v387_v35 }
  0xa0   : > { %17279 = vmatmul.mubr.msk.f32.vlgmr.msra.gmra.mrb[0].mxu0 %vm426_vm2, %v387_v35  ;;  %17280 = vmatprep.subr.msk.mxu1 %vm430_vm1, %v19218_v8  ;;  %v1063_v40 = vpop.permute.xlu1 %1062  ;;  %v1061_v1 = vpop.permute.xlu0 %1060  ;;  %v3829_v8 = vld [vmem:[%s19176_s22 + $0x8] sm:$0x77] }
  0xa1   : > { %17285 = vmatpush1.msk.msra.mxu0 %vm430_vm1, %v1065_v39  ;;  %17281 = vmatpush1.msk.msra.mxu1 %vm430_vm1, %v19210_v7  ;;  %v1070_v42 = vsel %vm1064_vm3, %v1059_v37, %v1061_v1  ;;  %v17283_v7 = vld [vmem:[%s21905_s1 + $0x10] sm:$0xff]  ;;  %v3837_v46 = vcombine.high %v3829_v8, %v3829_v8  ;;  %v1071_v52 = vsel %vm1064_vm3, %v1061_v1, %v1063_v40  ;;  %v17322_v1 = vld [vmem:[%s21905_s1 + $0x28] sm:$0xff] }
  0xa2   : > { %3505 = vrot.lane.b32.xlu1 %v3490_v5, %s19082_s14  ;;  %3503 = vrot.lane.b32.xlu0 %v3482_v2, %s19082_s14  ;;  %v4527_v2 = vld [vmem:[%s19176_s22 + $0x8] sm:$0x77]  ;;  %s19085_s14 = smov 62   ;;  %v4528_v39 = vld [vmem:[%s19176_s22 + $0x10] sm:$0x77] }
  0xa3   : > { %17287 = vmatprep.subr.msk.mxu1 %vm430_vm1, %v1068_v3  ;;  %1027 = vmatprep.mubr.f32.mxu1 %v19073_v0 }
  0xa4   : > { %17282 = vmatmul.mubr.msk.f32.vlgmr.msra.gmra.mrb[4].mxu1 %vm426_vm2, %v387_v35  ;;  %1155 = vmatprep.mubr.f32.mxu0 %v19073_v0  ;;  %v1402_v44 = vpop.permute.xlu1 %1401  ;;  %v1400_v45 = vpop.permute.xlu0 %1399 }
  0xa5   : > { %17288 = vmatpush1.msk.msra.mxu1 %vm430_vm1, %v1067_v43  ;;  %17290 = vmatprep.subr.msk.mxu0 %vm430_vm1, %v1070_v42  ;;  %v1415_v47 = vsel %vm1413_vm4, %v1400_v45, %v1402_v44  ;;  %v4536_v42 = vcombine.high %v4528_v39, %v4528_v39 }
  0xa6   : > { %3844 = vrot.lane.b32.xlu1 %v3829_v8, %s19083_s21  ;;  %3842 = vrot.lane.b32.xlu0 %v3836_v41, %s19083_s21  ;;  %v4529_v8 = vld [vmem:[%s19176_s22 + $0x18] sm:$0x77] }
  0xa7   : > { %17286 = vmatmul.mubr.msk.f32.vlgmr.msra.gmra.mrb[2].mxu0 %vm426_vm2, %v17283_v7  ;;  %1226 = vmatprep.mubr.f32.mxu1 %v19073_v0 }
  0xa8   : > { %17291 = vmatpush1.msk.msra.mxu0 %vm430_vm1, %v1069_v48  ;;  %17293 = vmatprep.subr.msk.mxu1 %vm430_vm1, %v1063_v40  ;;  %v1404_v50 = vpop.permute.xlu1 %1403  ;;  %v1398_v51 = vpop.permute.xlu0 %1397 }
  0xa9   : > { %17289 = vmatmul.mubr.msk.f32.vlgmr.msra.gmra.mrb[2].mxu1 %vm426_vm2, %v17283_v7  ;;  %17297 = vmatprep.subr.msk.mxu0 %vm430_vm1, %v1415_v47  ;;  %v1414_v53 = vsel %vm1413_vm4, %v1398_v51, %v1400_v45  ;;  %v1416_v59 = vsel %vm1413_vm4, %v1402_v44, %v1404_v50 }
  0xaa   : > { %17294 = vmatpush1.msk.msra.mxu1 %vm430_vm1, %v1071_v52  ;;  %3846 = vrot.lane.b32.xlu1 %v3837_v46, %s19083_s21  ;;  %v4537_v46 = vcombine.high %v4529_v8, %v4529_v8 }
  0xab   : > { %3840 = vrot.lane.b32.xlu0 %v3828_v4, %s19083_s21  ;;  %1297 = vmatprep.mubr.f32.mxu0 %v19073_v0  ;;  %v4535_v4 = vcombine.high %v4527_v2, %v4527_v2 }
  0xac   : > { %17292 = vmatmul.mubr.msk.f32.vlgmr.msra.gmra.mrb[0].mxu0 %vm426_vm2, %v17283_v7  ;;  %v1408_v56 = vpop.permute.xlu1 %1407  ;;  %v1406_v57 = vpop.permute.xlu0 %1405  ;;  %1368 = vmatprep.mubr.f32.mxu1 %v19073_v0 }
  0xad   : > { %17298 = vmatpush1.msk.msra.mxu0 %vm430_vm1, %v1414_v53  ;;  %17295 = vmatmul.mubr.msk.f32.vlgmr.msra.gmra.mrb[4].mxu1 %vm426_vm2, %v17283_v7  ;;  %v1417_v58 = vsel %vm1413_vm4, %v1404_v50, %v1406_v57  ;;  %v1418_v14 = vsel %vm1413_vm4, %v1406_v57, %v1408_v56  ;;  %v4876_v53 = vld [vmem:[%s19176_s22 + $0x8] sm:$0x77] }
  0xae   : > { %3850 = vrot.lane.b32.xlu1 %v3838_v54, %s19083_s21  ;;  %17300 = vmatprep.subr.msk.mxu1 %vm430_vm1, %v1417_v58  ;;  %v4884_v58 = vcombine.high %v4876_v53, %v4876_v53 }
  0xaf   : > { %3848 = vrot.lane.b32.xlu0 %v3830_v49, %s19083_s21  ;;  %17301 = vmatpush1.msk.msra.mxu1 %vm430_vm1, %v1416_v59  ;;  %v4875_v49 = vld [vmem:[%s19176_s22] sm:$0x77]  ;;  %v4877_v59 = vld [vmem:[%s19176_s22 + $0x10] sm:$0x77] }
  0xb0   : > { %v1412_v62 = vpop.permute.xlu1 %1411  ;;  %v1410_v63 = vpop.permute.xlu0 %1409  ;;  %1575 = vmatprep.mubr.f32.mxu1 %v19073_v0  ;;  %1504 = vmatprep.mubr.f32.mxu0 %v19073_v0  ;;  %v4883_v54 = vcombine.high %v4875_v49, %v4875_v49 }
  0xb1   : > { %v1420_v10 = vsel %vm1413_vm4, %v1410_v63, %v1412_v62  ;;  %17306 = vmatprep.subr.msk.mxu1 %vm430_vm1, %v1412_v62  ;;  %17302 = vmatmul.mubr.msk.f32.vlgmr.msra.gmra.mrb[2].mxu1 %vm426_vm2, %v17296_v61  ;;  %v1419_v11 = vsel %vm1413_vm4, %v1408_v56, %v1410_v63  ;;  %v17335_v62 = vld [vmem:[%s21905_s1 + $0x30] sm:$0xff] }
  0xb2   : > { %3854 = vrot.lane.b32.xlu1 %v3839_v60, %s19083_s21  ;;  %17303 = vmatprep.subr.msk.mxu0 %vm430_vm1, %v1419_v11 }
  0xb3   : > { %3852 = vrot.lane.b32.xlu0 %v3831_v55, %s19083_s21  ;;  %17307 = vmatpush1.msk.msra.mxu1 %vm430_vm1, %v1420_v10  ;;  %v4878_v10 = vld [vmem:[%s19176_s22 + $0x18] sm:$0x77] }
  0xb4   : > { %17299 = vmatmul.mubr.msk.f32.vlgmr.msra.gmra.mrb[2].mxu0 %vm426_vm2, %v17296_v61  ;;  %v1751_v15 = vpop.permute.xlu1 %1750  ;;  %v1749_v16 = vpop.permute.xlu0 %1748  ;;  %1717 = vmatprep.mubr.f32.mxu1 %v19073_v0 }
  0xb5   : > { %17304 = vmatpush1.msk.msra.mxu0 %vm430_vm1, %v1418_v14  ;;  %v1764_v17 = vsel %vm1762_vm5, %v1749_v16, %v1751_v15  ;;  %1646 = vmatprep.mubr.f32.mxu0 %v19073_v0 }
  0xb6   : > { %4193 = vrot.lane.b32.xlu1 %v4178_v12, %s19084_s30  ;;  %17310 = vmatprep.subr.msk.mxu0 %vm430_vm1, %v1764_v17 }
  0xb7   : > { %4191 = vrot.lane.b32.xlu0 %v4185_v13, %s19084_s30  ;;  %17308 = vmatmul.mubr.msk.f32.vlgmr.msra.gmra.mrb[4].mxu1 %vm426_vm2, %v17296_v61 }
  0xb8   : > { %v1753_v20 = vpop.permute.xlu1 %1752  ;;  %v1747_v21 = vpop.permute.xlu0 %1746  ;;  %17305 = vmatmul.mubr.msk.f32.vlgmr.msra.gmra.mrb[0].mxu0 %vm426_vm2, %v17296_v61  ;;  %1924 = vmatprep.mubr.f32.mxu1 %v19073_v0 }
  0xb9   : > { %v1763_v22 = vsel %vm1762_vm5, %v1747_v21, %v1749_v16  ;;  %1853 = vmatprep.mubr.f32.mxu0 %v19073_v0  ;;  %v1765_v29 = vsel %vm1762_vm5, %v1751_v15, %v1753_v20  ;;  %v4886_v15 = vcombine.high %v4878_v10, %v4878_v10 }
  0xba   : > { %4195 = vrot.lane.b32.xlu1 %v4186_v18, %s19084_s30  ;;  %17311 = vmatpush1.msk.msra.mxu0 %vm430_vm1, %v1763_v22  ;;  %v5224_v18 = vld [vmem:[%s19176_s22] sm:$0x77]  ;;  %v5225_v22 = vld [vmem:[%s19176_s22 + $0x8] sm:$0x77] }
  0xbb   : > { %4189 = vrot.lane.b32.xlu0 %v4177_v9, %s19084_s30  ;;  %v4885_v9 = vcombine.high %v4877_v59, %v4877_v59 }
  0xbc   : > { %v1757_v26 = vpop.permute.xlu1 %1756  ;;  %v1755_v27 = vpop.permute.xlu0 %1754  ;;  %17312 = vmatmul.mubr.msk.f32.vlgmr.msra.gmra.mrb[2].mxu0 %vm426_vm2, %v17309_v23 }
  0xbd   : > { %v1766_v28 = vsel %vm1762_vm5, %v1753_v20, %v1755_v27  ;;  %1995 = vmatprep.mubr.f32.mxu0 %v19073_v0  ;;  %v1767_v36 = vsel %vm1762_vm5, %v1755_v27, %v1757_v26  ;;  %v5233_v27 = vcombine.high %v5225_v22, %v5225_v22 }
  0xbe   : > { %4199 = vrot.lane.b32.xlu1 %v4187_v24, %s19084_s30  ;;  %17313 = vmatprep.subr.msk.mxu1 %vm430_vm1, %v1766_v28  ;;  %v5226_v28 = vld [vmem:[%s19176_s22 + $0x10] sm:$0x77] }
  0xbf   : > { %4197 = vrot.lane.b32.xlu0 %v4179_v19, %s19084_s30  ;;  %17314 = vmatpush1.msk.msra.mxu1 %vm430_vm1, %v1765_v29 }
  0xc0   : > { %v1761_v31 = vpop.permute.xlu1 %1760  ;;  %v1759_v32 = vpop.permute.xlu0 %1758  ;;  %17315 = vmatmul.mubr.msk.f32.vlgmr.msra.gmra.mrb[2].mxu1 %vm426_vm2, %v17309_v23 }
  0xc1   : > { %v1769_v34 = vsel %vm1762_vm5, %v1759_v32, %v1761_v31  ;;  %17319 = vmatprep.subr.msk.mxu1 %vm430_vm1, %v1761_v31  ;;  %v1768_v35 = vsel %vm1762_vm5, %v1757_v26, %v1759_v32  ;;  %2066 = vmatprep.mubr.f32.mxu1 %v19073_v0  ;;  %v17348_v31 = vld [vmem:[%s21905_s1 + $0x38] sm:$0xff] }
  0xc2   : > { %4203 = vrot.lane.b32.xlu1 %v4188_v30, %s19084_s30  ;;  %17316 = vmatprep.subr.msk.mxu0 %vm430_vm1, %v1768_v35 }
  0xc3   : > { %4201 = vrot.lane.b32.xlu0 %v4180_v25, %s19084_s30  ;;  %17320 = vmatpush1.msk.msra.mxu1 %vm430_vm1, %v1769_v34  ;;  %v5227_v34 = vld [vmem:[%s19176_s22 + $0x18] sm:$0x77]  ;;  %s19090_s30 = smov 30  }
  0xc4   : > { %17317 = vmatpush1.msk.msra.mxu0 %vm430_vm1, %v1767_v36  ;;  %v2100_v37 = vpop.permute.xlu1 %2099  ;;  %v2098_v38 = vpop.permute.xlu0 %2097  ;;  %17321 = vmatmul.mubr.msk.f32.vlgmr.msra.gmra.mrb[4].mxu1 %vm426_vm2, %v17309_v23 }
  0xc5   : > { %v2113_v5 = vsel %vm2111_vm6, %v2098_v38, %v2100_v37  ;;  %17318 = vmatmul.mubr.msk.f32.vlgmr.msra.gmra.mrb[0].mxu0 %vm426_vm2, %v17309_v23  ;;  %2273 = vmatprep.mubr.f32.mxu1 %v19073_v0  ;;  %v5232_v23 = vcombine.high %v5224_v18, %v5224_v18 }
  0xc6   : > { %4542 = vrot.lane.b32.xlu1 %v4527_v2, %s19085_s14  ;;  %17323 = vmatprep.subr.msk.mxu0 %vm430_vm1, %v2113_v5 }
  0xc7   : > { %4540 = vrot.lane.b32.xlu0 %v4534_v6, %s19085_s14  ;;  %2202 = vmatprep.mubr.f32.mxu0 %v19073_v0 }
  0xc8   : > { %v2102_v3 = vpop.permute.xlu1 %2101  ;;  %v2096_v40 = vpop.permute.xlu0 %2095 }
  0xc9   : > { %v2112_v41 = vsel %vm2111_vm6, %v2096_v40, %v2098_v38  ;;  %v2114_v45 = vsel %vm2111_vm6, %v2100_v37, %v2102_v3  ;;  %v5235_v37 = vcombine.high %v5227_v34, %v5227_v34 }
  0xca   : > { %4544 = vrot.lane.b32.xlu1 %v4535_v4, %s19085_s14  ;;  %17324 = vmatpush1.msk.msra.mxu0 %vm430_vm1, %v2112_v41  ;;  %v5573_v4 = vld [vmem:[%s19176_s22] sm:$0x77] }
  0xcb   : > { %4538 = vrot.lane.b32.xlu0 %v4526_v33, %s19085_s14  ;;  %17325 = vmatmul.mubr.msk.f32.vlgmr.msra.gmra.mrb[2].mxu0 %vm426_vm2, %v17322_v1  ;;  %v5234_v33 = vcombine.high %v5226_v28, %v5226_v28  ;;  %v5581_v41 = vcombine.high %v5573_v4, %v5573_v4 }
  0xcc   : > { %v2106_v43 = vpop.permute.xlu1 %2105  ;;  %v2104_v7 = vpop.permute.xlu0 %2103  ;;  %2344 = vmatprep.mubr.f32.mxu0 %v19073_v0 }
  0xcd   : > { %v2115_v44 = vsel %vm2111_vm6, %v2102_v3, %v2104_v7  ;;  %v2116_v52 = vsel %vm2111_vm6, %v2104_v7, %v2106_v43 }
  0xce   : > { %4548 = vrot.lane.b32.xlu1 %v4536_v42, %s19085_s14  ;;  %17326 = vmatprep.subr.msk.mxu1 %vm430_vm1, %v2115_v44  ;;  %v5575_v44 = vld [vmem:[%s19176_s22 + $0x10] sm:$0x77] }
  0xcf   : > { %4546 = vrot.lane.b32.xlu0 %v4528_v39, %s19085_s14  ;;  %17327 = vmatpush1.msk.msra.mxu1 %vm430_vm1, %v2114_v45 }
  0xd0   : > { %v2110_v47 = vpop.permute.xlu1 %2109  ;;  %v2108_v48 = vpop.permute.xlu0 %2107  ;;  %17328 = vmatmul.mubr.msk.f32.vlgmr.msra.gmra.mrb[2].mxu1 %vm426_vm2, %v17322_v1 }
  0xd1   : > { %v2118_v50 = vsel %vm2111_vm6, %v2108_v48, %v2110_v47  ;;  %17332 = vmatprep.subr.msk.mxu1 %vm430_vm1, %v2110_v47  ;;  %v2117_v51 = vsel %vm2111_vm6, %v2106_v43, %v2108_v48  ;;  %2415 = vmatprep.mubr.f32.mxu1 %v19073_v0  ;;  %v17361_v47 = vld [vmem:[%s21905_s1 + $0x40] sm:$0xff] }
  0xd2   : > { %4552 = vrot.lane.b32.xlu1 %v4537_v46, %s19085_s14  ;;  %17329 = vmatprep.subr.msk.mxu0 %vm430_vm1, %v2117_v51 }
  0xd3   : > { %4550 = vrot.lane.b32.xlu0 %v4529_v8, %s19085_s14  ;;  %17333 = vmatpush1.msk.msra.mxu1 %vm430_vm1, %v2118_v50  ;;  %v5576_v50 = vld [vmem:[%s19176_s22 + $0x18] sm:$0x77] }
  0xd4   : > { %17330 = vmatpush1.msk.msra.mxu0 %vm430_vm1, %v2116_v52  ;;  %v2449_v55 = vpop.permute.xlu1 %2448  ;;  %v2447_v56 = vpop.permute.xlu0 %2446  ;;  %17334 = vmatmul.mubr.msk.f32.vlgmr.msra.gmra.mrb[4].mxu1 %vm426_vm2, %v17322_v1 }
  0xd5   : > { %v2462_v57 = vsel %vm2460_vm7, %v2447_v56, %v2449_v55  ;;  %17331 = vmatmul.mubr.msk.f32.vlgmr.msra.gmra.mrb[0].mxu0 %vm426_vm2, %v17322_v1  ;;  %2622 = vmatprep.mubr.f32.mxu1 %v19073_v0  ;;  %v5574_v1 = vld [vmem:[%s19176_s22 + $0x8] sm:$0x77] }
  0xd6   : > { %4891 = vrot.lane.b32.xlu1 %v4876_v53, %s19086_s19  ;;  %17336 = vmatprep.subr.msk.mxu0 %vm430_vm1, %v2462_v57  ;;  %v5582_v7 = vcombine.high %v5574_v1, %v5574_v1 }
  0xd7   : > { %4889 = vrot.lane.b32.xlu0 %v4883_v54, %s19086_s19  ;;  %2551 = vmatprep.mubr.f32.mxu0 %v19073_v0 }
  0xd8   : > { %v2451_v60 = vpop.permute.xlu1 %2450  ;;  %v2445_v61 = vpop.permute.xlu0 %2444 }
  0xd9   : > { %v2461_v63 = vsel %vm2460_vm7, %v2445_v61, %v2447_v56  ;;  %v2463_v14 = vsel %vm2460_vm7, %v2449_v55, %v2451_v60  ;;  %v5584_v55 = vcombine.high %v5576_v50, %v5576_v50 }
  0xda   : > { %4893 = vrot.lane.b32.xlu1 %v4884_v58, %s19086_s19  ;;  %17337 = vmatpush1.msk.msra.mxu0 %vm430_vm1, %v2461_v63  ;;  %v5922_v58 = vld [vmem:[%s19176_s22] sm:$0x77] }
  0xdb   : > { %4887 = vrot.lane.b32.xlu0 %v4875_v49, %s19086_s19  ;;  %17338 = vmatmul.mubr.msk.f32.vlgmr.msra.gmra.mrb[2].mxu0 %vm426_vm2, %v17335_v62  ;;  %v5583_v49 = vcombine.high %v5575_v44, %v5575_v44  ;;  %v5930_v63 = vcombine.high %v5922_v58, %v5922_v58 }
  0xdc   : > { %v2455_v11 = vpop.permute.xlu1 %2454  ;;  %v2453_v12 = vpop.permute.xlu0 %2452  ;;  %2693 = vmatprep.mubr.f32.mxu0 %v19073_v0 }
  0xdd   : > { %v2464_v13 = vsel %vm2460_vm7, %v2451_v60, %v2453_v12  ;;  %v2465_v21 = vsel %vm2460_vm7, %v2453_v12, %v2455_v11 }
  0xde   : > { %4897 = vrot.lane.b32.xlu1 %v4885_v9, %s19086_s19  ;;  %17339 = vmatprep.subr.msk.mxu1 %vm430_vm1, %v2464_v13  ;;  %v5924_v13 = vld [vmem:[%s19176_s22 + $0x10] sm:$0x77] }
  0xdf   : > { %4895 = vrot.lane.b32.xlu0 %v4877_v59, %s19086_s19  ;;  %17340 = vmatpush1.msk.msra.mxu1 %vm430_vm1, %v2463_v14 }
  0xe0   : > { %v2459_v16 = vpop.permute.xlu1 %2458  ;;  %v2457_v17 = vpop.permute.xlu0 %2456  ;;  %17341 = vmatmul.mubr.msk.f32.vlgmr.msra.gmra.mrb[2].mxu1 %vm426_vm2, %v17335_v62 }
  0xe1   : > { %v2467_v19 = vsel %vm2460_vm7, %v2457_v17, %v2459_v16  ;;  %17345 = vmatprep.subr.msk.mxu1 %vm430_vm1, %v2459_v16  ;;  %v2466_v20 = vsel %vm2460_vm7, %v2455_v11, %v2457_v17  ;;  %2764 = vmatprep.mubr.f32.mxu1 %v19073_v0  ;;  %v5932_v16 = vcombine.high %v5924_v13, %v5924_v13  ;;  %v17374_v17 = vld [vmem:[%s21905_s1 + $0x48] sm:$0xff]  ;;  %vm5601_vm7 = vcmask 261120  }
  0xe2   : > { %4901 = vrot.lane.b32.xlu1 %v4886_v15, %s19086_s19  ;;  %17342 = vmatprep.subr.msk.mxu0 %vm430_vm1, %v2466_v20 }
  0xe3   : > { %4899 = vrot.lane.b32.xlu0 %v4878_v10, %s19086_s19  ;;  %17346 = vmatpush1.msk.msra.mxu1 %vm430_vm1, %v2467_v19  ;;  %s19089_s19 = smov 31   ;;  %v5925_v19 = vld [vmem:[%s19176_s22 + $0x18] sm:$0x77] }
  0xe4   : > { %17343 = vmatpush1.msk.msra.mxu0 %vm430_vm1, %v2465_v21  ;;  %v2798_v24 = vpop.permute.xlu1 %2797  ;;  %v2796_v25 = vpop.permute.xlu0 %2795  ;;  %17347 = vmatmul.mubr.msk.f32.vlgmr.msra.gmra.mrb[4].mxu1 %vm426_vm2, %v17335_v62 }
  0xe5   : > { %v2811_v26 = vsel %vm2809_vm8, %v2796_v25, %v2798_v24  ;;  %17344 = vmatmul.mubr.msk.f32.vlgmr.msra.gmra.mrb[0].mxu0 %vm426_vm2, %v17335_v62  ;;  %2971 = vmatprep.mubr.f32.mxu1 %v19073_v0  ;;  %v5923_v62 = vld [vmem:[%s19176_s22 + $0x8] sm:$0x77] }
  0xe6   : > { %5240 = vrot.lane.b32.xlu1 %v5225_v22, %s19087_s29  ;;  %17349 = vmatprep.subr.msk.mxu0 %vm430_vm1, %v2811_v26  ;;  %v5931_v11 = vcombine.high %v5923_v62, %v5923_v62  ;;  %v5933_v22 = vcombine.high %v5925_v19, %v5925_v19  ;;  %v6272_v26 = vld [vmem:[%s19176_s22 + $0x8] sm:$0x77] }
  0xe7   : > { %5238 = vrot.lane.b32.xlu0 %v5232_v23, %s19087_s29  ;;  %2900 = vmatprep.mubr.f32.mxu0 %v19073_v0 }
  0xe8   : > { %v2800_v29 = vpop.permute.xlu1 %2799  ;;  %v2794_v30 = vpop.permute.xlu0 %2793 }
  0xe9   : > { %v2810_v32 = vsel %vm2809_vm8, %v2794_v30, %v2796_v25  ;;  %v2812_v6 = vsel %vm2809_vm8, %v2798_v24, %v2800_v29  ;;  %v6271_v25 = vld [vmem:[%s19176_s22] sm:$0x77] }
  0xea   : > { %5242 = vrot.lane.b32.xlu1 %v5233_v27, %s19087_s29  ;;  %17350 = vmatpush1.msk.msra.mxu0 %vm430_vm1, %v2810_v32  ;;  %v6279_v27 = vcombine.high %v6271_v25, %v6271_v25  ;;  %v6280_v32 = vcombine.high %v6272_v26, %v6272_v26 }
  0xeb   : > { %5236 = vrot.lane.b32.xlu0 %v5224_v18, %s19087_s29  ;;  %17351 = vmatmul.mubr.msk.f32.vlgmr.msra.gmra.mrb[2].mxu0 %vm426_vm2, %v17348_v31 }
  0xec   : > { %v2804_v35 = vpop.permute.xlu1 %2803  ;;  %v2802_v36 = vpop.permute.xlu0 %2801  ;;  %3042 = vmatprep.mubr.f32.mxu0 %v19073_v0 }
  0xed   : > { %v2813_v2 = vsel %vm2809_vm8, %v2800_v29, %v2802_v36  ;;  %v2814_v40 = vsel %vm2809_vm8, %v2802_v36, %v2804_v35 }
  0xee   : > { %5246 = vrot.lane.b32.xlu1 %v5234_v33, %s19087_s29  ;;  %17352 = vmatprep.subr.msk.mxu1 %vm430_vm1, %v2813_v2 }
  0xef   : > { %5244 = vrot.lane.b32.xlu0 %v5226_v28, %s19087_s29  ;;  %17353 = vmatpush1.msk.msra.mxu1 %vm430_vm1, %v2812_v6 }
  0xf0   : > { %v2808_v38 = vpop.permute.xlu1 %2807  ;;  %v2806_v5 = vpop.permute.xlu0 %2805  ;;  %17354 = vmatmul.mubr.msk.f32.vlgmr.msra.gmra.mrb[2].mxu1 %vm426_vm2, %v17348_v31 }
  0xf1   : > { %v2816_v39 = vsel %vm2809_vm8, %v2806_v5, %v2808_v38  ;;  %17358 = vmatprep.subr.msk.mxu1 %vm430_vm1, %v2808_v38  ;;  %v2815_v3 = vsel %vm2809_vm8, %v2804_v35, %v2806_v5  ;;  %3113 = vmatprep.mubr.f32.mxu1 %v19073_v0  ;;  %vm5950_vm8 = vcmask 252928  }
  0xf2   : > { %5250 = vrot.lane.b32.xlu1 %v5235_v37, %s19087_s29  ;;  %17355 = vmatprep.subr.msk.mxu0 %vm430_vm1, %v2815_v3  ;;  %v6274_v37 = vld [vmem:[%s19176_s22 + $0x18] sm:$0x77] }
  0xf3   : > { %5248 = vrot.lane.b32.xlu0 %v5227_v34, %s19087_s29  ;;  %17359 = vmatpush1.msk.msra.mxu1 %vm430_vm1, %v2816_v39  ;;  %v6273_v34 = vld [vmem:[%s19176_s22 + $0x10] sm:$0x77]  ;;  %v6282_v3 = vcombine.high %v6274_v37, %v6274_v37 }
  0xf4   : > { %17356 = vmatpush1.msk.msra.mxu0 %vm430_vm1, %v2814_v40  ;;  %v3147_v42 = vpop.permute.xlu1 %3146  ;;  %v3145_v8 = vpop.permute.xlu0 %3144  ;;  %17360 = vmatmul.mubr.msk.f32.vlgmr.msra.gmra.mrb[4].mxu1 %vm426_vm2, %v17348_v31  ;;  %v6281_v6 = vcombine.high %v6273_v34, %v6273_v34 }
  0xf5   : > { %v3160_v43 = vsel %vm3158_vm9, %v3145_v8, %v3147_v42  ;;  %17357 = vmatmul.mubr.msk.f32.vlgmr.msra.gmra.mrb[0].mxu0 %vm426_vm2, %v17348_v31  ;;  %3320 = vmatprep.mubr.f32.mxu1 %v19073_v0 }
  0xf6   : > { %5589 = vrot.lane.b32.xlu1 %v5574_v1, %s19088_s13  ;;  %17362 = vmatprep.subr.msk.mxu0 %vm430_vm1, %v3160_v43  ;;  %v6620_v1 = vld [vmem:[%s19176_s22] sm:$0x77]  ;;  %v6621_v43 = vld [vmem:[%s19176_s22 + $0x8] sm:$0x77] }
  0xf7   : > { %5587 = vrot.lane.b32.xlu0 %v5581_v41, %s19088_s13  ;;  %3249 = vmatprep.mubr.f32.mxu0 %v19073_v0 }
  0xf8   : > { %v3149_v45 = vpop.permute.xlu1 %3148  ;;  %v3143_v46 = vpop.permute.xlu0 %3142 }
  0xf9   : > { %v3159_v48 = vsel %vm3158_vm9, %v3143_v46, %v3145_v8  ;;  %v3161_v54 = vsel %vm3158_vm9, %v3147_v42, %v3149_v45 }
  0xfa   : > { %5591 = vrot.lane.b32.xlu1 %v5582_v7, %s19088_s13  ;;  %17363 = vmatpush1.msk.msra.mxu0 %vm430_vm1, %v3159_v48  ;;  %v6628_v7 = vcombine.high %v6620_v1, %v6620_v1 }
  0xfb   : > { %5585 = vrot.lane.b32.xlu0 %v5573_v4, %s19088_s13  ;;  %17364 = vmatmul.mubr.msk.f32.vlgmr.msra.gmra.mrb[2].mxu0 %vm426_vm2, %v17361_v47  ;;  %v17387_v4 = vld [vmem:[%s21905_s1 + $0x50] sm:$0xff] }
  0xfc   : > { %v3153_v51 = vpop.permute.xlu1 %3152  ;;  %v3151_v52 = vpop.permute.xlu0 %3150  ;;  %3391 = vmatprep.mubr.f32.mxu0 %v19073_v0 }
  0xfd   : > { %v3162_v53 = vsel %vm3158_vm9, %v3149_v45, %v3151_v52  ;;  %v3163_v61 = vsel %vm3158_vm9, %v3151_v52, %v3153_v51 }
  0xfe   : > { %5595 = vrot.lane.b32.xlu1 %v5583_v49, %s19088_s13  ;;  %17365 = vmatprep.subr.msk.mxu1 %vm430_vm1, %v3162_v53 }
  0xff   : > { %5593 = vrot.lane.b32.xlu0 %v5575_v44, %s19088_s13  ;;  %17366 = vmatpush1.msk.msra.mxu1 %vm430_vm1, %v3161_v54 }
 0x100   : > { %v3157_v56 = vpop.permute.xlu1 %3156  ;;  %v3155_v57 = vpop.permute.xlu0 %3154  ;;  %17367 = vmatmul.mubr.msk.f32.vlgmr.msra.gmra.mrb[2].mxu1 %vm426_vm2, %v17361_v47 }
 0x101   : > { %v3165_v59 = vsel %vm3158_vm9, %v3155_v57, %v3157_v56  ;;  %17371 = vmatprep.subr.msk.mxu1 %vm430_vm1, %v3157_v56  ;;  %v3164_v60 = vsel %vm3158_vm9, %v3153_v51, %v3155_v57  ;;  %3462 = vmatprep.mubr.f32.mxu1 %v19073_v0  ;;  %vm6299_vm9 = vcmask 244736  }
 0x102   : > { %5599 = vrot.lane.b32.xlu1 %v5584_v55, %s19088_s13  ;;  %17368 = vmatprep.subr.msk.mxu0 %vm430_vm1, %v3164_v60  ;;  %v6623_v55 = vld [vmem:[%s19176_s22 + $0x18] sm:$0x77] }
 0x103   : > { %5597 = vrot.lane.b32.xlu0 %v5576_v50, %s19088_s13  ;;  %17372 = vmatpush1.msk.msra.mxu1 %vm430_vm1, %v3165_v59  ;;  %v6622_v50 = vld [vmem:[%s19176_s22 + $0x10] sm:$0x77]  ;;  %v6631_v60 = vcombine.high %v6623_v55, %v6623_v55 }
 0x104   : > { %17369 = vmatpush1.msk.msra.mxu0 %vm430_vm1, %v3163_v61  ;;  %v3496_v9 = vpop.permute.xlu1 %3495  ;;  %17373 = vmatmul.mubr.msk.f32.vlgmr.msra.gmra.mrb[4].mxu1 %vm426_vm2, %v17361_v47  ;;  %v6630_v54 = vcombine.high %v6622_v50, %v6622_v50 }
 0x105   : > { %v3494_v10 = vpop.permute.xlu0 %3493  ;;  %17370 = vmatmul.mubr.msk.f32.vlgmr.msra.gmra.mrb[0].mxu0 %vm426_vm2, %v17361_v47  ;;  %3669 = vmatprep.mubr.f32.mxu1 %v19073_v0  ;;  %v6629_v47 = vcombine.high %v6621_v43, %v6621_v43 }
 0x106   : > { %5938 = vrot.lane.b32.xlu1 %v5923_v62, %s19089_s19  ;;  %v3509_v12 = vsel %vm3507_vm10, %v3494_v10, %v3496_v9  ;;  %3598 = vmatprep.mubr.f32.mxu0 %v19073_v0  ;;  %v6969_v62 = vld [vmem:[%s19176_s22] sm:$0x77] }
 0x107   : > { %5936 = vrot.lane.b32.xlu0 %v5930_v63, %s19089_s19  ;;  %17375 = vmatprep.subr.msk.mxu0 %vm430_vm1, %v3509_v12  ;;  %v6977_v12 = vcombine.high %v6969_v62, %v6969_v62 }
 0x109   : > { %v3498_v14 = vpop.permute.xlu1 %3497 }
 0x10a   : > { %5940 = vrot.lane.b32.xlu1 %v5931_v11, %s19089_s19  ;;  %v3492_v15 = vpop.permute.xlu0 %3491  ;;  %v3510_v24 = vsel %vm3507_vm10, %v3496_v9, %v3498_v14  ;;  %v6970_v11 = vld [vmem:[%s19176_s22 + $0x8] sm:$0x77] }
 0x10b   : > { %5934 = vrot.lane.b32.xlu0 %v5922_v58, %s19089_s19  ;;  %v3508_v18 = vsel %vm3507_vm10, %v3492_v15, %v3494_v10  ;;  %v17400_v58 = vld [vmem:[%s21905_s1 + $0x58] sm:$0xff] }
 0x10c   : > { %17376 = vmatpush1.msk.msra.mxu0 %vm430_vm1, %v3508_v18 }
 0x10d   : > { %17377 = vmatmul.mubr.msk.f32.vlgmr.msra.gmra.mrb[2].mxu0 %vm426_vm2, %v17374_v17  ;;  %v3502_v20 = vpop.permute.xlu1 %3501 }
 0x10e   : > { %5944 = vrot.lane.b32.xlu1 %v5932_v16, %s19089_s19  ;;  %v3500_v21 = vpop.permute.xlu0 %3499  ;;  %3740 = vmatprep.mubr.f32.mxu0 %v19073_v0  ;;  %v6978_v16 = vcombine.high %v6970_v11, %v6970_v11 }
 0x10f   : > { %5942 = vrot.lane.b32.xlu0 %v5924_v13, %s19089_s19  ;;  %v3511_v23 = vsel %vm3507_vm10, %v3498_v14, %v3500_v21  ;;  %v3512_v33 = vsel %vm3507_vm10, %v3500_v21, %v3502_v20 }
 0x110   : > { %17378 = vmatprep.subr.msk.mxu1 %vm430_vm1, %v3511_v23 }
 0x111   : > { %17379 = vmatpush1.msk.msra.mxu1 %vm430_vm1, %v3510_v24  ;;  %v6972_v24 = vld [vmem:[%s19176_s22 + $0x18] sm:$0x77] }
 0x112   : > { %5948 = vrot.lane.b32.xlu1 %v5933_v22, %s19089_s19  ;;  %17380 = vmatmul.mubr.msk.f32.vlgmr.msra.gmra.mrb[2].mxu1 %vm426_vm2, %v17374_v17 }
 0x113   : > { %5946 = vrot.lane.b32.xlu0 %v5925_v19, %s19089_s19  ;;  %3811 = vmatprep.mubr.f32.mxu1 %v19073_v0  ;;  %v6971_v19 = vld [vmem:[%s19176_s22 + $0x10] sm:$0x77] }
 0x114   : > { %v3506_v28 = vpop.permute.xlu1 %3505  ;;  %v3504_v29 = vpop.permute.xlu0 %3503  ;;  %v6979_v23 = vcombine.high %v6971_v19, %v6971_v19 }
 0x115   : > { %v3514_v30 = vsel %vm3507_vm10, %v3504_v29, %v3506_v28  ;;  %17384 = vmatprep.subr.msk.mxu1 %vm430_vm1, %v3506_v28  ;;  %v3513_v31 = vsel %vm3507_vm10, %v3502_v20, %v3504_v29  ;;  %v6980_v29 = vcombine.high %v6972_v24, %v6972_v24  ;;  %vm6648_vm10 = vcmask 236544  }
 0x116   : > { %6287 = vrot.lane.b32.xlu1 %v6272_v26, %s19090_s30  ;;  %17381 = vmatprep.subr.msk.mxu0 %vm430_vm1, %v3513_v31  ;;  %v7643_v31 = vld [vmem:[%s19176_s22 + $0x4] sm:$0x77] }
 0x117   : > { %6285 = vrot.lane.b32.xlu0 %v6279_v27, %s19090_s30  ;;  %17385 = vmatpush1.msk.msra.mxu1 %vm430_vm1, %v3514_v30  ;;  %v17413_v27 = vld [vmem:[%s21905_s1 + $0x60] sm:$0xff] }
 0x118   : > { %17382 = vmatpush1.msk.msra.mxu0 %vm430_vm1, %v3512_v33  ;;  %v3845_v35 = vpop.permute.xlu1 %3844  ;;  %v3843_v36 = vpop.permute.xlu0 %3842  ;;  %17386 = vmatmul.mubr.msk.f32.vlgmr.msra.gmra.mrb[4].mxu1 %vm426_vm2, %v17374_v17 }
 0x119   : > { %v3858_v2 = vsel %vm3856_vm11, %v3843_v36, %v3845_v35  ;;  %17383 = vmatmul.mubr.msk.f32.vlgmr.msra.gmra.mrb[0].mxu0 %vm426_vm2, %v17374_v17  ;;  %4018 = vmatprep.mubr.f32.mxu1 %v19073_v0 }
 0x11a   : > { %6289 = vrot.lane.b32.xlu1 %v6280_v32, %s19090_s30  ;;  %17388 = vmatprep.subr.msk.mxu0 %vm430_vm1, %v3858_v2 }
 0x11b   : > { %6283 = vrot.lane.b32.xlu0 %v6271_v25, %s19090_s30  ;;  %3947 = vmatprep.mubr.f32.mxu0 %v19073_v0 }
 0x11c   : > { %v3847_v38 = vpop.permute.xlu1 %3846 }
 0x11d   : > { %v3841_v5 = vpop.permute.xlu0 %3840  ;;  %v3859_v8 = vsel %vm3856_vm11, %v3845_v35, %v3847_v38  ;;  %v7644_v35 = vld [vmem:[%s19176_s22 + $0xc] sm:$0x77] }
 0x11e   : > { %v3857_v39 = vsel %vm3856_vm11, %v3841_v5, %v3843_v36  ;;  %6293 = vrot.lane.b32.xlu1 %v6281_v6, %s19090_s30  ;;  %v7651_v36 = vcombine.high %v7643_v31, %v7643_v31 }
 0x11f   : > { %6291 = vrot.lane.b32.xlu0 %v6273_v34, %s19090_s30  ;;  %17389 = vmatpush1.msk.msra.mxu0 %vm430_vm1, %v3857_v39  ;;  %v7645_v39 = vld [vmem:[%s19176_s22 + $0x14] sm:$0x77] }
 0x120   : > { %v3851_v40 = vpop.permute.xlu1 %3850  ;;  %17390 = vmatmul.mubr.msk.f32.vlgmr.msra.gmra.mrb[2].mxu0 %vm426_vm2, %v17387_v4 }
 0x121   : > { %v3849_v41 = vpop.permute.xlu0 %3848  ;;  %4089 = vmatprep.mubr.f32.mxu0 %v19073_v0 }
 0x122   : > { %6297 = vrot.lane.b32.xlu1 %v6282_v3, %s19090_s30  ;;  %v3860_v42 = vsel %vm3856_vm11, %v3847_v38, %v3849_v41  ;;  %v3861_v49 = vsel %vm3856_vm11, %v3849_v41, %v3851_v40  ;;  %v7652_v38 = vcombine.high %v7644_v35, %v7644_v35  ;;  %v7653_v41 = vcombine.high %v7645_v39, %v7645_v39 }
 0x123   : > { %6295 = vrot.lane.b32.xlu0 %v6274_v37, %s19090_s30  ;;  %17391 = vmatprep.subr.msk.mxu1 %vm430_vm1, %v3860_v42  ;;  %v7646_v42 = vld [vmem:[%s19176_s22 + $0x1c] sm:$0x77]  ;;  %s19096_s30 = smov 58  }
 0x124   : > { %17392 = vmatpush1.msk.msra.mxu1 %vm430_vm1, %v3859_v8  ;;  %v3855_v44 = vpop.permute.xlu1 %3854 }
 0x125   : > { %v3853_v45 = vpop.permute.xlu0 %3852  ;;  %17397 = vmatprep.subr.msk.mxu1 %vm430_vm1, %v3855_v44  ;;  %17393 = vmatmul.mubr.msk.f32.vlgmr.msra.gmra.mrb[2].mxu1 %vm426_vm2, %v17387_v4 }
 0x126   : > { %v3863_v46 = vsel %vm3856_vm11, %v3853_v45, %v3855_v44  ;;  %6636 = vrot.lane.b32.xlu1 %v6621_v43, %s19091_s15  ;;  %v3862_v48 = vsel %vm3856_vm11, %v3851_v40, %v3853_v45  ;;  %4160 = vmatprep.mubr.f32.mxu1 %v19073_v0  ;;  %v7654_v45 = vcombine.high %v7646_v42, %v7646_v42 }
 0x127   : > { %6634 = vrot.lane.b32.xlu0 %v6628_v7, %s19091_s15  ;;  %17394 = vmatprep.subr.msk.mxu0 %vm430_vm1, %v3862_v48  ;;  %v17426_v7 = vld [vmem:[%s21905_s1 + $0x68] sm:$0xff] }
 0x128   : > { %17398 = vmatpush1.msk.msra.mxu1 %vm430_vm1, %v3863_v46  ;;  %17395 = vmatpush1.msk.msra.mxu0 %vm430_vm1, %v3861_v49  ;;  %v4194_v51 = vpop.permute.xlu1 %4193 }
 0x129   : > { %v4192_v52 = vpop.permute.xlu0 %4191  ;;  %17396 = vmatmul.mubr.msk.f32.vlgmr.msra.gmra.mrb[0].mxu0 %vm426_vm2, %v17387_v4  ;;  %17399 = vmatmul.mubr.msk.f32.vlgmr.msra.gmra.mrb[4].mxu1 %vm426_vm2, %v17387_v4 }
 0x12a   : > { %6638 = vrot.lane.b32.xlu1 %v6629_v47, %s19091_s15  ;;  %v4207_v53 = vsel %vm4205_vm12, %v4192_v52, %v4194_v51  ;;  %4367 = vmatprep.mubr.f32.mxu1 %v19073_v0  ;;  %v7991_v47 = vld [vmem:[%s19176_s22 + $0x4] sm:$0x77] }
 0x12b   : > { %6632 = vrot.lane.b32.xlu0 %v6620_v1, %s19091_s15  ;;  %17401 = vmatprep.subr.msk.mxu0 %vm430_vm1, %v4207_v53 }
 0x12c   : > { %v4196_v56 = vpop.permute.xlu1 %4195  ;;  %4296 = vmatprep.mubr.f32.mxu0 %v19073_v0 }
 0x12d   : > { %v4190_v57 = vpop.permute.xlu0 %4189  ;;  %v4208_v10 = vsel %vm4205_vm12, %v4194_v51, %v4196_v56  ;;  %v7992_v51 = vld [vmem:[%s19176_s22 + $0xc] sm:$0x77] }
 0x12e   : > { %v4206_v59 = vsel %vm4205_vm12, %v4190_v57, %v4192_v52  ;;  %6642 = vrot.lane.b32.xlu1 %v6630_v54, %s19091_s15  ;;  %v7999_v52 = vcombine.high %v7991_v47, %v7991_v47 }
 0x12f   : > { %6640 = vrot.lane.b32.xlu0 %v6622_v50, %s19091_s15  ;;  %17402 = vmatpush1.msk.msra.mxu0 %vm430_vm1, %v4206_v59  ;;  %v7993_v59 = vld [vmem:[%s19176_s22 + $0x14] sm:$0x77] }
 0x130   : > { %v4200_v61 = vpop.permute.xlu1 %4199  ;;  %17403 = vmatmul.mubr.msk.f32.vlgmr.msra.gmra.mrb[2].mxu0 %vm426_vm2, %v17400_v58 }
 0x131   : > { %v4198_v63 = vpop.permute.xlu0 %4197  ;;  %4438 = vmatprep.mubr.f32.mxu0 %v19073_v0 }
 0x132   : > { %6646 = vrot.lane.b32.xlu1 %v6631_v60, %s19091_s15  ;;  %v4209_v9 = vsel %vm4205_vm12, %v4196_v56, %v4198_v63  ;;  %v4210_v18 = vsel %vm4205_vm12, %v4198_v63, %v4200_v61  ;;  %v8000_v56 = vcombine.high %v7992_v51, %v7992_v51  ;;  %v8001_v63 = vcombine.high %v7993_v59, %v7993_v59 }
 0x133   : > { %6644 = vrot.lane.b32.xlu0 %v6623_v55, %s19091_s15  ;;  %17404 = vmatprep.subr.msk.mxu1 %vm430_vm1, %v4209_v9  ;;  %v7994_v9 = vld [vmem:[%s19176_s22 + $0x1c] sm:$0x77]  ;;  %s19099_s15 = smov 112  }
 0x134   : > { %17405 = vmatpush1.msk.msra.mxu1 %vm430_vm1, %v4208_v10  ;;  %v4204_v13 = vpop.permute.xlu1 %4203 }
 0x135   : > { %v4202_v14 = vpop.permute.xlu0 %4201  ;;  %17410 = vmatprep.subr.msk.mxu1 %vm430_vm1, %v4204_v13  ;;  %17406 = vmatmul.mubr.msk.f32.vlgmr.msra.gmra.mrb[2].mxu1 %vm426_vm2, %v17400_v58 }
 0x136   : > { %v4212_v15 = vsel %vm4205_vm12, %v4202_v14, %v4204_v13  ;;  %6985 = vrot.lane.b32.xlu1 %v6970_v11, %s19092_s20  ;;  %v4211_v17 = vsel %vm4205_vm12, %v4200_v61, %v4202_v14  ;;  %4509 = vmatprep.mubr.f32.mxu1 %v19073_v0  ;;  %v8002_v14 = vcombine.high %v7994_v9, %v7994_v9  ;;  %vm6997_vm12 = vcmask 228352  }
 0x137   : > { %6983 = vrot.lane.b32.xlu0 %v6977_v12, %s19092_s20  ;;  %17407 = vmatprep.subr.msk.mxu0 %vm430_vm1, %v4211_v17  ;;  %v17439_v12 = vld [vmem:[%s21905_s1 + $0x70] sm:$0xff] }
 0x138   : > { %17411 = vmatpush1.msk.msra.mxu1 %vm430_vm1, %v4212_v15  ;;  %17408 = vmatpush1.msk.msra.mxu0 %vm430_vm1, %v4210_v18  ;;  %v4543_v20 = vpop.permute.xlu1 %4542 }
 0x139   : > { %v4541_v21 = vpop.permute.xlu0 %4540  ;;  %17409 = vmatmul.mubr.msk.f32.vlgmr.msra.gmra.mrb[0].mxu0 %vm426_vm2, %v17400_v58  ;;  %17412 = vmatmul.mubr.msk.f32.vlgmr.msra.gmra.mrb[4].mxu1 %vm426_vm2, %v17400_v58 }
 0x13a   : > { %6987 = vrot.lane.b32.xlu1 %v6978_v16, %s19092_s20  ;;  %v4556_v22 = vsel %vm4554_vm13, %v4541_v21, %v4543_v20  ;;  %4716 = vmatprep.mubr.f32.mxu1 %v19073_v0  ;;  %v8339_v16 = vld [vmem:[%s19176_s22 + $0x4] sm:$0x77] }
 0x13b   : > { %6981 = vrot.lane.b32.xlu0 %v6969_v62, %s19092_s20  ;;  %17414 = vmatprep.subr.msk.mxu0 %vm430_vm1, %v4556_v22 }
 0x13c   : > { %v4545_v25 = vpop.permute.xlu1 %4544  ;;  %4645 = vmatprep.mubr.f32.mxu0 %v19073_v0 }
 0x13d   : > { %v4539_v26 = vpop.permute.xlu0 %4538  ;;  %v4557_v34 = vsel %vm4554_vm13, %v4543_v20, %v4545_v25  ;;  %v8340_v20 = vld [vmem:[%s19176_s22 + $0xc] sm:$0x77] }
 0x13e   : > { %v4555_v28 = vsel %vm4554_vm13, %v4539_v26, %v4541_v21  ;;  %6991 = vrot.lane.b32.xlu1 %v6979_v23, %s19092_s20  ;;  %v8347_v21 = vcombine.high %v8339_v16, %v8339_v16 }
 0x13f   : > { %6989 = vrot.lane.b32.xlu0 %v6971_v19, %s19092_s20  ;;  %17415 = vmatpush1.msk.msra.mxu0 %vm430_vm1, %v4555_v28  ;;  %v8341_v28 = vld [vmem:[%s19176_s22 + $0x14] sm:$0x77] }
 0x140   : > { %v4549_v30 = vpop.permute.xlu1 %4548  ;;  %17416 = vmatmul.mubr.msk.f32.vlgmr.msra.gmra.mrb[2].mxu0 %vm426_vm2, %v17413_v27 }
 0x141   : > { %v4547_v32 = vpop.permute.xlu0 %4546  ;;  %4787 = vmatprep.mubr.f32.mxu0 %v19073_v0 }
 0x142   : > { %6995 = vrot.lane.b32.xlu1 %v6980_v29, %s19092_s20  ;;  %v4558_v33 = vsel %vm4554_vm13, %v4545_v25, %v4547_v32  ;;  %v4559_v4 = vsel %vm4554_vm13, %v4547_v32, %v4549_v30  ;;  %v8348_v25 = vcombine.high %v8340_v20, %v8340_v20  ;;  %v8349_v32 = vcombine.high %v8341_v28, %v8341_v28 }
 0x143   : > { %6993 = vrot.lane.b32.xlu0 %v6972_v24, %s19092_s20  ;;  %17417 = vmatprep.subr.msk.mxu1 %vm430_vm1, %v4558_v33  ;;  %v8342_v33 = vld [vmem:[%s19176_s22 + $0x1c] sm:$0x77] }
 0x144   : > { %17418 = vmatpush1.msk.msra.mxu1 %vm430_vm1, %v4557_v34  ;;  %v4553_v2 = vpop.permute.xlu1 %4552 }
 0x145   : > { %v4551_v6 = vpop.permute.xlu0 %4550  ;;  %17423 = vmatprep.subr.msk.mxu1 %vm430_vm1, %v4553_v2  ;;  %17419 = vmatmul.mubr.msk.f32.vlgmr.msra.gmra.mrb[2].mxu1 %vm426_vm2, %v17413_v27 }
 0x146   : > { %v4561_v37 = vsel %vm4554_vm13, %v4551_v6, %v4553_v2  ;;  %7659 = vrot.lane.b32.xlu1 %v7644_v35, %s19074_s23  ;;  %v4560_v5 = vsel %vm4554_vm13, %v4549_v30, %v4551_v6  ;;  %4858 = vmatprep.mubr.f32.mxu1 %v19073_v0  ;;  %v8350_v6 = vcombine.high %v8342_v33, %v8342_v33 }
 0x147   : > { %7657 = vrot.lane.b32.xlu0 %v7651_v36, %s19074_s23  ;;  %17420 = vmatprep.subr.msk.mxu0 %vm430_vm1, %v4560_v5  ;;  %v17452_v36 = vld [vmem:[%s21905_s1 + $0x78] sm:$0xff] }
 0x148   : > { %17424 = vmatpush1.msk.msra.mxu1 %vm430_vm1, %v4561_v37  ;;  %17421 = vmatpush1.msk.msra.mxu0 %vm430_vm1, %v4559_v4  ;;  %v4892_v3 = vpop.permute.xlu1 %4891 }
 0x149   : > { %v4890_v40 = vpop.permute.xlu0 %4889  ;;  %17422 = vmatmul.mubr.msk.f32.vlgmr.msra.gmra.mrb[0].mxu0 %vm426_vm2, %v17413_v27  ;;  %17425 = vmatmul.mubr.msk.f32.vlgmr.msra.gmra.mrb[4].mxu1 %vm426_vm2, %v17413_v27 }
 0x14a   : > { %7661 = vrot.lane.b32.xlu1 %v7652_v38, %s19074_s23  ;;  %v4905_v1 = vsel %vm4903_vm14, %v4890_v40, %v4892_v3  ;;  %5065 = vmatprep.mubr.f32.mxu1 %v19073_v0  ;;  %v8687_v38 = vld [vmem:[%s19176_s22 + $0x4] sm:$0x77] }
 0x14b   : > { %7655 = vrot.lane.b32.xlu0 %v7643_v31, %s19074_s23  ;;  %17427 = vmatprep.subr.msk.mxu0 %vm430_vm1, %v4905_v1 }
 0x14c   : > { %v4894_v8 = vpop.permute.xlu1 %4893  ;;  %4994 = vmatprep.mubr.f32.mxu0 %v19073_v0 }
 0x14d   : > { %v4888_v43 = vpop.permute.xlu0 %4887  ;;  %v4906_v50 = vsel %vm4903_vm14, %v4892_v3, %v4894_v8  ;;  %v8688_v3 = vld [vmem:[%s19176_s22 + $0xc] sm:$0x77] }
 0x14e   : > { %v4904_v44 = vsel %vm4903_vm14, %v4888_v43, %v4890_v40  ;;  %7665 = vrot.lane.b32.xlu1 %v7653_v41, %s19074_s23  ;;  %v8695_v40 = vcombine.high %v8687_v38, %v8687_v38 }
 0x14f   : > { %7663 = vrot.lane.b32.xlu0 %v7645_v39, %s19074_s23  ;;  %17428 = vmatpush1.msk.msra.mxu0 %vm430_vm1, %v4904_v44  ;;  %v8689_v44 = vld [vmem:[%s19176_s22 + $0x14] sm:$0x77] }
 0x150   : > { %v4898_v46 = vpop.permute.xlu1 %4897  ;;  %17429 = vmatmul.mubr.msk.f32.vlgmr.msra.gmra.mrb[2].mxu0 %vm426_vm2, %v17426_v7 }
 0x151   : > { %v4896_v48 = vpop.permute.xlu0 %4895  ;;  %5136 = vmatprep.mubr.f32.mxu0 %v19073_v0 }
 0x152   : > { %7669 = vrot.lane.b32.xlu1 %v7654_v45, %s19074_s23  ;;  %v4907_v49 = vsel %vm4903_vm14, %v4894_v8, %v4896_v48  ;;  %v4908_v58 = vsel %vm4903_vm14, %v4896_v48, %v4898_v46  ;;  %v8696_v8 = vcombine.high %v8688_v3, %v8688_v3 }
 0x153   : > { %7667 = vrot.lane.b32.xlu0 %v7646_v42, %s19074_s23  ;;  %17430 = vmatprep.subr.msk.mxu1 %vm430_vm1, %v4907_v49  ;;  %v8697_v49 = vcombine.high %v8689_v44, %v8689_v44 }
 0x154   : > { %17431 = vmatpush1.msk.msra.mxu1 %vm430_vm1, %v4906_v50  ;;  %v4902_v53 = vpop.permute.xlu1 %4901 }
 0x155   : > { %v4900_v54 = vpop.permute.xlu0 %4899  ;;  %17436 = vmatprep.subr.msk.mxu1 %vm430_vm1, %v4902_v53  ;;  %17432 = vmatmul.mubr.msk.f32.vlgmr.msra.gmra.mrb[2].mxu1 %vm426_vm2, %v17426_v7 }
 0x156   : > { %v4910_v55 = vsel %vm4903_vm14, %v4900_v54, %v4902_v53  ;;  %8007 = vrot.lane.b32.xlu1 %v7992_v51, %s19075_s24  ;;  %v4909_v57 = vsel %vm4903_vm14, %v4898_v46, %v4900_v54  ;;  %5207 = vmatprep.mubr.f32.mxu1 %v19073_v0  ;;  %v8690_v51 = vld [vmem:[%s19176_s22 + $0x1c] sm:$0x77]  ;;  %v19093_v53 = vmov 0   ;;  %vm11615_vm14 = vcmask 457728  }
 0x157   : > { %8005 = vrot.lane.b32.xlu0 %v7999_v52, %s19075_s24  ;;  %17433 = vmatprep.subr.msk.mxu0 %vm430_vm1, %v4909_v57  ;;  %v8698_v57 = vcombine.high %v8690_v51, %v8690_v51 }
 0x158   : > { %17437 = vmatpush1.msk.msra.mxu1 %vm430_vm1, %v4910_v55  ;;  %17434 = vmatpush1.msk.msra.mxu0 %vm430_vm1, %v4908_v58  ;;  %v5241_v60 = vpop.permute.xlu1 %5240  ;;  %v17465_v55 = vld [vmem:[%s21905_s1 + $0x80] sm:$0xff] }
 0x159   : > { %v5239_v61 = vpop.permute.xlu0 %5238  ;;  %17435 = vmatmul.mubr.msk.f32.vlgmr.msra.gmra.mrb[0].mxu0 %vm426_vm2, %v17426_v7  ;;  %17438 = vmatmul.mubr.msk.f32.vlgmr.msra.gmra.mrb[4].mxu1 %vm426_vm2, %v17426_v7 }
 0x15a   : > { %8009 = vrot.lane.b32.xlu1 %v8000_v56, %s19075_s24  ;;  %v5254_v62 = vsel %vm5252_vm15, %v5239_v61, %v5241_v60  ;;  %5414 = vmatprep.mubr.f32.mxu1 %v19073_v0 }
 0x15b   : > { %8003 = vrot.lane.b32.xlu0 %v7991_v47, %s19075_s24  ;;  %17440 = vmatprep.subr.msk.mxu0 %vm430_vm1, %v5254_v62 }
 0x15c   : > { %v5243_v10 = vpop.permute.xlu1 %5242  ;;  %5343 = vmatprep.mubr.f32.mxu0 %v19073_v0  ;;  %18786 = vset.pattern.permute.xlu0 %v19093_v53 }
 0x15d   : > { %v5237_v11 = vpop.permute.xlu0 %5236  ;;  %v5255_v19 = vsel %vm5252_vm15, %v5241_v60, %v5243_v10  ;;  %18787 = vset.pattern.permute.xlu1 %v19093_v53  ;;  %v7320_v53 = vld [vmem:[%s19176_s22 + $0x14] sm:$0x77] }
 0x15e   : > { %v5253_v13 = vsel %vm5252_vm15, %v5237_v11, %v5239_v61  ;;  %8013 = vrot.lane.b32.xlu1 %v8001_v63, %s19075_s24 }
 0x15f   : > { %8011 = vrot.lane.b32.xlu0 %v7993_v59, %s19075_s24  ;;  %17441 = vmatpush1.msk.msra.mxu0 %vm430_vm1, %v5253_v13 }
 0x160   : > { %v5247_v15 = vpop.permute.xlu1 %5246  ;;  %17442 = vmatmul.mubr.msk.f32.vlgmr.msra.gmra.mrb[2].mxu0 %vm426_vm2, %v17439_v12 }
 0x161   : > { %v5245_v17 = vpop.permute.xlu0 %5244  ;;  %5485 = vmatprep.mubr.f32.mxu0 %v19073_v0 }
 0x162   : > { %8017 = vrot.lane.b32.xlu1 %v8002_v14, %s19075_s24  ;;  %v5256_v18 = vsel %vm5252_vm15, %v5243_v10, %v5245_v17  ;;  %v5257_v27 = vsel %vm5252_vm15, %v5245_v17, %v5247_v15 }
 0x163   : > { %8015 = vrot.lane.b32.xlu0 %v7994_v9, %s19075_s24  ;;  %17443 = vmatprep.subr.msk.mxu1 %vm430_vm1, %v5256_v18  ;;  %v9033_v9 = vld [vmem:[%s21906_s2] sm:$0xff]  ;;  %v17478_v18 = vld [vmem:[%s21905_s1 + $0x88] sm:$0xff] }
 0x164   : > { %17444 = vmatpush1.msk.msra.mxu1 %vm430_vm1, %v5255_v19  ;;  %v5251_v22 = vpop.permute.xlu1 %5250  ;;  %v19864_v47 = vpop.f32.mrb[0].mxu1 }
 0x165   : > { %v5249_v23 = vpop.permute.xlu0 %5248  ;;  %17449 = vmatprep.subr.msk.mxu1 %vm430_vm1, %v5251_v22  ;;  %17445 = vmatmul.mubr.msk.f32.vlgmr.msra.gmra.mrb[2].mxu1 %vm426_vm2, %v17439_v12  ;;  %v19869_v50 = vpop.f32.mrb[1].mxu1 }
 0x166   : > { %v5259_v24 = vsel %vm5252_vm15, %v5249_v23, %v5251_v22  ;;  %8355 = vrot.lane.b32.xlu1 %v8340_v20, %s19076_s25  ;;  %v5258_v26 = vsel %vm5252_vm15, %v5247_v15, %v5249_v23  ;;  %5556 = vmatprep.mubr.f32.mxu1 %v19073_v0 }
 0x167   : > { %8353 = vrot.lane.b32.xlu0 %v8347_v21, %s19076_s25  ;;  %17446 = vmatprep.subr.msk.mxu0 %vm430_vm1, %v5258_v26 }
 0x168   : > { %17450 = vmatpush1.msk.msra.mxu1 %vm430_vm1, %v5259_v24  ;;  %17447 = vmatpush1.msk.msra.mxu0 %vm430_vm1, %v5257_v27  ;;  %v5590_v29 = vpop.permute.xlu1 %5589 }
 0x169   : > { %v5588_v30 = vpop.permute.xlu0 %5587  ;;  %17448 = vmatmul.mubr.msk.f32.vlgmr.msra.gmra.mrb[0].mxu0 %vm426_vm2, %v17439_v12  ;;  %17451 = vmatmul.mubr.msk.f32.vlgmr.msra.gmra.mrb[4].mxu1 %vm426_vm2, %v17439_v12 }
 0x16a   : > { %8357 = vrot.lane.b32.xlu1 %v8348_v25, %s19076_s25  ;;  %v5603_v31 = vsel %vm5601_vm7, %v5588_v30, %v5590_v29  ;;  %5763 = vmatprep.mubr.f32.mxu1 %v19073_v0 }
 0x16b   : > { %8351 = vrot.lane.b32.xlu0 %v8339_v16, %s19076_s25  ;;  %17453 = vmatprep.subr.msk.mxu0 %vm430_vm1, %v5603_v31 }
 0x16c   : > { %v5592_v34 = vpop.permute.xlu1 %5591  ;;  %5692 = vmatprep.mubr.f32.mxu0 %v19073_v0 }
 0x16d   : > { %v5586_v35 = vpop.permute.xlu0 %5585  ;;  %v5604_v39 = vsel %vm5601_vm7, %v5590_v29, %v5592_v34 }
 0x16e   : > { %v5602_v2 = vsel %vm5601_vm7, %v5586_v35, %v5588_v30  ;;  %8361 = vrot.lane.b32.xlu1 %v8349_v32, %s19076_s25 }
 0x16f   : > { %8359 = vrot.lane.b32.xlu0 %v8341_v28, %s19076_s25  ;;  %17454 = vmatpush1.msk.msra.mxu0 %vm430_vm1, %v5602_v2 }
 0x170   : > { %v5596_v37 = vpop.permute.xlu1 %5595  ;;  %17455 = vmatmul.mubr.msk.f32.vlgmr.msra.gmra.mrb[2].mxu0 %vm426_vm2, %v17452_v36 }
 0x171   : > { %v5594_v5 = vpop.permute.xlu0 %5593  ;;  %5834 = vmatprep.mubr.f32.mxu0 %v19073_v0 }
 0x172   : > { %8365 = vrot.lane.b32.xlu1 %v8350_v6, %s19076_s25  ;;  %v5605_v4 = vsel %vm5601_vm7, %v5592_v34, %v5594_v5  ;;  %v5606_v7 = vsel %vm5601_vm7, %v5594_v5, %v5596_v37  ;;  %v17491_v34 = vld [vmem:[%s21905_s1 + $0x90] sm:$0xff] }
 0x173   : > { %8363 = vrot.lane.b32.xlu0 %v8342_v33, %s19076_s25  ;;  %17456 = vmatprep.subr.msk.mxu1 %vm430_vm1, %v5605_v4  ;;  %s17811_s25 = sshll.u32 %s21917_s18, 4 }
 0x174   : > { %17457 = vmatpush1.msk.msra.mxu1 %vm430_vm1, %v5604_v39  ;;  %v5600_v1 = vpop.permute.xlu1 %5599 }
 0x175   : > { %v5598_v41 = vpop.permute.xlu0 %5597  ;;  %17462 = vmatprep.subr.msk.mxu1 %vm430_vm1, %v5600_v1  ;;  %17458 = vmatmul.mubr.msk.f32.vlgmr.msra.gmra.mrb[2].mxu1 %vm426_vm2, %v17452_v36 }
 0x176   : > { %v5608_v42 = vsel %vm5601_vm7, %v5598_v41, %v5600_v1  ;;  %8703 = vrot.lane.b32.xlu1 %v8688_v3, %s19077_s26  ;;  %v5607_v43 = vsel %vm5601_vm7, %v5596_v37, %v5598_v41  ;;  %5905 = vmatprep.mubr.f32.mxu1 %v19073_v0  ;;  %vm17106_vm7 = vcmask 687104  }
 0x177   : > { %8701 = vrot.lane.b32.xlu0 %v8695_v40, %s19077_s26  ;;  %17459 = vmatprep.subr.msk.mxu0 %vm430_vm1, %v5607_v43  ;;  %v17504_v43 = vld [vmem:[%s21905_s1 + $0x98] sm:$0xff] }
 0x178   : > { %17463 = vmatpush1.msk.msra.mxu1 %vm430_vm1, %v5608_v42  ;;  %17460 = vmatpush1.msk.msra.mxu0 %vm430_vm1, %v5606_v7  ;;  %v5939_v45 = vpop.permute.xlu1 %5938 }
 0x179   : > { %v5937_v46 = vpop.permute.xlu0 %5936  ;;  %17461 = vmatmul.mubr.msk.f32.vlgmr.msra.gmra.mrb[0].mxu0 %vm426_vm2, %v17452_v36  ;;  %17464 = vmatmul.mubr.msk.f32.vlgmr.msra.gmra.mrb[4].mxu1 %vm426_vm2, %v17452_v36 }
 0x17a   : > { %8705 = vrot.lane.b32.xlu1 %v8696_v8, %s19077_s26  ;;  %v5952_v48 = vsel %vm5950_vm8, %v5937_v46, %v5939_v45  ;;  %6112 = vmatprep.mubr.f32.mxu1 %v19073_v0 }
 0x17b   : > { %8699 = vrot.lane.b32.xlu0 %v8687_v38, %s19077_s26  ;;  %17466 = vmatprep.subr.msk.mxu0 %vm430_vm1, %v5952_v48 }
 0x17c   : > { %v5941_v52 = vpop.permute.xlu1 %5940  ;;  %6041 = vmatprep.mubr.f32.mxu0 %v19073_v0 }
 0x17d   : > { %v5935_v54 = vpop.permute.xlu0 %5934  ;;  %v5953_v61 = vsel %vm5950_vm8, %v5939_v45, %v5941_v52 }
 0x17e   : > { %v5951_v56 = vsel %vm5950_vm8, %v5935_v54, %v5937_v46  ;;  %8709 = vrot.lane.b32.xlu1 %v8697_v49, %s19077_s26  ;;  %v7319_v46 = vld [vmem:[%s19176_s22 + $0xc] sm:$0x77]  ;;  %v7318_v49 = vld [vmem:[%s19176_s22 + $0x4] sm:$0x77] }
 0x17f   : > { %8707 = vrot.lane.b32.xlu0 %v8689_v44, %s19077_s26  ;;  %17467 = vmatpush1.msk.msra.mxu0 %vm430_vm1, %v5951_v56  ;;  %v7327_v54 = vcombine.high %v7319_v46, %v7319_v46  ;;  %v7326_v56 = vcombine.high %v7318_v49, %v7318_v49 }
 0x180   : > { %v5945_v58 = vpop.permute.xlu1 %5944  ;;  %17468 = vmatmul.mubr.msk.f32.vlgmr.msra.gmra.mrb[2].mxu0 %vm426_vm2, %v17465_v55 }
 0x181   : > { %v5943_v59 = vpop.permute.xlu0 %5942  ;;  %6183 = vmatprep.mubr.f32.mxu0 %v19073_v0 }
 0x182   : > { %8713 = vrot.lane.b32.xlu1 %v8698_v57, %s19077_s26  ;;  %v5954_v60 = vsel %vm5950_vm8, %v5941_v52, %v5943_v59  ;;  %v5955_v12 = vsel %vm5950_vm8, %v5943_v59, %v5945_v58  ;;  %v7321_v59 = vld [vmem:[%s19176_s22 + $0x1c] sm:$0x77] }
 0x183   : > { %8711 = vrot.lane.b32.xlu0 %v8690_v51, %s19077_s26  ;;  %17469 = vmatprep.subr.msk.mxu1 %vm430_vm1, %v5954_v60 }
 0x184   : > { %17470 = vmatpush1.msk.msra.mxu1 %vm430_vm1, %v5953_v61  ;;  %v5949_v62 = vpop.permute.xlu1 %5948  ;;  %v7328_v61 = vcombine.high %v7320_v53, %v7320_v53 }
 0x185   : > { %v5947_v63 = vpop.permute.xlu0 %5946  ;;  %17475 = vmatprep.subr.msk.mxu1 %vm430_vm1, %v5949_v62  ;;  %17471 = vmatmul.mubr.msk.f32.vlgmr.msra.gmra.mrb[2].mxu1 %vm426_vm2, %v17465_v55 }
 0x186   : > { %v5957_v10 = vsel %vm5950_vm8, %v5947_v63, %v5949_v62  ;;  %v5956_v11 = vsel %vm5950_vm8, %v5945_v58, %v5947_v63  ;;  %6254 = vmatprep.mubr.f32.mxu1 %v19073_v0  ;;  %vm17113_vm8 = vcmask 1043456  }
 0x187   : > { %17472 = vmatprep.subr.msk.mxu0 %vm430_vm1, %v5956_v11  ;;  %17476 = vmatpush1.msk.msra.mxu1 %vm430_vm1, %v5957_v10  ;;  %v17517_v10 = vld [vmem:[%s21905_s1 + $0xa0] sm:$0xff] }
 0x188   : > { %17473 = vmatpush1.msk.msra.mxu0 %vm430_vm1, %v5955_v12  ;;  %v6288_v13 = vpop.permute.xlu1 %6287  ;;  %9036 = vperm.xlu0 %18786, %v9033_v9   ;;  %v7329_v9 = vcombine.high %v7321_v59, %v7321_v59 }
 0x189   : > { %v6286_v14 = vpop.permute.xlu0 %6285  ;;  %17474 = vmatmul.mubr.msk.f32.vlgmr.msra.gmra.mrb[0].mxu0 %vm426_vm2, %v17465_v55  ;;  %17477 = vmatmul.mubr.msk.f32.vlgmr.msra.gmra.mrb[4].mxu1 %vm426_vm2, %v17465_v55 }
 0x18a   : > { %v6301_v15 = vsel %vm6299_vm9, %v6286_v14, %v6288_v13  ;;  %6461 = vmatprep.mubr.f32.mxu1 %v19073_v0  ;;  %6390 = vmatprep.mubr.f32.mxu0 %v19073_v0 }
 0x18b   : > { %17479 = vmatprep.subr.msk.mxu0 %vm430_vm1, %v6301_v15 }
 0x18c   : > { %v6290_v16 = vpop.permute.xlu1 %6289 }
 0x18d   : > { %v6284_v17 = vpop.permute.xlu0 %6283  ;;  %v6302_v23 = vsel %vm6299_vm9, %v6288_v13, %v6290_v16 }
 0x18e   : > { %v6300_v19 = vsel %vm6299_vm9, %v6284_v17, %v6286_v14 }
 0x18f   : > { %17480 = vmatpush1.msk.msra.mxu0 %vm430_vm1, %v6300_v19 }
 0x190   : > { %v6294_v20 = vpop.permute.xlu1 %6293  ;;  %17481 = vmatmul.mubr.msk.f32.vlgmr.msra.gmra.mrb[2].mxu0 %vm426_vm2, %v17478_v18 }
 0x191   : > { %v6292_v21 = vpop.permute.xlu0 %6291  ;;  %6532 = vmatprep.mubr.f32.mxu0 %v19073_v0 }
 0x192   : > { %v6303_v22 = vsel %vm6299_vm9, %v6290_v16, %v6292_v21  ;;  %v6304_v28 = vsel %vm6299_vm9, %v6292_v21, %v6294_v20 }
 0x193   : > { %17482 = vmatprep.subr.msk.mxu1 %vm430_vm1, %v6303_v22 }
 0x194   : > { %17483 = vmatpush1.msk.msra.mxu1 %vm430_vm1, %v6302_v23  ;;  %v6298_v24 = vpop.permute.xlu1 %6297 }
 0x195   : > { %v6296_v25 = vpop.permute.xlu0 %6295  ;;  %17488 = vmatprep.subr.msk.mxu1 %vm430_vm1, %v6298_v24  ;;  %17484 = vmatmul.mubr.msk.f32.vlgmr.msra.gmra.mrb[2].mxu1 %vm426_vm2, %v17478_v18 }
 0x196   : > { %v6306_v26 = vsel %vm6299_vm9, %v6296_v25, %v6298_v24  ;;  %v6305_v27 = vsel %vm6299_vm9, %v6294_v20, %v6296_v25  ;;  %6603 = vmatprep.mubr.f32.mxu1 %v19073_v0  ;;  %vm17193_vm9 = vcmask 1024  }
 0x197   : > { %17485 = vmatprep.subr.msk.mxu0 %vm430_vm1, %v6305_v27  ;;  %17489 = vmatpush1.msk.msra.mxu1 %vm430_vm1, %v6306_v26 }
 0x198   : > { %17486 = vmatpush1.msk.msra.mxu0 %vm430_vm1, %v6304_v28  ;;  %v6637_v29 = vpop.permute.xlu1 %6636 }
 0x199   : > { %v6635_v30 = vpop.permute.xlu0 %6634  ;;  %17487 = vmatmul.mubr.msk.f32.vlgmr.msra.gmra.mrb[0].mxu0 %vm426_vm2, %v17478_v18  ;;  %17490 = vmatmul.mubr.msk.f32.vlgmr.msra.gmra.mrb[4].mxu1 %vm426_vm2, %v17478_v18  ;;  %v17530_v18 = vld [vmem:[%s21905_s1 + $0xa8] sm:$0xff] }
 0x19a   : > { %v6650_v31 = vsel %vm6648_vm10, %v6635_v30, %v6637_v29  ;;  %6810 = vmatprep.mubr.f32.mxu1 %v19073_v0  ;;  %6739 = vmatprep.mubr.f32.mxu0 %v19073_v0 }
 0x19b   : > { %17492 = vmatprep.subr.msk.mxu0 %vm430_vm1, %v6650_v31 }
 0x19c   : > { %v6639_v32 = vpop.permute.xlu1 %6638 }
 0x19d   : > { %v6633_v33 = vpop.permute.xlu0 %6632  ;;  %v6651_v37 = vsel %vm6648_vm10, %v6637_v29, %v6639_v32 }
 0x19e   : > { %v6649_v35 = vsel %vm6648_vm10, %v6633_v33, %v6635_v30  ;;  %v17543_v30 = vld [vmem:[%s21905_s1 + $0xb0] sm:$0xff] }
 0x19f   : > { %17493 = vmatpush1.msk.msra.mxu0 %vm430_vm1, %v6649_v35 }
 0x1a0   : > { %v6643_v36 = vpop.permute.xlu1 %6642  ;;  %17494 = vmatmul.mubr.msk.f32.vlgmr.msra.gmra.mrb[2].mxu0 %vm426_vm2, %v17491_v34 }
 0x1a1   : > { %v6641_v2 = vpop.permute.xlu0 %6640  ;;  %6881 = vmatprep.mubr.f32.mxu0 %v19073_v0 }
 0x1a2   : > { %v6652_v6 = vsel %vm6648_vm10, %v6639_v32, %v6641_v2  ;;  %v6653_v3 = vsel %vm6648_vm10, %v6641_v2, %v6643_v36 }
 0x1a3   : > { %17495 = vmatprep.subr.msk.mxu1 %vm430_vm1, %v6652_v6 }
 0x1a4   : > { %17496 = vmatpush1.msk.msra.mxu1 %vm430_vm1, %v6651_v37  ;;  %v6647_v38 = vpop.permute.xlu1 %6646 }
 0x1a5   : > { %v6645_v5 = vpop.permute.xlu0 %6644  ;;  %17501 = vmatprep.subr.msk.mxu1 %vm430_vm1, %v6647_v38  ;;  %17497 = vmatmul.mubr.msk.f32.vlgmr.msra.gmra.mrb[2].mxu1 %vm426_vm2, %v17491_v34 }
 0x1a6   : > { %v6655_v4 = vsel %vm6648_vm10, %v6645_v5, %v6647_v38  ;;  %v6654_v39 = vsel %vm6648_vm10, %v6643_v36, %v6645_v5  ;;  %6952 = vmatprep.mubr.f32.mxu1 %v19073_v0 }
 0x1a7   : > { %17498 = vmatprep.subr.msk.mxu0 %vm430_vm1, %v6654_v39  ;;  %17502 = vmatpush1.msk.msra.mxu1 %vm430_vm1, %v6655_v4 }
 0x1a8   : > { %17499 = vmatpush1.msk.msra.mxu0 %vm430_vm1, %v6653_v3  ;;  %v6986_v40 = vpop.permute.xlu1 %6985 }
 0x1a9   : > { %v6984_v1 = vpop.permute.xlu0 %6983  ;;  %17500 = vmatmul.mubr.msk.f32.vlgmr.msra.gmra.mrb[0].mxu0 %vm426_vm2, %v17491_v34  ;;  %17503 = vmatmul.mubr.msk.f32.vlgmr.msra.gmra.mrb[4].mxu1 %vm426_vm2, %v17491_v34 }
 0x1aa   : > { %v6999_v41 = vsel %vm6997_vm12, %v6984_v1, %v6986_v40  ;;  %7088 = vmatprep.mubr.f32.mxu0 %v19073_v0  ;;  %7159 = vmatprep.mubr.f32.mxu1 %v19073_v0 }
 0x1ab   : > { %17505 = vmatprep.subr.msk.mxu0 %vm430_vm1, %v6999_v41 }
 0x1ac   : > { %v6988_v42 = vpop.permute.xlu1 %6987 }
 0x1ad   : > { %v6982_v8 = vpop.permute.xlu0 %6981  ;;  %v7000_v51 = vsel %vm6997_vm12, %v6986_v40, %v6988_v42 }
 0x1ae   : > { %v6998_v7 = vsel %vm6997_vm12, %v6982_v8, %v6984_v1  ;;  %v17556_v1 = vld [vmem:[%s21905_s1 + $0xb8] sm:$0xff] }
 0x1af   : > { %17506 = vmatpush1.msk.msra.mxu0 %vm430_vm1, %v6998_v7 }
 0x1b0   : > { %v6992_v44 = vpop.permute.xlu1 %6991  ;;  %17507 = vmatmul.mubr.msk.f32.vlgmr.msra.gmra.mrb[2].mxu0 %vm426_vm2, %v17504_v43 }
 0x1b1   : > { %v6990_v45 = vpop.permute.xlu0 %6989  ;;  %7230 = vmatprep.mubr.f32.mxu0 %v19073_v0 }
 0x1b2   : > { %v7001_v48 = vsel %vm6997_vm12, %v6988_v42, %v6990_v45  ;;  %v7002_v60 = vsel %vm6997_vm12, %v6990_v45, %v6992_v44 }
 0x1b3   : > { %17508 = vmatprep.subr.msk.mxu1 %vm430_vm1, %v7001_v48 }
 0x1b4   : > { %17509 = vmatpush1.msk.msra.mxu1 %vm430_vm1, %v7000_v51  ;;  %v6996_v52 = vpop.permute.xlu1 %6995 }
 0x1b5   : > { %v6994_v55 = vpop.permute.xlu0 %6993  ;;  %17514 = vmatprep.subr.msk.mxu1 %vm430_vm1, %v6996_v52  ;;  %17510 = vmatmul.mubr.msk.f32.vlgmr.msra.gmra.mrb[2].mxu1 %vm426_vm2, %v17504_v43 }
 0x1b6   : > { %v7004_v57 = vsel %vm6997_vm12, %v6994_v55, %v6996_v52  ;;  %v7003_v58 = vsel %vm6997_vm12, %v6992_v44, %v6994_v55  ;;  %7301 = vmatprep.mubr.f32.mxu1 %v19073_v0 }
 0x1b7   : > { %17511 = vmatprep.subr.msk.mxu0 %vm430_vm1, %v7003_v58  ;;  %17515 = vmatpush1.msk.msra.mxu1 %vm430_vm1, %v7004_v57 }
 0x1b8   : > { %17512 = vmatpush1.msk.msra.mxu0 %vm430_vm1, %v7002_v60  ;;  %v7660_v62 = vpop.permute.xlu1 %7659  ;;  %17521 = vmatprep.subr.msk.mxu1 %vm430_vm1, %v7327_v54 }
 0x1b9   : > { %17513 = vmatmul.mubr.msk.f32.vlgmr.msra.gmra.mrb[0].mxu0 %vm426_vm2, %v17504_v43  ;;  %v7658_v63 = vpop.permute.xlu0 %7657  ;;  %17518 = vmatprep.subr.msk.mxu0 %vm430_vm1, %v7326_v56  ;;  %v17569_v56 = vld [vmem:[%s21905_s1 + $0xc0] sm:$0xff] }
 0x1ba   : > { %17516 = vmatmul.mubr.msk.f32.vlgmr.msra.gmra.mrb[4].mxu1 %vm426_vm2, %v17504_v43  ;;  %17519 = vmatpush1.msk.msra.mxu0 %vm430_vm1, %v7318_v49  ;;  %v7672_v13 = vsel %vm418_vm0, %v7658_v63, %v7660_v62 }
 0x1bb   : > { %7413 = vmatprep.mubr.f32.mxu0 %v19073_v0  ;;  %17524 = vmatprep.subr.msk.mxu0 %vm430_vm1, %v7328_v61 }
 0x1bc   : > { %v7662_v11 = vpop.permute.xlu1 %7661  ;;  %17522 = vmatpush1.msk.msra.mxu1 %vm430_vm1, %v7319_v46  ;;  %7484 = vmatprep.mubr.f32.mxu1 %v19073_v0 }
 0x1bd   : > { %17520 = vmatmul.mubr.msk.f32.vlgmr.msra.gmra.mrb[2].mxu0 %vm426_vm2, %v17517_v10  ;;  %v7656_v12 = vpop.permute.xlu0 %7655  ;;  %17527 = vmatprep.subr.msk.mxu1 %vm430_vm1, %v7329_v9  ;;  %v7673_v19 = vsel %vm418_vm0, %v7660_v62, %v7662_v11 }
 0x1be   : > { %17525 = vmatpush1.msk.msra.mxu0 %vm430_vm1, %v7320_v53  ;;  %17523 = vmatmul.mubr.msk.f32.vlgmr.msra.gmra.mrb[2].mxu1 %vm426_vm2, %v17517_v10  ;;  %v7671_v15 = vsel %vm418_vm0, %v7656_v12, %v7658_v63 }
 0x1bf   : > { %17531 = vmatprep.subr.msk.mxu0 %vm430_vm1, %v7672_v13  ;;  %7555 = vmatprep.mubr.f32.mxu0 %v19073_v0 }
 0x1c0   : > { %v7666_v14 = vpop.permute.xlu1 %7665  ;;  %17528 = vmatpush1.msk.msra.mxu1 %vm430_vm1, %v7321_v59  ;;  %7626 = vmatprep.mubr.f32.mxu1 %v19073_v0 }
 0x1c1   : > { %17526 = vmatmul.mubr.msk.f32.vlgmr.msra.gmra.mrb[0].mxu0 %vm426_vm2, %v17517_v10  ;;  %v7664_v16 = vpop.permute.xlu0 %7663 }
 0x1c2   : > { %17532 = vmatpush1.msk.msra.mxu0 %vm430_vm1, %v7671_v15  ;;  %17529 = vmatmul.mubr.msk.f32.vlgmr.msra.gmra.mrb[4].mxu1 %vm426_vm2, %v17517_v10  ;;  %v7674_v17 = vsel %vm418_vm0, %v7662_v11, %v7664_v16  ;;  %v7675_v24 = vsel %vm418_vm0, %v7664_v16, %v7666_v14 }
 0x1c3   : > { %17534 = vmatprep.subr.msk.mxu1 %vm430_vm1, %v7674_v17  ;;  %7832 = vmatprep.mubr.f32.mxu1 %v19073_v0 }
 0x1c4   : > { %17535 = vmatpush1.msk.msra.mxu1 %vm430_vm1, %v7673_v19  ;;  %v7670_v20 = vpop.permute.xlu1 %7669  ;;  %7761 = vmatprep.mubr.f32.mxu0 %v19073_v0 }
 0x1c5   : > { %v7668_v21 = vpop.permute.xlu0 %7667  ;;  %17540 = vmatprep.subr.msk.mxu1 %vm430_vm1, %v7670_v20  ;;  %17533 = vmatmul.mubr.msk.f32.vlgmr.msra.gmra.mrb[2].mxu0 %vm426_vm2, %v17530_v18 }
 0x1c6   : > { %v7677_v22 = vsel %vm418_vm0, %v7668_v21, %v7670_v20  ;;  %17536 = vmatmul.mubr.msk.f32.vlgmr.msra.gmra.mrb[2].mxu1 %vm426_vm2, %v17530_v18  ;;  %v7676_v23 = vsel %vm418_vm0, %v7666_v14, %v7668_v21  ;;  %7903 = vmatprep.mubr.f32.mxu0 %v19073_v0 }
 0x1c7   : > { %17537 = vmatprep.subr.msk.mxu0 %vm430_vm1, %v7676_v23  ;;  %17541 = vmatpush1.msk.msra.mxu1 %vm430_vm1, %v7677_v22 }
 0x1c8   : > { %17538 = vmatpush1.msk.msra.mxu0 %vm430_vm1, %v7675_v24  ;;  %v8008_v25 = vpop.permute.xlu1 %8007  ;;  %7974 = vmatprep.mubr.f32.mxu1 %v19073_v0 }
 0x1c9   : > { %v8006_v26 = vpop.permute.xlu0 %8005  ;;  %17539 = vmatmul.mubr.msk.f32.vlgmr.msra.gmra.mrb[0].mxu0 %vm426_vm2, %v17530_v18 }
 0x1ca   : > { %v8020_v27 = vsel %vm1064_vm3, %v8006_v26, %v8008_v25  ;;  %17542 = vmatmul.mubr.msk.f32.vlgmr.msra.gmra.mrb[4].mxu1 %vm426_vm2, %v17530_v18  ;;  %8109 = vmatprep.mubr.f32.mxu0 %v19073_v0 }
 0x1cb   : > { %17544 = vmatprep.subr.msk.mxu0 %vm430_vm1, %v8020_v27  ;;  %8180 = vmatprep.mubr.f32.mxu1 %v19073_v0 }
 0x1cc   : > { %v8010_v28 = vpop.permute.xlu1 %8009 }
 0x1cd   : > { %v8004_v29 = vpop.permute.xlu0 %8003  ;;  %v8021_v35 = vsel %vm1064_vm3, %v8008_v25, %v8010_v28 }
 0x1ce   : > { %v8019_v31 = vsel %vm1064_vm3, %v8004_v29, %v8006_v26 }
 0x1cf   : > { %17545 = vmatpush1.msk.msra.mxu0 %vm430_vm1, %v8019_v31 }
 0x1d0   : > { %v8014_v32 = vpop.permute.xlu1 %8013  ;;  %17546 = vmatmul.mubr.msk.f32.vlgmr.msra.gmra.mrb[2].mxu0 %vm426_vm2, %v17543_v30 }
 0x1d1   : > { %v8012_v33 = vpop.permute.xlu0 %8011  ;;  %8251 = vmatprep.mubr.f32.mxu0 %v19073_v0 }
 0x1d2   : > { %v8022_v34 = vsel %vm1064_vm3, %v8010_v28, %v8012_v33  ;;  %v8023_v38 = vsel %vm1064_vm3, %v8012_v33, %v8014_v32 }
 0x1d3   : > { %17547 = vmatprep.subr.msk.mxu1 %vm430_vm1, %v8022_v34 }
 0x1d4   : > { %17548 = vmatpush1.msk.msra.mxu1 %vm430_vm1, %v8021_v35  ;;  %v8018_v36 = vpop.permute.xlu1 %8017 }
 0x1d5   : > { %v8016_v2 = vpop.permute.xlu0 %8015  ;;  %17553 = vmatprep.subr.msk.mxu1 %vm430_vm1, %v8018_v36  ;;  %17549 = vmatmul.mubr.msk.f32.vlgmr.msra.gmra.mrb[2].mxu1 %vm426_vm2, %v17543_v30 }
 0x1d6   : > { %v8025_v6 = vsel %vm1064_vm3, %v8016_v2, %v8018_v36  ;;  %v8024_v37 = vsel %vm1064_vm3, %v8014_v32, %v8016_v2  ;;  %8322 = vmatprep.mubr.f32.mxu1 %v19073_v0 }
 0x1d7   : > { %17550 = vmatprep.subr.msk.mxu0 %vm430_vm1, %v8024_v37  ;;  %17554 = vmatpush1.msk.msra.mxu1 %vm430_vm1, %v8025_v6 }
 0x1d8   : > { %17551 = vmatpush1.msk.msra.mxu0 %vm430_vm1, %v8023_v38  ;;  %v8356_v5 = vpop.permute.xlu1 %8355 }
 0x1d9   : > { %v8354_v4 = vpop.permute.xlu0 %8353  ;;  %17552 = vmatmul.mubr.msk.f32.vlgmr.msra.gmra.mrb[0].mxu0 %vm426_vm2, %v17543_v30  ;;  %17555 = vmatmul.mubr.msk.f32.vlgmr.msra.gmra.mrb[4].mxu1 %vm426_vm2, %v17543_v30 }
 0x1da   : > { %v8368_v39 = vsel %vm1413_vm4, %v8354_v4, %v8356_v5  ;;  %8528 = vmatprep.mubr.f32.mxu1 %v19073_v0  ;;  %8457 = vmatprep.mubr.f32.mxu0 %v19073_v0 }
 0x1db   : > { %17557 = vmatprep.subr.msk.mxu0 %vm430_vm1, %v8368_v39 }
 0x1dc   : > { %v8358_v3 = vpop.permute.xlu1 %8357 }
 0x1dd   : > { %v8352_v40 = vpop.permute.xlu0 %8351  ;;  %v8369_v7 = vsel %vm1413_vm4, %v8356_v5, %v8358_v3 }
 0x1de   : > { %v8367_v41 = vsel %vm1413_vm4, %v8352_v40, %v8354_v4 }
 0x1df   : > { %17558 = vmatpush1.msk.msra.mxu0 %vm430_vm1, %v8367_v41 }
 0x1e0   : > { %v8362_v42 = vpop.permute.xlu1 %8361  ;;  %17559 = vmatmul.mubr.msk.f32.vlgmr.msra.gmra.mrb[2].mxu0 %vm426_vm2, %v17556_v1 }
 0x1e1   : > { %v8360_v8 = vpop.permute.xlu0 %8359  ;;  %8599 = vmatprep.mubr.f32.mxu0 %v19073_v0 }
 0x1e2   : > { %v8370_v43 = vsel %vm1413_vm4, %v8358_v3, %v8360_v8  ;;  %v8371_v49 = vsel %vm1413_vm4, %v8360_v8, %v8362_v42 }
 0x1e3   : > { %17560 = vmatprep.subr.msk.mxu1 %vm430_vm1, %v8370_v43 }
 0x1e4   : > { %17561 = vmatpush1.msk.msra.mxu1 %vm430_vm1, %v8369_v7  ;;  %v8366_v44 = vpop.permute.xlu1 %8365 }
 0x1e5   : > { %v8364_v45 = vpop.permute.xlu0 %8363  ;;  %17566 = vmatprep.subr.msk.mxu1 %vm430_vm1, %v8366_v44  ;;  %17562 = vmatmul.mubr.msk.f32.vlgmr.msra.gmra.mrb[2].mxu1 %vm426_vm2, %v17556_v1 }
 0x1e6   : > { %v8373_v46 = vsel %vm1413_vm4, %v8364_v45, %v8366_v44  ;;  %v8372_v48 = vsel %vm1413_vm4, %v8362_v42, %v8364_v45  ;;  %8670 = vmatprep.mubr.f32.mxu1 %v19073_v0  ;;  %vm10252_vm4 = vcmask 982016  }
 0x1e7   : > { %17563 = vmatprep.subr.msk.mxu0 %vm430_vm1, %v8372_v48  ;;  %17567 = vmatpush1.msk.msra.mxu1 %vm430_vm1, %v8373_v46 }
 0x1e8   : > { %17564 = vmatpush1.msk.msra.mxu0 %vm430_vm1, %v8371_v49  ;;  %v8704_v51 = vpop.permute.xlu1 %8703 }
 0x1e9   : > { %v8702_v52 = vpop.permute.xlu0 %8701  ;;  %17565 = vmatmul.mubr.msk.f32.vlgmr.msra.gmra.mrb[0].mxu0 %vm426_vm2, %v17556_v1  ;;  %17568 = vmatmul.mubr.msk.f32.vlgmr.msra.gmra.mrb[4].mxu1 %vm426_vm2, %v17556_v1 }
 0x1ea   : > { %v8716_v53 = vsel %vm1762_vm5, %v8702_v52, %v8704_v51  ;;  %8805 = vmatprep.mubr.f32.mxu0 %v19073_v0  ;;  %8876 = vmatprep.mubr.f32.mxu1 %v19073_v0 }
 0x1eb   : > { %17570 = vmatprep.subr.msk.mxu0 %vm430_vm1, %v8716_v53 }
 0x1ec   : > { %v8706_v54 = vpop.permute.xlu1 %8705 }
 0x1ed   : > { %v8700_v55 = vpop.permute.xlu0 %8699  ;;  %v8717_v61 = vsel %vm1762_vm5, %v8704_v51, %v8706_v54 }
 0x1ee   : > { %v8715_v57 = vsel %vm1762_vm5, %v8700_v55, %v8702_v52 }
 0x1ef   : > { %17571 = vmatpush1.msk.msra.mxu0 %vm430_vm1, %v8715_v57 }
 0x1f0   : > { %17572 = vmatmul.mubr.msk.f32.vlgmr.msra.gmra.mrb[2].mxu0 %vm426_vm2, %v17569_v56  ;;  %v8710_v58 = vpop.permute.xlu1 %8709 }
 0x1f1   : > { %v8708_v59 = vpop.permute.xlu0 %8707  ;;  %8947 = vmatprep.mubr.f32.mxu0 %v19073_v0 }
 0x1f2   : > { %v8718_v60 = vsel %vm1762_vm5, %v8706_v54, %v8708_v59  ;;  %v8719_v11 = vsel %vm1762_vm5, %v8708_v59, %v8710_v58 }
 0x1f3   : > { %17573 = vmatprep.subr.msk.mxu1 %vm430_vm1, %v8718_v60 }
 0x1f4   : > { %17574 = vmatpush1.msk.msra.mxu1 %vm430_vm1, %v8717_v61  ;;  %v8714_v62 = vpop.permute.xlu1 %8713 }
 0x1f5   : > { %17575 = vmatmul.mubr.msk.f32.vlgmr.msra.gmra.mrb[2].mxu1 %vm426_vm2, %v17569_v56  ;;  %v8712_v63 = vpop.permute.xlu0 %8711  ;;  %17579 = vmatprep.subr.msk.mxu1 %vm430_vm1, %v8714_v62 }
 0x1f6   : > { %v8721_v9 = vsel %vm1762_vm5, %v8712_v63, %v8714_v62  ;;  %v8720_v10 = vsel %vm1762_vm5, %v8710_v58, %v8712_v63  ;;  %9018 = vmatprep.mubr.f32.mxu1 %v19073_v0 }
 0x1f7   : > { %17576 = vmatprep.subr.msk.mxu0 %vm430_vm1, %v8720_v10  ;;  %17580 = vmatpush1.msk.msra.mxu1 %vm430_vm1, %v8721_v9 }
 0x1f8   : > { %17577 = vmatpush1.msk.msra.mxu0 %vm430_vm1, %v8719_v11  ;;  %vm9094_vm1 = vcmask 31744  }
 0x1f9   : > { %17578 = vmatmul.mubr.msk.f32.vlgmr.msra.gmra.mrb[0].mxu0 %vm426_vm2, %v17569_v56  ;;  %17581 = vmatmul.mubr.msk.f32.vlgmr.msra.gmra.mrb[4].mxu1 %vm426_vm2, %v17569_v56  ;;  %vm9233_vm2 = vcmask 64512  }
 0x1fa   : > { %9304 = vmatprep.mubr.f32.mxu1 %v19073_v0 }
 0x207   : > { %v9037_v13 = vpop.permute.xlu0 %9036 }
 0x2c3   : > { %v8807_v12 = vpop.f32.mrb[2].mxu0 }
 0x2c4   : > { %v18316_v14 = vadd.f32 %v8807_v12, %v19864_v47  ;;  %v8809_v15 = vpop.f32.mrb[3].mxu0 }
 0x2c5   : > { %v18317_v16 = vadd.f32 %v8809_v15, %v19869_v50 }
 0x2c6   : > { %v9039_v17 = vadd.f32 %v18316_v14, %v9037_v13 }
 0x2c7   : > { %v9040_v18 = vadd.f32 %v18317_v16, %v9037_v13 }
 0x2c8   : > { %v9047_v19 = vsub.f32 0.0, %v9039_v17  ;;  %v8878_v20 = vpop.f32.mrb[2].mxu1 }
 0x2c9   : > { %v9048_v21 = vsub.f32 0.0, %v9040_v18  ;;  %v9041_v22 = vadd.f32 %v9037_v13, %v8878_v20  ;;  %v8880_v23 = vpop.f32.mrb[3].mxu1 }
 0x2ca   : > { %v9055_v24 = vmul.f32 1.442695, %v9047_v19  ;;  %v9042_v25 = vadd.f32 %v9037_v13, %v8880_v23 }
 0x2cb   : > { %v9057_v26 = vmul.f32 1.442695, %v9048_v21  ;;  %v9049_v27 = vsub.f32 0.0, %v9041_v22 }
 0x2cc   : > { %18884 = vpow2.f32 %v9055_v24  ;;  %v9050_v28 = vsub.f32 0.0, %v9042_v25  ;;  %v8949_v29 = vpop.f32.mrb[0].mxu0  ;;  %v9020_v30 = vpop.f32.mrb[4].mxu1 }
 0x2cd   : > { %18886 = vpow2.f32 %v9057_v26  ;;  %v9059_v47 = vmul.f32 1.442695, %v9049_v27  ;;  %v9043_v31 = vadd.f32 %v9037_v13, %v8949_v29  ;;  %v9045_v32 = vadd.f32 %v9037_v13, %v9020_v30  ;;  %v8951_v50 = vpop.f32.mrb[1].mxu0  ;;  %v9022_v33 = vpop.f32.mrb[5].mxu1 }
 0x2ce   : > { %v9061_v34 = vmul.f32 1.442695, %v9050_v28  ;;  %v9044_v35 = vadd.f32 %v9037_v13, %v8951_v50  ;;  %v9046_v36 = vadd.f32 %v9037_v13, %v9022_v33 }
 0x2cf   : > { %18888 = vpow2.f32 %v9059_v47  ;;  %v9051_v2 = vsub.f32 0.0, %v9043_v31  ;;  %v9053_v6 = vsub.f32 0.0, %v9045_v32  ;;  %v20141_v47 = vld [vmem:[%s21907_s3 + $0x10] sm:$0xff] }
 0x2d0   : > { %18890 = vpow2.f32 %v9061_v34  ;;  %v9052_v37 = vsub.f32 0.0, %v9044_v35  ;;  %v9054_v38 = vsub.f32 0.0, %v9046_v36  ;;  %18005 = vmatprep.mubr.msk.f32.mxu0 %vm9233_vm2, %v20141_v47 }
 0x2d1   : > { %v9063_v5 = vmul.f32 1.442695, %v9051_v2  ;;  %v9067_v4 = vmul.f32 1.442695, %v9053_v6 }
 0x2d2   : > { %v9065_v39 = vmul.f32 1.442695, %v9052_v37  ;;  %v9069_v3 = vmul.f32 1.442695, %v9054_v38 }
 0x2d3   : > { %18892 = vpow2.f32 %v9063_v5 }
 0x2d4   : > { %18894 = vpow2.f32 %v9067_v4 }
 0x2d5   : > { %18896 = vpow2.f32 %v9065_v39 }
 0x2d6   : > { %v18885_v40 = vpop.eup %18884  ;;  %18898 = vpow2.f32 %v9069_v3 }
 0x2d7   : > { %v18887_v1 = vpop.eup %18886  ;;  %v9071_v41 = vadd.f32 1.0, %v18885_v40 }
 0x2d8   : > { %v9072_v42 = vadd.f32 1.0, %v18887_v1 }
 0x2d9   : > { %v18889_v8 = vpop.eup %18888  ;;  %18900 = vrcp.f32 %v9071_v41 }
 0x2da   : > { %v18891_v43 = vpop.eup %18890  ;;  %18902 = vrcp.f32 %v9072_v42  ;;  %v9073_v7 = vadd.f32 1.0, %v18889_v8 }
 0x2db   : > { %v9074_v44 = vadd.f32 1.0, %v18891_v43 }
 0x2dc   : > { %18904 = vrcp.f32 %v9073_v7 }
 0x2dd   : > { %v18893_v45 = vpop.eup %18892  ;;  %18906 = vrcp.f32 %v9074_v44  ;;  %v20284_v44 = vld [vmem:[%s21907_s3 + $0x18] sm:$0xff] }
 0x2de   : > { %v18895_v46 = vpop.eup %18894  ;;  %v9075_v48 = vadd.f32 1.0, %v18893_v45  ;;  %v20299_v45 = vld [vmem:[%s21907_s3] sm:$0xff] }
 0x2df   : > { %v18897_v49 = vpop.eup %18896  ;;  %v9077_v51 = vadd.f32 1.0, %v18895_v46 }
 0x2e0   : > { %v18899_v52 = vpop.eup %18898  ;;  %18908 = vrcp.f32 %v9075_v48  ;;  %v9076_v53 = vadd.f32 1.0, %v18897_v49  ;;  %v20316_v49 = vld [vmem:[%s21907_s3 + $0x8] sm:$0xff] }
 0x2e1   : > { %18910 = vrcp.f32 %v9077_v51  ;;  %v9078_v54 = vadd.f32 1.0, %v18899_v52 }
 0x2e2   : > { %18912 = vrcp.f32 %v9076_v53 }
 0x2e3   : > { %v18901_v55 = vpop.eup %18900  ;;  %18914 = vrcp.f32 %v9078_v54 }
 0x2e4   : > { %v18903_v56 = vpop.eup %18902 }
 0x2e6   : > { %v18905_v57 = vpop.eup %18904 }
 0x2e7   : > { %v18907_v58 = vpop.eup %18906 }
 0x2ea   : > { %v18909_v59 = vpop.eup %18908 }
 0x2eb   : > { %v20112_v60 = vpop.eup %18910  ;;  %9118 = vrot.lane.b32.xlu1 %v18909_v59, %s19074_s23 }
 0x2ec   : > { %v18913_v61 = vpop.eup %18912  ;;  %9122 = vrot.lane.b32.xlu0 %v20112_v60, %s19074_s23 }
 0x2ed   : > { %v18915_v62 = vpop.eup %18914 }
 0x2ee   : > { %9095 = vst.msk [vmem:[#allocation2 + $0x38] sm:$0xff] %vm9094_vm1, %v18915_v62 }
 0x2ef   : > { %9120 = vrot.lane.b32.xlu1 %v18913_v61, %s19074_s23 }
 0x2f0   : > { %9114 = vrot.lane.b32.xlu0 %v18905_v57, %s19074_s23 }
 0x2f3   : > { %9112 = vrot.lane.b32.xlu1 %v18903_v56, %s19074_s23 }
 0x2f4   : > { %9110 = vrot.lane.b32.xlu0 %v18901_v55, %s19074_s23 }
 0x2f5   : > { %v9144_v63 = vld [vmem:[#allocation2 + $0x38] sm:$0xff] }
 0x2f7   : > { %9116 = vrot.lane.b32.xlu1 %v18907_v58, %s19074_s23 }
 0x2fb   : > { %9146 = vrot.lane.b32.xlu1 %v9144_v63, %s19074_s23 }
 0x35d   : > { %v9119_v9 = vpop.permute.xlu1 %9118 }
 0x35e   : > { %v9123_v10 = vpop.permute.xlu0 %9122 }
 0x35f   : > { %v9143_v39 = vmax.f32 %v20112_v60, %v9123_v10 }
 0x361   : > { %v9121_v11 = vpop.permute.xlu1 %9120 }
 0x362   : > { %v9128_v12 = vsel %vm418_vm0, %v9119_v9, %v9121_v11  ;;  %v9129_v13 = vsel %vm418_vm0, %v9121_v11, %v9123_v10  ;;  %v9115_v16 = vpop.permute.xlu0 %9114 }
 0x363   : > { %v9141_v14 = vmax.f32 %v18909_v59, %v9128_v12  ;;  %v9142_v15 = vmax.f32 %v18913_v61, %v9129_v13  ;;  %v20361_v61 = vld [vmem:[%s21907_s3 + $0x28] sm:$0xff]  ;;  %v20386_v12 = vld [vmem:[%s21907_s3 + $0x30] sm:$0xff] }
 0x365   : > { %v9113_v17 = vpop.permute.xlu1 %9112  ;;  %9168 = vrot.lane.b32.xlu1 %v9142_v15, %s19078_s27  ;;  %9166 = vrot.lane.b32.xlu0 %v9141_v14, %s19078_s27 }
 0x366   : > { %v9125_v18 = vsel %vm418_vm0, %v9113_v17, %v9115_v16  ;;  %v9111_v20 = vpop.permute.xlu0 %9110 }
 0x367   : > { %v9138_v19 = vmax.f32 %v18903_v56, %v9125_v18  ;;  %v9124_v26 = vsel %vm418_vm0, %v9111_v20, %v9113_v17 }
 0x368   : > { %v9137_v29 = vmax.f32 %v18901_v55, %v9124_v26 }
 0x369   : > { %v9117_v21 = vpop.permute.xlu1 %9116  ;;  %9160 = vrot.lane.b32.xlu0 %v9138_v19, %s19078_s27 }
 0x36a   : > { %v9126_v22 = vsel %vm418_vm0, %v9115_v16, %v9117_v21  ;;  %v9127_v23 = vsel %vm418_vm0, %v9117_v21, %v9119_v9  ;;  %v20404_v16 = vld [vmem:[%s21907_s3 + $0x38] sm:$0xff] }
 0x36b   : > { %v9139_v24 = vmax.f32 %v18905_v57, %v9126_v22  ;;  %v9140_v25 = vmax.f32 %v18907_v58, %v9127_v23  ;;  %v20343_v57 = vld [vmem:[%s21907_s3 + $0x20] sm:$0xff] }
 0x36c   : > { %v20431_v23 = vld [vmem:[%s21907_s3 + $0x40] sm:$0xff] }
 0x36d   : > { %v9147_v27 = vpop.permute.xlu1 %9146  ;;  %9162 = vrot.lane.b32.xlu1 %v9139_v24, %s19078_s27  ;;  %9164 = vrot.lane.b32.xlu0 %v9140_v25, %s19078_s27 }
 0x36e   : > { %v9148_v28 = vsel %vm418_vm0, %v9123_v10, %v9147_v27  ;;  %vm9984_vm0 = vcmask 998400   ;;  %v20449_v27 = vld [vmem:[%s21907_s3 + $0x48] sm:$0xff] }
 0x36f   : > { %v9150_v30 = vmax.f32 %v20112_v60, %v9148_v28 }
 0x371   : > { %9170 = vrot.lane.b32.xlu0 %v9150_v30, %s19078_s27  ;;  %9158 = vrot.lane.b32.xlu1 %v9137_v29, %s19078_s27  ;;  %s19094_s27 = smov 122  }
 0x3d7   : > { %v9169_v31 = vpop.permute.xlu1 %9168  ;;  %v9167_v32 = vpop.permute.xlu0 %9166 }
 0x3d8   : > { %v9176_v50 = vsel %vm2111_vm6, %v9167_v32, %v9169_v31 }
 0x3d9   : > { %v20146_v33 = vmax.f32 %v9141_v14, %v9176_v50 }
 0x3db   : > { %9196 = vst [vmem:[#allocation3 + $0x20] sm:$0xff] %v20146_v33  ;;  %v9161_v34 = vpop.permute.xlu0 %9160  ;;  %9222 = vrot.lane.b32.xlu1 %v20146_v33, %s19075_s24 }
 0x3df   : > { %v9163_v35 = vpop.permute.xlu1 %9162  ;;  %v9165_v36 = vpop.permute.xlu0 %9164 }
 0x3e0   : > { %v9173_v2 = vsel %vm2111_vm6, %v9161_v34, %v9163_v35  ;;  %v9174_v6 = vsel %vm2111_vm6, %v9163_v35, %v9165_v36  ;;  %v9175_v37 = vsel %vm2111_vm6, %v9165_v36, %v9167_v32 }
 0x3e1   : > { %v20154_v38 = vmax.f32 %v9138_v19, %v9173_v2  ;;  %v20156_v5 = vmax.f32 %v9139_v24, %v9174_v6  ;;  %v20158_v4 = vmax.f32 %v9140_v25, %v9175_v37  ;;  %v20491_v6 = vld [vmem:[%s21907_s3 + $0x58] sm:$0xff] }
 0x3e3   : > { %9194 = vst [vmem:[#allocation3 + $0x10] sm:$0xff] %v20156_v5  ;;  %9195 = vst [vmem:[#allocation3 + $0x18] sm:$0xff] %v20158_v4  ;;  %v9159_v3 = vpop.permute.xlu1 %9158  ;;  %v9171_v40 = vpop.permute.xlu0 %9170  ;;  %9709 = vrot.lane.b32.xlu0 %v20154_v38, %s19077_s26  ;;  %9711 = vrot.lane.b32.xlu1 %v20156_v5, %s19077_s26 }
 0x3e4   : > { %v9172_v1 = vsel %vm2111_vm6, %v9159_v3, %v9161_v34  ;;  %v9177_v41 = vsel %vm2111_vm6, %v9169_v31, %v9171_v40  ;;  %v9191_v42 = vmax.f32 %v9143_v39, %v9171_v40  ;;  %v20476_v34 = vld [vmem:[%s21907_s3 + $0x50] sm:$0xff] }
 0x3e5   : > { %v20169_v8 = vmax.f32 %v9137_v29, %v9172_v1  ;;  %v20171_v43 = vmax.f32 %v9142_v15, %v9177_v41 }
 0x3e6   : > { %9198 = vst.msk [vmem:[#allocation3 + $0x30] sm:$0xff] %vm2111_vm6, %v9191_v42  ;;  %vm11344_vm6 = vcmask 474112  }
 0x3e7   : > { %9197 = vst [vmem:[#allocation3 + $0x28] sm:$0xff] %v20171_v43  ;;  %9707 = vrot.lane.b32.xlu0 %v20169_v8, %s19077_s26  ;;  %9715 = vrot.lane.b32.xlu1 %v20146_v33, %s19077_s26 }
 0x3eb   : > { %9976 = vrot.lane.b32.xlu0 %v20154_v38, %s19094_s27  ;;  %9978 = vrot.lane.b32.xlu1 %v20156_v5, %s19094_s27 }
 0x3ed   : > { %v20408_v17 = vld [vmem:[#allocation3 + $0x30] sm:$0xff] }
 0x3ef   : > { %9974 = vrot.lane.b32.xlu0 %v20169_v8, %s19094_s27  ;;  %9982 = vrot.lane.b32.xlu1 %v20146_v33, %s19094_s27 }
 0x3f3   : > { %10244 = vrot.lane.b32.xlu0 %v20154_v38, %s19095_s28  ;;  %10246 = vrot.lane.b32.xlu1 %v20156_v5, %s19095_s28 }
 0x3f7   : > { %10242 = vrot.lane.b32.xlu0 %v20169_v8, %s19095_s28  ;;  %10250 = vrot.lane.b32.xlu1 %v20146_v33, %s19095_s28 }
 0x3fb   : > { %10524 = vrot.lane.b32.xlu0 %v20154_v38, %s19083_s21  ;;  %10526 = vrot.lane.b32.xlu1 %v20156_v5, %s19083_s21 }
 0x3ff   : > { %10522 = vrot.lane.b32.xlu0 %v20169_v8, %s19083_s21  ;;  %10794 = vrot.lane.b32.xlu1 %v20154_v38, %s19085_s14 }
 0x403   : > { %10530 = vrot.lane.b32.xlu1 %v20146_v33, %s19083_s21  ;;  %10532 = vrot.lane.b32.xlu0 %v20171_v43, %s19083_s21 }
 0x407   : > { %10792 = vrot.lane.b32.xlu1 %v20169_v8, %s19085_s14  ;;  %10796 = vrot.lane.b32.xlu0 %v20156_v5, %s19085_s14 }
 0x40b   : > { %11066 = vrot.lane.b32.xlu1 %v20156_v5, %s19087_s29  ;;  %10800 = vrot.lane.b32.xlu0 %v20146_v33, %s19085_s14 }
 0x40f   : > { %10802 = vrot.lane.b32.xlu1 %v20171_v43, %s19085_s14  ;;  %11064 = vrot.lane.b32.xlu0 %v20154_v38, %s19087_s29 }
 0x413   : > { %9216 = vrot.lane.b32.xlu1 %v20154_v38, %s19075_s24  ;;  %11062 = vrot.lane.b32.xlu0 %v20169_v8, %s19087_s29 }
 0x417   : > { %9214 = vrot.lane.b32.xlu1 %v20169_v8, %s19075_s24  ;;  %9218 = vrot.lane.b32.xlu0 %v20156_v5, %s19075_s24 }
 0x41b   : > { %11072 = vrot.lane.b32.xlu1 %v20171_v43, %s19087_s29  ;;  %11070 = vrot.lane.b32.xlu0 %v20146_v33, %s19087_s29 }
 0x41f   : > { %11336 = vrot.lane.b32.xlu1 %v20156_v5, %s19096_s30  ;;  %11334 = vrot.lane.b32.xlu0 %v20154_v38, %s19096_s30 }
 0x423   : > { %9220 = vrot.lane.b32.xlu1 %v20158_v4, %s19075_s24  ;;  %11332 = vrot.lane.b32.xlu0 %v20169_v8, %s19096_s30 }
 0x427   : > { %11342 = vrot.lane.b32.xlu1 %v20171_v43, %s19096_s30  ;;  %11340 = vrot.lane.b32.xlu0 %v20146_v33, %s19096_s30 }
 0x42b   : > { %11607 = vrot.lane.b32.xlu1 %v20156_v5, %s19097_s12  ;;  %11605 = vrot.lane.b32.xlu0 %v20154_v38, %s19097_s12 }
 0x42f   : > { %9713 = vrot.lane.b32.xlu1 %v20158_v4, %s19077_s26  ;;  %11603 = vrot.lane.b32.xlu0 %v20169_v8, %s19097_s12 }
 0x433   : > { %11613 = vrot.lane.b32.xlu1 %v20171_v43, %s19097_s12  ;;  %11611 = vrot.lane.b32.xlu0 %v20146_v33, %s19097_s12 }
 0x437   : > { %10248 = vrot.lane.b32.xlu1 %v20158_v4, %s19095_s28  ;;  %9980 = vrot.lane.b32.xlu0 %v20158_v4, %s19094_s27 }
 0x43b   : > { %12126 = vrot.lane.b32.xlu1 %v20158_v4, %s19075_s24  ;;  %12124 = vrot.lane.b32.xlu0 %v20156_v5, %s19075_s24 }
 0x43f   : > { %10528 = vrot.lane.b32.xlu1 %v20158_v4, %s19083_s21  ;;  %12122 = vrot.lane.b32.xlu0 %v20154_v38, %s19075_s24 }
 0x443   : > { %12391 = vrot.lane.b32.xlu1 %v20156_v5, %s19077_s26  ;;  %12130 = vrot.lane.b32.xlu0 %v20171_v43, %s19075_s24 }
 0x447   : > { %12389 = vrot.lane.b32.xlu1 %v20154_v38, %s19077_s26  ;;  %12393 = vrot.lane.b32.xlu0 %v20158_v4, %s19077_s26 }
 0x44b   : > { %12658 = vrot.lane.b32.xlu1 %v20156_v5, %s19094_s27  ;;  %10798 = vrot.lane.b32.xlu0 %v20158_v4, %s19085_s14 }
 0x44d   : > { %v20279_v7 = vpop.permute.xlu1 %9222 }
 0x44e   : > { %18003 = vmatprep.subr.mxu0 %v20279_v7 }
 0x44f   : > { %18004 = vmatpush3.msra.mxu0 %v20279_v7  ;;  %12397 = vrot.lane.b32.xlu1 %v20171_v43, %s19077_s26 }
 0x450   : > { %11068 = vrot.lane.b32.xlu0 %v20158_v4, %s19087_s29  ;;  %18006 = vmatmul.mubr.msk.f32.vlgmr.msra.gmra.mrb[4].mxu0 %vm9233_vm2, %v20284_v44 }
 0x451   : > { %9475 = vmatprep.subr.mxu0 %v20154_v38  ;;  %9539 = vmatprep.mubr.f32.mxu0 %v19073_v0 }
 0x452   : > { %9476 = vmatpush1.msra.mxu0 %v20169_v8 }
 0x453   : > { %18008 = vmatprep.subr.mxu0 %v20146_v33  ;;  %12656 = vrot.lane.b32.xlu1 %v20154_v38, %s19094_s27 }
 0x454   : > { %12660 = vrot.lane.b32.xlu0 %v20158_v4, %s19094_s27  ;;  %17590 = vmatmul.mubr.msk.f32.vlgmr.msra.gmra.mrb[6].mxu0 %vm9233_vm2, %v20299_v45 }
 0x455   : > { %18009 = vmatpush3.msra.mxu0 %v20146_v33  ;;  %v20310_v46 = vpop.permute.xlu1 %9711  ;;  %v9710_v48 = vpop.permute.xlu0 %9709  ;;  %9545 = vmatprep.mubr.f32.mxu0 %v19073_v0 }
 0x456   : > { %v9718_v51 = vsel %vm1762_vm5, %v9710_v48, %v20310_v46 }
 0x457   : > { %12927 = vrot.lane.b32.xlu1 %v20158_v4, %s19095_s28  ;;  %9732 = vmatprep.subr.mxu0 %v9718_v51 }
 0x458   : > { %11338 = vrot.lane.b32.xlu0 %v20158_v4, %s19096_s30  ;;  %17591 = vmatmul.mubr.msk.f32.gmra.mrb[8].mxu0 %vm9233_vm2, %v20316_v49 }
 0x459   : > { %v20326_v52 = vpop.permute.xlu1 %9715  ;;  %v9708_v53 = vpop.permute.xlu0 %9707  ;;  %18010 = vmatprep.mubr.msk.f32.mxu0 %vm9233_vm2, %v20299_v45 }
 0x45a   : > { %v9717_v54 = vsel %vm1762_vm5, %v9708_v53, %v9710_v48  ;;  %v20521_v48 = vld [vmem:[%s21907_s3 + $0x60] sm:$0xff] }
 0x45b   : > { %12664 = vrot.lane.b32.xlu1 %v20171_v43, %s19094_s27 }
 0x45c   : > { %12925 = vrot.lane.b32.xlu0 %v20156_v5, %s19095_s28  ;;  %18011 = vmatmul.mubr.msk.f32.vlgmr.msra.gmra.mrb[4].mxu0 %vm9233_vm2, %v20316_v49 }
 0x45d   : > { %9733 = vmatpush1.msra.mxu0 %v9717_v54  ;;  %v20337_v55 = vpop.permute.xlu1 %9978  ;;  %v9977_v56 = vpop.permute.xlu0 %9976  ;;  %9796 = vmatprep.mubr.f32.mxu0 %v19073_v0 }
 0x45e   : > { %18013 = vmatprep.subr.mxu0 %v20326_v52  ;;  %v9986_v59 = vsel %vm9984_vm0, %v9977_v56, %v20337_v55 }
 0x45f   : > { %11609 = vrot.lane.b32.xlu1 %v20158_v4, %s19097_s12 }
 0x460   : > { %12923 = vrot.lane.b32.xlu0 %v20154_v38, %s19095_s28  ;;  %17598 = vmatmul.mubr.msk.f32.vlgmr.msra.gmra.mrb[6].mxu0 %vm9233_vm2, %v20343_v57 }
 0x461   : > { %18014 = vmatpush3.msra.mxu0 %v20326_v52  ;;  %v20353_v58 = vpop.permute.xlu1 %9982  ;;  %v9975_v60 = vpop.permute.xlu0 %9974  ;;  %9802 = vmatprep.mubr.f32.mxu0 %v19073_v0 }
 0x462   : > { %10000 = vmatprep.subr.mxu0 %v9986_v59  ;;  %v9985_v9 = vsel %vm9984_vm0, %v9975_v60, %v9977_v56  ;;  %v20542_v56 = vld [vmem:[%s21907_s3 + $0x68] sm:$0xff] }
 0x463   : > { %13204 = vrot.lane.b32.xlu1 %v20156_v5, %s19083_s21 }
 0x464   : > { %13206 = vrot.lane.b32.xlu0 %v20158_v4, %s19083_s21  ;;  %17599 = vmatmul.mubr.msk.f32.gmra.mrb[8].mxu0 %vm9233_vm2, %v20361_v61 }
 0x465   : > { %v20369_v62 = vpop.permute.xlu1 %10246  ;;  %v10245_v63 = vpop.permute.xlu0 %10244  ;;  %18015 = vmatprep.mubr.msk.f32.mxu0 %vm9233_vm2, %v20343_v57 }
 0x466   : > { %v10254_v14 = vsel %vm10252_vm4, %v10245_v63, %v20369_v62 }
 0x467   : > { %13202 = vrot.lane.b32.xlu1 %v20154_v38, %s19083_s21 }
 0x468   : > { %12931 = vrot.lane.b32.xlu0 %v20171_v43, %s19095_s28  ;;  %18016 = vmatmul.mubr.msk.f32.vlgmr.msra.gmra.mrb[4].mxu0 %vm9233_vm2, %v20361_v61 }
 0x469   : > { %10001 = vmatpush1.msra.mxu0 %v9985_v9  ;;  %v20380_v10 = vpop.permute.xlu1 %10250  ;;  %v10243_v11 = vpop.permute.xlu0 %10242  ;;  %10064 = vmatprep.mubr.f32.mxu0 %v19073_v0 }
 0x46a   : > { %18018 = vmatprep.subr.mxu0 %v20353_v58  ;;  %v10253_v20 = vsel %vm10252_vm4, %v10243_v11, %v10245_v63 }
 0x46b   : > { %13474 = vrot.lane.b32.xlu1 %v20156_v5, %s19085_s14 }
 0x46c   : > { %12128 = vrot.lane.b32.xlu0 %v20146_v33, %s19075_s24  ;;  %17606 = vmatmul.mubr.msk.f32.vlgmr.msra.gmra.mrb[6].mxu0 %vm9233_vm2, %v20386_v12 }
 0x46d   : > { %18019 = vmatpush3.msra.mxu0 %v20353_v58  ;;  %v20396_v13 = vpop.permute.xlu1 %10526  ;;  %v10525_v15 = vpop.permute.xlu0 %10524  ;;  %10070 = vmatprep.mubr.f32.mxu0 %v19073_v0 }
 0x46e   : > { %10268 = vmatprep.subr.mxu0 %v10254_v14  ;;  %v10535_v25 = vsel %vm3856_vm11, %v10525_v15, %v20396_v13 }
 0x46f   : > { %13210 = vrot.lane.b32.xlu1 %v20171_v43, %s19083_s21 }
 0x470   : > { %13212 = vrot.lane.b32.xlu0 %v20408_v17, %s19083_s21  ;;  %17607 = vmatmul.mubr.msk.f32.gmra.mrb[8].mxu0 %vm9233_vm2, %v20404_v16 }
 0x471   : > { %v20414_v18 = vpop.permute.xlu1 %10794  ;;  %v10523_v19 = vpop.permute.xlu0 %10522  ;;  %18020 = vmatprep.mubr.msk.f32.mxu0 %vm9233_vm2, %v20386_v12 }
 0x472   : > { %v10534_v30 = vsel %vm3856_vm11, %v10523_v19, %v10525_v15 }
 0x473   : > { %13472 = vrot.lane.b32.xlu1 %v20154_v38, %s19085_s14 }
 0x474   : > { %13476 = vrot.lane.b32.xlu0 %v20158_v4, %s19085_s14  ;;  %18021 = vmatmul.mubr.msk.f32.vlgmr.msra.gmra.mrb[4].mxu0 %vm9233_vm2, %v20404_v16 }
 0x475   : > { %10269 = vmatpush1.msra.mxu0 %v10253_v20  ;;  %v20425_v21 = vpop.permute.xlu1 %10530  ;;  %v10533_v22 = vpop.permute.xlu0 %10532  ;;  %10332 = vmatprep.mubr.f32.mxu0 %v19073_v0 }
 0x476   : > { %18023 = vmatprep.subr.mxu0 %v20380_v10  ;;  %v10538_v32 = vsel %vm3856_vm11, %v20425_v21, %v10533_v22  ;;  %v20597_v22 = vld [vmem:[%s21907_s3 + $0x78] sm:$0xff] }
 0x477   : > { %12662 = vrot.lane.b32.xlu1 %v20146_v33, %s19094_s27 }
 0x478   : > { %12395 = vrot.lane.b32.xlu0 %v20146_v33, %s19077_s26  ;;  %17614 = vmatmul.mubr.msk.f32.vlgmr.msra.gmra.mrb[6].mxu0 %vm9233_vm2, %v20431_v23 }
 0x479   : > { %18024 = vmatpush3.msra.mxu0 %v20380_v10  ;;  %v10793_v24 = vpop.permute.xlu1 %10792  ;;  %v20443_v26 = vpop.permute.xlu0 %10796  ;;  %10338 = vmatprep.mubr.f32.mxu0 %v19073_v0 }
 0x47a   : > { %10550 = vmatprep.subr.mxu0 %v10535_v25  ;;  %v10805_v36 = vsel %vm4554_vm13, %v20414_v18, %v20443_v26  ;;  %v10804_v1 = vsel %vm4554_vm13, %v10793_v24, %v20414_v18  ;;  %v20574_v18 = vld [vmem:[%s21907_s3 + $0x70] sm:$0xff] }
 0x47b   : > { %13480 = vrot.lane.b32.xlu1 %v20171_v43, %s19085_s14 }
 0x47c   : > { %13482 = vrot.lane.b32.xlu0 %v20408_v17, %s19085_s14  ;;  %17615 = vmatmul.mubr.msk.f32.gmra.mrb[8].mxu0 %vm9233_vm2, %v20449_v27 }
 0x47d   : > { %v20457_v28 = vpop.permute.xlu1 %11066  ;;  %v20459_v29 = vpop.permute.xlu0 %10800  ;;  %18025 = vmatprep.mubr.msk.f32.mxu0 %vm9233_vm2, %v20431_v23 }
 0x47f   : > { %13746 = vrot.lane.b32.xlu1 %v20158_v4, %s19087_s29 }
 0x480   : > { %13744 = vrot.lane.b32.xlu0 %v20156_v5, %s19087_s29  ;;  %18026 = vmatmul.mubr.msk.f32.vlgmr.msra.gmra.mrb[4].mxu0 %vm9233_vm2, %v20449_v27 }
 0x481   : > { %10551 = vmatpush1.msra.mxu0 %v10534_v30  ;;  %v10803_v31 = vpop.permute.xlu1 %10802  ;;  %v11065_v50 = vpop.permute.xlu0 %11064  ;;  %10614 = vmatprep.mubr.f32.mxu0 %v19073_v0 }
 0x482   : > { %18028 = vmatprep.subr.mxu0 %v10538_v32  ;;  %v10808_v8 = vsel %vm4554_vm13, %v20459_v29, %v10803_v31  ;;  %v11075_v54 = vsel %vm5252_vm15, %v11065_v50, %v20457_v28 }
 0x483   : > { %12929 = vrot.lane.b32.xlu1 %v20146_v33, %s19095_s28 }
 0x484   : > { %13742 = vrot.lane.b32.xlu0 %v20154_v38, %s19087_s29  ;;  %17622 = vmatmul.mubr.msk.f32.vlgmr.msra.gmra.mrb[6].mxu0 %vm9233_vm2, %v20476_v34 }
 0x485   : > { %18029 = vmatpush3.msra.mxu0 %v10538_v32  ;;  %v9217_v35 = vpop.permute.xlu1 %9216  ;;  %v11063_v2 = vpop.permute.xlu0 %11062  ;;  %10620 = vmatprep.mubr.f32.mxu0 %v19073_v0  ;;  %v20633_v32 = vld [vmem:[%s21907_s3 + $0x80] sm:$0xff] }
 0x486   : > { %10820 = vmatprep.subr.mxu0 %v10805_v36  ;;  %v11074_v11 = vsel %vm5252_vm15, %v11063_v2, %v11065_v50 }
 0x487   : > { %13752 = vrot.lane.b32.xlu1 %v20408_v17, %s19087_s29 }
 0x488   : > { %14014 = vrot.lane.b32.xlu0 %v20156_v5, %s19096_s30  ;;  %17623 = vmatmul.mubr.msk.f32.gmra.mrb[8].mxu0 %vm9233_vm2, %v20491_v6 }
 0x489   : > { %v9215_v37 = vpop.permute.xlu1 %9214  ;;  %v9219_v39 = vpop.permute.xlu0 %9218  ;;  %18030 = vmatprep.mubr.msk.f32.mxu0 %vm9233_vm2, %v20476_v34 }
 0x48a   : > { %v9224_v3 = vsel %vm1064_vm3, %v9215_v37, %v9217_v35  ;;  %v9225_v40 = vsel %vm1064_vm3, %v9217_v35, %v9219_v39 }
 0x48b   : > { %14016 = vrot.lane.b32.xlu1 %v20158_v4, %s19096_s30  ;;  %9240 = vmatprep.subr.mxu1 %v9225_v40 }
 0x48c   : > { %13750 = vrot.lane.b32.xlu0 %v20171_v43, %s19087_s29  ;;  %9241 = vmatpush1.msra.mxu1 %v9224_v3 }
 0x48d   : > { %18031 = vmatmul.mubr.msk.f32.vlgmr.msra.gmra.mrb[4].mxu0 %vm9233_vm2, %v20491_v6  ;;  %v11073_v41 = vpop.permute.xlu1 %11072  ;;  %v20511_v42 = vpop.permute.xlu0 %11070  ;;  %17584 = vmatmul.mubr.msk.f32.vlgmr.msra.gmra.mrb[6].mxu1 %vm9233_vm2, %v20141_v47 }
 0x48e   : > { %10821 = vmatpush1.msra.mxu0 %v10804_v1  ;;  %10884 = vmatprep.mubr.f32.mxu0 %v19073_v0  ;;  %v11078_v15 = vsel %vm5252_vm15, %v20511_v42, %v11073_v41  ;;  %v20698_v41 = vld [vmem:[%s21907_s3 + $0x90] sm:$0xff] }
 0x48f   : > { %18033 = vmatprep.subr.mxu0 %v10808_v8  ;;  %13208 = vrot.lane.b32.xlu1 %v20146_v33, %s19083_s21 }
 0x490   : > { %14012 = vrot.lane.b32.xlu0 %v20154_v38, %s19096_s30  ;;  %9310 = vmatprep.mubr.f32.mxu1 %v19073_v0 }
 0x491   : > { %17630 = vmatmul.mubr.msk.f32.vlgmr.msra.gmra.mrb[6].mxu0 %vm9233_vm2, %v20521_v48  ;;  %v20530_v51 = vpop.permute.xlu1 %11336  ;;  %v20532_v53 = vpop.permute.xlu0 %11334  ;;  %17585 = vmatmul.mubr.msk.f32.gmra.mrb[8].mxu1 %vm9233_vm2, %v20284_v44 }
 0x492   : > { %18034 = vmatpush3.msra.mxu0 %v10808_v8  ;;  %10890 = vmatprep.mubr.f32.mxu0 %v19073_v0  ;;  %v11346_v20 = vsel %vm11344_vm6, %v20532_v53, %v20530_v51 }
 0x493   : > { %11090 = vmatprep.subr.mxu0 %v11075_v54  ;;  %14022 = vrot.lane.b32.xlu1 %v20408_v17, %s19096_s30 }
 0x494   : > { %13478 = vrot.lane.b32.xlu0 %v20146_v33, %s19085_s14  ;;  %9381 = vmatprep.mubr.f32.mxu1 %v19073_v0  ;;  %s386_s14 = scalar_lea.vmem %s21915_s11, %s17811_s25 }
 0x495   : > { %17631 = vmatmul.mubr.msk.f32.gmra.mrb[8].mxu0 %vm9233_vm2, %v20542_v56  ;;  %v9221_v59 = vpop.permute.xlu1 %9220  ;;  %v11333_v60 = vpop.permute.xlu0 %11332 }
 0x496   : > { %v9227_v63 = vsel %vm1064_vm3, %v9221_v59, %v20279_v7  ;;  %18035 = vmatprep.mubr.msk.f32.mxu0 %vm9233_vm2, %v20521_v48  ;;  %v9226_v9 = vsel %vm1064_vm3, %v9219_v39, %v9221_v59 }
 0x497   : > { %14284 = vrot.lane.b32.xlu1 %v20156_v5, %s19097_s12  ;;  %9317 = vmatprep.subr.mxu1 %v9227_v63 }
 0x498   : > { %14020 = vrot.lane.b32.xlu0 %v20171_v43, %s19096_s30  ;;  %9318 = vmatpush1.msra.mxu1 %v9226_v9 }
 0x499   : > { %18036 = vmatmul.mubr.msk.f32.vlgmr.msra.gmra.mrb[4].mxu0 %vm9233_vm2, %v20542_v56  ;;  %v11343_v14 = vpop.permute.xlu1 %11342  ;;  %17586 = vmatmul.mubr.msk.f32.vlgmr.msra.gmra.mrb[10].mxu1 %vm9233_vm2, %v20141_v47  ;;  %v20565_v7 = vpop.permute.xlu0 %11340 }
 0x49a   : > { %11091 = vmatpush1.msra.mxu0 %v11074_v11  ;;  %9552 = vmatprep.subr.mxu1 %v20158_v4 }
 0x49b   : > { %18038 = vmatprep.subr.mxu0 %v11078_v15  ;;  %9553 = vmatpush1.msra.mxu1 %v20156_v5 }
 0x49c   : > { %14282 = vrot.lane.b32.xlu1 %v20154_v38, %s19097_s12  ;;  %14286 = vrot.lane.b32.xlu0 %v20158_v4, %s19097_s12 }
 0x49d   : > { %11154 = vmatprep.mubr.f32.mxu0 %v19073_v0  ;;  %9387 = vmatprep.mubr.f32.mxu1 %v19073_v0  ;;  %v20582_v47 = vpop.permute.xlu1 %11607  ;;  %v20584_v19 = vpop.permute.xlu0 %11605 }
 0x49e   : > { %17638 = vmatmul.mubr.msk.f32.vlgmr.msra.gmra.mrb[6].mxu0 %vm9233_vm2, %v20574_v18  ;;  %17587 = vmatmul.mubr.msk.f32.gmra.mrb[12].mxu1 %vm9233_vm2, %v20284_v44  ;;  %v11617_v36 = vsel %vm11615_vm14, %v20584_v19, %v20582_v47 }
 0x49f   : > { %18039 = vmatpush3.msra.mxu0 %v11078_v15  ;;  %11160 = vmatprep.mubr.f32.mxu0 %v19073_v0 }
 0x4a0   : > { %11361 = vmatprep.subr.mxu0 %v11346_v20  ;;  %14290 = vrot.lane.b32.xlu1 %v20171_v43, %s19097_s12 }
 0x4a1   : > { %13748 = vrot.lane.b32.xlu0 %v20146_v33, %s19087_s29  ;;  %9616 = vmatprep.mubr.f32.mxu1 %v19073_v0  ;;  %v9714_v44 = vpop.permute.xlu1 %9713  ;;  %v11604_v24 = vpop.permute.xlu0 %11603 }
 0x4a2   : > { %17639 = vmatmul.mubr.msk.f32.gmra.mrb[8].mxu0 %vm9233_vm2, %v20597_v22  ;;  %17592 = vmatmul.mubr.msk.f32.vlgmr.msra.gmra.mrb[10].mxu1 %vm9233_vm2, %v20299_v45  ;;  %v9720_v25 = vsel %vm1762_vm5, %v9714_v44, %v20326_v52  ;;  %v9719_v30 = vsel %vm1762_vm5, %v20310_v46, %v9714_v44  ;;  %v11345_v52 = vsel %vm11344_vm6, %v11333_v60, %v20532_v53 }
 0x4a3   : > { %9809 = vmatprep.subr.mxu1 %v9720_v25  ;;  %18040 = vmatprep.mubr.msk.f32.mxu0 %vm9233_vm2, %v20574_v18  ;;  %v11349_v46 = vsel %vm11344_vm6, %v20565_v7, %v11343_v14 }
 0x4a4   : > { %14018 = vrot.lane.b32.xlu1 %v20146_v33, %s19096_s30  ;;  %9622 = vmatprep.mubr.f32.mxu1 %v19073_v0 }
 0x4a5   : > { %14292 = vrot.lane.b32.xlu0 %v20408_v17, %s19097_s12  ;;  %9810 = vmatpush1.msra.mxu1 %v9719_v30  ;;  %v11614_v45 = vpop.permute.xlu1 %11613  ;;  %v20619_v31 = vpop.permute.xlu0 %11611 }
 0x4a6   : > { %18041 = vmatmul.mubr.msk.f32.vlgmr.msra.gmra.mrb[4].mxu0 %vm9233_vm2, %v20597_v22  ;;  %17593 = vmatmul.mubr.msk.f32.gmra.mrb[12].mxu1 %vm9233_vm2, %v20316_v49  ;;  %v11620_v1 = vsel %vm11615_vm14, %v20619_v31, %v11614_v45 }
 0x4a7   : > { %11362 = vmatpush1.msra.mxu0 %v11345_v52  ;;  %11425 = vmatprep.mubr.f32.mxu0 %v19073_v0 }
 0x4a8   : > { %18043 = vmatprep.subr.mxu0 %v11349_v46  ;;  %14802 = vrot.lane.b32.xlu1 %v20158_v4, %s19075_s24 }
 0x4a9   : > { %14288 = vrot.lane.b32.xlu0 %v20146_v33, %s19097_s12  ;;  %9873 = vmatprep.mubr.f32.mxu1 %v19073_v0  ;;  %v10249_v49 = vpop.permute.xlu1 %10248  ;;  %v9981_v50 = vpop.permute.xlu0 %9980 }
 0x4aa   : > { %17646 = vmatmul.mubr.msk.f32.vlgmr.msra.gmra.mrb[6].mxu0 %vm9233_vm2, %v20633_v32  ;;  %17600 = vmatmul.mubr.msk.f32.vlgmr.msra.gmra.mrb[10].mxu1 %vm9233_vm2, %v20343_v57  ;;  %v9988_v35 = vsel %vm9984_vm0, %v9981_v50, %v20353_v58  ;;  %v9987_v2 = vsel %vm9984_vm0, %v20337_v55, %v9981_v50  ;;  %v20656_v57 = vld [vmem:[%s21907_s3 + $0x88] sm:$0xff]  ;;  %v10256_v55 = vsel %vm10252_vm4, %v10249_v49, %v20380_v10 }
 0x4ab   : > { %18044 = vmatpush3.msra.mxu0 %v11349_v46  ;;  %10077 = vmatprep.subr.mxu1 %v9988_v35  ;;  %v10255_v10 = vsel %vm10252_vm4, %v20369_v62, %v10249_v49  ;;  %v20902_v49 = vld [vmem:[%s21907_s3 + $0xc8] sm:$0xff] }
 0x4ac   : > { %11632 = vmatprep.subr.mxu0 %v11617_v36  ;;  %14800 = vrot.lane.b32.xlu1 %v20156_v5, %s19075_s24 }
 0x4ad   : > { %14804 = vrot.lane.b32.xlu0 %v20146_v33, %s19075_s24  ;;  %11431 = vmatprep.mubr.f32.mxu0 %v19073_v0  ;;  %v20661_v58 = vpop.permute.xlu1 %12126  ;;  %v20663_v37 = vpop.permute.xlu0 %12124 }
 0x4ae   : > { %9879 = vmatprep.mubr.f32.mxu1 %v19073_v0  ;;  %10078 = vmatpush1.msra.mxu1 %v9987_v2  ;;  %v12133_v63 = vsel %vm1064_vm3, %v20663_v37, %v20661_v58  ;;  %v20935_v2 = vld [vmem:[%s21907_s3 + $0xd0] sm:$0xff] }
 0x4af   : > { %17647 = vmatmul.mubr.msk.f32.gmra.mrb[8].mxu0 %vm9233_vm2, %v20656_v57  ;;  %17601 = vmatmul.mubr.msk.f32.gmra.mrb[12].mxu1 %vm9233_vm2, %v20361_v61  ;;  %v11616_v61 = vsel %vm11615_vm14, %v11604_v24, %v20584_v19 }
 0x4b0   : > { %10345 = vmatprep.subr.mxu1 %v10256_v55  ;;  %15069 = vrot.lane.b32.xlu1 %v20158_v4, %s19077_s26  ;;  %v20952_v55 = vld [vmem:[%s21907_s3 + $0xd8] sm:$0xff] }
 0x4b1   : > { %14808 = vrot.lane.b32.xlu0 %v20408_v17, %s19075_s24  ;;  %18045 = vmatprep.mubr.msk.f32.mxu0 %vm9233_vm2, %v20633_v32  ;;  %v10529_v39 = vpop.permute.xlu1 %10528  ;;  %v20678_v3 = vpop.permute.xlu0 %12122 }
 0x4b2   : > { %10141 = vmatprep.mubr.f32.mxu1 %v19073_v0  ;;  %v10537_v40 = vsel %vm3856_vm11, %v10529_v39, %v20425_v21  ;;  %v20717_v21 = vld [vmem:[%s21907_s3 + $0x98] sm:$0xff]  ;;  %v12132_v14 = vsel %vm1064_vm3, %v20678_v3, %v20663_v37 }
 0x4b3   : > { %18046 = vmatmul.mubr.msk.f32.vlgmr.msra.gmra.mrb[4].mxu0 %vm9233_vm2, %v20656_v57  ;;  %17608 = vmatmul.mubr.msk.f32.vlgmr.msra.gmra.mrb[10].mxu1 %vm9233_vm2, %v20386_v12 }
 0x4b4   : > { %11633 = vmatpush1.msra.mxu0 %v11616_v61  ;;  %10346 = vmatpush1.msra.mxu1 %v10255_v10 }
 0x4b5   : > { %18048 = vmatprep.subr.mxu0 %v11620_v1  ;;  %15067 = vrot.lane.b32.xlu1 %v20156_v5, %s19077_s26  ;;  %v20700_v12 = vpop.permute.xlu1 %12391  ;;  %v20702_v62 = vpop.permute.xlu0 %12130 }
 0x4b6   : > { %15071 = vrot.lane.b32.xlu0 %v20146_v33, %s19077_s26  ;;  %10627 = vmatprep.subr.mxu1 %v10537_v40 }
 0x4b7   : > { %11696 = vmatprep.mubr.f32.mxu0 %v19073_v0  ;;  %10147 = vmatprep.mubr.f32.mxu1 %v19073_v0 }
 0x4b8   : > { %17654 = vmatmul.mubr.msk.f32.vlgmr.msra.gmra.mrb[6].mxu0 %vm9233_vm2, %v20698_v41  ;;  %17609 = vmatmul.mubr.msk.f32.gmra.mrb[12].mxu1 %vm9233_vm2, %v20404_v16  ;;  %v10536_v16 = vsel %vm3856_vm11, %v20396_v13, %v10529_v39  ;;  %v20755_v13 = vld [vmem:[%s21907_s3 + $0xa0] sm:$0xff] }
 0x4b9   : > { %18049 = vmatpush3.msra.mxu0 %v11620_v1  ;;  %15075 = vrot.lane.b32.xlu1 %v20408_v17, %s19077_s26  ;;  %v20719_v8 = vpop.permute.xlu1 %12389  ;;  %v20721_v53 = vpop.permute.xlu0 %12393 }
 0x4ba   : > { %11880 = vmatprep.subr.mxu0 %v20156_v5  ;;  %14806 = vrot.lane.b32.xlu0 %v20171_v43, %s19075_s24  ;;  %v12399_v45 = vsel %vm1762_vm5, %v20719_v8, %v20700_v12 }
 0x4bb   : > { %11702 = vmatprep.mubr.f32.mxu0 %v19073_v0  ;;  %10409 = vmatprep.mubr.f32.mxu1 %v19073_v0 }
 0x4bc   : > { %17655 = vmatmul.mubr.msk.f32.gmra.mrb[8].mxu0 %vm9233_vm2, %v20717_v21  ;;  %17616 = vmatmul.mubr.msk.f32.vlgmr.msra.gmra.mrb[10].mxu1 %vm9233_vm2, %v20431_v23 }
 0x4bd   : > { %10628 = vmatpush1.msra.mxu1 %v10536_v16  ;;  %15336 = vrot.lane.b32.xlu1 %v20158_v4, %s19094_s27  ;;  %v20736_v54 = vpop.permute.xlu1 %12658  ;;  %v10799_v59 = vpop.permute.xlu0 %10798 }
 0x4be   : > { %15338 = vrot.lane.b32.xlu0 %v20146_v33, %s19094_s27  ;;  %18050 = vmatprep.mubr.msk.f32.mxu0 %vm9233_vm2, %v20698_v41  ;;  %v10807_v60 = vsel %vm4554_vm13, %v10799_v59, %v20459_v29 }
 0x4bf   : > { %10415 = vmatprep.mubr.f32.mxu1 %v19073_v0  ;;  %10897 = vmatprep.subr.mxu1 %v10807_v60 }
 0x4c0   : > { %18051 = vmatmul.mubr.msk.f32.vlgmr.msra.gmra.mrb[4].mxu0 %vm9233_vm2, %v20717_v21  ;;  %17617 = vmatmul.mubr.msk.f32.gmra.mrb[12].mxu1 %vm9233_vm2, %v20449_v27 }
 0x4c1   : > { %11881 = vmatpush1.msra.mxu0 %v20154_v38  ;;  %15334 = vrot.lane.b32.xlu1 %v20156_v5, %s19094_s27  ;;  %v20757_v23 = vpop.permute.xlu1 %12397  ;;  %v10806_v38 = vsel %vm4554_vm13, %v20443_v26, %v10799_v59  ;;  %v20783_v26 = vld [vmem:[%s21907_s3 + $0xa8] sm:$0xff]  ;;  %v15865_v59 = vld [vmem:[%s21908_s4] sm:$0xff] }
 0x4c2   : > { %18053 = vmatprep.subr.mxu0 %v20171_v43  ;;  %15073 = vrot.lane.b32.xlu0 %v20171_v43, %s19077_s26  ;;  %v11069_v29 = vpop.permute.xlu0 %11068 }
 0x4c3   : > { %11944 = vmatprep.mubr.f32.mxu0 %v19073_v0  ;;  %10691 = vmatprep.mubr.f32.mxu1 %v19073_v0  ;;  %v11077_v27 = vsel %vm5252_vm15, %v11069_v29, %v20511_v42 }
 0x4c4   : > { %17662 = vmatmul.mubr.msk.f32.vlgmr.msra.gmra.mrb[6].mxu0 %vm9233_vm2, %v20755_v13  ;;  %17624 = vmatmul.mubr.msk.f32.vlgmr.msra.gmra.mrb[10].mxu1 %vm9233_vm2, %v20476_v34 }
 0x4c5   : > { %18054 = vmatpush3.msra.mxu0 %v20171_v43  ;;  %10898 = vmatpush1.msra.mxu1 %v10806_v38  ;;  %v20776_v9 = vpop.permute.xlu1 %12656 }
 0x4c6   : > { %12147 = vmatprep.subr.mxu0 %v12133_v63  ;;  %15342 = vrot.lane.b32.xlu1 %v20408_v17, %s19094_s27  ;;  %v20785_v34 = vpop.permute.xlu0 %12660  ;;  %v12666_v50 = vsel %vm9984_vm0, %v20776_v9, %v20736_v54  ;;  %v17700_v9 = vld [vmem:[%s21907_s3 + $0xf0] sm:$0xff] }
 0x4c7   : > { %15603 = vrot.lane.b32.xlu0 %v20158_v4, %s19095_s28  ;;  %11167 = vmatprep.subr.mxu1 %v11077_v27  ;;  %v12667_v46 = vsel %vm9984_vm0, %v20736_v54, %v20785_v34  ;;  %v21006_v54 = vld [vmem:[%s21907_s3 + $0xe8] sm:$0xff] }
 0x4c8   : > { %11950 = vmatprep.mubr.f32.mxu0 %v19073_v0  ;;  %10697 = vmatprep.mubr.f32.mxu1 %v19073_v0 }
 0x4c9   : > { %17663 = vmatmul.mubr.msk.f32.gmra.mrb[8].mxu0 %vm9233_vm2, %v20783_v26  ;;  %17625 = vmatmul.mubr.msk.f32.gmra.mrb[12].mxu1 %vm9233_vm2, %v20491_v6  ;;  %v20795_v42 = vpop.permute.xlu1 %12927  ;;  %v11076_v6 = vsel %vm5252_vm15, %v20457_v28, %v11069_v29 }
 0x4ca   : > { %15605 = vrot.lane.b32.xlu1 %v20146_v33, %s19095_s28  ;;  %18055 = vmatprep.mubr.msk.f32.mxu0 %vm9233_vm2, %v20755_v13  ;;  %v11339_v11 = vpop.permute.xlu0 %11338 }
 0x4cb   : > { %15340 = vrot.lane.b32.xlu0 %v20171_v43, %s19094_s27  ;;  %10961 = vmatprep.mubr.f32.mxu1 %v19073_v0  ;;  %v11348_v15 = vsel %vm11344_vm6, %v11339_v11, %v20565_v7  ;;  %v20845_v7 = vld [vmem:[%s21907_s3 + $0xb8] sm:$0xff] }
 0x4cd   : > { %18056 = vmatmul.mubr.msk.f32.vlgmr.msra.gmra.mrb[4].mxu0 %vm9233_vm2, %v20783_v26  ;;  %17632 = vmatmul.mubr.msk.f32.vlgmr.msra.gmra.mrb[10].mxu1 %vm9233_vm2, %v20521_v48  ;;  %v20815_v19 = vpop.permute.xlu1 %12664  ;;  %v20825_v48 = vld [vmem:[%s21907_s3 + $0xb0] sm:$0xff] }
 0x4ce   : > { %12148 = vmatpush1.msra.mxu0 %v12132_v14  ;;  %11168 = vmatpush1.msra.mxu1 %v11076_v6  ;;  %v20817_v20 = vpop.permute.xlu0 %12925  ;;  %v17701_v14 = vld [vmem:[%s21907_s3 + $0xf8] sm:$0xff] }
 0x4cf   : > { %18058 = vmatprep.subr.mxu0 %v20702_v62  ;;  %15607 = vrot.lane.b32.xlu1 %v20171_v43, %s19095_s28  ;;  %v12934_v37 = vsel %vm10252_vm4, %v20817_v20, %v20795_v42 }
 0x4d0   : > { %15601 = vrot.lane.b32.xlu0 %v20156_v5, %s19095_s28  ;;  %11438 = vmatprep.subr.mxu1 %v11348_v15  ;;  %v12400_v5 = vsel %vm1762_vm5, %v20700_v12, %v20721_v53 }
 0x4d1   : > { %12211 = vmatprep.mubr.f32.mxu0 %v19073_v0  ;;  %10967 = vmatprep.mubr.f32.mxu1 %v19073_v0  ;;  %v11610_v28 = vpop.permute.xlu1 %11609 }
 0x4d2   : > { %17670 = vmatmul.mubr.msk.f32.vlgmr.msra.gmra.mrb[6].mxu0 %vm9233_vm2, %v20825_v48  ;;  %17633 = vmatmul.mubr.msk.f32.gmra.mrb[12].mxu1 %vm9233_vm2, %v20542_v56  ;;  %v20835_v43 = vpop.permute.xlu0 %12923  ;;  %v15866_v56 = vld [vmem:[%s21908_s4 + $0x8] sm:$0xff]  ;;  %v11619_v44 = vsel %vm11615_vm14, %v11610_v28, %v20619_v31 }
 0x4d3   : > { %18059 = vmatpush3.msra.mxu0 %v20702_v62  ;;  %12217 = vmatprep.mubr.f32.mxu0 %v19073_v0  ;;  %v12933_v1 = vsel %vm10252_vm4, %v20835_v43, %v20817_v20 }
 0x4d4   : > { %12414 = vmatprep.subr.mxu0 %v12400_v5  ;;  %15609 = vrot.lane.b32.xlu0 %v20408_v17, %s19095_s28  ;;  %v11347_v17 = vsel %vm11344_vm6, %v20530_v51, %v11339_v11  ;;  %v17708_v5 = vld [vmem:[%s21907_s3 + $0x100] sm:$0xff] }
 0x4d5   : > { %11231 = vmatprep.mubr.f32.mxu1 %v19073_v0  ;;  %v20855_v24 = vpop.permute.xlu1 %13204  ;;  %15869 = vperm.xlu1 %18787, %v15865_v59  }
 0x4d6   : > { %17671 = vmatmul.mubr.msk.f32.gmra.mrb[8].mxu0 %vm9233_vm2, %v20845_v7  ;;  %17640 = vmatmul.mubr.msk.f32.vlgmr.msra.gmra.mrb[10].mxu1 %vm9233_vm2, %v20574_v18  ;;  %v20863_v25 = vpop.permute.xlu0 %13206  ;;  %v20883_v18 = vld [vmem:[%s21907_s3 + $0xc0] sm:$0xff] }
 0x4d7   : > { %11439 = vmatpush1.msra.mxu1 %v11347_v17  ;;  %18060 = vmatprep.mubr.msk.f32.mxu0 %vm9233_vm2, %v20825_v48  ;;  %v13215_v8 = vsel %vm3856_vm11, %v20855_v24, %v20863_v25 }
 0x4d8   : > { %15874 = vperm.xlu0 %18786, %v15866_v56   ;;  %11709 = vmatprep.subr.mxu1 %v11619_v44 }
 0x4d9   : > { %11237 = vmatprep.mubr.f32.mxu1 %v19073_v0  ;;  %v20868_v30 = vpop.permute.xlu1 %13202 }
 0x4da   : > { %18061 = vmatmul.mubr.msk.f32.vlgmr.msra.gmra.mrb[4].mxu0 %vm9233_vm2, %v20845_v7  ;;  %17641 = vmatmul.mubr.msk.f32.gmra.mrb[12].mxu1 %vm9233_vm2, %v20597_v22  ;;  %v20877_v51 = vpop.permute.xlu0 %12931  ;;  %v11618_v22 = vsel %vm11615_vm14, %v20582_v47, %v11610_v28 }
 0x4db   : > { %12415 = vmatpush1.msra.mxu0 %v12399_v45  ;;  %12478 = vmatprep.mubr.f32.mxu0 %v19073_v0 }
 0x4dc   : > { %18063 = vmatprep.subr.mxu0 %v20757_v23  ;;  %11502 = vmatprep.mubr.f32.mxu1 %v19073_v0 }
 0x4dd   : > { %v20887_v31 = vpop.permute.xlu1 %13474 }
 0x4de   : > { %17678 = vmatmul.mubr.msk.f32.vlgmr.msra.gmra.mrb[6].mxu0 %vm9233_vm2, %v20883_v18  ;;  %17648 = vmatmul.mubr.msk.f32.vlgmr.msra.gmra.mrb[10].mxu1 %vm9233_vm2, %v20633_v32  ;;  %v12129_v52 = vpop.permute.xlu0 %12128 }
 0x4df   : > { %18064 = vmatpush3.msra.mxu0 %v20757_v23  ;;  %11710 = vmatpush1.msra.mxu1 %v11618_v22  ;;  %v12135_v36 = vsel %vm1064_vm3, %v12129_v52, %v20702_v62  ;;  %v12134_v61 = vsel %vm1064_vm3, %v20661_v58, %v12129_v52 }
 0x4e0   : > { %12681 = vmatprep.subr.mxu0 %v12667_v46  ;;  %11957 = vmatprep.subr.mxu1 %v20146_v33  ;;  %v17716_v46 = vld [vmem:[%s21907_s3 + $0x110] sm:$0xff] }
 0x4e1   : > { %12484 = vmatprep.mubr.f32.mxu0 %v19073_v0  ;;  %11508 = vmatprep.mubr.f32.mxu1 %v19073_v0  ;;  %v20907_v47 = vpop.permute.xlu1 %13210 }
 0x4e2   : > { %17679 = vmatmul.mubr.msk.f32.gmra.mrb[8].mxu0 %vm9233_vm2, %v20902_v49  ;;  %17649 = vmatmul.mubr.msk.f32.gmra.mrb[12].mxu1 %vm9233_vm2, %v20656_v57  ;;  %v20913_v32 = vpop.permute.xlu0 %13212 }
 0x4e3   : > { %18065 = vmatprep.mubr.msk.f32.mxu0 %vm9233_vm2, %v20883_v18  ;;  %11773 = vmatprep.mubr.f32.mxu1 %v19073_v0  ;;  %v13218_v27 = vsel %vm3856_vm11, %v20907_v47, %v20913_v32 }
 0x4e5   : > { %v20918_v33 = vpop.permute.xlu1 %13472 }
 0x4e6   : > { %18066 = vmatmul.mubr.msk.f32.vlgmr.msra.gmra.mrb[4].mxu0 %vm9233_vm2, %v20902_v49  ;;  %17656 = vmatmul.mubr.msk.f32.vlgmr.msra.gmra.mrb[10].mxu1 %vm9233_vm2, %v20698_v41  ;;  %v20927_v35 = vpop.permute.xlu0 %13476  ;;  %v20985_v41 = vld [vmem:[%s21907_s3 + $0xe0] sm:$0xff]  ;;  %v13484_v28 = vsel %vm4554_vm13, %v20918_v33, %v20887_v31  ;;  %v17717_v33 = vld [vmem:[%s21907_s3 + $0x118] sm:$0xff] }
 0x4e7   : > { %12682 = vmatpush1.msra.mxu0 %v12666_v50  ;;  %11958 = vmatpush1.msra.mxu1 %v20158_v4  ;;  %v13485_v11 = vsel %vm4554_vm13, %v20887_v31, %v20927_v35 }
 0x4e8   : > { %18068 = vmatprep.subr.mxu0 %v20815_v19  ;;  %12224 = vmatprep.subr.mxu1 %v12135_v36 }
 0x4e9   : > { %12745 = vmatprep.mubr.f32.mxu0 %v19073_v0  ;;  %11779 = vmatprep.mubr.f32.mxu1 %v19073_v0  ;;  %v12663_v57 = vpop.permute.xlu1 %12662 }
 0x4ea   : > { %17686 = vmatmul.mubr.msk.f32.vlgmr.msra.gmra.mrb[6].mxu0 %vm9233_vm2, %v20935_v2  ;;  %17657 = vmatmul.mubr.msk.f32.gmra.mrb[12].mxu1 %vm9233_vm2, %v20717_v21  ;;  %v12396_v4 = vpop.permute.xlu0 %12395  ;;  %v12669_v16 = vsel %vm9984_vm0, %v12663_v57, %v20815_v19  ;;  %v12668_v29 = vsel %vm9984_vm0, %v20785_v34, %v12663_v57 }
 0x4eb   : > { %18069 = vmatpush3.msra.mxu0 %v20815_v19  ;;  %12751 = vmatprep.mubr.f32.mxu0 %v19073_v0  ;;  %v12402_v39 = vsel %vm1762_vm5, %v12396_v4, %v20757_v23  ;;  %v12401_v62 = vsel %vm1762_vm5, %v20721_v53, %v12396_v4  ;;  %v13214_v23 = vsel %vm3856_vm11, %v20868_v30, %v20855_v24 }
 0x4ec   : > { %12948 = vmatprep.subr.mxu0 %v12934_v37  ;;  %12021 = vmatprep.mubr.f32.mxu1 %v19073_v0 }
 0x4ed   : > { %v20957_v3 = vpop.permute.xlu1 %13480 }
 0x4ee   : > { %17687 = vmatmul.mubr.msk.f32.gmra.mrb[8].mxu0 %vm9233_vm2, %v20952_v55  ;;  %17664 = vmatmul.mubr.msk.f32.vlgmr.msra.gmra.mrb[10].mxu1 %vm9233_vm2, %v20755_v13  ;;  %v20965_v10 = vpop.permute.xlu0 %13482 }
 0x4ef   : > { %12225 = vmatpush1.msra.mxu1 %v12134_v61  ;;  %18070 = vmatprep.mubr.msk.f32.mxu0 %vm9233_vm2, %v20935_v2 }
 0x4f0   : > { %12491 = vmatprep.subr.mxu1 %v12402_v39  ;;  %12027 = vmatprep.mubr.f32.mxu1 %v19073_v0 }
 0x4f1   : > { %v20970_v40 = vpop.permute.xlu1 %13746 }
 0x4f2   : > { %18071 = vmatmul.mubr.msk.f32.vlgmr.msra.gmra.mrb[4].mxu0 %vm9233_vm2, %v20952_v55  ;;  %17665 = vmatmul.mubr.msk.f32.gmra.mrb[12].mxu1 %vm9233_vm2, %v20783_v26  ;;  %v20979_v58 = vpop.permute.xlu0 %13744 }
 0x4f3   : > { %12949 = vmatpush1.msra.mxu0 %v12933_v1  ;;  %13012 = vmatprep.mubr.f32.mxu0 %v19073_v0  ;;  %v13755_v24 = vsel %vm5252_vm15, %v20979_v58, %v20970_v40  ;;  %v17725_v1 = vld [vmem:[%s21907_s3 + $0x128] sm:$0xff] }
 0x4f4   : > { %18073 = vmatprep.subr.mxu0 %v20877_v51  ;;  %12288 = vmatprep.mubr.f32.mxu1 %v19073_v0 }
 0x4f5   : > { %v12930_v12 = vpop.permute.xlu1 %12929 }
 0x4f6   : > { %17694 = vmatmul.mubr.msk.f32.vlgmr.msra.gmra.mrb[6].mxu0 %vm9233_vm2, %v20985_v41  ;;  %17672 = vmatmul.mubr.msk.f32.vlgmr.msra.gmra.mrb[10].mxu1 %vm9233_vm2, %v20825_v48  ;;  %v20995_v21 = vpop.permute.xlu0 %13742  ;;  %v12936_v63 = vsel %vm10252_vm4, %v12930_v12, %v20877_v51  ;;  %v12935_v19 = vsel %vm10252_vm4, %v20795_v42, %v12930_v12  ;;  %v13488_v42 = vsel %vm4554_vm13, %v20957_v3, %v20965_v10 }
 0x4f7   : > { %18074 = vmatpush3.msra.mxu0 %v20877_v51  ;;  %12492 = vmatpush1.msra.mxu1 %v12401_v62  ;;  %v13754_v51 = vsel %vm5252_vm15, %v20995_v21, %v20979_v58 }
 0x4f8   : > { %13230 = vmatprep.subr.mxu0 %v13215_v8  ;;  %12758 = vmatprep.subr.mxu1 %v12669_v16  ;;  %v17732_v16 = vld [vmem:[%s21907_s3 + $0x130] sm:$0xff] }
 0x4f9   : > { %13018 = vmatprep.mubr.f32.mxu0 %v19073_v0  ;;  %12294 = vmatprep.mubr.f32.mxu1 %v19073_v0  ;;  %v21010_v53 = vpop.permute.xlu1 %13752 }
 0x4fa   : > { %17695 = vmatmul.mubr.msk.f32.gmra.mrb[8].mxu0 %vm9233_vm2, %v21006_v54  ;;  %17673 = vmatmul.mubr.msk.f32.gmra.mrb[12].mxu1 %vm9233_vm2, %v20845_v7  ;;  %v21019_v60 = vpop.permute.xlu0 %14014 }
 0x4fb   : > { %18075 = vmatprep.mubr.msk.f32.mxu0 %vm9233_vm2, %v20985_v41  ;;  %12555 = vmatprep.mubr.f32.mxu1 %v19073_v0 }
 0x4fd   : > { %v21024_v13 = vpop.permute.xlu1 %14016 }
 0x4fe   : > { %18076 = vmatmul.mubr.msk.f32.vlgmr.msra.gmra.mrb[4].mxu0 %vm9233_vm2, %v21006_v54  ;;  %17680 = vmatmul.mubr.msk.f32.vlgmr.msra.gmra.mrb[10].mxu1 %vm9233_vm2, %v20883_v18  ;;  %v21035_v38 = vpop.permute.xlu0 %13750  ;;  %v14025_v32 = vsel %vm11344_vm6, %v21019_v60, %v21024_v13 }
 0x4ff   : > { %13231 = vmatpush1.msra.mxu0 %v13214_v23  ;;  %12759 = vmatpush1.msra.mxu1 %v12668_v29  ;;  %v13758_v52 = vsel %vm5252_vm15, %v21035_v38, %v21010_v53  ;;  %v19060_v53 = vld [vmem:[#allocation3 + $0x28] sm:$0xff] }
 0x500   : > { %18078 = vmatprep.subr.mxu0 %v13218_v27  ;;  %13025 = vmatprep.subr.mxu1 %v12936_v63 }
 0x501   : > { %13294 = vmatprep.mubr.f32.mxu0 %v19073_v0  ;;  %12561 = vmatprep.mubr.f32.mxu1 %v19073_v0  ;;  %v13209_v26 = vpop.permute.xlu1 %13208 }
 0x502   : > { %17702 = vmatmul.mubr.msk.f32.vlgmr.msra.gmra.mrb[6].mxu0 %vm9233_vm2, %v17700_v9  ;;  %17681 = vmatmul.mubr.msk.f32.gmra.mrb[12].mxu1 %vm9233_vm2, %v20902_v49  ;;  %v21050_v34 = vpop.permute.xlu0 %14012  ;;  %v13217_v6 = vsel %vm3856_vm11, %v13209_v26, %v20907_v47  ;;  %v13216_v7 = vsel %vm3856_vm11, %v20863_v25, %v13209_v26  ;;  %v17709_v25 = vld [vmem:[%s21907_s3 + $0x108] sm:$0xff]  ;;  %v17740_v26 = vld [vmem:[%s21907_s3 + $0x140] sm:$0xff] }
 0x503   : > { %18079 = vmatpush3.msra.mxu0 %v13218_v27  ;;  %13300 = vmatprep.mubr.f32.mxu0 %v19073_v0  ;;  %v14024_v4 = vsel %vm11344_vm6, %v21050_v34, %v21019_v60  ;;  %v17733_v60 = vld [vmem:[%s21907_s3 + $0x138] sm:$0xff] }
 0x504   : > { %13500 = vmatprep.subr.mxu0 %v13485_v11  ;;  %12822 = vmatprep.mubr.f32.mxu1 %v19073_v0  ;;  %v19064_v11 = vld [vmem:[#allocation3 + $0x30] sm:$0xff] }
 0x505   : > { %v21062_v15 = vpop.permute.xlu1 %14022 }
 0x506   : > { %17703 = vmatmul.mubr.msk.f32.gmra.mrb[8].mxu0 %vm9233_vm2, %v17701_v14  ;;  %17688 = vmatmul.mubr.msk.f32.vlgmr.msra.gmra.mrb[10].mxu1 %vm9233_vm2, %v20935_v2  ;;  %v13479_v20 = vpop.permute.xlu0 %13478 }
 0x507   : > { %13026 = vmatpush1.msra.mxu1 %v12935_v19  ;;  %18080 = vmatprep.mubr.msk.f32.mxu0 %vm9233_vm2, %v17700_v9  ;;  %v13487_v17 = vsel %vm4554_vm13, %v13479_v20, %v20957_v3  ;;  %v13486_v18 = vsel %vm4554_vm13, %v20927_v35, %v13479_v20  ;;  %v17741_v19 = vld [vmem:[%s21907_s3 + $0x148] sm:$0xff]  ;;  %vm16087_vm13 = vcmask 7168  }
 0x508   : > { %13307 = vmatprep.subr.mxu1 %v13217_v6  ;;  %12828 = vmatprep.mubr.f32.mxu1 %v19073_v0 }
 0x509   : > { %v21071_v48 = vpop.permute.xlu1 %14284 }
 0x50a   : > { %18081 = vmatmul.mubr.msk.f32.vlgmr.msra.gmra.mrb[4].mxu0 %vm9233_vm2, %v17701_v14  ;;  %17689 = vmatmul.mubr.msk.f32.gmra.mrb[12].mxu1 %vm9233_vm2, %v20952_v55  ;;  %v21079_v43 = vpop.permute.xlu0 %14020  ;;  %v17724_v55 = vld [vmem:[%s21907_s3 + $0x120] sm:$0xff] }
 0x50b   : > { %13501 = vmatpush1.msra.mxu0 %v13484_v28  ;;  %13564 = vmatprep.mubr.f32.mxu0 %v19073_v0  ;;  %v14028_v37 = vsel %vm11344_vm6, %v21079_v43, %v21062_v15  ;;  %v17748_v28 = vld [vmem:[%s21907_s3 + $0x150] sm:$0xff] }
 0x50c   : > { %18083 = vmatprep.subr.mxu0 %v13488_v42  ;;  %13089 = vmatprep.mubr.f32.mxu1 %v19073_v0 }
 0x50e   : > { %17710 = vmatmul.mubr.msk.f32.vlgmr.msra.gmra.mrb[6].mxu0 %vm9233_vm2, %v17708_v5  ;;  %17696 = vmatmul.mubr.msk.f32.vlgmr.msra.gmra.mrb[10].mxu1 %vm9233_vm2, %v20985_v41  ;;  %v21094_v56 = vpop.permute.xlu1 %14282  ;;  %v21096_v44 = vpop.permute.xlu0 %14286 }
 0x50f   : > { %18084 = vmatpush3.msra.mxu0 %v13488_v42  ;;  %13308 = vmatpush1.msra.mxu1 %v13216_v7  ;;  %v14295_v10 = vsel %vm11615_vm14, %v21071_v48, %v21096_v44  ;;  %v14294_v62 = vsel %vm11615_vm14, %v21094_v56, %v21071_v48  ;;  %v17749_v56 = vld [vmem:[%s21907_s3 + $0x158] sm:$0xff] }
 0x510   : > { %13770 = vmatprep.subr.mxu0 %v13755_v24  ;;  %13577 = vmatprep.subr.mxu1 %v13487_v17  ;;  %v17756_v17 = vld [vmem:[%s21907_s3 + $0x160] sm:$0xff] }
 0x511   : > { %13570 = vmatprep.mubr.f32.mxu0 %v19073_v0  ;;  %13095 = vmatprep.mubr.f32.mxu1 %v19073_v0 }
 0x512   : > { %17711 = vmatmul.mubr.msk.f32.gmra.mrb[8].mxu0 %vm9233_vm2, %v17709_v25  ;;  %17697 = vmatmul.mubr.msk.f32.gmra.mrb[12].mxu1 %vm9233_vm2, %v21006_v54  ;;  %v21111_v30 = vpop.permute.xlu1 %14290 }
 0x513   : > { %18085 = vmatprep.mubr.msk.f32.mxu0 %vm9233_vm2, %v17708_v5  ;;  %13371 = vmatprep.mubr.f32.mxu1 %v19073_v0  ;;  %v13749_v45 = vpop.permute.xlu0 %13748 }
 0x514   : > { %v13757_v31 = vsel %vm5252_vm15, %v13749_v45, %v21035_v38  ;;  %v13756_v35 = vsel %vm5252_vm15, %v20970_v40, %v13749_v45  ;;  %v19062_v38 = vld [vmem:[#allocation3 + $0x20] sm:$0xff]  ;;  %vm19101_vm15 = vmmov 0  }
 0x516   : > { %18086 = vmatmul.mubr.msk.f32.vlgmr.msra.gmra.mrb[4].mxu0 %vm9233_vm2, %v17709_v25  ;;  %17704 = vmatmul.mubr.msk.f32.vlgmr.msra.gmra.mrb[10].mxu1 %vm9233_vm2, %v17700_v9  ;;  %v14019_v22 = vpop.permute.xlu1 %14018  ;;  %v19063_v9 = vld [vmem:[#allocation3 + $0x10] sm:$0xff] }
 0x517   : > { %13771 = vmatpush1.msra.mxu0 %v13754_v51  ;;  %13578 = vmatpush1.msra.mxu1 %v13486_v18  ;;  %v14293_v49 = vpop.permute.xlu0 %14292  ;;  %v14027_v2 = vsel %vm11344_vm6, %v14019_v22, %v21079_v43  ;;  %v14026_v61 = vsel %vm11344_vm6, %v21024_v13, %v14019_v22  ;;  %v19061_v13 = vld [vmem:[#allocation3 + $0x18] sm:$0xff]  ;;  %v17764_v22 = vld [vmem:[%s21907_s3 + $0x170] sm:$0xff] }
 0x518   : > { %18088 = vmatprep.subr.mxu0 %v13758_v52  ;;  %13834 = vmatprep.mubr.f32.mxu0 %v19073_v0  ;;  %v14298_v8 = vsel %vm11615_vm14, %v21111_v30, %v14293_v49  ;;  %v17757_v18 = vld [vmem:[%s21907_s3 + $0x168] sm:$0xff]  ;;  %v17765_v49 = vld [vmem:[%s21907_s3 + $0x178] sm:$0xff] }
 0x519   : > { %13847 = vmatprep.subr.mxu1 %v13757_v31  ;;  %13377 = vmatprep.mubr.f32.mxu1 %v19073_v0 }
 0x51a   : > { %17718 = vmatmul.mubr.msk.f32.vlgmr.msra.gmra.mrb[6].mxu0 %vm9233_vm2, %v17716_v46  ;;  %17705 = vmatmul.mubr.msk.f32.gmra.mrb[12].mxu1 %vm9233_vm2, %v17701_v14  ;;  %v21134_v47 = vpop.permute.xlu1 %14802 }
 0x51b   : > { %18089 = vmatpush3.msra.mxu0 %v13758_v52  ;;  %13840 = vmatprep.mubr.f32.mxu0 %v19073_v0  ;;  %v14289_v50 = vpop.permute.xlu0 %14288 }
 0x51c   : > { %14040 = vmatprep.subr.mxu0 %v14025_v32  ;;  %13641 = vmatprep.mubr.f32.mxu1 %v19073_v0  ;;  %v14297_v40 = vsel %vm11615_vm14, %v14289_v50, %v21111_v30  ;;  %v14296_v21 = vsel %vm11615_vm14, %v21096_v44, %v14289_v50 }
 0x51e   : > { %17719 = vmatmul.mubr.msk.f32.gmra.mrb[8].mxu0 %vm9233_vm2, %v17717_v33  ;;  %17712 = vmatmul.mubr.msk.f32.vlgmr.msra.gmra.mrb[10].mxu1 %vm9233_vm2, %v17708_v5  ;;  %v21148_v36 = vpop.permute.xlu1 %14800 }
 0x51f   : > { %13848 = vmatpush1.msra.mxu1 %v13756_v35  ;;  %18090 = vmatprep.mubr.msk.f32.mxu0 %vm9233_vm2, %v17716_v46  ;;  %v21153_v57 = vpop.permute.xlu0 %14804  ;;  %v14810_v43 = vsel %vm1064_vm3, %v21148_v36, %v21134_v47 }
 0x520   : > { %14117 = vmatprep.subr.mxu1 %v14027_v2  ;;  %13647 = vmatprep.mubr.f32.mxu1 %v19073_v0  ;;  %v14811_v6 = vsel %vm1064_vm3, %v21134_v47, %v21153_v57  ;;  %v17772_v47 = vld [vmem:[%s21907_s3 + $0x180] sm:$0xff] }
 0x522   : > { %18091 = vmatmul.mubr.msk.f32.vlgmr.msra.gmra.mrb[4].mxu0 %vm9233_vm2, %v17717_v33  ;;  %17713 = vmatmul.mubr.msk.f32.gmra.mrb[12].mxu1 %vm9233_vm2, %v17709_v25  ;;  %v21171_v3 = vpop.permute.xlu1 %15069 }
 0x523   : > { %14041 = vmatpush1.msra.mxu0 %v14024_v4  ;;  %14104 = vmatprep.mubr.f32.mxu0 %v19073_v0  ;;  %v21168_v39 = vpop.permute.xlu0 %14808 }
 0x524   : > { %18093 = vmatprep.subr.mxu0 %v14028_v37  ;;  %13911 = vmatprep.mubr.f32.mxu1 %v19073_v0 }
 0x526   : > { %17726 = vmatmul.mubr.msk.f32.vlgmr.msra.gmra.mrb[6].mxu0 %vm9233_vm2, %v17724_v55  ;;  %17720 = vmatmul.mubr.msk.f32.vlgmr.msra.gmra.mrb[10].mxu1 %vm9233_vm2, %v17716_v46 }
 0x527   : > { %18094 = vmatpush3.msra.mxu0 %v14028_v37  ;;  %14118 = vmatpush1.msra.mxu1 %v14026_v61  ;;  %v21190_v41 = vpop.permute.xlu1 %15067 }
 0x528   : > { %14310 = vmatprep.subr.mxu0 %v14295_v10  ;;  %14387 = vmatprep.subr.mxu1 %v14297_v40  ;;  %v21185_v58 = vpop.permute.xlu0 %15071  ;;  %v15077_v31 = vsel %vm1762_vm5, %v21190_v41, %v21171_v3 }
 0x529   : > { %14110 = vmatprep.mubr.f32.mxu0 %v19073_v0  ;;  %13917 = vmatprep.mubr.f32.mxu1 %v19073_v0  ;;  %v15078_v24 = vsel %vm1762_vm5, %v21171_v3, %v21185_v58 }
 0x52a   : > { %17727 = vmatmul.mubr.msk.f32.gmra.mrb[8].mxu0 %vm9233_vm2, %v17725_v1  ;;  %17721 = vmatmul.mubr.msk.f32.gmra.mrb[12].mxu1 %vm9233_vm2, %v17717_v33  ;;  %v17773_v33 = vld [vmem:[%s21907_s3 + $0x188] sm:$0xff] }
 0x52b   : > { %18095 = vmatprep.mubr.msk.f32.mxu0 %vm9233_vm2, %v17724_v55  ;;  %14181 = vmatprep.mubr.f32.mxu1 %v19073_v0  ;;  %v21207_v54 = vpop.permute.xlu1 %15075 }
 0x52c   : > { %v14807_v12 = vpop.permute.xlu0 %14806 }
 0x52d   : > { %v14813_v27 = vsel %vm1064_vm3, %v14807_v12, %v21168_v39  ;;  %v14812_v14 = vsel %vm1064_vm3, %v21153_v57, %v14807_v12 }
 0x52e   : > { %18096 = vmatmul.mubr.msk.f32.vlgmr.msra.gmra.mrb[4].mxu0 %vm9233_vm2, %v17725_v1  ;;  %17728 = vmatmul.mubr.msk.f32.vlgmr.msra.gmra.mrb[10].mxu1 %vm9233_vm2, %v17724_v55 }
 0x52f   : > { %14311 = vmatpush1.msra.mxu0 %v14294_v62  ;;  %14388 = vmatpush1.msra.mxu1 %v14296_v21  ;;  %v21220_v29 = vpop.permute.xlu1 %15336 }
 0x530   : > { %18098 = vmatprep.subr.mxu0 %v14298_v8  ;;  %14635 = vmatprep.subr.mxu1 %v19060_v53  ;;  %v21209_v59 = vpop.permute.xlu0 %15338 }
 0x531   : > { %14374 = vmatprep.mubr.f32.mxu0 %v19073_v0  ;;  %14187 = vmatprep.mubr.f32.mxu1 %v19073_v0  ;;  %v15345_v46 = vsel %vm9984_vm0, %v21220_v29, %v21209_v59 }
 0x532   : > { %17734 = vmatmul.mubr.msk.f32.vlgmr.msra.gmra.mrb[6].mxu0 %vm9233_vm2, %v17732_v16  ;;  %17729 = vmatmul.mubr.msk.f32.gmra.mrb[12].mxu1 %vm9233_vm2, %v17725_v1 }
 0x533   : > { %18099 = vmatpush3.msra.mxu0 %v14298_v8  ;;  %14380 = vmatprep.mubr.f32.mxu0 %v19073_v0  ;;  %v21236_v34 = vpop.permute.xlu1 %15334 }
 0x534   : > { %14558 = vmatprep.subr.mxu0 %v19061_v13  ;;  %14451 = vmatprep.mubr.f32.mxu1 %v19073_v0  ;;  %v15074_v23 = vpop.permute.xlu0 %15073  ;;  %v15344_v32 = vsel %vm9984_vm0, %v21236_v34, %v21220_v29 }
 0x535   : > { %v15080_v15 = vsel %vm1762_vm5, %v15074_v23, %v21207_v54  ;;  %v15079_v42 = vsel %vm1762_vm5, %v21185_v58, %v15074_v23  ;;  %vm15941_vm5 = vcmask 719872  }
 0x536   : > { %17735 = vmatmul.mubr.msk.f32.gmra.mrb[8].mxu0 %vm9233_vm2, %v17733_v60  ;;  %17736 = vmatmul.mubr.msk.f32.vlgmr.msra.gmra.mrb[10].mxu1 %vm9233_vm2, %v17732_v16 }
 0x537   : > { %14636 = vmatpush1.msra.mxu1 %v19062_v38  ;;  %18100 = vmatprep.mubr.msk.f32.mxu0 %vm9233_vm2, %v17732_v16 }
 0x538   : > { %14902 = vmatprep.subr.mxu1 %v14813_v27  ;;  %14457 = vmatprep.mubr.f32.mxu1 %v19073_v0  ;;  %v21253_v48 = vpop.permute.xlu1 %15342 }
 0x539   : > { %v21230_v63 = vpop.permute.xlu0 %15603 }
 0x53a   : > { %18101 = vmatmul.mubr.msk.f32.vlgmr.msra.gmra.mrb[4].mxu0 %vm9233_vm2, %v17733_v60  ;;  %17737 = vmatmul.mubr.msk.f32.gmra.mrb[12].mxu1 %vm9233_vm2, %v17733_v60 }
 0x53b   : > { %14559 = vmatpush1.msra.mxu0 %v19063_v9  ;;  %14622 = vmatprep.mubr.f32.mxu0 %v19073_v0 }
 0x53c   : > { %18103 = vmatprep.subr.mxu0 %v19064_v11  ;;  %14699 = vmatprep.mubr.f32.mxu1 %v19073_v0  ;;  %v15606_v44 = vpop.permute.xlu1 %15605 }
 0x53d   : > { %v15341_v20 = vpop.permute.xlu0 %15340  ;;  %v15612_v36 = vsel %vm10252_vm4, %v21230_v63, %v15606_v44 }
 0x53e   : > { %17742 = vmatmul.mubr.msk.f32.vlgmr.msra.gmra.mrb[6].mxu0 %vm9233_vm2, %v17740_v26  ;;  %17744 = vmatmul.mubr.msk.f32.vlgmr.msra.gmra.mrb[10].mxu1 %vm9233_vm2, %v17740_v26  ;;  %v15347_v7 = vsel %vm9984_vm0, %v15341_v20, %v21253_v48  ;;  %v15346_v30 = vsel %vm9984_vm0, %v21209_v59, %v15341_v20 }
 0x53f   : > { %18104 = vmatpush3.msra.mxu0 %v19064_v11  ;;  %14903 = vmatpush1.msra.mxu1 %v14812_v14 }
 0x540   : > { %14825 = vmatprep.subr.mxu0 %v14811_v6  ;;  %15169 = vmatprep.subr.mxu1 %v15080_v15 }
 0x541   : > { %14628 = vmatprep.mubr.f32.mxu0 %v19073_v0  ;;  %14705 = vmatprep.mubr.f32.mxu1 %v19073_v0  ;;  %v15608_v45 = vpop.permute.xlu1 %15607 }
 0x542   : > { %17743 = vmatmul.mubr.msk.f32.gmra.mrb[8].mxu0 %vm9233_vm2, %v17741_v19  ;;  %17745 = vmatmul.mubr.msk.f32.gmra.mrb[12].mxu1 %vm9233_vm2, %v17741_v19  ;;  %v21267_v5 = vpop.permute.xlu0 %15601  ;;  %v15613_v52 = vsel %vm10252_vm4, %v15606_v44, %v15608_v45 }
 0x543   : > { %18105 = vmatprep.mubr.msk.f32.mxu0 %vm9233_vm2, %v17740_v26  ;;  %14966 = vmatprep.mubr.f32.mxu1 %v19073_v0  ;;  %v15611_v4 = vsel %vm10252_vm4, %v21267_v5, %v21230_v63 }
 0x546   : > { %18106 = vmatmul.mubr.msk.f32.vlgmr.msra.gmra.mrb[4].mxu0 %vm9233_vm2, %v17741_v19  ;;  %17752 = vmatmul.mubr.msk.f32.vlgmr.msra.gmra.mrb[10].mxu1 %vm9233_vm2, %v17748_v28  ;;  %v15610_v25 = vpop.permute.xlu0 %15609 }
 0x547   : > { %14826 = vmatpush1.msra.mxu0 %v14810_v43  ;;  %15170 = vmatpush1.msra.mxu1 %v15079_v42  ;;  %v15614_v51 = vsel %vm10252_vm4, %v15608_v45, %v15610_v25 }
 0x548   : > { %18108 = vmatprep.subr.mxu0 %v21168_v39  ;;  %15436 = vmatprep.subr.mxu1 %v15347_v7 }
 0x549   : > { %14889 = vmatprep.mubr.f32.mxu0 %v19073_v0  ;;  %14972 = vmatprep.mubr.f32.mxu1 %v19073_v0 }
 0x54a   : > { %17750 = vmatmul.mubr.msk.f32.vlgmr.msra.gmra.mrb[6].mxu0 %vm9233_vm2, %v17748_v28  ;;  %17753 = vmatmul.mubr.msk.f32.gmra.mrb[12].mxu1 %vm9233_vm2, %v17749_v56 }
 0x54b   : > { %18109 = vmatpush3.msra.mxu0 %v21168_v39  ;;  %14895 = vmatprep.mubr.f32.mxu0 %v19073_v0 }
 0x54c   : > { %15092 = vmatprep.subr.mxu0 %v15078_v24  ;;  %15233 = vmatprep.mubr.f32.mxu1 %v19073_v0 }
 0x54e   : > { %17751 = vmatmul.mubr.msk.f32.gmra.mrb[8].mxu0 %vm9233_vm2, %v17749_v56  ;;  %17760 = vmatmul.mubr.msk.f32.vlgmr.msra.gmra.mrb[10].mxu1 %vm9233_vm2, %v17756_v17 }
 0x54f   : > { %15437 = vmatpush1.msra.mxu1 %v15346_v30  ;;  %18110 = vmatprep.mubr.msk.f32.mxu0 %vm9233_vm2, %v17748_v28 }
 0x550   : > { %15703 = vmatprep.subr.mxu1 %v15614_v51  ;;  %15239 = vmatprep.mubr.f32.mxu1 %v19073_v0 }
 0x552   : > { %18111 = vmatmul.mubr.msk.f32.vlgmr.msra.gmra.mrb[4].mxu0 %vm9233_vm2, %v17749_v56  ;;  %17761 = vmatmul.mubr.msk.f32.gmra.mrb[12].mxu1 %vm9233_vm2, %v17757_v18 }
 0x553   : > { %15093 = vmatpush1.msra.mxu0 %v15077_v31  ;;  %15156 = vmatprep.mubr.f32.mxu0 %v19073_v0 }
 0x554   : > { %18113 = vmatprep.subr.mxu0 %v21207_v54  ;;  %15500 = vmatprep.mubr.f32.mxu1 %v19073_v0  ;;  %v15870_v37 = vpop.permute.xlu1 %15869 }
 0x556   : > { %17758 = vmatmul.mubr.msk.f32.vlgmr.msra.gmra.mrb[6].mxu0 %vm9233_vm2, %v17756_v17  ;;  %17768 = vmatmul.mubr.msk.f32.vlgmr.msra.gmra.mrb[10].mxu1 %vm9233_vm2, %v17764_v22 }
 0x557   : > { %18114 = vmatpush3.msra.mxu0 %v21207_v54  ;;  %15704 = vmatpush1.msra.mxu1 %v15613_v52  ;;  %v15875_v40 = vpop.permute.xlu0 %15874 }
 0x558   : > { %15359 = vmatprep.subr.mxu0 %v15345_v46  ;;  %15162 = vmatprep.mubr.f32.mxu0 %v19073_v0 }
 0x559   : > { %15506 = vmatprep.mubr.f32.mxu1 %v19073_v0 }
 0x55a   : > { %17759 = vmatmul.mubr.msk.f32.gmra.mrb[8].mxu0 %vm9233_vm2, %v17757_v18  ;;  %17769 = vmatmul.mubr.msk.f32.gmra.mrb[12].mxu1 %vm9233_vm2, %v17765_v49 }
 0x55b   : > { %18115 = vmatprep.mubr.msk.f32.mxu0 %vm9233_vm2, %v17756_v17  ;;  %15767 = vmatprep.mubr.f32.mxu1 %v19073_v0 }
 0x55e   : > { %18116 = vmatmul.mubr.msk.f32.vlgmr.msra.gmra.mrb[4].mxu0 %vm9233_vm2, %v17757_v18  ;;  %17776 = vmatmul.mubr.msk.f32.vlgmr.msra.gmra.mrb[10].mxu1 %vm9233_vm2, %v17772_v47 }
 0x55f   : > { %15360 = vmatpush1.msra.mxu0 %v15344_v32  ;;  %15423 = vmatprep.mubr.f32.mxu0 %v19073_v0 }
 0x560   : > { %18118 = vmatprep.subr.mxu0 %v21253_v48  ;;  %15773 = vmatprep.mubr.f32.mxu1 %v19073_v0  ;;  %v9306_v50 = vpop.f32.mrb[6].mxu1 }
 0x561   : > { %v9308_v35 = vpop.f32.mrb[7].mxu1 }
 0x562   : > { %17766 = vmatmul.mubr.msk.f32.vlgmr.msra.gmra.mrb[6].mxu0 %vm9233_vm2, %v17764_v22  ;;  %17777 = vmatmul.mubr.msk.f32.gmra.mrb[12].mxu1 %vm9233_vm2, %v17773_v33 }
 0x563   : > { %18119 = vmatpush3.msra.mxu0 %v21253_v48  ;;  %15429 = vmatprep.mubr.f32.mxu0 %v19073_v0 }
 0x564   : > { %15626 = vmatprep.subr.mxu0 %v15612_v36  ;;  %v9312_v2 = vpop.f32.mrb[8].mxu1 }
 0x565   : > { %v9314_v57 = vpop.f32.mrb[9].mxu1 }
 0x566   : > { %17767 = vmatmul.mubr.msk.f32.gmra.mrb[8].mxu0 %vm9233_vm2, %v17765_v49 }
 0x567   : > { %18120 = vmatprep.mubr.msk.f32.mxu0 %vm9233_vm2, %v17764_v22 }
 0x56a   : > { %18121 = vmatmul.mubr.msk.f32.vlgmr.msra.gmra.mrb[4].mxu0 %vm9233_vm2, %v17765_v49 }
 0x56b   : > { %15627 = vmatpush1.msra.mxu0 %v15611_v4  ;;  %15690 = vmatprep.mubr.f32.mxu0 %v19073_v0 }
 0x56c   : > { %18123 = vmatprep.subr.mxu0 %v15610_v25 }
 0x56e   : > { %17774 = vmatmul.mubr.msk.f32.vlgmr.msra.gmra.mrb[6].mxu0 %vm9233_vm2, %v17772_v47 }
 0x56f   : > { %18124 = vmatpush3.msra.mxu0 %v15610_v25  ;;  %15696 = vmatprep.mubr.f32.mxu0 %v19073_v0 }
 0x572   : > { %17775 = vmatmul.mubr.msk.f32.gmra.mrb[8].mxu0 %vm9233_vm2, %v17773_v33 }
 0x573   : > { %18125 = vmatprep.mubr.msk.f32.mxu0 %vm9233_vm2, %v17772_v47 }
 0x576   : > { %18126 = vmatmul.mubr.msk.f32.vlgmr.msra.gmra.mrb[4].mxu0 %vm9233_vm2, %v17773_v33 }
 0x577   : > { %18158 = vmatprep.mubr.msk.f32.mxu0 %vm19101_vm15, %v19073_v0 }
 0x631   : > { %v15769_v55 = vpop.f32.mrb[10].mxu1 }
 0x632   : > { %v15879_v39 = vadd.f32 %v15870_v37, %v15769_v55  ;;  %v15771_v3 = vpop.f32.mrb[11].mxu1 }
 0x633   : > { %v15880_v61 = vadd.f32 %v15870_v37, %v15771_v3 }
 0x634   : > { %v15889_v10 = vsub.f32 0.0, %v15879_v39 }
 0x635   : > { %v15890_v1 = vsub.f32 0.0, %v15880_v61  ;;  %v15775_v58 = vpop.f32.mrb[12].mxu1 }
 0x636   : > { %v15901_v41 = vmul.f32 1.442695, %v15889_v10  ;;  %v15884_v12 = vadd.f32 %v15875_v40, %v15775_v58  ;;  %v15777_v62 = vpop.f32.mrb[13].mxu1 }
 0x637   : > { %v15903_v21 = vmul.f32 1.442695, %v15890_v1  ;;  %v15885_v8 = vadd.f32 %v15875_v40, %v15777_v62 }
 0x638   : > { %18916 = vpow2.f32 %v15901_v41  ;;  %v15894_v16 = vsub.f32 0.0, %v15884_v12 }
 0x639   : > { %18918 = vpow2.f32 %v15903_v21  ;;  %v15895_v54 = vsub.f32 0.0, %v15885_v8 }
 0x63a   : > { %v15911_v53 = vmul.f32 1.442695, %v15894_v16 }
 0x63b   : > { %v15913_v59 = vmul.f32 1.442695, %v15895_v54 }
 0x63c   : > { %18920 = vpow2.f32 %v15911_v53 }
 0x63d   : > { %18922 = vpow2.f32 %v15913_v59 }
 0x641   : > { %v15692_v60 = vpop.f32.mrb[6].mxu0 }
 0x642   : > { %v18917_v13 = vpop.eup %18916  ;;  %v18318_v23 = vadd.f32 %v15692_v60, %v9306_v50  ;;  %v15694_v29 = vpop.f32.mrb[7].mxu0 }
 0x643   : > { %v18919_v38 = vpop.eup %18918  ;;  %v15919_v27 = vadd.f32 1.0, %v18917_v13  ;;  %v18319_v63 = vadd.f32 %v15694_v29, %v9308_v35 }
 0x644   : > { %v15920_v9 = vadd.f32 1.0, %v18919_v38  ;;  %v15877_v26 = vadd.f32 %v18318_v23, %v15870_v37 }
 0x645   : > { %18924 = vrcp.f32 %v15919_v27  ;;  %v15878_v34 = vadd.f32 %v18319_v63, %v15870_v37  ;;  %v15698_v11 = vpop.f32.mrb[8].mxu0 }
 0x646   : > { %v18921_v14 = vpop.eup %18920  ;;  %18926 = vrcp.f32 %v15920_v9  ;;  %v15887_v6 = vsub.f32 0.0, %v15877_v26  ;;  %v18320_v15 = vadd.f32 %v15698_v11, %v9312_v2  ;;  %v15700_v19 = vpop.f32.mrb[9].mxu0 }
 0x647   : > { %v18923_v20 = vpop.eup %18922  ;;  %v15924_v48 = vadd.f32 1.0, %v18921_v14  ;;  %v15888_v28 = vsub.f32 0.0, %v15878_v34  ;;  %v18321_v43 = vadd.f32 %v15700_v19, %v9314_v57 }
 0x648   : > { %v15925_v42 = vadd.f32 1.0, %v18923_v20  ;;  %v15897_v5 = vmul.f32 1.442695, %v15887_v6  ;;  %v15882_v7 = vadd.f32 %v18320_v15, %v15875_v40 }
 0x649   : > { %18928 = vrcp.f32 %v15924_v48  ;;  %v15899_v56 = vmul.f32 1.442695, %v15888_v28  ;;  %v15883_v44 = vadd.f32 %v18321_v43, %v15875_v40  ;;  %v18127_v24 = vpop.f32.mrb[4].mxu0 }
 0x64a   : > { %18930 = vrcp.f32 %v15925_v42  ;;  %v15892_v17 = vsub.f32 0.0, %v15882_v7  ;;  %v15886_v25 = vadd.f32 %v18127_v24, %v15875_v40  ;;  %v15846_v30 = vpop.f32.mrb[5].mxu0 }
 0x64b   : > { %18932 = vpow2.f32 %v15897_v5  ;;  %v15893_v45 = vsub.f32 0.0, %v15883_v44  ;;  %v15881_v51 = vadd.f32 %v15870_v37, %v15846_v30 }
 0x64c   : > { %18934 = vpow2.f32 %v15899_v56  ;;  %v15907_v18 = vmul.f32 1.442695, %v15892_v17  ;;  %v15896_v31 = vsub.f32 0.0, %v15886_v25 }
 0x64d   : > { %v15909_v22 = vmul.f32 1.442695, %v15893_v45  ;;  %v15891_v52 = vsub.f32 0.0, %v15881_v51 }
 0x64e   : > { %18936 = vpow2.f32 %v15907_v18  ;;  %v15915_v46 = vmul.f32 1.442695, %v15896_v31 }
 0x64f   : > { %v18925_v49 = vpop.eup %18924  ;;  %18938 = vpow2.f32 %v15909_v22  ;;  %v15905_v47 = vmul.f32 1.442695, %v15891_v52 }
 0x650   : > { %v21359_v32 = vpop.eup %18926  ;;  %18940 = vpow2.f32 %v15915_v46  ;;  %15972 = vrot.lane.b32.xlu0 %v18925_v49, %s19075_s24 }
 0x651   : > { %18942 = vpow2.f32 %v15905_v47  ;;  %15974 = vrot.lane.b32.xlu1 %v21359_v32, %s19075_s24 }
 0x653   : > { %v18929_v33 = vpop.eup %18928 }
 0x654   : > { %v21364_v50 = vpop.eup %18930 }
 0x655   : > { %v18933_v35 = vpop.eup %18932 }
 0x656   : > { %v18935_v36 = vpop.eup %18934  ;;  %v15917_v2 = vadd.f32 1.0, %v18933_v35 }
 0x657   : > { %v15918_v57 = vadd.f32 1.0, %v18935_v36 }
 0x658   : > { %v18937_v4 = vpop.eup %18936  ;;  %18944 = vrcp.f32 %v15917_v2 }
 0x659   : > { %v18939_v37 = vpop.eup %18938  ;;  %18946 = vrcp.f32 %v15918_v57  ;;  %v15922_v55 = vadd.f32 1.0, %v18937_v4 }
 0x65a   : > { %v18941_v39 = vpop.eup %18940  ;;  %v15923_v3 = vadd.f32 1.0, %v18939_v37 }
 0x65b   : > { %v18943_v61 = vpop.eup %18942  ;;  %18948 = vrcp.f32 %v15922_v55  ;;  %v15926_v10 = vadd.f32 1.0, %v18941_v39 }
 0x65c   : > { %18950 = vrcp.f32 %v15923_v3  ;;  %v15921_v40 = vadd.f32 1.0, %v18943_v61 }
 0x65d   : > { %18952 = vrcp.f32 %v15926_v10 }
 0x65e   : > { %18954 = vrcp.f32 %v15921_v40 }
 0x662   : > { %v18945_v1 = vpop.eup %18944 }
 0x663   : > { %v18947_v58 = vpop.eup %18946 }
 0x664   : > { %15970 = vrot.lane.b32.xlu1 %v18947_v58, %s19075_s24 }
 0x665   : > { %v18949_v41 = vpop.eup %18948 }
 0x666   : > { %v18951_v12 = vpop.eup %18950 }
 0x667   : > { %v18953_v62 = vpop.eup %18952  ;;  %15980 = vrot.lane.b32.xlu0 %v18951_v12, %s19075_s24 }
 0x668   : > { %v18955_v21 = vpop.eup %18954  ;;  %15947 = vst.msk [vmem:[#allocation4 + $0x48] sm:$0xff] %vm15941_vm5, %v18953_v62  ;;  %15982 = vrot.lane.b32.xlu1 %v18929_v33, %s19075_s24  ;;  %v19100_v62 = vmov 0.0|0.0  }
 0x669   : > { %15942 = vst.msk [vmem:[#allocation4 + $0x20] sm:$0xff] %vm15941_vm5, %v18955_v21  ;;  %18275 = vmatprep.subr.bf16.mxu0 %v19100_v62 }
 0x66b   : > { %15984 = vrot.lane.b32.xlu0 %v21364_v50, %s19075_s24 }
 0x66c   : > { %15968 = vrot.lane.b32.xlu1 %v18945_v1, %s19075_s24 }
 0x66f   : > { %15978 = vrot.lane.b32.xlu0 %v18949_v41, %s19075_s24  ;;  %v15957_v16 = vld [vmem:[#allocation4 + $0x48] sm:$0xff] }
 0x670   : > { %v15952_v8 = vld [vmem:[#allocation4 + $0x20] sm:$0xff] }
 0x671   : > { %15976 = vrot.lane.b32.xlu1 %v15952_v8, %s19075_s24 }
 0x673   : > { %15986 = vrot.lane.b32.xlu0 %v15957_v16, %s19075_s24  ;;  %s19098_s24 = smov 116  }
 0x6c2   : > { %v15973_v54 = vpop.permute.xlu0 %15972 }
 0x6c3   : > { %v15975_v53 = vpop.permute.xlu1 %15974 }
 0x6c4   : > { %v15990_v59 = vsel %vm1064_vm3, %v15973_v54, %v15975_v53 }
 0x6c5   : > { %v16008_v60 = vmax.f32 %v18925_v49, %v15990_v59 }
 0x6c7   : > { %16030 = vrot.lane.b32.xlu0 %v16008_v60, %s19083_s21 }
 0x6d6   : > { %v15971_v13 = vpop.permute.xlu1 %15970 }
 0x6d7   : > { %v15989_v23 = vsel %vm1064_vm3, %v15971_v13, %v15973_v54 }
 0x6d8   : > { %v16007_v29 = vmax.f32 %v18947_v58, %v15989_v23 }
 0x6d9   : > { %v15981_v38 = vpop.permute.xlu0 %15980 }
 0x6da   : > { %v15983_v27 = vpop.permute.xlu1 %15982  ;;  %16028 = vrot.lane.b32.xlu1 %v16007_v29, %s19083_s21 }
 0x6db   : > { %v15993_v63 = vsel %vm1064_vm3, %v15981_v38, %v15983_v27 }
 0x6dc   : > { %v16012_v9 = vmax.f32 %v18951_v12, %v15993_v63  ;;  %v16347_v12 = vld [vmem:[%s21909_s5 + $0x8] sm:$0xff] }
 0x6dd   : > { %v15985_v26 = vpop.permute.xlu0 %15984  ;;  %16581 = vmatprep.mubr.f32.mxu1 %v16347_v12 }
 0x6de   : > { %v15969_v34 = vpop.permute.xlu1 %15968  ;;  %16038 = vrot.lane.b32.xlu1 %v16012_v9, %s19083_s21  ;;  %v15994_v11 = vsel %vm1064_vm3, %v15983_v27, %v15985_v26 }
 0x6df   : > { %v15988_v14 = vsel %vm1064_vm3, %v15969_v34, %v15971_v13  ;;  %v16013_v6 = vmax.f32 %v18929_v33, %v15994_v11 }
 0x6e0   : > { %v16006_v15 = vmax.f32 %v18945_v1, %v15988_v14 }
 0x6e1   : > { %16040 = vrot.lane.b32.xlu0 %v16013_v6, %s19083_s21  ;;  %v15979_v19 = vpop.permute.xlu0 %15978 }
 0x6e2   : > { %16026 = vrot.lane.b32.xlu1 %v16006_v15, %s19083_s21  ;;  %v15992_v20 = vsel %vm1064_vm3, %v15979_v19, %v15981_v38 }
 0x6e3   : > { %v15977_v48 = vpop.permute.xlu1 %15976  ;;  %v16011_v28 = vmax.f32 %v18949_v41, %v15992_v20 }
 0x6e4   : > { %v15991_v43 = vsel %vm1064_vm3, %v15975_v53, %v15977_v48  ;;  %v16010_v44 = vmax.f32 %v15952_v8, %v15977_v48 }
 0x6e5   : > { %v16009_v42 = vmax.f32 %v21359_v32, %v15991_v43  ;;  %16036 = vrot.lane.b32.xlu0 %v16011_v28, %s19083_s21  ;;  %v15987_v5 = vpop.permute.xlu0 %15986 }
 0x6e6   : > { %v15995_v7 = vsel %vm1064_vm3, %v15985_v26, %v15987_v5  ;;  %v16015_v24 = vmax.f32 %v15957_v16, %v15987_v5  ;;  %vm16078_vm3 = vcmask 162816  }
 0x6e7   : > { %16032 = vrot.lane.b32.xlu1 %v16009_v42, %s19083_s21  ;;  %v16014_v56 = vmax.f32 %v21364_v50, %v15995_v7 }
 0x6e9   : > { %16042 = vrot.lane.b32.xlu0 %v16014_v56, %s19083_s21 }
 0x6eb   : > { %16034 = vrot.lane.b32.xlu1 %v16010_v44, %s19083_s21 }
 0x6ed   : > { %16044 = vrot.lane.b32.xlu0 %v16015_v24, %s19083_s21 }
 0x739   : > { %v16031_v17 = vpop.permute.xlu0 %16030 }
 0x74c   : > { %v16029_v25 = vpop.permute.xlu1 %16028 }
 0x74d   : > { %v16047_v30 = vsel %vm3856_vm11, %v16029_v25, %v16031_v17 }
 0x74e   : > { %v16065_v45 = vmax.f32 %v16007_v29, %v16047_v30 }
 0x750   : > { %16140 = vst.msk [vmem:[#allocation6 + $0x50] sm:$0xff] %vm16087_vm13, %v16065_v45  ;;  %v16039_v51 = vpop.permute.xlu1 %16038  ;;  %16170 = vrot.lane.b32.xlu1 %v16065_v45, %s19098_s24 }
 0x753   : > { %v16041_v18 = vpop.permute.xlu0 %16040 }
 0x754   : > { %v16027_v31 = vpop.permute.xlu1 %16026  ;;  %v16051_v22 = vsel %vm3856_vm11, %v16039_v51, %v16041_v18  ;;  %16182 = vrot.lane.b32.xlu1 %v16065_v45, %s19099_s15 }
 0x755   : > { %v16046_v52 = vsel %vm3856_vm11, %v16027_v31, %v16029_v25  ;;  %v16070_v46 = vmax.f32 %v16012_v9, %v16051_v22 }
 0x756   : > { %v16064_v49 = vmax.f32 %v16006_v15, %v16046_v52 }
 0x757   : > { %16141 = vst.msk [vmem:[#allocation6 + $0x58] sm:$0xff] %vm16087_vm13, %v16070_v46  ;;  %v16037_v47 = vpop.permute.xlu0 %16036  ;;  %16172 = vrot.lane.b32.xlu0 %v16070_v46, %s19098_s24 }
 0x758   : > { %16088 = vst.msk [vmem:[#allocation6] sm:$0xff] %vm16087_vm13, %v16064_v49  ;;  %v16050_v32 = vsel %vm3856_vm11, %v16037_v47, %v16039_v51  ;;  %16094 = vrot.lane.b32.xlu1 %v16064_v49, %s19077_s26 }
 0x759   : > { %v16033_v33 = vpop.permute.xlu1 %16032  ;;  %v16069_v50 = vmax.f32 %v16011_v28, %v16050_v32 }
 0x75a   : > { %v16048_v35 = vsel %vm3856_vm11, %v16031_v17, %v16033_v33 }
 0x75b   : > { %v16066_v36 = vmax.f32 %v16008_v60, %v16048_v35  ;;  %16089 = vst.msk [vmem:[#allocation6 + $0x8] sm:$0xff] %vm16087_vm13, %v16069_v50  ;;  %v16043_v2 = vpop.permute.xlu0 %16042  ;;  %16184 = vrot.lane.b32.xlu0 %v16070_v46, %s19099_s15 }
 0x75c   : > { %v16052_v57 = vsel %vm3856_vm11, %v16041_v18, %v16043_v2  ;;  %16106 = vrot.lane.b32.xlu1 %v16064_v49, %s19095_s28 }
 0x75d   : > { %16192 = vst.msk [vmem:[#allocation6 + $0xa0] sm:$0xff] %vm16087_vm13, %v16066_v36  ;;  %v16035_v4 = vpop.permute.xlu1 %16034  ;;  %v16071_v37 = vmax.f32 %v16013_v6, %v16052_v57 }
 0x75e   : > { %v16049_v55 = vsel %vm3856_vm11, %v16033_v33, %v16035_v4  ;;  %v16068_v39 = vmax.f32 %v16010_v44, %v16035_v4 }
 0x75f   : > { %v16067_v3 = vmax.f32 %v16009_v42, %v16049_v55  ;;  %16193 = vst.msk [vmem:[#allocation6 + $0xa8] sm:$0xff] %vm16087_vm13, %v16071_v37  ;;  %v16045_v61 = vpop.permute.xlu0 %16044  ;;  %16096 = vrot.lane.b32.xlu0 %v16069_v50, %s19077_s26  ;;  %v16406_v63 = vld [vmem:[#allocation6] sm:$0xff]  ;;  %v16417_v55 = vld [vmem:[#allocation6 + $0x58] sm:$0xff] }
 0x760   : > { %16079 = vst.msk [vmem:[#allocation5 + $0x20] sm:$0xff] %vm16078_vm3, %v16068_v39  ;;  %v16053_v10 = vsel %vm3856_vm11, %v16043_v2, %v16045_v61  ;;  %v16073_v40 = vmax.f32 %v16015_v24, %v16045_v61  ;;  %16118 = vrot.lane.b32.xlu1 %v16064_v49, %s19098_s24  ;;  %vm16471_vm11 = vcmask 130048  }
 0x761   : > { %16244 = vst.msk [vmem:[#allocation6 + $0xf0] sm:$0xff] %vm16087_vm13, %v16067_v3  ;;  %v16072_v1 = vmax.f32 %v16014_v56, %v16053_v10 }
 0x762   : > { %16084 = vst.msk [vmem:[#allocation5 + $0x48] sm:$0xff] %vm16078_vm3, %v16073_v40  ;;  %v16407_v60 = vld [vmem:[#allocation6 + $0x8] sm:$0xff] }
 0x763   : > { %16245 = vst.msk [vmem:[#allocation6 + $0xf8] sm:$0xff] %vm16087_vm13, %v16072_v1  ;;  %16108 = vrot.lane.b32.xlu0 %v16069_v50, %s19095_s28  ;;  %v18218_v9 = vpack.c.bf16 %v16407_v60, %v16406_v63 }
 0x764   : > { %16130 = vrot.lane.b32.xlu1 %v16064_v49, %s19099_s15  ;;  %v16426_v42 = vld [vmem:[#allocation6 + $0xa0] sm:$0xff] }
 0x766   : > { %v16427_v15 = vld [vmem:[#allocation6 + $0xa8] sm:$0xff] }
 0x767   : > { %v16294_v58 = vld [vmem:[#allocation5 + $0x20] sm:$0xff]  ;;  %16120 = vrot.lane.b32.xlu0 %v16069_v50, %s19098_s24  ;;  %v18224_v5 = vpack.c.bf16 %v16427_v15, %v16426_v42 }
 0x768   : > { %16296 = vst.msk [vmem:[#allocation6 + $0x140] sm:$0xff] %vm16087_vm13, %v16294_v58  ;;  %16198 = vrot.lane.b32.xlu1 %v16066_v36, %s19077_s26 }
 0x769   : > { %v16295_v41 = vld [vmem:[#allocation5 + $0x48] sm:$0xff] }
 0x76a   : > { %16297 = vst.msk [vmem:[#allocation6 + $0x148] sm:$0xff] %vm16087_vm13, %v16295_v41 }
 0x76b   : > { %16132 = vrot.lane.b32.xlu0 %v16069_v50, %s19099_s15 }
 0x76c   : > { %16210 = vrot.lane.b32.xlu1 %v16066_v36, %s19095_s28 }
 0x76f   : > { %16200 = vrot.lane.b32.xlu0 %v16071_v37, %s19077_s26 }
 0x770   : > { %16222 = vrot.lane.b32.xlu1 %v16066_v36, %s19098_s24 }
 0x773   : > { %16212 = vrot.lane.b32.xlu0 %v16071_v37, %s19095_s28 }
 0x774   : > { %16234 = vrot.lane.b32.xlu1 %v16066_v36, %s19099_s15 }
 0x777   : > { %16224 = vrot.lane.b32.xlu0 %v16071_v37, %s19098_s24 }
 0x778   : > { %16146 = vrot.lane.b32.xlu1 %v16065_v45, %s19077_s26 }
 0x77b   : > { %16236 = vrot.lane.b32.xlu0 %v16071_v37, %s19099_s15 }
 0x77c   : > { %16158 = vrot.lane.b32.xlu1 %v16065_v45, %s19095_s28 }
 0x77f   : > { %16148 = vrot.lane.b32.xlu0 %v16070_v46, %s19077_s26 }
 0x780   : > { %16250 = vrot.lane.b32.xlu1 %v16067_v3, %s19077_s26 }
 0x783   : > { %16160 = vrot.lane.b32.xlu0 %v16070_v46, %s19095_s28 }
 0x784   : > { %16262 = vrot.lane.b32.xlu1 %v16067_v3, %s19095_s28 }
 0x787   : > { %16252 = vrot.lane.b32.xlu0 %v16072_v1, %s19077_s26 }
 0x788   : > { %16274 = vrot.lane.b32.xlu1 %v16067_v3, %s19098_s24 }
 0x78b   : > { %16264 = vrot.lane.b32.xlu0 %v16072_v1, %s19095_s28 }
 0x78c   : > { %16286 = vrot.lane.b32.xlu1 %v16067_v3, %s19099_s15 }
 0x78f   : > { %16276 = vrot.lane.b32.xlu0 %v16072_v1, %s19098_s24 }
 0x790   : > { %16302 = vrot.lane.b32.xlu1 %v16294_v58, %s19077_s26 }
 0x793   : > { %16288 = vrot.lane.b32.xlu0 %v16072_v1, %s19099_s15  ;;  %v16416_v1 = vld [vmem:[#allocation6 + $0x50] sm:$0xff] }
 0x794   : > { %16314 = vrot.lane.b32.xlu1 %v16294_v58, %s19095_s28 }
 0x797   : > { %16304 = vrot.lane.b32.xlu0 %v16295_v41, %s19077_s26 }
 0x798   : > { %16326 = vrot.lane.b32.xlu1 %v16294_v58, %s19098_s24 }
 0x79b   : > { %16316 = vrot.lane.b32.xlu0 %v16295_v41, %s19095_s28 }
 0x79c   : > { %16338 = vrot.lane.b32.xlu1 %v16294_v58, %s19099_s15  ;;  %v18238_v58 = vpack.c.bf16 %v16417_v55, %v16416_v1 }
 0x79f   : > { %16328 = vrot.lane.b32.xlu0 %v16295_v41, %s19098_s24 }
 0x7a3   : > { %16340 = vrot.lane.b32.xlu0 %v16295_v41, %s19099_s15 }
 0x7c2   : > { %v16171_v21 = vpop.permute.xlu1 %16170 }
 0x7c3   : > { %16176 = vst.msk [vmem:[#allocation6 + $0x80] sm:$0xff] %vm16087_vm13, %v16171_v21 }
 0x7c6   : > { %v16183_v8 = vpop.permute.xlu1 %16182 }
 0x7c7   : > { %16188 = vst.msk [vmem:[#allocation6 + $0x90] sm:$0xff] %vm16087_vm13, %v16183_v8 }
 0x7c9   : > { %v16173_v16 = vpop.permute.xlu0 %16172 }
 0x7ca   : > { %v16095_v54 = vpop.permute.xlu1 %16094  ;;  %16177 = vst.msk [vmem:[#allocation6 + $0x88] sm:$0xff] %vm16087_vm13, %v16173_v16  ;;  %v16422_v23 = vld [vmem:[#allocation6 + $0x80] sm:$0xff] }
 0x7cb   : > { %16100 = vst.msk [vmem:[#allocation6 + $0x10] sm:$0xff] %vm16087_vm13, %v16095_v54  ;;  %v16437_v54 = vld [vmem:[#allocation6 + $0xf8] sm:$0xff] }
 0x7cd   : > { %v16185_v53 = vpop.permute.xlu0 %16184 }
 0x7ce   : > { %v16107_v59 = vpop.permute.xlu1 %16106  ;;  %16189 = vst.msk [vmem:[#allocation6 + $0x98] sm:$0xff] %vm16087_vm13, %v16185_v53  ;;  %v16424_v34 = vld [vmem:[#allocation6 + $0x90] sm:$0xff] }
 0x7cf   : > { %16112 = vst.msk [vmem:[#allocation6 + $0x20] sm:$0xff] %vm16087_vm13, %v16107_v59 }
 0x7d1   : > { %v16097_v13 = vpop.permute.xlu0 %16096  ;;  %v16423_v29 = vld [vmem:[#allocation6 + $0x88] sm:$0xff] }
 0x7d2   : > { %v16119_v38 = vpop.permute.xlu1 %16118  ;;  %16101 = vst.msk [vmem:[#allocation6 + $0x18] sm:$0xff] %vm16087_vm13, %v16097_v13  ;;  %v18216_v27 = vpack.c.bf16 %v16423_v29, %v16422_v23  ;;  %v16408_v20 = vld [vmem:[#allocation6 + $0x10] sm:$0xff] }
 0x7d3   : > { %16124 = vst.msk [vmem:[#allocation6 + $0x30] sm:$0xff] %vm16087_vm13, %v16119_v38  ;;  %v16436_v29 = vld [vmem:[#allocation6 + $0xf0] sm:$0xff] }
 0x7d4   : > { %18217 = vmatprep.subr.bf16.mxu1 %v18216_v27  ;;  %v18244_v38 = vpack.c.bf16 %v16437_v54, %v16436_v29  ;;  %v16382_v29 = vld [vmem:[%s21909_s5 + $0x120] sm:$0xff] }
 0x7d5   : > { %18219 = vmatpush3.bf16.msra.mxu1 %v18218_v9  ;;  %v16109_v26 = vpop.permute.xlu0 %16108  ;;  %v16425_v11 = vld [vmem:[#allocation6 + $0x98] sm:$0xff] }
 0x7d6   : > { %v16131_v14 = vpop.permute.xlu1 %16130  ;;  %16113 = vst.msk [vmem:[#allocation6 + $0x28] sm:$0xff] %vm16087_vm13, %v16109_v26  ;;  %v18220_v6 = vpack.c.bf16 %v16425_v11, %v16424_v34  ;;  %v16410_v56 = vld [vmem:[#allocation6 + $0x20] sm:$0xff]  ;;  %v16346_v11 = vld [vmem:[%s21909_s5] sm:$0xff] }
 0x7d7   : > { %16136 = vst.msk [vmem:[#allocation6 + $0x40] sm:$0xff] %vm16087_vm13, %v16131_v14 }
 0x7d8   : > { %18221 = vmatprep.subr.bf16.mxu1 %v18220_v6 }
 0x7d9   : > { %v16121_v19 = vpop.permute.xlu0 %16120  ;;  %v16409_v48 = vld [vmem:[#allocation6 + $0x18] sm:$0xff] }
 0x7da   : > { %v16199_v28 = vpop.permute.xlu1 %16198  ;;  %16125 = vst.msk [vmem:[#allocation6 + $0x38] sm:$0xff] %vm16087_vm13, %v16121_v19  ;;  %v18222_v43 = vpack.c.bf16 %v16409_v48, %v16408_v20  ;;  %v16412_v47 = vld [vmem:[#allocation6 + $0x30] sm:$0xff]  ;;  %v16351_v19 = vld [vmem:[%s21909_s5 + $0x28] sm:$0xff] }
 0x7db   : > { %16204 = vst.msk [vmem:[#allocation6 + $0xb0] sm:$0xff] %vm16087_vm13, %v16199_v28  ;;  %v16350_v28 = vld [vmem:[%s21909_s5 + $0x20] sm:$0xff] }
 0x7dc   : > { %18223 = vmatpush3.bf16.msra.mxu1 %v18222_v43 }
 0x7dd   : > { %18225 = vmatprep.subr.bf16.mxu1 %v18224_v5  ;;  %v16133_v7 = vpop.permute.xlu0 %16132  ;;  %v16411_v44 = vld [vmem:[#allocation6 + $0x28] sm:$0xff] }
 0x7de   : > { %v16211_v24 = vpop.permute.xlu1 %16210  ;;  %16137 = vst.msk [vmem:[#allocation6 + $0x48] sm:$0xff] %vm16087_vm13, %v16133_v7  ;;  %v18226_v17 = vpack.c.bf16 %v16411_v44, %v16410_v56  ;;  %v16414_v4 = vld [vmem:[#allocation6 + $0x40] sm:$0xff] }
 0x7df   : > { %16216 = vst.msk [vmem:[#allocation6 + $0xc0] sm:$0xff] %vm16087_vm13, %v16211_v24  ;;  %v16355_v7 = vld [vmem:[%s21909_s5 + $0x48] sm:$0xff]  ;;  %v16354_v24 = vld [vmem:[%s21909_s5 + $0x40] sm:$0xff] }
 0x7e0   : > { %18227 = vmatpush3.bf16.msra.mxu1 %v18226_v17 }
 0x7e1   : > { %v16201_v25 = vpop.permute.xlu0 %16200  ;;  %v16413_v18 = vld [vmem:[#allocation6 + $0x38] sm:$0xff] }
 0x7e2   : > { %v16223_v30 = vpop.permute.xlu1 %16222  ;;  %16205 = vst.msk [vmem:[#allocation6 + $0xb8] sm:$0xff] %vm16087_vm13, %v16201_v25  ;;  %v16428_v22 = vld [vmem:[#allocation6 + $0xb0] sm:$0xff]  ;;  %v18230_v32 = vpack.c.bf16 %v16413_v18, %v16412_v47 }
 0x7e3   : > { %16228 = vst.msk [vmem:[#allocation6 + $0xd0] sm:$0xff] %vm16087_vm13, %v16223_v30 }
 0x7e5   : > { %v16213_v45 = vpop.permute.xlu0 %16212  ;;  %v16415_v33 = vld [vmem:[#allocation6 + $0x48] sm:$0xff] }
 0x7e6   : > { %v16235_v51 = vpop.permute.xlu1 %16234  ;;  %16217 = vst.msk [vmem:[#allocation6 + $0xc8] sm:$0xff] %vm16087_vm13, %v16213_v45  ;;  %v16430_v35 = vld [vmem:[#allocation6 + $0xc0] sm:$0xff]  ;;  %v18234_v37 = vpack.c.bf16 %v16415_v33, %v16414_v4  ;;  %v16447_v33 = vld [vmem:[#allocation6 + $0x148] sm:$0xff] }
 0x7e7   : > { %16240 = vst.msk [vmem:[#allocation6 + $0xe0] sm:$0xff] %vm16087_vm13, %v16235_v51  ;;  %v16359_v45 = vld [vmem:[%s21909_s5 + $0x68] sm:$0xff] }
 0x7e9   : > { %v16225_v31 = vpop.permute.xlu0 %16224  ;;  %v16429_v52 = vld [vmem:[#allocation6 + $0xb8] sm:$0xff] }
 0x7ea   : > { %v16147_v46 = vpop.permute.xlu1 %16146  ;;  %16229 = vst.msk [vmem:[#allocation6 + $0xd8] sm:$0xff] %vm16087_vm13, %v16225_v31  ;;  %v18228_v49 = vpack.c.bf16 %v16429_v52, %v16428_v22  ;;  %v16432_v3 = vld [vmem:[#allocation6 + $0xd0] sm:$0xff]  ;;  %v16358_v31 = vld [vmem:[%s21909_s5 + $0x60] sm:$0xff] }
 0x7eb   : > { %16152 = vst.msk [vmem:[#allocation6 + $0x60] sm:$0xff] %vm16087_vm13, %v16147_v46 }
 0x7ec   : > { %18229 = vmatprep.subr.bf16.mxu1 %v18228_v49  ;;  %v16363_v49 = vld [vmem:[%s21909_s5 + $0x88] sm:$0xff] }
 0x7ed   : > { %18231 = vmatpush3.bf16.msra.mxu1 %v18230_v32  ;;  %v16237_v50 = vpop.permute.xlu0 %16236  ;;  %v16431_v36 = vld [vmem:[#allocation6 + $0xc8] sm:$0xff] }
 0x7ee   : > { %v16159_v2 = vpop.permute.xlu1 %16158  ;;  %16241 = vst.msk [vmem:[#allocation6 + $0xe8] sm:$0xff] %vm16087_vm13, %v16237_v50  ;;  %v18232_v57 = vpack.c.bf16 %v16431_v36, %v16430_v35  ;;  %v16434_v12 = vld [vmem:[#allocation6 + $0xe0] sm:$0xff]  ;;  %v16362_v50 = vld [vmem:[%s21909_s5 + $0x80] sm:$0xff] }
 0x7ef   : > { %16164 = vst.msk [vmem:[#allocation6 + $0x70] sm:$0xff] %vm16087_vm13, %v16159_v2  ;;  %v16446_v36 = vld [vmem:[#allocation6 + $0x140] sm:$0xff] }
 0x7f0   : > { %18233 = vmatprep.subr.bf16.mxu1 %v18232_v57  ;;  %v16367_v2 = vld [vmem:[%s21909_s5 + $0xa8] sm:$0xff]  ;;  %v18261_v57 = vpack.c.bf16 %v16447_v33, %v16446_v36  ;;  %v16397_v33 = vld [vmem:[%s21909_s5 + $0x198] sm:$0xff]  ;;  %v16400_v36 = vld [vmem:[%s21909_s5 + $0x1b0] sm:$0xff] }
 0x7f1   : > { %18235 = vmatpush3.bf16.msra.mxu1 %v18234_v37  ;;  %v16149_v39 = vpop.permute.xlu0 %16148  ;;  %v16433_v61 = vld [vmem:[#allocation6 + $0xd8] sm:$0xff] }
 0x7f2   : > { %v16251_v10 = vpop.permute.xlu1 %16250  ;;  %16153 = vst.msk [vmem:[#allocation6 + $0x68] sm:$0xff] %vm16087_vm13, %v16149_v39  ;;  %v18236_v40 = vpack.c.bf16 %v16433_v61, %v16432_v3  ;;  %v16418_v59 = vld [vmem:[#allocation6 + $0x60] sm:$0xff]  ;;  %v16366_v37 = vld [vmem:[%s21909_s5 + $0xa0] sm:$0xff] }
 0x7f3   : > { %16256 = vst.msk [vmem:[#allocation6 + $0x100] sm:$0xff] %vm16087_vm13, %v16251_v10  ;;  %v16371_v3 = vld [vmem:[%s21909_s5 + $0xc8] sm:$0xff] }
 0x7f4   : > { %18237 = vmatprep.subr.bf16.mxu1 %v18236_v40  ;;  %v16370_v40 = vld [vmem:[%s21909_s5 + $0xc0] sm:$0xff] }
 0x7f5   : > { %18239 = vmatpush3.bf16.msra.mxu1 %v18238_v58  ;;  %v16161_v41 = vpop.permute.xlu0 %16160  ;;  %v16435_v21 = vld [vmem:[#allocation6 + $0xe8] sm:$0xff]  ;;  %v16375_v58 = vld [vmem:[%s21909_s5 + $0xe8] sm:$0xff] }
 0x7f6   : > { %v16263_v8 = vpop.permute.xlu1 %16262  ;;  %16165 = vst.msk [vmem:[#allocation6 + $0x78] sm:$0xff] %vm16087_vm13, %v16161_v41  ;;  %v18240_v16 = vpack.c.bf16 %v16435_v21, %v16434_v12  ;;  %v16420_v63 = vld [vmem:[#allocation6 + $0x70] sm:$0xff]  ;;  %v16374_v21 = vld [vmem:[%s21909_s5 + $0xe0] sm:$0xff] }
 0x7f7   : > { %16268 = vst.msk [vmem:[#allocation6 + $0x110] sm:$0xff] %vm16087_vm13, %v16263_v8 }
 0x7f8   : > { %18241 = vmatprep.subr.bf16.mxu1 %v18240_v16  ;;  %v16379_v16 = vld [vmem:[%s21909_s5 + $0x108] sm:$0xff] }
 0x7f9   : > { %v16253_v53 = vpop.permute.xlu0 %16252  ;;  %v16419_v60 = vld [vmem:[#allocation6 + $0x68] sm:$0xff] }
 0x7fa   : > { %v16275_v13 = vpop.permute.xlu1 %16274  ;;  %16257 = vst.msk [vmem:[#allocation6 + $0x108] sm:$0xff] %vm16087_vm13, %v16253_v53  ;;  %v18242_v23 = vpack.c.bf16 %v16419_v60, %v16418_v59  ;;  %v16438_v6 = vld [vmem:[#allocation6 + $0x100] sm:$0xff]  ;;  %v16378_v59 = vld [vmem:[%s21909_s5 + $0x100] sm:$0xff] }
 0x7fb   : > { %16280 = vst.msk [vmem:[#allocation6 + $0x120] sm:$0xff] %vm16087_vm13, %v16275_v13  ;;  %v16383_v13 = vld [vmem:[%s21909_s5 + $0x128] sm:$0xff] }
 0x7fc   : > { %18243 = vmatpush3.bf16.msra.mxu1 %v18242_v23 }
 0x7fd   : > { %18245 = vmatprep.subr.bf16.mxu1 %v18244_v38  ;;  %v16265_v27 = vpop.permute.xlu0 %16264  ;;  %v16421_v9 = vld [vmem:[#allocation6 + $0x78] sm:$0xff]  ;;  %v16387_v38 = vld [vmem:[%s21909_s5 + $0x148] sm:$0xff] }
 0x7fe   : > { %v16287_v26 = vpop.permute.xlu1 %16286  ;;  %16269 = vst.msk [vmem:[#allocation6 + $0x118] sm:$0xff] %vm16087_vm13, %v16265_v27  ;;  %v18246_v34 = vpack.c.bf16 %v16421_v9, %v16420_v63  ;;  %v16440_v42 = vld [vmem:[#allocation6 + $0x110] sm:$0xff]  ;;  %v16386_v27 = vld [vmem:[%s21909_s5 + $0x140] sm:$0xff]  ;;  %v16391_v63 = vld [vmem:[%s21909_s5 + $0x168] sm:$0xff] }
 0x7ff   : > { %16292 = vst.msk [vmem:[#allocation6 + $0x130] sm:$0xff] %vm16087_vm13, %v16287_v26  ;;  %v16390_v9 = vld [vmem:[%s21909_s5 + $0x160] sm:$0xff]  ;;  %v16395_v26 = vld [vmem:[%s21909_s5 + $0x188] sm:$0xff] }
 0x800   : > { %18247 = vmatpush3.bf16.msra.mxu1 %v18246_v34  ;;  %v16394_v34 = vld [vmem:[%s21909_s5 + $0x180] sm:$0xff] }
 0x801   : > { %v16277_v14 = vpop.permute.xlu0 %16276  ;;  %18248 = vmatprep.subr.bf16.mxu1 %v19100_v62  ;;  %v16439_v15 = vld [vmem:[#allocation6 + $0x108] sm:$0xff] }
 0x802   : > { %v16303_v20 = vpop.permute.xlu1 %16302  ;;  %16281 = vst.msk [vmem:[#allocation6 + $0x128] sm:$0xff] %vm16087_vm13, %v16277_v14  ;;  %v18249_v48 = vpack.c.bf16 %v16439_v15, %v16438_v6  ;;  %v16442_v25 = vld [vmem:[#allocation6 + $0x120] sm:$0xff]  ;;  %v16398_v14 = vld [vmem:[%s21909_s5 + $0x1a0] sm:$0xff] }
 0x803   : > { %16308 = vst.msk [vmem:[#allocation6 + $0x150] sm:$0xff] %vm16087_vm13, %v16303_v20  ;;  %16582 = vmatmul.mubr.f32.vlgmr.msra.gmra.mrb[14].mxu1 %v16346_v11  ;;  %v16399_v11 = vld [vmem:[%s21909_s5 + $0x1a8] sm:$0xff]  ;;  %v16402_v15 = vld [vmem:[%s21909_s5 + $0x1c0] sm:$0xff]  ;;  %v16348_v20 = vld [vmem:[%s21909_s5 + $0x10] sm:$0xff] }
 0x804   : > { %18250 = vmatpush1.bf16.msra.mxu1 %v18249_v48  ;;  %16586 = vmatprep.mubr.f32.mxu1 %v16351_v19  ;;  %v16403_v6 = vld [vmem:[%s21909_s5 + $0x1c8] sm:$0xff]  ;;  %v16349_v19 = vld [vmem:[%s21909_s5 + $0x18] sm:$0xff] }
 0x805   : > { %v16289_v43 = vpop.permute.xlu0 %16288  ;;  %18251 = vmatprep.subr.bf16.mxu1 %v19100_v62  ;;  %v16441_v5 = vld [vmem:[#allocation6 + $0x118] sm:$0xff]  ;;  %v16353_v48 = vld [vmem:[%s21909_s5 + $0x38] sm:$0xff] }
 0x806   : > { %v16315_v56 = vpop.permute.xlu1 %16314  ;;  %16293 = vst.msk [vmem:[#allocation6 + $0x138] sm:$0xff] %vm16087_vm13, %v16289_v43  ;;  %v18252_v44 = vpack.c.bf16 %v16441_v5, %v16440_v42  ;;  %v16444_v52 = vld [vmem:[#allocation6 + $0x130] sm:$0xff]  ;;  %v16356_v42 = vld [vmem:[%s21909_s5 + $0x50] sm:$0xff] }
 0x807   : > { %16320 = vst.msk [vmem:[#allocation6 + $0x160] sm:$0xff] %vm16087_vm13, %v16315_v56  ;;  %16587 = vmatmul.mubr.f32.gmra.mrb[16].mxu1 %v16350_v28  ;;  %v16352_v28 = vld [vmem:[%s21909_s5 + $0x30] sm:$0xff]  ;;  %v16357_v43 = vld [vmem:[%s21909_s5 + $0x58] sm:$0xff] }
 0x808   : > { %18253 = vmatpush1.bf16.msra.mxu1 %v18252_v44  ;;  %16591 = vmatprep.mubr.f32.mxu1 %v16355_v7  ;;  %v16361_v5 = vld [vmem:[%s21909_s5 + $0x78] sm:$0xff]  ;;  %v16360_v7 = vld [vmem:[%s21909_s5 + $0x70] sm:$0xff] }
 0x809   : > { %v16305_v17 = vpop.permute.xlu0 %16304  ;;  %18254 = vmatprep.subr.bf16.mxu1 %v19100_v62  ;;  %v16443_v30 = vld [vmem:[#allocation6 + $0x128] sm:$0xff]  ;;  %v16365_v56 = vld [vmem:[%s21909_s5 + $0x98] sm:$0xff] }
 0x80a   : > { %v16327_v51 = vpop.permute.xlu1 %16326  ;;  %16309 = vst.msk [vmem:[#allocation6 + $0x158] sm:$0xff] %vm16087_vm13, %v16305_v17  ;;  %v18255_v18 = vpack.c.bf16 %v16443_v30, %v16442_v25  ;;  %v16448_v39 = vld [vmem:[#allocation6 + $0x150] sm:$0xff]  ;;  %v16364_v44 = vld [vmem:[%s21909_s5 + $0x90] sm:$0xff] }
 0x80b   : > { %16332 = vst.msk [vmem:[#allocation6 + $0x170] sm:$0xff] %vm16087_vm13, %v16327_v51  ;;  %16592 = vmatmul.mubr.f32.gmra.mrb[18].mxu1 %v16354_v24  ;;  %v16369_v24 = vld [vmem:[%s21909_s5 + $0xb8] sm:$0xff]  ;;  %v16368_v17 = vld [vmem:[%s21909_s5 + $0xb0] sm:$0xff] }
 0x80c   : > { %18256 = vmatpush1.bf16.msra.mxu1 %v18255_v18  ;;  %16596 = vmatprep.mubr.f32.mxu1 %v16359_v45  ;;  %v16373_v25 = vld [vmem:[%s21909_s5 + $0xd8] sm:$0xff]  ;;  %v16372_v30 = vld [vmem:[%s21909_s5 + $0xd0] sm:$0xff] }
 0x80d   : > { %v16317_v22 = vpop.permute.xlu0 %16316  ;;  %18257 = vmatprep.subr.bf16.mxu1 %v19100_v62  ;;  %v16445_v46 = vld [vmem:[#allocation6 + $0x138] sm:$0xff]  ;;  %v16377_v45 = vld [vmem:[%s21909_s5 + $0xf8] sm:$0xff]  ;;  %v16376_v51 = vld [vmem:[%s21909_s5 + $0xf0] sm:$0xff] }
 0x80e   : > { %v16339_v47 = vpop.permute.xlu1 %16338  ;;  %16321 = vst.msk [vmem:[#allocation6 + $0x168] sm:$0xff] %vm16087_vm13, %v16317_v22  ;;  %v18258_v32 = vpack.c.bf16 %v16445_v46, %v16444_v52  ;;  %v16450_v1 = vld [vmem:[#allocation6 + $0x160] sm:$0xff]  ;;  %v16381_v18 = vld [vmem:[%s21909_s5 + $0x118] sm:$0xff]  ;;  %v16384_v52 = vld [vmem:[%s21909_s5 + $0x130] sm:$0xff] }
 0x80f   : > { %16344 = vst.msk [vmem:[#allocation6 + $0x180] sm:$0xff] %vm16087_vm13, %v16339_v47  ;;  %16597 = vmatmul.mubr.f32.gmra.mrb[20].mxu1 %v16358_v31  ;;  %v16380_v31 = vld [vmem:[%s21909_s5 + $0x110] sm:$0xff]  ;;  %v16385_v22 = vld [vmem:[%s21909_s5 + $0x138] sm:$0xff] }
 0x810   : > { %18259 = vmatpush1.bf16.msra.mxu1 %v18258_v32  ;;  %16601 = vmatprep.mubr.f32.mxu1 %v16363_v49  ;;  %v16389_v46 = vld [vmem:[%s21909_s5 + $0x158] sm:$0xff]  ;;  %v16388_v49 = vld [vmem:[%s21909_s5 + $0x150] sm:$0xff] }
 0x811   : > { %v16329_v35 = vpop.permute.xlu0 %16328  ;;  %18260 = vmatprep.subr.bf16.mxu1 %v19100_v62  ;;  %v16449_v4 = vld [vmem:[#allocation6 + $0x158] sm:$0xff]  ;;  %v16393_v47 = vld [vmem:[%s21909_s5 + $0x178] sm:$0xff]  ;;  %v16392_v32 = vld [vmem:[%s21909_s5 + $0x170] sm:$0xff] }
 0x812   : > { %16333 = vst.msk [vmem:[#allocation6 + $0x178] sm:$0xff] %vm16087_vm13, %v16329_v35  ;;  %v18264_v61 = vpack.c.bf16 %v16449_v4, %v16448_v39  ;;  %v16452_v8 = vld [vmem:[#allocation6 + $0x170] sm:$0xff] }
 0x813   : > { %16602 = vmatmul.mubr.f32.gmra.mrb[22].mxu1 %v16362_v50  ;;  %v16396_v50 = vld [vmem:[%s21909_s5 + $0x190] sm:$0xff]  ;;  %v16401_v35 = vld [vmem:[%s21909_s5 + $0x1b8] sm:$0xff] }
 0x814   : > { %18262 = vmatpush1.bf16.msra.mxu1 %v18261_v57  ;;  %16606 = vmatprep.mubr.f32.mxu1 %v16367_v2  ;;  %v16405_v2 = vld [vmem:[%s21909_s5 + $0x1d8] sm:$0xff]  ;;  %v16404_v57 = vld [vmem:[%s21909_s5 + $0x1d0] sm:$0xff] }
 0x815   : > { %v16341_v55 = vpop.permute.xlu0 %16340  ;;  %18263 = vmatprep.subr.bf16.mxu1 %v19100_v62  ;;  %v16451_v10 = vld [vmem:[#allocation6 + $0x168] sm:$0xff] }
 0x816   : > { %16345 = vst.msk [vmem:[#allocation6 + $0x188] sm:$0xff] %vm16087_vm13, %v16341_v55  ;;  %v18267_v41 = vpack.c.bf16 %v16451_v10, %v16450_v1  ;;  %v16454_v60 = vld [vmem:[#allocation6 + $0x180] sm:$0xff] }
 0x817   : > { %16607 = vmatmul.mubr.f32.gmra.mrb[24].mxu1 %v16366_v37 }
 0x818   : > { %18265 = vmatpush1.bf16.msra.mxu1 %v18264_v61  ;;  %16611 = vmatprep.mubr.f32.mxu1 %v16371_v3 }
 0x819   : > { %18266 = vmatprep.subr.bf16.mxu1 %v19100_v62  ;;  %v16453_v12 = vld [vmem:[#allocation6 + $0x178] sm:$0xff] }
 0x81a   : > { %v18270_v54 = vpack.c.bf16 %v16453_v12, %v16452_v8 }
 0x81b   : > { %16612 = vmatmul.mubr.f32.gmra.mrb[26].mxu1 %v16370_v40 }
 0x81c   : > { %18268 = vmatpush1.bf16.msra.mxu1 %v18267_v41  ;;  %16616 = vmatprep.mubr.f32.mxu1 %v16375_v58 }
 0x81d   : > { %18269 = vmatprep.subr.bf16.mxu1 %v19100_v62  ;;  %v16455_v53 = vld [vmem:[#allocation6 + $0x188] sm:$0xff] }
 0x81e   : > { %v18273_v23 = vpack.c.bf16 %v16455_v53, %v16454_v60 }
 0x81f   : > { %16617 = vmatmul.mubr.f32.gmra.mrb[28].mxu1 %v16374_v21 }
 0x820   : > { %18271 = vmatpush1.bf16.msra.mxu1 %v18270_v54  ;;  %16621 = vmatprep.mubr.f32.mxu1 %v16379_v16 }
 0x821   : > { %18272 = vmatprep.subr.bf16.mxu1 %v19100_v62 }
 0x823   : > { %16622 = vmatmul.mubr.f32.gmra.mrb[30].mxu1 %v16378_v59 }
 0x824   : > { %18274 = vmatpush1.bf16.msra.mxu1 %v18273_v23  ;;  %16626 = vmatprep.mubr.f32.mxu1 %v16383_v13 }
 0x827   : > { %16627 = vmatmul.mubr.f32.gmra.mrb[32].mxu1 %v16382_v29 }
 0x828   : > { %16631 = vmatprep.mubr.f32.mxu1 %v16387_v38 }
 0x82b   : > { %16632 = vmatmul.mubr.f32.gmra.mrb[34].mxu1 %v16386_v27 }
 0x82c   : > { %16636 = vmatprep.mubr.f32.mxu1 %v16391_v63 }
 0x82f   : > { %16637 = vmatmul.mubr.f32.gmra.mrb[36].mxu1 %v16390_v9 }
 0x830   : > { %16641 = vmatprep.mubr.f32.mxu1 %v16395_v26 }
 0x833   : > { %16642 = vmatmul.mubr.f32.gmra.mrb[38].mxu1 %v16394_v34 }
 0x834   : > { %16646 = vmatprep.mubr.f32.mxu1 %v16399_v11 }
 0x837   : > { %16647 = vmatmul.mubr.f32.gmra.mrb[40].mxu1 %v16398_v14 }
 0x838   : > { %16651 = vmatprep.mubr.f32.mxu1 %v16403_v6 }
 0x83b   : > { %16652 = vmatmul.mubr.f32.gmra.mrb[42].mxu1 %v16402_v15 }
 0x83c   : > { %17780 = vmatprep.mubr.msk.f32.mxu1 %vm16471_vm11, %v16349_v19 }
 0x83f   : > { %16722 = vmatmul.mubr.f32.vlgmr.msra.gmra.mrb[44].mxu1 %v16348_v20 }
 0x840   : > { %17781 = vmatprep.mubr.msk.f32.mxu1 %vm16471_vm11, %v16353_v48 }
 0x843   : > { %16727 = vmatmul.mubr.f32.gmra.mrb[46].mxu1 %v16352_v28 }
 0x844   : > { %17782 = vmatprep.mubr.msk.f32.mxu1 %vm16471_vm11, %v16357_v43 }
 0x847   : > { %16732 = vmatmul.mubr.f32.gmra.mrb[48].mxu1 %v16356_v42 }
 0x848   : > { %17783 = vmatprep.mubr.msk.f32.mxu1 %vm16471_vm11, %v16361_v5 }
 0x84b   : > { %16737 = vmatmul.mubr.f32.gmra.mrb[50].mxu1 %v16360_v7 }
 0x84c   : > { %17784 = vmatprep.mubr.msk.f32.mxu1 %vm16471_vm11, %v16365_v56 }
 0x84f   : > { %16742 = vmatmul.mubr.f32.gmra.mrb[52].mxu1 %v16364_v44 }
 0x850   : > { %17785 = vmatprep.mubr.msk.f32.mxu1 %vm16471_vm11, %v16369_v24 }
 0x853   : > { %16747 = vmatmul.mubr.f32.gmra.mrb[54].mxu1 %v16368_v17  ;;  %v16456_v17 = vld [vmem:[%s21910_s6] sm:$0xff] }
 0x854   : > { %17786 = vmatprep.mubr.msk.f32.mxu1 %vm16471_vm11, %v16373_v25 }
 0x857   : > { %16752 = vmatmul.mubr.f32.gmra.mrb[56].mxu1 %v16372_v30 }
 0x858   : > { %17787 = vmatprep.mubr.msk.f32.mxu1 %vm16471_vm11, %v16377_v45 }
 0x85b   : > { %16757 = vmatmul.mubr.f32.gmra.mrb[58].mxu1 %v16376_v51 }
 0x85c   : > { %17788 = vmatprep.mubr.msk.f32.mxu1 %vm16471_vm11, %v16381_v18  ;;  %v16457_v18 = vld [vmem:[%s21910_s6 + $0x8] sm:$0xff] }
 0x85f   : > { %16762 = vmatmul.mubr.f32.gmra.mrb[60].mxu1 %v16380_v31 }
 0x860   : > { %17789 = vmatprep.mubr.msk.f32.mxu1 %vm16471_vm11, %v16385_v22 }
 0x863   : > { %16767 = vmatmul.mubr.f32.gmra.mrb[62].mxu1 %v16384_v52 }
 0x864   : > { %17790 = vmatprep.mubr.msk.f32.mxu1 %vm16471_vm11, %v16389_v46 }
 0x867   : > { %16772 = vmatmul.mubr.f32.gmra.mrb[64].mxu1 %v16388_v49 }
 0x868   : > { %17791 = vmatprep.mubr.msk.f32.mxu1 %vm16471_vm11, %v16393_v47  ;;  %v16458_v47 = vld [vmem:[%s21910_s6 + $0x10] sm:$0xff] }
 0x86b   : > { %16777 = vmatmul.mubr.f32.gmra.mrb[66].mxu1 %v16392_v32 }
 0x86c   : > { %17792 = vmatprep.mubr.msk.f32.mxu1 %vm16471_vm11, %v16397_v33 }
 0x86f   : > { %16782 = vmatmul.mubr.f32.gmra.mrb[68].mxu1 %v16396_v50 }
 0x870   : > { %17793 = vmatprep.mubr.msk.f32.mxu1 %vm16471_vm11, %v16401_v35 }
 0x873   : > { %16787 = vmatmul.mubr.f32.gmra.mrb[70].mxu1 %v16400_v36 }
 0x874   : > { %17794 = vmatprep.mubr.msk.f32.mxu1 %vm16471_vm11, %v16405_v2 }
 0x877   : > { %16792 = vmatmul.mubr.f32.gmra.mrb[72].mxu1 %v16404_v57  ;;  %v16459_v57 = vld [vmem:[%s21910_s6 + $0x18] sm:$0xff] }
 0x8d6   : > { %v17919_v4 = vpop.f32.mrb[14].mxu1 }
 0x8d7   : > { %v17920_v37 = vpop.f32.mrb[15].mxu1 }
 0x8d8   : > { %v17921_v55 = vadd.f32 %v17920_v37, %v17919_v4 }
 0x8da   : > { %v17922_v39 = vpop.f32.mrb[16].mxu1  ;;  %v16584_v45 = vadd.f32 %v17921_v55, %v16456_v17 }
 0x8db   : > { %v17923_v3 = vpop.f32.mrb[17].mxu1 }
 0x8dc   : > { %v17924_v61 = vadd.f32 %v17923_v3, %v17922_v39 }
 0x8de   : > { %v17925_v10 = vpop.f32.mrb[18].mxu1  ;;  %v16589_v46 = vadd.f32 %v17924_v61, %v16457_v18 }
 0x8df   : > { %v17926_v40 = vpop.f32.mrb[19].mxu1 }
 0x8e0   : > { %v17927_v1 = vadd.f32 %v17926_v40, %v17925_v10  ;;  %v16460_v10 = vld [vmem:[%s21910_s6 + $0x20] sm:$0xff] }
 0x8e2   : > { %v17928_v58 = vpop.f32.mrb[20].mxu1  ;;  %v16594_v36 = vadd.f32 %v17927_v1, %v16458_v47 }
 0x8e3   : > { %v17929_v41 = vpop.f32.mrb[21].mxu1 }
 0x8e4   : > { %v17930_v12 = vadd.f32 %v17929_v41, %v17928_v58 }
 0x8e6   : > { %v17931_v21 = vpop.f32.mrb[22].mxu1  ;;  %v16599_v3 = vadd.f32 %v17930_v12, %v16459_v57 }
 0x8e7   : > { %v17932_v8 = vpop.f32.mrb[23].mxu1 }
 0x8e8   : > { %v21698_v16 = vadd.f32 %v17932_v8, %v17931_v21 }
 0x8ea   : > { %v17934_v54 = vpop.f32.mrb[24].mxu1  ;;  %v16604_v21 = vadd.f32 %v21698_v16, %v16460_v10 }
 0x8eb   : > { %v17935_v53 = vpop.f32.mrb[25].mxu1 }
 0x8ec   : > { %v21700_v59 = vadd.f32 %v17935_v53, %v17934_v54  ;;  %v16461_v54 = vld [vmem:[%s21910_s6 + $0x28] sm:$0xff] }
 0x8ee   : > { %v17937_v60 = vpop.f32.mrb[26].mxu1 }
 0x8ef   : > { %v17938_v13 = vpop.f32.mrb[27].mxu1 }
 0x8f0   : > { %v21704_v23 = vadd.f32 %v17938_v13, %v17937_v60 }
 0x8f2   : > { %v17940_v29 = vpop.f32.mrb[28].mxu1 }
 0x8f3   : > { %v17941_v38 = vpop.f32.mrb[29].mxu1 }
 0x8f4   : > { %v21706_v27 = vadd.f32 %v17941_v38, %v17940_v29 }
 0x8f6   : > { %v17943_v63 = vpop.f32.mrb[30].mxu1 }
 0x8f7   : > { %v17944_v9 = vpop.f32.mrb[31].mxu1 }
 0x8f8   : > { %v21708_v26 = vadd.f32 %v17944_v9, %v17943_v63  ;;  %v16609_v63 = vadd.f32 %v21700_v59, %v16461_v54  ;;  %v16463_v59 = vld [vmem:[%s21910_s6 + $0x38] sm:$0xff] }
 0x8fa   : > { %v17946_v34 = vpop.f32.mrb[32].mxu1 }
 0x8fb   : > { %v17947_v11 = vpop.f32.mrb[33].mxu1 }
 0x8fc   : > { %v21710_v14 = vadd.f32 %v17947_v11, %v17946_v34  ;;  %v16462_v34 = vld [vmem:[%s21910_s6 + $0x30] sm:$0xff] }
 0x8fe   : > { %v17949_v6 = vpop.f32.mrb[34].mxu1 }
 0x8ff   : > { %v17950_v15 = vpop.f32.mrb[35].mxu1 }
 0x900   : > { %v21712_v19 = vadd.f32 %v17950_v15, %v17949_v6 }
 0x902   : > { %v17952_v20 = vpop.f32.mrb[36].mxu1 }
 0x903   : > { %v17953_v48 = vpop.f32.mrb[37].mxu1 }
 0x904   : > { %v21714_v28 = vadd.f32 %v17953_v48, %v17952_v20 }
 0x906   : > { %v17955_v43 = vpop.f32.mrb[38].mxu1 }
 0x907   : > { %v17956_v42 = vpop.f32.mrb[39].mxu1 }
 0x908   : > { %v21716_v5 = vadd.f32 %v17956_v42, %v17955_v43  ;;  %v16614_v43 = vadd.f32 %v21704_v23, %v16462_v34  ;;  %v16464_v23 = vld [vmem:[%s21910_s6 + $0x40] sm:$0xff] }
 0x90a   : > { %v17958_v7 = vpop.f32.mrb[40].mxu1 }
 0x90b   : > { %v17959_v56 = vpop.f32.mrb[41].mxu1 }
 0x90c   : > { %v21718_v44 = vadd.f32 %v17959_v56, %v17958_v7 }
 0x90e   : > { %v17961_v24 = vpop.f32.mrb[42].mxu1 }
 0x90f   : > { %v17962_v25 = vpop.f32.mrb[43].mxu1 }
 0x910   : > { %v21723_v30 = vadd.f32 %v17962_v25, %v17961_v24 }
 0x912   : > { %v16723_v51 = vpop.f32.mrb[44].mxu1 }
 0x913   : > { %v16724_v31 = vadd.f32 %v16723_v51, %v16584_v45  ;;  %v16725_v22 = vpop.f32.mrb[45].mxu1  ;;  %v16619_v51 = vadd.f32 %v21706_v27, %v16463_v59  ;;  %v16465_v27 = vld [vmem:[%s21910_s6 + $0x48] sm:$0xff] }
 0x915   : > { %v16797_v52 = vsub.f32 0.0, %v16724_v31 }
 0x916   : > { %v16728_v49 = vpop.f32.mrb[46].mxu1 }
 0x917   : > { %v16812_v32 = vmul.f32 1.442695, %v16797_v52  ;;  %v16729_v33 = vadd.f32 %v16728_v49, %v16589_v46  ;;  %v16730_v50 = vpop.f32.mrb[47].mxu1 }
 0x919   : > { %18956 = vpow2.f32 %v16812_v32  ;;  %v16798_v35 = vsub.f32 0.0, %v16729_v33  ;;  %v16624_v32 = vadd.f32 %v21708_v26, %v16464_v23  ;;  %v16466_v26 = vld [vmem:[%s21910_s6 + $0x50] sm:$0xff] }
 0x91a   : > { %v16733_v2 = vpop.f32.mrb[48].mxu1 }
 0x91b   : > { %v16814_v4 = vmul.f32 1.442695, %v16798_v35  ;;  %v16734_v37 = vadd.f32 %v16733_v2, %v16594_v36  ;;  %v16735_v55 = vpop.f32.mrb[49].mxu1 }
 0x91d   : > { %18958 = vpow2.f32 %v16814_v4  ;;  %v16799_v39 = vsub.f32 0.0, %v16734_v37 }
 0x91e   : > { %v16738_v61 = vpop.f32.mrb[50].mxu1 }
 0x91f   : > { %v16816_v40 = vmul.f32 1.442695, %v16799_v39  ;;  %v16739_v58 = vadd.f32 %v16738_v61, %v16599_v3  ;;  %v16740_v41 = vpop.f32.mrb[51].mxu1  ;;  %v16629_v39 = vadd.f32 %v21710_v14, %v16465_v27 }
 0x921   : > { %18960 = vpow2.f32 %v16816_v40  ;;  %v16800_v1 = vsub.f32 0.0, %v16739_v58 }
 0x922   : > { %v16743_v8 = vpop.f32.mrb[52].mxu1 }
 0x923   : > { %v18957_v53 = vpop.eup %18956  ;;  %v16818_v60 = vmul.f32 1.442695, %v16800_v1  ;;  %v16744_v12 = vadd.f32 %v16743_v8, %v16604_v21  ;;  %v16745_v13 = vpop.f32.mrb[53].mxu1  ;;  %v16634_v8 = vadd.f32 %v21712_v19, %v16466_v26  ;;  %v16468_v19 = vld [vmem:[%s21910_s6 + $0x60] sm:$0xff] }
 0x924   : > { %v16842_v29 = vadd.f32 1.0, %v18957_v53  ;;  %v16467_v53 = vld [vmem:[%s21910_s6 + $0x58] sm:$0xff]  ;;  %v16644_v59 = vadd.f32 %v21716_v5, %v16468_v19  ;;  %v16470_v5 = vld [vmem:[%s21910_s6 + $0x70] sm:$0xff]  ;;  %v16877_v19 = vld [vmem:[%s21911_s7 + $0x28] sm:$0xff] }
 0x925   : > { %18962 = vpow2.f32 %v16818_v60  ;;  %v16801_v38 = vsub.f32 0.0, %v16744_v12  ;;  %v16639_v34 = vadd.f32 %v21714_v28, %v16467_v53  ;;  %v16654_v27 = vadd.f32 %v21723_v30, %v16470_v5 }
 0x926   : > { %v16748_v9 = vpop.f32.mrb[54].mxu1  ;;  %18964 = vrcp.f32 %v16842_v29 }
 0x927   : > { %v18959_v16 = vpop.eup %18958  ;;  %v16820_v11 = vmul.f32 1.442695, %v16801_v38  ;;  %v16749_v6 = vadd.f32 %v16748_v9, %v16609_v63  ;;  %v16750_v15 = vpop.f32.mrb[55].mxu1 }
 0x928   : > { %v16843_v20 = vadd.f32 1.0, %v18959_v16 }
 0x929   : > { %18966 = vpow2.f32 %v16820_v11  ;;  %v16802_v48 = vsub.f32 0.0, %v16749_v6 }
 0x92a   : > { %18968 = vrcp.f32 %v16843_v20  ;;  %v16753_v42 = vpop.f32.mrb[56].mxu1 }
 0x92b   : > { %v18961_v7 = vpop.eup %18960  ;;  %v16822_v56 = vmul.f32 1.442695, %v16802_v48  ;;  %v16754_v24 = vadd.f32 %v16753_v42, %v16614_v43  ;;  %v16755_v17 = vpop.f32.mrb[57].mxu1 }
 0x92c   : > { %v16844_v25 = vadd.f32 1.0, %v18961_v7 }
 0x92d   : > { %18970 = vpow2.f32 %v16822_v56  ;;  %v16803_v45 = vsub.f32 0.0, %v16754_v24  ;;  %v16469_v56 = vld [vmem:[%s21910_s6 + $0x68] sm:$0xff] }
 0x92e   : > { %v16758_v18 = vpop.f32.mrb[58].mxu1  ;;  %18972 = vrcp.f32 %v16844_v25 }
 0x92f   : > { %v18963_v31 = vpop.eup %18962  ;;  %v16824_v22 = vmul.f32 1.442695, %v16803_v45  ;;  %v16759_v52 = vadd.f32 %v16758_v18, %v16619_v51  ;;  %v16760_v46 = vpop.f32.mrb[59].mxu1 }
 0x930   : > { %v16845_v49 = vadd.f32 1.0, %v18963_v31  ;;  %v18965_v33 = vpop.eup %18964  ;;  %v16649_v31 = vadd.f32 %v21718_v44, %v16469_v56  ;;  %v16884_v56 = vld [vmem:[%s21912_s8 + $0x8] sm:$0xff] }
 0x931   : > { %18974 = vpow2.f32 %v16824_v22  ;;  %v16804_v47 = vsub.f32 0.0, %v16759_v52 }
 0x932   : > { %18976 = vrcp.f32 %v16845_v49  ;;  %v16763_v50 = vpop.f32.mrb[60].mxu1 }
 0x933   : > { %v18967_v35 = vpop.eup %18966  ;;  %v16826_v36 = vmul.f32 1.442695, %v16804_v47  ;;  %v16764_v2 = vadd.f32 %v16763_v50, %v16624_v32  ;;  %v16765_v57 = vpop.f32.mrb[61].mxu1 }
 0x934   : > { %v18969_v4 = vpop.eup %18968  ;;  %v16846_v37 = vadd.f32 1.0, %v18967_v35 }
 0x935   : > { %18978 = vpow2.f32 %v16826_v36  ;;  %v16805_v55 = vsub.f32 0.0, %v16764_v2  ;;  %v18276_v3 = vpack.c.bf16 %v18969_v4, %v18965_v33 }
 0x936   : > { %v16768_v61 = vpop.f32.mrb[62].mxu1  ;;  %18980 = vrcp.f32 %v16846_v37 }
 0x937   : > { %v18971_v10 = vpop.eup %18970  ;;  %v16828_v40 = vmul.f32 1.442695, %v16805_v55  ;;  %v16769_v58 = vadd.f32 %v16768_v61, %v16629_v39  ;;  %v16770_v41 = vpop.f32.mrb[63].mxu1  ;;  %18277 = vmatpush3.bf16.msra.mxu0 %v18276_v3 }
 0x938   : > { %v16847_v1 = vadd.f32 1.0, %v18971_v10  ;;  %18278 = vmatprep.subr.bf16.mxu0 %v19100_v62  ;;  %v18973_v14 = vpop.eup %18972 }
 0x939   : > { %18982 = vpow2.f32 %v16828_v40  ;;  %v16806_v21 = vsub.f32 0.0, %v16769_v58 }
 0x93a   : > { %18984 = vrcp.f32 %v16847_v1  ;;  %v16773_v54 = vpop.f32.mrb[64].mxu1 }
 0x93b   : > { %v18975_v60 = vpop.eup %18974  ;;  %v16830_v12 = vmul.f32 1.442695, %v16806_v21  ;;  %v16774_v13 = vadd.f32 %v16773_v54, %v16634_v8  ;;  %v16775_v29 = vpop.f32.mrb[65].mxu1 }
 0x93c   : > { %v18977_v38 = vpop.eup %18976  ;;  %v16848_v63 = vadd.f32 1.0, %v18975_v60 }
 0x93d   : > { %18986 = vpow2.f32 %v16830_v12  ;;  %v16807_v9 = vsub.f32 0.0, %v16774_v13  ;;  %v18279_v16 = vpack.c.bf16 %v18977_v38, %v18973_v14 }
 0x93e   : > { %v16778_v11 = vpop.f32.mrb[66].mxu1  ;;  %18988 = vrcp.f32 %v16848_v63  ;;  %v16872_v63 = vld [vmem:[%s21911_s7] sm:$0xff] }
 0x93f   : > { %v18979_v6 = vpop.eup %18978  ;;  %v16832_v15 = vmul.f32 1.442695, %v16807_v9  ;;  %v16779_v20 = vadd.f32 %v16778_v11, %v16639_v34  ;;  %v16780_v48 = vpop.f32.mrb[67].mxu1  ;;  %18280 = vmatpush3.bf16.msra.mxu0 %v18279_v16  ;;  %v16874_v34 = vld [vmem:[%s21911_s7 + $0x10] sm:$0xff]  ;;  %v16875_v16 = vld [vmem:[%s21911_s7 + $0x18] sm:$0xff]  ;;  %v16876_v11 = vld [vmem:[%s21911_s7 + $0x20] sm:$0xff] }
 0x940   : > { %v16849_v43 = vadd.f32 1.0, %v18979_v6  ;;  %18281 = vmatprep.subr.bf16.mxu0 %v19100_v62  ;;  %v18981_v28 = vpop.eup %18980  ;;  %v16878_v6 = vld [vmem:[%s21911_s7 + $0x30] sm:$0xff]  ;;  %v16881_v48 = vld [vmem:[%s21911_s7 + $0x48] sm:$0xff] }
 0x941   : > { %18990 = vpow2.f32 %v16832_v15  ;;  %v16808_v42 = vsub.f32 0.0, %v16779_v20  ;;  %v16879_v15 = vld [vmem:[%s21911_s7 + $0x38] sm:$0xff]  ;;  %v16880_v20 = vld [vmem:[%s21911_s7 + $0x40] sm:$0xff] }
 0x942   : > { %18992 = vrcp.f32 %v16849_v43  ;;  %v16783_v7 = vpop.f32.mrb[68].mxu1  ;;  %v16882_v43 = vld [vmem:[%s21911_s7 + $0x50] sm:$0xf] }
 0x943   : > { %v18983_v24 = vpop.eup %18982  ;;  %v16834_v17 = vmul.f32 1.442695, %v16808_v42  ;;  %v16784_v25 = vadd.f32 %v16783_v7, %v16644_v59  ;;  %v16785_v45 = vpop.f32.mrb[69].mxu1  ;;  %v17102_v42 = vld [vmem:[%s21913_s9] sm:$0xff] }
 0x944   : > { %v18985_v51 = vpop.eup %18984  ;;  %v16850_v18 = vadd.f32 1.0, %v18983_v24  ;;  %18213 = vmatprep.mubr.msk.f32.mxu1 %vm17106_vm7, %v17102_v42  ;;  %v16883_v59 = vld [vmem:[%s21912_s8] sm:$0xff] }
 0x945   : > { %18994 = vpow2.f32 %v16834_v17  ;;  %v16809_v23 = vsub.f32 0.0, %v16784_v25  ;;  %v18282_v22 = vpack.c.bf16 %v18985_v51, %v18981_v28 }
 0x946   : > { %v16788_v52 = vpop.f32.mrb[70].mxu1  ;;  %18996 = vrcp.f32 %v16850_v18  ;;  %v16885_v18 = vld [vmem:[%s21912_s8 + $0x10] sm:$0xff] }
 0x947   : > { %v18987_v46 = vpop.eup %18986  ;;  %v16836_v49 = vmul.f32 1.442695, %v16809_v23  ;;  %v16789_v47 = vadd.f32 %v16788_v52, %v16649_v31  ;;  %v16790_v32 = vpop.f32.mrb[71].mxu1  ;;  %18283 = vmatpush3.bf16.msra.mxu0 %v18282_v22 }
 0x948   : > { %v16851_v33 = vadd.f32 1.0, %v18987_v46  ;;  %18284 = vmatprep.subr.bf16.mxu0 %v19100_v62  ;;  %v18989_v44 = vpop.eup %18988  ;;  %v16886_v46 = vld [vmem:[%s21912_s8 + $0x18] sm:$0xff] }
 0x949   : > { %18998 = vpow2.f32 %v16836_v49  ;;  %v16810_v50 = vsub.f32 0.0, %v16789_v47 }
 0x94a   : > { %19000 = vrcp.f32 %v16851_v33  ;;  %v16793_v35 = vpop.f32.mrb[72].mxu1 }
 0x94b   : > { %v18991_v36 = vpop.eup %18990  ;;  %v16838_v2 = vmul.f32 1.442695, %v16810_v50  ;;  %v16794_v57 = vadd.f32 %v16793_v35, %v16654_v27  ;;  %v16795_v4 = vpop.f32.mrb[73].mxu1  ;;  %v16887_v27 = vld [vmem:[%s21912_s8 + $0x20] sm:$0xff] }
 0x94c   : > { %v18993_v37 = vpop.eup %18992  ;;  %v16852_v55 = vadd.f32 1.0, %v18991_v36 }
 0x94d   : > { %19002 = vpow2.f32 %v16838_v2  ;;  %v16811_v39 = vsub.f32 0.0, %v16794_v57  ;;  %v18285_v3 = vpack.c.bf16 %v18993_v37, %v18989_v44 }
 0x94e   : > { %19004 = vrcp.f32 %v16852_v55  ;;  %v16888_v55 = vld [vmem:[%s21912_s8 + $0x28] sm:$0xff] }
 0x94f   : > { %v18995_v61 = vpop.eup %18994  ;;  %v16840_v26 = vmul.f32 1.442695, %v16811_v39  ;;  %18286 = vmatpush3.bf16.msra.mxu0 %v18285_v3 }
 0x950   : > { %v16853_v10 = vadd.f32 1.0, %v18995_v61  ;;  %18287 = vmatprep.subr.bf16.mxu0 %v19100_v62  ;;  %v18997_v30 = vpop.eup %18996 }
 0x951   : > { %19006 = vpow2.f32 %v16840_v26 }
 0x952   : > { %19008 = vrcp.f32 %v16853_v10 }
 0x953   : > { %v18999_v40 = vpop.eup %18998 }
 0x954   : > { %v19001_v58 = vpop.eup %19000  ;;  %v16854_v41 = vadd.f32 1.0, %v18999_v40 }
 0x955   : > { %v18288_v1 = vpack.c.bf16 %v19001_v58, %v18997_v30  ;;  %v16889_v58 = vld [vmem:[%s21912_s8 + $0x30] sm:$0xff] }
 0x956   : > { %19010 = vrcp.f32 %v16854_v41 }
 0x957   : > { %v19003_v21 = vpop.eup %19002  ;;  %18289 = vmatpush3.bf16.msra.mxu0 %v18288_v1 }
 0x958   : > { %v16855_v8 = vadd.f32 1.0, %v19003_v21  ;;  %18290 = vmatprep.subr.bf16.mxu0 %v19100_v62  ;;  %v19005_v14 = vpop.eup %19004 }
 0x95a   : > { %19012 = vrcp.f32 %v16855_v8 }
 0x95b   : > { %v19007_v54 = vpop.eup %19006 }
 0x95c   : > { %v19009_v53 = vpop.eup %19008  ;;  %v16856_v60 = vadd.f32 1.0, %v19007_v54 }
 0x95d   : > { %v18291_v12 = vpack.c.bf16 %v19009_v53, %v19005_v14 }
 0x95e   : > { %19014 = vrcp.f32 %v16856_v60  ;;  %v16890_v60 = vld [vmem:[%s21912_s8 + $0x38] sm:$0xff] }
 0x95f   : > { %18292 = vmatpush3.bf16.msra.mxu0 %v18291_v12 }
 0x960   : > { %18293 = vmatprep.subr.bf16.mxu0 %v19100_v62  ;;  %v19011_v13 = vpop.eup %19010  ;;  %v16873_v62 = vld [vmem:[%s21911_s7 + $0x8] sm:$0xff] }
 0x964   : > { %v19013_v29 = vpop.eup %19012 }
 0x965   : > { %v18294_v38 = vpack.c.bf16 %v19013_v29, %v19011_v13 }
 0x967   : > { %18295 = vmatpush3.bf16.msra.mxu0 %v18294_v38 }
 0x968   : > { %18156 = vmatprep.subr.mxu0 %v19073_v0  ;;  %v19015_v9 = vpop.eup %19014 }
 0x96b   : > { %18157 = vmatpush3.msra.mxu0 %v19015_v9 }
 0x96c   : > { %18159 = vmatmul.mubr.msk.f32.vlgmr.msra.gmra.mrb[10].mxu0 %vm10252_vm4, %v16872_v63 }
 0x96d   : > { %18161 = vmatprep.mubr.msk.f32.mxu0 %vm19101_vm15, %v19073_v0 }
 0x970   : > { %18162 = vmatmul.mubr.msk.f32.gmra.mrb[12].mxu0 %vm10252_vm4, %v16873_v62 }
 0x971   : > { %18164 = vmatprep.mubr.msk.f32.mxu0 %vm19101_vm15, %v19073_v0 }
 0x974   : > { %18165 = vmatmul.mubr.msk.f32.gmra.mrb[14].mxu0 %vm10252_vm4, %v16874_v34  ;;  %v16891_v34 = vld [vmem:[%s21912_s8 + $0x40] sm:$0xff] }
 0x975   : > { %18167 = vmatprep.mubr.msk.f32.mxu0 %vm19101_vm15, %v19073_v0 }
 0x978   : > { %18168 = vmatmul.mubr.msk.f32.gmra.mrb[16].mxu0 %vm10252_vm4, %v16875_v16 }
 0x979   : > { %18170 = vmatprep.mubr.msk.f32.mxu0 %vm19101_vm15, %v19073_v0 }
 0x97c   : > { %18171 = vmatmul.mubr.msk.f32.gmra.mrb[18].mxu0 %vm10252_vm4, %v16876_v11 }
 0x97d   : > { %18173 = vmatprep.mubr.msk.f32.mxu0 %vm19101_vm15, %v19073_v0 }
 0x980   : > { %18174 = vmatmul.mubr.msk.f32.gmra.mrb[20].mxu0 %vm10252_vm4, %v16877_v19 }
 0x981   : > { %18176 = vmatprep.mubr.msk.f32.mxu0 %vm19101_vm15, %v19073_v0 }
 0x984   : > { %18177 = vmatmul.mubr.msk.f32.gmra.mrb[22].mxu0 %vm10252_vm4, %v16878_v6 }
 0x985   : > { %18179 = vmatprep.mubr.msk.f32.mxu0 %vm19101_vm15, %v19073_v0 }
 0x988   : > { %18180 = vmatmul.mubr.msk.f32.gmra.mrb[24].mxu0 %vm10252_vm4, %v16879_v15 }
 0x989   : > { %18182 = vmatprep.mubr.msk.f32.mxu0 %vm19101_vm15, %v19073_v0 }
 0x98c   : > { %18183 = vmatmul.mubr.msk.f32.gmra.mrb[26].mxu0 %vm10252_vm4, %v16880_v20 }
 0x98d   : > { %18185 = vmatprep.mubr.msk.f32.mxu0 %vm19101_vm15, %v19073_v0 }
 0x990   : > { %18186 = vmatmul.mubr.msk.f32.gmra.mrb[28].mxu0 %vm10252_vm4, %v16881_v48 }
 0x991   : > { %18188 = vmatprep.mubr.msk.f32.mxu0 %vm19101_vm15, %v19073_v0 }
 0x994   : > { %18189 = vmatmul.mubr.msk.f32.gmra.mrb[30].mxu0 %vm10252_vm4, %v16882_v43 }
 0xa3f   : > { %v16993_v28 = vpop.f32.mrb[10].mxu0 }
 0xa40   : > { %v16994_v7 = vadd.f32 %v16993_v28, %v16883_v59  ;;  %v18160_v0 = vpop.f32.mrb[11].mxu0  ;;  %v16892_v59 = vld [vmem:[%s21912_s8 + $0x48] sm:$0xff] }
 0xa42   : > { %v17047_v24 = vsub.f32 0.0, %v16994_v7 }
 0xa43   : > { %v16998_v17 = vpop.f32.mrb[12].mxu0 }
 0xa44   : > { %v17058_v25 = vmul.f32 1.442695, %v17047_v24  ;;  %v16999_v45 = vadd.f32 %v16998_v17, %v16884_v56  ;;  %v18163_v51 = vpop.f32.mrb[13].mxu0 }
 0xa45   : > { %v16893_v51 = vld [vmem:[%s21912_s8 + $0x50] sm:$0xf] }
 0xa46   : > { %19016 = vpow2.f32 %v17058_v25  ;;  %v17048_v23 = vsub.f32 0.0, %v16999_v45 }
 0xa47   : > { %v17003_v31 = vpop.f32.mrb[14].mxu0 }
 0xa48   : > { %v17060_v22 = vmul.f32 1.442695, %v17048_v23  ;;  %v17004_v52 = vadd.f32 %v17003_v31, %v16885_v18  ;;  %v18166_v5 = vpop.f32.mrb[15].mxu0 }
 0xa4a   : > { %19018 = vpow2.f32 %v17060_v22  ;;  %v17049_v49 = vsub.f32 0.0, %v17004_v52 }
 0xa4b   : > { %v17008_v47 = vpop.f32.mrb[16].mxu0 }
 0xa4c   : > { %v17062_v32 = vmul.f32 1.442695, %v17049_v49  ;;  %v17009_v33 = vadd.f32 %v17008_v47, %v16886_v46  ;;  %v18169_v50 = vpop.f32.mrb[17].mxu0 }
 0xa4e   : > { %19020 = vpow2.f32 %v17062_v32  ;;  %v17050_v44 = vsub.f32 0.0, %v17009_v33 }
 0xa4f   : > { %v17013_v35 = vpop.f32.mrb[18].mxu0 }
 0xa50   : > { %v19017_v36 = vpop.eup %19016  ;;  %v17064_v2 = vmul.f32 1.442695, %v17050_v44  ;;  %v17014_v57 = vadd.f32 %v17013_v35, %v16887_v27  ;;  %v18172_v4 = vpop.f32.mrb[19].mxu0 }
 0xa51   : > { %v17080_v37 = vadd.f32 1.0, %v19017_v36 }
 0xa52   : > { %19022 = vpow2.f32 %v17064_v2  ;;  %v17051_v39 = vsub.f32 0.0, %v17014_v57 }
 0xa53   : > { %v17018_v3 = vpop.f32.mrb[20].mxu0  ;;  %19024 = vrcp.f32 %v17080_v37 }
 0xa54   : > { %v19019_v61 = vpop.eup %19018  ;;  %v17066_v26 = vmul.f32 1.442695, %v17051_v39  ;;  %v17019_v10 = vadd.f32 %v17018_v3, %v16888_v55  ;;  %v18175_v30 = vpop.f32.mrb[21].mxu0 }
 0xa55   : > { %v17081_v40 = vadd.f32 1.0, %v19019_v61 }
 0xa56   : > { %19026 = vpow2.f32 %v17066_v26  ;;  %v17052_v41 = vsub.f32 0.0, %v17019_v10 }
 0xa57   : > { %19028 = vrcp.f32 %v17081_v40  ;;  %v17023_v1 = vpop.f32.mrb[22].mxu0 }
 0xa58   : > { %v19021_v21 = vpop.eup %19020  ;;  %v17068_v8 = vmul.f32 1.442695, %v17052_v41  ;;  %v17024_v14 = vadd.f32 %v17023_v1, %v16889_v58  ;;  %v18178_v54 = vpop.f32.mrb[23].mxu0  ;;  %v17103_v1 = vld [vmem:[%s21913_s9 + $0x8] sm:$0x3] }
 0xa59   : > { %v17082_v53 = vadd.f32 1.0, %v19021_v21  ;;  %v17105_v21 = vld [vmem:[%s21914_s10 + $0x8] sm:$0x3] }
 0xa5a   : > { %19030 = vpow2.f32 %v17068_v8  ;;  %v17053_v12 = vsub.f32 0.0, %v17024_v14  ;;  %v17104_v8 = vld [vmem:[%s21914_s10] sm:$0xff] }
 0xa5b   : > { %v17028_v13 = vpop.f32.mrb[24].mxu0  ;;  %19032 = vrcp.f32 %v17082_v53 }
 0xa5c   : > { %v19023_v29 = vpop.eup %19022  ;;  %v17070_v38 = vmul.f32 1.442695, %v17053_v12  ;;  %v17029_v63 = vadd.f32 %v17028_v13, %v16890_v60  ;;  %v18181_v9 = vpop.f32.mrb[25].mxu0 }
 0xa5d   : > { %v17083_v62 = vadd.f32 1.0, %v19023_v29  ;;  %v19025_v11 = vpop.eup %19024 }
 0xa5e   : > { %19034 = vpow2.f32 %v17070_v38  ;;  %v17054_v16 = vsub.f32 0.0, %v17029_v63 }
 0xa5f   : > { %19036 = vrcp.f32 %v17083_v62  ;;  %v17033_v19 = vpop.f32.mrb[26].mxu0 }
 0xa60   : > { %v19027_v6 = vpop.eup %19026  ;;  %v17072_v15 = vmul.f32 1.442695, %v17054_v16  ;;  %v17034_v20 = vadd.f32 %v17033_v19, %v16891_v34  ;;  %v18184_v48 = vpop.f32.mrb[27].mxu0 }
 0xa61   : > { %v19029_v43 = vpop.eup %19028  ;;  %v17084_v42 = vadd.f32 1.0, %v19027_v6 }
 0xa62   : > { %19038 = vpow2.f32 %v17072_v15  ;;  %v17055_v28 = vsub.f32 0.0, %v17034_v20  ;;  %v18296_v7 = vpack.c.bf16 %v19029_v43, %v19025_v11 }
 0xa63   : > { %v17038_v0 = vpop.f32.mrb[28].mxu0  ;;  %19040 = vrcp.f32 %v17084_v42 }
 0xa64   : > { %v19031_v56 = vpop.eup %19030  ;;  %v17074_v24 = vmul.f32 1.442695, %v17055_v28  ;;  %18297 = vmatprep.subr.bf16.mxu1 %v18296_v7  ;;  %v17039_v17 = vadd.f32 %v17038_v0, %v16892_v59  ;;  %v18187_v25 = vpop.f32.mrb[29].mxu0 }
 0xa65   : > { %v17085_v45 = vadd.f32 1.0, %v19031_v56  ;;  %18299 = vmatpush3.bf16.msra.mxu1 %v18296_v7  ;;  %v19033_v23 = vpop.eup %19032 }
 0xa66   : > { %19042 = vpow2.f32 %v17074_v24  ;;  %v17056_v18 = vsub.f32 0.0, %v17039_v17 }
 0xa67   : > { %19044 = vrcp.f32 %v17085_v45  ;;  %v17043_v31 = vpop.f32.mrb[30].mxu0 }
 0xa68   : > { %v19035_v22 = vpop.eup %19034  ;;  %v17076_v52 = vmul.f32 1.442695, %v17056_v18  ;;  %v17044_v5 = vadd.f32 %v17043_v31, %v16893_v51  ;;  %v18190_v46 = vpop.f32.mrb[31].mxu0 }
 0xa69   : > { %v19037_v49 = vpop.eup %19036  ;;  %v17086_v47 = vadd.f32 1.0, %v19035_v22 }
 0xa6a   : > { %19046 = vpow2.f32 %v17076_v52  ;;  %v18300_v32 = vpack.c.bf16 %v19037_v49, %v19033_v23  ;;  %v17057_v33 = vsub.f32 0.0, %v17044_v5 }
 0xa6b   : > { %19048 = vrcp.f32 %v17086_v47 }
 0xa6c   : > { %v19039_v50 = vpop.eup %19038  ;;  %18301 = vmatprep.subr.bf16.mxu1 %v18300_v32  ;;  %v17078_v27 = vmul.f32 1.442695, %v17057_v33 }
 0xa6d   : > { %v17087_v44 = vadd.f32 1.0, %v19039_v50  ;;  %18303 = vmatpush3.bf16.msra.mxu1 %v18300_v32  ;;  %v19041_v35 = vpop.eup %19040 }
 0xa6e   : > { %19050 = vpow2.f32 %v17078_v27 }
 0xa6f   : > { %19052 = vrcp.f32 %v17087_v44 }
 0xa70   : > { %v19043_v36 = vpop.eup %19042 }
 0xa71   : > { %v19045_v2 = vpop.eup %19044  ;;  %v17088_v57 = vadd.f32 1.0, %v19043_v36 }
 0xa72   : > { %v18304_v4 = vpack.c.bf16 %v19045_v2, %v19041_v35 }
 0xa73   : > { %19054 = vrcp.f32 %v17088_v57 }
 0xa74   : > { %v19047_v37 = vpop.eup %19046  ;;  %18305 = vmatprep.subr.bf16.mxu1 %v18304_v4 }
 0xa75   : > { %v17089_v55 = vadd.f32 1.0, %v19047_v37  ;;  %18307 = vmatpush3.bf16.msra.mxu1 %v18304_v4  ;;  %v19049_v39 = vpop.eup %19048 }
 0xa77   : > { %19056 = vrcp.f32 %v17089_v55 }
 0xa78   : > { %v19051_v3 = vpop.eup %19050 }
 0xa79   : > { %v19053_v61 = vpop.eup %19052  ;;  %v17090_v26 = vadd.f32 1.0, %v19051_v3 }
 0xa7a   : > { %v18308_v10 = vpack.c.bf16 %v19053_v61, %v19049_v39 }
 0xa7b   : > { %19058 = vrcp.f32 %v17090_v26 }
 0xa7c   : > { %18309 = vmatprep.subr.bf16.mxu1 %v18308_v10 }
 0xa7d   : > { %18311 = vmatpush3.bf16.msra.mxu1 %v18308_v10  ;;  %v19055_v30 = vpop.eup %19054 }
 0xa81   : > { %v19057_v40 = vpop.eup %19056 }
 0xa82   : > { %v18312_v58 = vpack.c.bf16 %v19057_v40, %v19055_v30 }
 0xa84   : > { %18313 = vmatprep.subr.bf16.mxu1 %v18312_v58 }
 0xa85   : > { %v19059_v41 = vpop.eup %19058  ;;  %18315 = vmatpush3.bf16.msra.mxu1 %v18312_v58 }
 0xa86   : > { %18211 = vmatprep.subr.msk.mxu1 %vm17113_vm8, %v19059_v41 }
 0xa89   : > { %18212 = vmatpush3.msk.msra.mxu1 %vm17113_vm8, %v19059_v41 }
 0xa8a   : > { %18214 = vmatmul.mubr.msk.f32.vlgmr.msra.gmra.mrb[74].mxu1 %vm17106_vm7, %v17103_v1 }
 0xb5d   : > { %v18215_v14 = vpop.f32.mrb[74].mxu1 }
 0xb5e   : > { %v17189_v54 = vadd.f32 %v18215_v14, %v17105_v21  ;;  %v17183_v53 = vpop.f32.mrb[75].mxu1 }
 0xb5f   : > { %v17184_v60 = vadd.f32 %v17183_v53, %v17104_v8 }
 0xb60   : > { %17194 = vst.msk [vmem:[%s386_s14 + $0x8] sm:$0x3] %vm17193_vm9, %v17189_v54 }
 0xb61   : > { %17192 = vst.msk [vmem:[%s386_s14] sm:$0xff] %vm16087_vm13, %v17184_v60 }
 0xb62 PF: > { %s21_s17 = sadd.s32 1, %s19071_s17  }
 0xb63   : > { %p18_p4 = scmp.ge.s32.totalorder %s21_s17, 4  }
 0xb65   :  { %20 = sbr.rel (!%p18_p4) target bundleno = 1 (0x1), region = 142 }

</bundles_post_ra>
